<compile_context>
chip_gen: v7x
topology: tpu7x:2x2x1
jax: 0.10.0
libtpu: 0.0.40
codegen_flags: <defaults>
</compile_context>

<pallas_src>
import jax
import jax.numpy as jnp
import numpy as np
from jax.experimental import pallas as pl
from jax.experimental.pallas import tpu as pltpu


def _make_lut3d_kernel(dim, dim_pad):
    dmax = float(dim - 1)

    def kernel(img_ref, lut_ref, jf_ref, kf_ref, if_ref, out_ref):
        # img_ref: (3, P)           lut_ref: (3*dim_pad, dim2_pad)
        # jf_ref/kf_ref: (dim2_pad, 1)   if_ref: (3*dim_pad, 1)   out_ref: (3, P)
        img = img_ref[...]                                    # (3, P)

        # grid_sample semantics: img in [0,1] -> (img-0.5)*2 in [-1,1] -> unnormalize
        # with align_corners=True gives coord = img*(dim-1); border padding = clamp.
        coords = jnp.clip(img * dmax, 0.0, dmax)              # (3, P)
        x = coords[0:1, :]                                    # -> LUT last axis   (k)
        y = coords[1:2, :]                                    # -> LUT middle axis (j)
        z = coords[2:3, :]                                    # -> LUT first axis  (i)

        # Dense bilinear hat weights over the (j, k) plane:
        #   w_jk[r, p] = hat(y[p] - jf[r]) * hat(x[p] - kf[r]),  hat(t) = max(0, 1-|t|)
        # (dim2_pad, 1) tables broadcast against (1, P) coords -> (dim2_pad, P).
        # Pad rows have jf >= dim > dmax, so their weight is exactly 0.
        wy = jnp.maximum(0.0, 1.0 - jnp.abs(y - jf_ref[...]))
        wx = jnp.maximum(0.0, 1.0 - jnp.abs(x - kf_ref[...]))
        w_jk = wy * wx                                        # (dim2_pad, P)

        # MXU contraction of the (j, k) plane; P (>=128, lane axis) is the N dimension.
        t = jnp.dot(lut_ref[...], w_jk,
                    preferred_element_type=jnp.float32)       # (3*dim_pad, P)

        # Linear hat weights along i (replicated per channel via the precomputed table).
        w_i = jnp.maximum(0.0, 1.0 - jnp.abs(z - if_ref[...]))  # (3*dim_pad, P)
        m = t * w_i

        # Per-channel segment sum over the (padded, sublane-aligned) i axis -> (3, P).
        # Sublane reductions run on the XLU, off the MXU/VPU critical path.
        s0 = jnp.sum(m[0 * dim_pad:1 * dim_pad, :], axis=0, keepdims=True)
        s1 = jnp.sum(m[1 * dim_pad:2 * dim_pad, :], axis=0, keepdims=True)
        s2 = jnp.sum(m[2 * dim_pad:3 * dim_pad, :], axis=0, keepdims=True)
        out_ref[0:1, :] = s0
        out_ref[1:2, :] = s1
        out_ref[2:3, :] = s2

    return kernel


def lut3d_pallas(img, lut, *, block_pixels=512):
    """img: (N, 3, H, W) float32 NCHW; lut: (3, dim, dim, dim) float32."""
    n, ch, h, w = img.shape
    assert ch == 3, "LUT3D expects a 3-channel image"
    dim = lut.shape[-1]
    dim_pad = ((dim + 7) // 8) * 8            # channel segment, sublane-aligned
    dim2 = dim * dim
    dim2_pad = ((dim2 + 127) // 128) * 128    # matmul K, lane-aligned

    # Glue: NCHW -> channel-major (3, NPIX).  Outer-dim swap only (cheap strided copy,
    # no per-element channel interleave like NCHW->NHWC).
    npix = n * h * w
    pix = jnp.transpose(img, (1, 0, 2, 3)).reshape(3, npix).astype(jnp.float32)
    pad = (-npix) % block_pixels
    if pad:
        pix = jnp.pad(pix, ((0, 0), (0, pad)))
    npad = pix.shape[1]

    # Glue: LUT[c, i, j, k] -> (3*dim_pad, dim2_pad), row = c*dim_pad + i, col = j*dim + k,
    # zero-padded (pad rows/cols also get zero interpolation weight in the kernel).
    lut_t = lut.astype(jnp.float32).reshape(3, dim, dim2)
    lut_t = jnp.pad(lut_t, ((0, 0), (0, dim_pad - dim), (0, dim2_pad - dim2)))
    lut_t = lut_t.reshape(3 * dim_pad, dim2_pad)

    # Pixel-invariant index tables, computed once host-side (exact integer math).
    col = np.arange(dim2_pad)
    jf_tab = jnp.asarray((col // dim).astype(np.float32).reshape(dim2_pad, 1))
    kf_tab = jnp.asarray((col % dim).astype(np.float32).reshape(dim2_pad, 1))
    row = np.arange(3 * dim_pad)
    if_tab = jnp.asarray((row % dim_pad).astype(np.float32).reshape(3 * dim_pad, 1))

    kernel = _make_lut3d_kernel(dim, dim_pad)
    out = pl.pallas_call(
        kernel,
        out_shape=jax.ShapeDtypeStruct((3, npad), jnp.float32),
        grid_spec=pltpu.PrefetchScalarGridSpec(
            num_scalar_prefetch=0,
            grid=(npad // block_pixels,),
            in_specs=[
                pl.BlockSpec((3, block_pixels), lambda i: (0, i)),
                pl.BlockSpec((3 * dim_pad, dim2_pad), lambda i: (0, 0)),
                pl.BlockSpec((dim2_pad, 1), lambda i: (0, 0)),
                pl.BlockSpec((dim2_pad, 1), lambda i: (0, 0)),
                pl.BlockSpec((3 * dim_pad, 1), lambda i: (0, 0)),
            ],
            out_specs=pl.BlockSpec((3, block_pixels), lambda i: (0, i)),
        ),
        compiler_params=pltpu.CompilerParams(
            dimension_semantics=("parallel",),
            vmem_limit_bytes=48 * 1024 * 1024,   # headroom for (dim2_pad, P) f32 temporaries
        ),
    )(pix, lut_t, jf_tab, kf_tab, if_tab)

    out = out[:, :npix].reshape(3, n, h, w)
    return jnp.transpose(out, (1, 0, 2, 3))               # back to NCHW


def lut3d_reference(img, lut):
    """Pure-JAX reference of trilinear()/grid_sample (bilinear, border, align_corners)."""
    dim = lut.shape[-1]
    dmax = float(dim - 1)
    x = jnp.clip(img[:, 0] * dmax, 0.0, dmax)   # -> k axis
    y = jnp.clip(img[:, 1] * dmax, 0.0, dmax)   # -> j axis
    z = jnp.clip(img[:, 2] * dmax, 0.0, dmax)   # -> i axis
    x0 = jnp.floor(x).astype(jnp.int32); x1 = jnp.minimum(x0 + 1, dim - 1)
    y0 = jnp.floor(y).astype(jnp.int32); y1 = jnp.minimum(y0 + 1, dim - 1)
    z0 = jnp.floor(z).astype(jnp.int32); z1 = jnp.minimum(z0 + 1, dim - 1)
    fx = x - x0; fy = y - y0; fz = z - z0

    def g(zi, yi, xi):
        return lut[:, zi, yi, xi]               # (3, N, H, W)

    out = ((1 - fz) * ((1 - fy) * ((1 - fx) * g(z0, y0, x0) + fx * g(z0, y0, x1))
                       + fy * ((1 - fx) * g(z0, y1, x0) + fx * g(z0, y1, x1)))
           + fz * ((1 - fy) * ((1 - fx) * g(z1, y0, x0) + fx * g(z1, y0, x1))
                   + fy * ((1 - fx) * g(z1, y1, x0) + fx * g(z1, y1, x1))))
    return jnp.transpose(out, (1, 0, 2, 3))     # (N, 3, H, W)


if __name__ == "__main__":
    key = jax.random.PRNGKey(0)
    k_img, k_lut = jax.random.split(key)

    N, C, H, W = 2, 3, 16, 16
    DIM = 33                                    # module default

    img = jax.random.uniform(k_img, (N, C, H, W), dtype=jnp.float32)
    # LUT3D(dim=33, mode='zero') would initialize a zero (3, dim, dim, dim) parameter;
    # use a deterministic random parameter so the kernel path is actually exercised.
    # TODO(synk): mode='identity' loads IdentityLUT33.txt from disk; not reproduced here.
    lut = jax.random.uniform(k_lut, (3, DIM, DIM, DIM), dtype=jnp.float32)

    out = lut3d_pallas(img, lut)
    out = jax.block_until_ready(out)

    ref = lut3d_reference(img, lut)
    assert out.shape == (N, C, H, W)
    np.testing.assert_allclose(np.asarray(out), np.asarray(ref), rtol=1e-4, atol=1e-4)
    print("KERNEL_OK")
</pallas_src>

<mosaic_0001>
module attributes {stable_mosaic.version = 11 : i64} {
  func.func @kernel(%arg0: i32, %arg1: memref<3x512xf32, #tpu.memory_space<vmem>>, %arg2: memref<120x1152xf32, #tpu.memory_space<vmem>>, %arg3: memref<1152x1xf32, #tpu.memory_space<vmem>>, %arg4: memref<1152x1xf32, #tpu.memory_space<vmem>>, %arg5: memref<120x1xf32, #tpu.memory_space<vmem>>, %arg6: memref<3x512xf32, #tpu.memory_space<vmem>>) attributes {dimension_semantics = [#tpu.dimension_semantics<parallel>], iteration_bounds = array<i64: 1>, scalar_prefetch = 0 : i64, scratch_operands = 0 : i64, tpu.core_type = #tpu.core_type<tc>, window_params = [{transform_indices = @transform_0, window_bounds = array<i64: 3, 512>}, {pipeline_mode = #tpu.pipeline_mode<synchronous>, transform_indices = @transform_1, window_bounds = array<i64: 120, 1152>}, {pipeline_mode = #tpu.pipeline_mode<synchronous>, transform_indices = @transform_2, window_bounds = array<i64: 1152, 1>}, {pipeline_mode = #tpu.pipeline_mode<synchronous>, transform_indices = @transform_3, window_bounds = array<i64: 1152, 1>}, {pipeline_mode = #tpu.pipeline_mode<synchronous>, transform_indices = @transform_4, window_bounds = array<i64: 120, 1>}, {transform_indices = @transform_5, window_bounds = array<i64: 3, 512>}]} {
    %c0 = arith.constant 0 : index
    %c0_0 = arith.constant 0 : index
    %0 = vector.load %arg1[%c0, %c0_0] : memref<3x512xf32, #tpu.memory_space<vmem>>, vector<3x512xf32>
    %cst = arith.constant 3.200000e+01 : f32
    %1 = vector.broadcast %cst : f32 to vector<3x512xf32>
    %2 = arith.mulf %0, %1 : vector<3x512xf32>
    %cst_1 = arith.constant 0.000000e+00 : f32
    %cst_2 = arith.constant 3.200000e+01 : f32
    %3 = vector.broadcast %cst_1 : f32 to vector<3x512xf32>
    %4 = arith.maximumf %3, %2 : vector<3x512xf32>
    %5 = vector.broadcast %cst_2 : f32 to vector<3x512xf32>
    %6 = arith.minimumf %5, %4 : vector<3x512xf32>
    %7 = vector.extract_strided_slice %6 {offsets = [0, 0], sizes = [1, 512], strides = [1, 1]} : vector<3x512xf32> to vector<1x512xf32>
    %8 = vector.extract_strided_slice %6 {offsets = [1, 0], sizes = [1, 512], strides = [1, 1]} : vector<3x512xf32> to vector<1x512xf32>
    %9 = vector.extract_strided_slice %6 {offsets = [2, 0], sizes = [1, 512], strides = [1, 1]} : vector<3x512xf32> to vector<1x512xf32>
    %c0_3 = arith.constant 0 : index
    %c0_4 = arith.constant 0 : index
    %10 = vector.load %arg3[%c0_3, %c0_4] : memref<1152x1xf32, #tpu.memory_space<vmem>>, vector<1152x1xf32>
    %11 = vector.broadcast %8 : vector<1x512xf32> to vector<1152x512xf32>
    %12 = vector.broadcast %10 : vector<1152x1xf32> to vector<1152x512xf32>
    %13 = arith.subf %11, %12 : vector<1152x512xf32>
    %14 = math.absf %13 : vector<1152x512xf32>
    %cst_5 = arith.constant 1.000000e+00 : f32
    %15 = vector.broadcast %cst_5 : f32 to vector<1152x512xf32>
    %16 = arith.subf %15, %14 : vector<1152x512xf32>
    %cst_6 = arith.constant 0.000000e+00 : f32
    %17 = vector.broadcast %cst_6 : f32 to vector<1152x512xf32>
    %18 = arith.maximumf %17, %16 : vector<1152x512xf32>
    %c0_7 = arith.constant 0 : index
    %c0_8 = arith.constant 0 : index
    %19 = vector.load %arg4[%c0_7, %c0_8] : memref<1152x1xf32, #tpu.memory_space<vmem>>, vector<1152x1xf32>
    %20 = vector.broadcast %7 : vector<1x512xf32> to vector<1152x512xf32>
    %21 = vector.broadcast %19 : vector<1152x1xf32> to vector<1152x512xf32>
    %22 = arith.subf %20, %21 : vector<1152x512xf32>
    %23 = math.absf %22 : vector<1152x512xf32>
    %cst_9 = arith.constant 1.000000e+00 : f32
    %24 = vector.broadcast %cst_9 : f32 to vector<1152x512xf32>
    %25 = arith.subf %24, %23 : vector<1152x512xf32>
    %cst_10 = arith.constant 0.000000e+00 : f32
    %26 = vector.broadcast %cst_10 : f32 to vector<1152x512xf32>
    %27 = arith.maximumf %26, %25 : vector<1152x512xf32>
    %28 = arith.mulf %18, %27 : vector<1152x512xf32>
    %c0_11 = arith.constant 0 : index
    %c0_12 = arith.constant 0 : index
    %29 = vector.load %arg2[%c0_11, %c0_12] : memref<120x1152xf32, #tpu.memory_space<vmem>>, vector<120x1152xf32>
    %cst_13 = arith.constant dense<0.000000e+00> : vector<120x512xf32>
    %30 = tpu.matmul %29, %28, %cst_13 {dimension_numbers = #tpu.dot_dimension_numbers<[1], [0], [0], [1], [0, 0, 1, 1], [], []>} : vector<120x1152xf32>, vector<1152x512xf32>, vector<120x512xf32> -> vector<120x512xf32>
    %c0_14 = arith.constant 0 : index
    %c0_15 = arith.constant 0 : index
    %31 = vector.load %arg5[%c0_14, %c0_15] : memref<120x1xf32, #tpu.memory_space<vmem>>, vector<120x1xf32>
    %32 = vector.broadcast %9 : vector<1x512xf32> to vector<120x512xf32>
    %33 = vector.broadcast %31 : vector<120x1xf32> to vector<120x512xf32>
    %34 = arith.subf %32, %33 : vector<120x512xf32>
    %35 = math.absf %34 : vector<120x512xf32>
    %cst_16 = arith.constant 1.000000e+00 : f32
    %36 = vector.broadcast %cst_16 : f32 to vector<120x512xf32>
    %37 = arith.subf %36, %35 : vector<120x512xf32>
    %cst_17 = arith.constant 0.000000e+00 : f32
    %38 = vector.broadcast %cst_17 : f32 to vector<120x512xf32>
    %39 = arith.maximumf %38, %37 : vector<120x512xf32>
    %40 = arith.mulf %30, %39 : vector<120x512xf32>
    %41 = vector.extract_strided_slice %40 {offsets = [0, 0], sizes = [40, 512], strides = [1, 1]} : vector<120x512xf32> to vector<40x512xf32>
    %cst_18 = arith.constant dense<0.000000e+00> : vector<512xf32>
    %42 = vector.multi_reduction <add>, %41, %cst_18 [0] : vector<40x512xf32> to vector<512xf32>
    %43 = vector.shape_cast %42 : vector<512xf32> to vector<1x512xf32>
    %44 = vector.extract_strided_slice %40 {offsets = [40, 0], sizes = [40, 512], strides = [1, 1]} : vector<120x512xf32> to vector<40x512xf32>
    %cst_19 = arith.constant dense<0.000000e+00> : vector<512xf32>
    %45 = vector.multi_reduction <add>, %44, %cst_19 [0] : vector<40x512xf32> to vector<512xf32>
    %46 = vector.shape_cast %45 : vector<512xf32> to vector<1x512xf32>
    %47 = vector.extract_strided_slice %40 {offsets = [80, 0], sizes = [40, 512], strides = [1, 1]} : vector<120x512xf32> to vector<40x512xf32>
    %cst_20 = arith.constant dense<0.000000e+00> : vector<512xf32>
    %48 = vector.multi_reduction <add>, %47, %cst_20 [0] : vector<40x512xf32> to vector<512xf32>
    %49 = vector.shape_cast %48 : vector<512xf32> to vector<1x512xf32>
    %c0_21 = arith.constant 0 : index
    %c0_22 = arith.constant 0 : index
    %50 = vector.load %arg6[%c0_21, %c0_22] : memref<3x512xf32, #tpu.memory_space<vmem>>, vector<1x512xf32>
    tpu.vector_store %arg6[%c0_21, %c0_22], %43 {strides = array<i32>} : memref<3x512xf32, #tpu.memory_space<vmem>>, vector<1x512xf32>,
    %c1 = arith.constant 1 : index
    %c0_23 = arith.constant 0 : index
    %51 = vector.load %arg6[%c1, %c0_23] : memref<3x512xf32, #tpu.memory_space<vmem>>, vector<1x512xf32>
    tpu.vector_store %arg6[%c1, %c0_23], %46 {strides = array<i32>} : memref<3x512xf32, #tpu.memory_space<vmem>>, vector<1x512xf32>,
    %c2 = arith.constant 2 : index
    %c0_24 = arith.constant 0 : index
    %52 = vector.load %arg6[%c2, %c0_24] : memref<3x512xf32, #tpu.memory_space<vmem>>, vector<1x512xf32>
    tpu.vector_store %arg6[%c2, %c0_24], %49 {strides = array<i32>} : memref<3x512xf32, #tpu.memory_space<vmem>>, vector<1x512xf32>,
    return
  }
  func.func @transform_0(%arg0: i32) -> (i32, i32) {
    %c0_i32 = arith.constant 0 : i32
    %c0_i32_0 = arith.constant 0 : i32
    return %c0_i32, %arg0 : i32, i32
  }
  func.func @transform_1(%arg0: i32) -> (i32, i32) {
    %c0_i32 = arith.constant 0 : i32
    %c0_i32_0 = arith.constant 0 : i32
    %c0_i32_1 = arith.constant 0 : i32
    return %c0_i32, %c0_i32_0 : i32, i32
  }
  func.func @transform_2(%arg0: i32) -> (i32, i32) {
    %c0_i32 = arith.constant 0 : i32
    %c0_i32_0 = arith.constant 0 : i32
    %c0_i32_1 = arith.constant 0 : i32
    return %c0_i32, %c0_i32_0 : i32, i32
  }
  func.func @transform_3(%arg0: i32) -> (i32, i32) {
    %c0_i32 = arith.constant 0 : i32
    %c0_i32_0 = arith.constant 0 : i32
    %c0_i32_1 = arith.constant 0 : i32
    return %c0_i32, %c0_i32_0 : i32, i32
  }
  func.func @transform_4(%arg0: i32) -> (i32, i32) {
    %c0_i32 = arith.constant 0 : i32
    %c0_i32_0 = arith.constant 0 : i32
    %c0_i32_1 = arith.constant 0 : i32
    return %c0_i32, %c0_i32_0 : i32, i32
  }
  func.func @transform_5(%arg0: i32) -> (i32, i32) {
    %c0_i32 = arith.constant 0 : i32
    %c0_i32_0 = arith.constant 0 : i32
    return %c0_i32, %arg0 : i32, i32
  }
}

</mosaic_0001>

<bundles_post_ra>
// kernel: tpu_custom_call.1
= control target key start
LH: loop header
LB: loop body
LE: loop exit
PB: predicated region body
PF: predicated region fallthrough
CT: control target
= control target key end

     0   :  { %v10202_v2 = vmov 0   ;;  %s17898_s0 = inlined_call_operand.vmem [shape: f32[3,512], index: 0, kind: input, shape index: {}]   ;;  %s17899_s1 = inlined_call_operand.vmem [shape: f32[120,1152], index: 1, kind: input, shape index: {}]   ;;  %s17900_s2 = inlined_call_operand.vmem [shape: f32[1152,1], index: 2, kind: input, shape index: {}]   ;;  %s17901_s3 = inlined_call_operand.vmem [shape: f32[1152,1], index: 3, kind: input, shape index: {}]   ;;  %s17902_s4 = inlined_call_operand.vmem [shape: f32[120,1], index: 4, kind: input, shape index: {}]   ;;  %s17903_s5 = inlined_call_operand.hbm [shape: f32[3,512], index: 5, kind: output, shape index: {}]  }
   0x1   :  { %v31_v0 = vld [vmem:[%s17900_s2 + $0x10] sm:$0xff]  ;;  %v29_v1 = vld [vmem:[%s17900_s2] sm:$0xff]  ;;  %10177 = vset.pattern.permute.xlu1 %v10202_v2  ;;  %10176 = vset.pattern.permute.xlu0 %v10202_v2  ;;  %v32_v3 = vld [vmem:[%s17900_s2 + $0x18] sm:$0xff] }
   0x2   :  { %223 = vperm.xlu1 %10177, %v31_v0   ;;  %213 = vperm.xlu0 %10176, %v29_v1   ;;  %v30_v4 = vld [vmem:[%s17900_s2 + $0x8] sm:$0xff]  ;;  %v33_v6 = vld [vmem:[%s17900_s2 + $0x20] sm:$0xff]  ;;  %v36_v7 = vld [vmem:[%s17900_s2 + $0x38] sm:$0xff] }
   0x3   :  { %v34_v5 = vld [vmem:[%s17900_s2 + $0x28] sm:$0xff]  ;;  %v35_v8 = vld [vmem:[%s17900_s2 + $0x30] sm:$0xff]  ;;  %v37_v10 = vld [vmem:[%s17900_s2 + $0x40] sm:$0xff] }
   0x4   :  { %v38_v9 = vld [vmem:[%s17900_s2 + $0x48] sm:$0xff]  ;;  %v40_v11 = vld [vmem:[%s17900_s2 + $0x58] sm:$0xff]  ;;  %v39_v12 = vld [vmem:[%s17900_s2 + $0x50] sm:$0xff] }
   0x5   :  { %v42_v13 = vld [vmem:[%s17900_s2 + $0x68] sm:$0xff]  ;;  %v41_v14 = vld [vmem:[%s17900_s2 + $0x60] sm:$0xff] }
   0x6   :  { %228 = vperm.xlu1 %10177, %v32_v3   ;;  %218 = vperm.xlu0 %10176, %v30_v4  }
   0xa   :  { %238 = vperm.xlu1 %10177, %v34_v5   ;;  %233 = vperm.xlu0 %10176, %v33_v6  }
   0xe   :  { %248 = vperm.xlu1 %10177, %v36_v7   ;;  %243 = vperm.xlu0 %10176, %v35_v8  }
  0x12   :  { %258 = vperm.xlu1 %10177, %v38_v9   ;;  %253 = vperm.xlu0 %10176, %v37_v10  }
  0x16   :  { %268 = vperm.xlu1 %10177, %v40_v11   ;;  %263 = vperm.xlu0 %10176, %v39_v12  }
  0x1a   :  { %278 = vperm.xlu1 %10177, %v42_v13   ;;  %273 = vperm.xlu0 %10176, %v41_v14  }
  0x1b   :  { %10 = vsyncpa [#allocation3], 0  ;;  %v44_v15 = vld [vmem:[%s17900_s2 + $0x78] sm:$0xff]  ;;  %v43_v16 = vld [vmem:[%s17900_s2 + $0x70] sm:$0xff]  ;;  %v17904_v61 = vlaneseq }
  0x1c   :  { %v46_v17 = vld [vmem:[%s17900_s2 + $0x88] sm:$0xff]  ;;  %v45_v18 = vld [vmem:[%s17900_s2 + $0x80] sm:$0xff]  ;;  %v48_v19 = vld [vmem:[%s17900_s2 + $0x98] sm:$0xff] }
  0x1d   :  { %v47_v20 = vld [vmem:[%s17900_s2 + $0x90] sm:$0xff]  ;;  %v50_v21 = vld [vmem:[%s17900_s2 + $0xa8] sm:$0xff]  ;;  %v49_v22 = vld [vmem:[%s17900_s2 + $0xa0] sm:$0xff]  ;;  %v10423_v2 = vshrl.u32 %v17904_v61, 7 }
  0x1e   :  { %288 = vperm.xlu1 %10177, %v44_v15   ;;  %283 = vperm.xlu0 %10176, %v43_v16   ;;  %v52_v23 = vld [vmem:[%s17900_s2 + $0xb8] sm:$0xff]  ;;  %v51_v24 = vld [vmem:[%s17900_s2 + $0xb0] sm:$0xff]  ;;  %v54_v25 = vld [vmem:[%s17900_s2 + $0xc8] sm:$0xff] }
  0x1f   :  { %v53_v26 = vld [vmem:[%s17900_s2 + $0xc0] sm:$0xff]  ;;  %v56_v27 = vld [vmem:[%s17900_s2 + $0xd8] sm:$0xff]  ;;  %v55_v28 = vld [vmem:[%s17900_s2 + $0xd0] sm:$0xff]  ;;  %18161 = vst [vmem:[#allocation5_spill] sm:$0xff] %v10423_v2  ;;  %v181_v7 = vsub.s32 5, %v10423_v2  ;;  %v177_v10 = vsub.s32 1, %v10423_v2 }
  0x20   :  { %v58_v29 = vld [vmem:[%s17900_s2 + $0xe8] sm:$0xff]  ;;  %v57_v30 = vld [vmem:[%s17900_s2 + $0xe0] sm:$0xff]  ;;  %v60_v31 = vld [vmem:[%s17900_s2 + $0xf8] sm:$0xff] }
  0x21   :  { %v59_v32 = vld [vmem:[%s17900_s2 + $0xf0] sm:$0xff]  ;;  %v62_v33 = vld [vmem:[%s17900_s2 + $0x108] sm:$0xff]  ;;  %v61_v34 = vld [vmem:[%s17900_s2 + $0x100] sm:$0xff] }
  0x22   :  { %298 = vperm.xlu1 %10177, %v46_v17   ;;  %293 = vperm.xlu0 %10176, %v45_v18   ;;  %v64_v35 = vld [vmem:[%s17900_s2 + $0x118] sm:$0xff]  ;;  %v63_v36 = vld [vmem:[%s17900_s2 + $0x110] sm:$0xff]  ;;  %v66_v37 = vld [vmem:[%s17900_s2 + $0x128] sm:$0xff] }
  0x23   :  { %v65_v38 = vld [vmem:[%s17900_s2 + $0x120] sm:$0xff]  ;;  %v68_v39 = vld [vmem:[%s17900_s2 + $0x138] sm:$0xff]  ;;  %v67_v40 = vld [vmem:[%s17900_s2 + $0x130] sm:$0xff] }
  0x24   :  { %v70_v41 = vld [vmem:[%s17900_s2 + $0x148] sm:$0xff]  ;;  %v69_v42 = vld [vmem:[%s17900_s2 + $0x140] sm:$0xff]  ;;  %v72_v43 = vld [vmem:[%s17900_s2 + $0x158] sm:$0xff] }
  0x25   :  { %v71_v44 = vld [vmem:[%s17900_s2 + $0x150] sm:$0xff]  ;;  %v74_v45 = vld [vmem:[%s17900_s2 + $0x168] sm:$0xff]  ;;  %v73_v46 = vld [vmem:[%s17900_s2 + $0x160] sm:$0xff] }
  0x26   :  { %308 = vperm.xlu1 %10177, %v48_v19   ;;  %303 = vperm.xlu0 %10176, %v47_v20   ;;  %v76_v47 = vld [vmem:[%s17900_s2 + $0x178] sm:$0xff]  ;;  %v75_v48 = vld [vmem:[%s17900_s2 + $0x170] sm:$0xff]  ;;  %v78_v49 = vld [vmem:[%s17900_s2 + $0x188] sm:$0xff] }
  0x27   :  { %v77_v50 = vld [vmem:[%s17900_s2 + $0x180] sm:$0xff]  ;;  %v80_v51 = vld [vmem:[%s17900_s2 + $0x198] sm:$0xff]  ;;  %v79_v52 = vld [vmem:[%s17900_s2 + $0x190] sm:$0xff] }
  0x28   :  { %v82_v53 = vld [vmem:[%s17900_s2 + $0x1a8] sm:$0xff]  ;;  %v81_v54 = vld [vmem:[%s17900_s2 + $0x1a0] sm:$0xff]  ;;  %v84_v55 = vld [vmem:[%s17900_s2 + $0x1b8] sm:$0xff] }
  0x29   :  { %v83_v56 = vld [vmem:[%s17900_s2 + $0x1b0] sm:$0xff]  ;;  %v21_v57 = vld [vmem:[%s17898_s0] sm:$0x77]  ;;  %v22_v58 = vld [vmem:[%s17898_s0 + $0x8] sm:$0x77] }
  0x2a   :  { %318 = vperm.xlu1 %10177, %v50_v21   ;;  %313 = vperm.xlu0 %10176, %v49_v22   ;;  %v86_v59 = vld [vmem:[%s17900_s2 + $0x1c8] sm:$0xff]  ;;  %v85_v60 = vld [vmem:[%s17900_s2 + $0x1c0] sm:$0xff]  ;;  %v23_v62 = vmul.f32 32.0, %v21_v57  ;;  %v24_v63 = vmul.f32 32.0, %v22_v58  ;;  %v88_v0 = vld [vmem:[%s17900_s2 + $0x1d8] sm:$0xff] }
  0x2b   :  { %v87_v1 = vld [vmem:[%s17900_s2 + $0x1d0] sm:$0xff]  ;;  %v90_v5 = vld [vmem:[%s17900_s2 + $0x1e8] sm:$0xff]  ;;  %v89_v6 = vld [vmem:[%s17900_s2 + $0x1e0] sm:$0xff] }
  0x2c   :  { %v25_v3 = vmax.f32 %v23_v62, 0.0  ;;  %v26_v4 = vmax.f32 %v24_v63, 0.0  ;;  %v92_v11 = vld [vmem:[%s17900_s2 + $0x1f8] sm:$0xff]  ;;  %v91_v12 = vld [vmem:[%s17900_s2 + $0x1f0] sm:$0xff]  ;;  %v94_v18 = vld [vmem:[%s17900_s2 + $0x208] sm:$0xff] }
  0x2d   :  { %v93_v19 = vld [vmem:[%s17900_s2 + $0x200] sm:$0xff] }
  0x2e   :  { %328 = vperm.xlu1 %10177, %v52_v23   ;;  %323 = vperm.xlu0 %10176, %v51_v24   ;;  %v10432_v8 = vmin.f32 %v25_v3, 32.0  ;;  %v10434_v9 = vmin.f32 %v26_v4, 32.0  ;;  %v96_v24 = vld [vmem:[%s17900_s2 + $0x218] sm:$0xff] }
  0x30   :  { %18162 = vst [vmem:[#allocation6_spill] sm:$0xff] %v10432_v8  ;;  %18163 = vst [vmem:[#allocation7_spill] sm:$0xff] %v10434_v9  ;;  %v182_v13 = vrot.slane %v10432_v8, %v181_v7  ;;  %v190_v14 = vrot.slane %v10434_v9, %v181_v7  ;;  %v178_v15 = vrot.slane %v10432_v8, %v177_v10 }
  0x31   :  { %v186_v21 = vrot.slane %v10434_v9, %v177_v10 }
  0x32   :  { %338 = vperm.xlu1 %10177, %v54_v25   ;;  %333 = vperm.xlu0 %10176, %v53_v26   ;;  %v10446_v16 = vrot.slane %v182_v13, %v177_v10  ;;  %v10448_v17 = vrot.slane %v190_v14, %v177_v10  ;;  %v10459_v23 = vrot.slane %v178_v15, %v177_v10  ;;  %v102_v14 = vld [vmem:[%s17900_s2 + $0x248] sm:$0xff]  ;;  %v101_v15 = vld [vmem:[%s17900_s2 + $0x240] sm:$0xff] }
  0x34   :  { %18164 = vst [vmem:[#allocation8_spill] sm:$0xff] %v10448_v17  ;;  %18165 = vst [vmem:[#allocation9_spill] sm:$0xff] %v10459_v23 }
  0x36   :  { %348 = vperm.xlu1 %10177, %v56_v27   ;;  %343 = vperm.xlu0 %10176, %v55_v28   ;;  %v95_v27 = vld [vmem:[%s17900_s2 + $0x210] sm:$0xff]  ;;  %v10469_v28 = vrot.slane %v186_v21, %v177_v10 }
  0x38   :  { %18166 = vst [vmem:[#allocation10_spill] sm:$0xff] %v10469_v28 }
  0x3a   :  { %358 = vperm.xlu1 %10177, %v58_v29   ;;  %353 = vperm.xlu0 %10176, %v57_v30  }
  0x3e   :  { %368 = vperm.xlu1 %10177, %v60_v31   ;;  %363 = vperm.xlu0 %10176, %v59_v32  }
  0x42   :  { %378 = vperm.xlu1 %10177, %v62_v33   ;;  %373 = vperm.xlu0 %10176, %v61_v34  }
  0x46   :  { %388 = vperm.xlu1 %10177, %v64_v35   ;;  %383 = vperm.xlu0 %10176, %v63_v36   ;;  %v98_v36 = vld [vmem:[%s17900_s2 + $0x228] sm:$0xff] }
  0x4a   :  { %398 = vperm.xlu1 %10177, %v66_v37   ;;  %393 = vperm.xlu0 %10176, %v65_v38   ;;  %v97_v37 = vld [vmem:[%s17900_s2 + $0x220] sm:$0xff] }
  0x4e   :  { %408 = vperm.xlu1 %10177, %v68_v39   ;;  %403 = vperm.xlu0 %10176, %v67_v40  }
  0x52   :  { %418 = vperm.xlu1 %10177, %v70_v41   ;;  %413 = vperm.xlu0 %10176, %v69_v42  }
  0x56   :  { %428 = vperm.xlu1 %10177, %v72_v43   ;;  %423 = vperm.xlu0 %10176, %v71_v44  }
  0x5a   :  { %438 = vperm.xlu1 %10177, %v74_v45   ;;  %433 = vperm.xlu0 %10176, %v73_v46  }
  0x5e   :  { %448 = vperm.xlu1 %10177, %v76_v47   ;;  %443 = vperm.xlu0 %10176, %v75_v48  }
  0x62   :  { %458 = vperm.xlu1 %10177, %v78_v49   ;;  %453 = vperm.xlu0 %10176, %v77_v50  }
  0x66   :  { %468 = vperm.xlu1 %10177, %v80_v51   ;;  %463 = vperm.xlu0 %10176, %v79_v52  }
  0x6a   :  { %478 = vperm.xlu1 %10177, %v82_v53   ;;  %473 = vperm.xlu0 %10176, %v81_v54   ;;  %v100_v54 = vld [vmem:[%s17900_s2 + $0x238] sm:$0xff] }
  0x6e   :  { %488 = vperm.xlu1 %10177, %v84_v55   ;;  %483 = vperm.xlu0 %10176, %v83_v56   ;;  %v99_v55 = vld [vmem:[%s17900_s2 + $0x230] sm:$0xff] }
  0x72   :  { %498 = vperm.xlu1 %10177, %v86_v59   ;;  %493 = vperm.xlu0 %10176, %v85_v60  }
  0x76   :  { %508 = vperm.xlu1 %10177, %v88_v0   ;;  %503 = vperm.xlu0 %10176, %v87_v1  }
  0x7a   :  { %518 = vperm.xlu1 %10177, %v90_v5   ;;  %513 = vperm.xlu0 %10176, %v89_v6  }
  0x7e   :  { %528 = vperm.xlu1 %10177, %v92_v11   ;;  %523 = vperm.xlu0 %10176, %v91_v12  }
  0x81   :  { %v10456_v20 = vpop.permute.xlu1 %223  ;;  %v214_v22 = vpop.permute.xlu0 %213 }
  0x82   :  { %538 = vperm.xlu1 %10177, %v94_v18   ;;  %533 = vperm.xlu0 %10176, %v93_v19   ;;  %v932_v25 = vsub.f32 %v10446_v16, %v214_v22  ;;  %v934_v26 = vsub.f32 %v10448_v17, %v214_v22  ;;  %v939_v33 = vsub.f32 %v10459_v23, %v10456_v20 }
  0x83   :  { %v940_v34 = vsub.f32 %v10446_v16, %v10456_v20  ;;  %v942_v35 = vsub.f32 %v10448_v17, %v10456_v20  ;;  %v931_v40 = vsub.f32 %v10459_v23, %v214_v22  ;;  %v933_v45 = vsub.f32 %v10469_v28, %v214_v22 }
  0x84   :  { %v1508_v31 = vand.u32 2147483647, %v932_v25  ;;  %v1510_v32 = vand.u32 2147483647, %v934_v26  ;;  %v941_v46 = vsub.f32 %v10469_v28, %v10456_v20  ;;  %v10499_v49 = vand.u32 2147483647, %v939_v33 }
  0x85   :  { %v10471_v29 = vpop.permute.xlu1 %228  ;;  %v219_v30 = vpop.permute.xlu0 %218  ;;  %v10495_v47 = vand.u32 2147483647, %v940_v34  ;;  %v10497_v48 = vand.u32 2147483647, %v942_v35  ;;  %v1507_v59 = vand.u32 2147483647, %v931_v40 }
  0x86   :  { %548 = vperm.xlu1 %10177, %v96_v24   ;;  %543 = vperm.xlu0 %10176, %v95_v27   ;;  %v936_v38 = vsub.f32 %v10446_v16, %v219_v30  ;;  %v938_v39 = vsub.f32 %v10448_v17, %v219_v30  ;;  %v2084_v43 = vsub.f32 1.0, %v1508_v31  ;;  %v2086_v44 = vsub.f32 1.0, %v1510_v32  ;;  %v104_v40 = vld [vmem:[%s17900_s2 + $0x258] sm:$0xff] }
  0x87   :  { %v943_v50 = vsub.f32 %v10459_v23, %v10471_v29  ;;  %v944_v51 = vsub.f32 %v10446_v16, %v10471_v29  ;;  %v945_v52 = vsub.f32 %v10469_v28, %v10471_v29  ;;  %v946_v53 = vsub.f32 %v10448_v17, %v10471_v29 }
  0x88   :  { %v1512_v56 = vand.u32 2147483647, %v936_v38  ;;  %v1514_v57 = vand.u32 2147483647, %v938_v39  ;;  %v935_v58 = vsub.f32 %v10459_v23, %v219_v30  ;;  %v10520_v63 = vmax.f32 %v2084_v43, 0.0  ;;  %v103_v43 = vld [vmem:[%s17900_s2 + $0x250] sm:$0xff] }
  0x89   :  { %v10488_v41 = vpop.permute.xlu1 %238  ;;  %v10490_v42 = vpop.permute.xlu0 %233  ;;  %v10522_v0 = vmax.f32 %v2086_v44, 0.0  ;;  %v937_v1 = vsub.f32 %v10469_v28, %v219_v30  ;;  %v1509_v3 = vand.u32 2147483647, %v933_v45  ;;  %v2083_v22 = vsub.f32 1.0, %v1507_v59  ;;  %v118_v38 = vld [vmem:[%s17900_s2 + $0x2c8] sm:$0xff] }
  0x8a   :  { %558 = vperm.xlu1 %10177, %v98_v36   ;;  %553 = vperm.xlu0 %10176, %v97_v37   ;;  %v951_v4 = vsub.f32 %v10459_v23, %v10488_v41  ;;  %v952_v5 = vsub.f32 %v10446_v16, %v10488_v41  ;;  %v953_v6 = vsub.f32 %v10469_v28, %v10488_v41  ;;  %v2088_v18 = vsub.f32 1.0, %v1512_v56 }
  0x8b   :  { %v954_v7 = vsub.f32 %v10448_v17, %v10488_v41  ;;  %v947_v10 = vsub.f32 %v10459_v23, %v10490_v42  ;;  %v948_v11 = vsub.f32 %v10446_v16, %v10490_v42  ;;  %v949_v12 = vsub.f32 %v10469_v28, %v10490_v42 }
  0x8c   :  { %v950_v13 = vsub.f32 %v10448_v17, %v10490_v42  ;;  %v2090_v19 = vsub.f32 1.0, %v1514_v57  ;;  %v1511_v21 = vand.u32 2147483647, %v935_v58  ;;  %v1513_v26 = vand.u32 2147483647, %v937_v1  ;;  %v116_v42 = vld [vmem:[%s17900_s2 + $0x2b8] sm:$0xff] }
  0x8d   :  { %v10516_v60 = vpop.permute.xlu1 %248  ;;  %v10518_v62 = vpop.permute.xlu0 %243  ;;  %v2085_v27 = vsub.f32 1.0, %v1509_v3  ;;  %v1520_v30 = vand.u32 2147483647, %v944_v51  ;;  %v2092_v31 = vsub.f32 1.0, %v10495_v47  ;;  %v10574_v44 = vmax.f32 %v2088_v18, 0.0 }
  0x8e   :  { %568 = vperm.xlu1 %10177, %v100_v54   ;;  %563 = vperm.xlu0 %10176, %v99_v55   ;;  %v960_v33 = vsub.f32 %v10446_v16, %v10516_v60  ;;  %v962_v35 = vsub.f32 %v10448_v17, %v10516_v60  ;;  %v956_v37 = vsub.f32 %v10446_v16, %v10518_v62  ;;  %v10576_v45 = vmax.f32 %v2090_v19, 0.0 }
  0x8f   :  { %v958_v39 = vsub.f32 %v10448_v17, %v10518_v62  ;;  %v2087_v47 = vsub.f32 1.0, %v1511_v21  ;;  %v10578_v51 = vmax.f32 %v2083_v22, 0.0  ;;  %v2089_v56 = vsub.f32 1.0, %v1513_v26  ;;  %v106_v26 = vld [vmem:[%s17900_s2 + $0x268] sm:$0xff] }
  0x90   :  { %v10584_v57 = vmax.f32 %v2085_v27, 0.0  ;;  %v2096_v58 = vsub.f32 1.0, %v1520_v30  ;;  %v10586_v59 = vmax.f32 %v2092_v31, 0.0  ;;  %v105_v27 = vld [vmem:[%s17900_s2 + $0x260] sm:$0xff]  ;;  %v1522_v31 = vand.u32 2147483647, %v946_v53 }
  0x91   :  { %v10547_v24 = vpop.permute.xlu1 %258  ;;  %v10549_v25 = vpop.permute.xlu0 %253  ;;  %v10610_v30 = vmax.f32 %v2087_v47, 0.0  ;;  %v10625_v1 = vmax.f32 %v2089_v56, 0.0  ;;  %v2091_v18 = vsub.f32 1.0, %v10499_v49  ;;  %v108_v53 = vld [vmem:[%s17900_s2 + $0x278] sm:$0xff]  ;;  %v110_v49 = vld [vmem:[%s17900_s2 + $0x288] sm:$0xff] }
  0x92   :  { %578 = vperm.xlu1 %10177, %v102_v14   ;;  %573 = vperm.xlu0 %10176, %v101_v15   ;;  %v10627_v47 = vmax.f32 %v2096_v58, 0.0  ;;  %v2098_v61 = vsub.f32 1.0, %v1522_v31 }
  0x93   :  { %v10668_v31 = vmax.f32 %v2091_v18, 0.0 }
  0x95   :  { %v10580_v54 = vpop.permute.xlu1 %268  ;;  %v10582_v55 = vpop.permute.xlu0 %263 }
  0x96   :  { %18167 = vst [vmem:[#allocation11_spill] sm:$0xff] %v10580_v54  ;;  %18168 = vst [vmem:[#allocation12_spill] sm:$0xff] %v10582_v55  ;;  %588 = vperm.xlu1 %10177, %v104_v40   ;;  %583 = vperm.xlu0 %10176, %v103_v43   ;;  %v2094_v40 = vsub.f32 1.0, %v10497_v48  ;;  %v1519_v43 = vand.u32 2147483647, %v943_v50 }
  0x97   :  { %v1517_v50 = vand.u32 2147483647, %v941_v46 }
  0x98   :  { %v10653_v48 = vmax.f32 %v2094_v40, 0.0  ;;  %v2095_v58 = vsub.f32 1.0, %v1519_v43  ;;  %v1524_v43 = vand.u32 2147483647, %v948_v11  ;;  %v109_v11 = vld [vmem:[%s17900_s2 + $0x280] sm:$0xff]  ;;  %v10692_v40 = vmax.f32 %v2098_v61, 0.0 }
  0x99   :  { %v10621_v14 = vpop.permute.xlu1 %278  ;;  %v10623_v21 = vpop.permute.xlu0 %273  ;;  %v2093_v29 = vsub.f32 1.0, %v1517_v50  ;;  %v112_v61 = vld [vmem:[%s17900_s2 + $0x298] sm:$0xff] }
  0x9a   :  { %18169 = vst [vmem:[#allocation13_spill] sm:$0xff] %v10621_v14  ;;  %18170 = vst [vmem:[#allocation14_spill] sm:$0xff] %v10623_v21  ;;  %598 = vperm.xlu1 %10177, %v106_v26   ;;  %593 = vperm.xlu0 %10176, %v105_v27   ;;  %v107_v26 = vld [vmem:[%s17900_s2 + $0x270] sm:$0xff]  ;;  %v1521_v27 = vand.u32 2147483647, %v945_v52  ;;  %v10694_v20 = vmax.f32 %v2095_v58, 0.0 }
  0x9b   :  { %v2100_v18 = vsub.f32 1.0, %v1524_v43  ;;  %v10722_v22 = vmax.f32 %v2093_v29, 0.0  ;;  %v1523_v29 = vand.u32 2147483647, %v947_v10  ;;  %v1525_v10 = vand.u32 2147483647, %v949_v12 }
  0x9c   :  { %v2097_v56 = vsub.f32 1.0, %v1521_v27  ;;  %v1530_v27 = vand.u32 2147483647, %v954_v7  ;;  %v114_v7 = vld [vmem:[%s17900_s2 + $0x2a8] sm:$0xff]  ;;  %v1532_v12 = vand.u32 2147483647, %v956_v37 }
  0x9d   :  { %v10664_v46 = vpop.permute.xlu1 %288  ;;  %v10666_v15 = vpop.permute.xlu0 %283  ;;  %v10758_v50 = vmax.f32 %v2100_v18, 0.0  ;;  %v2101_v34 = vsub.f32 1.0, %v1525_v10  ;;  %v1534_v37 = vand.u32 2147483647, %v958_v39 }
  0x9e   :  { %18171 = vst [vmem:[#allocation15_spill] sm:$0xff] %v10664_v46  ;;  %18172 = vst [vmem:[#allocation16_spill] sm:$0xff] %v10666_v15  ;;  %608 = vperm.xlu1 %10177, %v108_v53   ;;  %603 = vperm.xlu0 %10176, %v107_v26   ;;  %v1528_v53 = vand.u32 2147483647, %v952_v5  ;;  %v1526_v26 = vand.u32 2147483647, %v950_v13 }
  0x9f   :  { %v10732_v43 = vmax.f32 %v2097_v56, 0.0  ;;  %v2106_v19 = vsub.f32 1.0, %v1530_v27  ;;  %v2099_v27 = vsub.f32 1.0, %v1523_v29  ;;  %v10842_v39 = vmax.f32 %v2101_v34, 0.0 }
  0xa0   :  { %v2104_v3 = vsub.f32 1.0, %v1528_v53  ;;  %v2110_v10 = vsub.f32 1.0, %v1534_v37  ;;  %v120_v37 = vld [vmem:[%s17900_s2 + $0x2d8] sm:$0xff] }
  0xa1   :  { %v10707_v52 = vpop.permute.xlu1 %298  ;;  %v10709_v58 = vpop.permute.xlu0 %293 }
  0xa2   :  { %18173 = vst [vmem:[#allocation17_spill] sm:$0xff] %v10707_v52  ;;  %18174 = vst [vmem:[#allocation18_spill] sm:$0xff] %v10709_v58  ;;  %618 = vperm.xlu1 %10177, %v110_v49   ;;  %613 = vperm.xlu0 %10176, %v109_v11   ;;  %v111_v49 = vld [vmem:[%s17900_s2 + $0x290] sm:$0xff]  ;;  %v2102_v11 = vsub.f32 1.0, %v1526_v26  ;;  %v10760_v5 = vmax.f32 %v2104_v3, 0.0  ;;  %v113_v3 = vld [vmem:[%s17900_s2 + $0x2a0] sm:$0xff] }
  0xa3   :  { %v1527_v26 = vand.u32 2147483647, %v951_v4  ;;  %v1529_v4 = vand.u32 2147483647, %v953_v6 }
  0xa4   :  { %v10775_v18 = vmax.f32 %v2102_v11, 0.0 }
  0xa5   :  { %v10745_v13 = vpop.permute.xlu1 %308  ;;  %v10747_v56 = vpop.permute.xlu0 %303  ;;  %v2103_v11 = vsub.f32 1.0, %v1527_v26  ;;  %v2105_v29 = vsub.f32 1.0, %v1529_v4  ;;  %v1538_v4 = vand.u32 2147483647, %v962_v35 }
  0xa6   :  { %18175 = vst [vmem:[#allocation19_spill] sm:$0xff] %v10745_v13  ;;  %18176 = vst [vmem:[#allocation20_spill] sm:$0xff] %v10747_v56  ;;  %628 = vperm.xlu1 %10177, %v112_v61   ;;  %623 = vperm.xlu0 %10176, %v111_v49   ;;  %v10802_v49 = vmax.f32 %v2106_v19, 0.0  ;;  %v115_v19 = vld [vmem:[%s17900_s2 + $0x2b0] sm:$0xff]  ;;  %v18193_v13 = vsub.f32 %v10446_v16, %v10549_v25 }
  0xa7   :  { %v10840_v32 = vmax.f32 %v2103_v11, 0.0  ;;  %v117_v11 = vld [vmem:[%s17900_s2 + $0x2c0] sm:$0xff]  ;;  %v10871_v34 = vmax.f32 %v2105_v29, 0.0 }
  0xa8   :  { %v1540_v56 = vand.u32 2147483647, %v18193_v13 }
  0xa9   :  { %v10785_v61 = vpop.permute.xlu1 %318  ;;  %v10787_v53 = vpop.permute.xlu0 %313  ;;  %18184 = vst [vmem:[#allocation27_spill] sm:$0xff] %v10871_v34 }
  0xaa   :  { %18177 = vst [vmem:[#allocation21_spill] sm:$0xff] %v10785_v61  ;;  %18178 = vst [vmem:[#allocation22_spill] sm:$0xff] %v10787_v53  ;;  %638 = vperm.xlu1 %10177, %v114_v7   ;;  %633 = vperm.xlu0 %10176, %v113_v3   ;;  %v1536_v7 = vand.u32 2147483647, %v960_v33  ;;  %v10816_v3 = vmax.f32 %v2099_v27, 0.0  ;;  %v2108_v33 = vsub.f32 1.0, %v1532_v12  ;;  %v18192_v53 = vsub.f32 %v10469_v28, %v10516_v60 }
  0xac   :  { %v2112_v36 = vsub.f32 1.0, %v1536_v7  ;;  %v1537_v27 = vand.u32 2147483647, %v18192_v53 }
  0xad   :  { %v10824_v41 = vpop.permute.xlu1 %328  ;;  %v10826_v6 = vpop.permute.xlu0 %323 }
  0xae   :  { %18179 = vst [vmem:[#allocation23_spill] sm:$0xff] %v10824_v41  ;;  %18180 = vst [vmem:[#allocation24_spill] sm:$0xff] %v10826_v6  ;;  %648 = vperm.xlu1 %10177, %v116_v42   ;;  %643 = vperm.xlu0 %10176, %v115_v19   ;;  %v18183_v42 = vsub.f32 %v10459_v23, %v10518_v62  ;;  %v10873_v41 = vmax.f32 %v2108_v33, 0.0  ;;  %v2114_v33 = vsub.f32 1.0, %v1538_v4  ;;  %v10904_v6 = vmax.f32 %v2110_v10, 0.0 }
  0xaf   :  { %v18198_v4 = vsub.f32 %v10446_v16, %v10547_v24  ;;  %v2113_v35 = vsub.f32 1.0, %v1537_v27 }
  0xb0   :  { %v1531_v12 = vand.u32 2147483647, %v18183_v42  ;;  %18185 = vst [vmem:[#allocation28_spill] sm:$0xff] %v10873_v41  ;;  %v10882_v42 = vmax.f32 %v2112_v36, 0.0  ;;  %v119_v36 = vld [vmem:[%s17900_s2 + $0x2d0] sm:$0xff]  ;;  %18190 = vst [vmem:[#allocation32_spill] sm:$0xff] %v10904_v6 }
  0xb1   :  { %v10857_v7 = vpop.permute.xlu1 %338  ;;  %v10859_v19 = vpop.permute.xlu0 %333  ;;  %v10943_v53 = vmax.f32 %v2114_v33, 0.0  ;;  %v10989_v52 = vmax.f32 %v2113_v35, 0.0  ;;  %v126_v35 = vld [vmem:[%s17900_s2 + $0x308] sm:$0xff] }
  0xb2   :  { %18181 = vst [vmem:[#allocation25_spill] sm:$0xff] %v10857_v7  ;;  %18182 = vst [vmem:[#allocation26_spill] sm:$0xff] %v10859_v19  ;;  %658 = vperm.xlu1 %10177, %v118_v38   ;;  %653 = vperm.xlu0 %10176, %v117_v11   ;;  %v18187_v38 = vsub.f32 %v10459_v23, %v10516_v60  ;;  %v2107_v61 = vsub.f32 1.0, %v1531_v12  ;;  %v18191_v11 = vsub.f32 %v10469_v28, %v10518_v62  ;;  %v122_v62 = vld [vmem:[%s17900_s2 + $0x2e8] sm:$0xff] }
  0xb3   :  { %18186 = vst [vmem:[#allocation29_spill] sm:$0xff] %v10882_v42  ;;  %18196 = vst [vmem:[#allocation35_spill] sm:$0xff] %v10943_v53  ;;  %v18199_v19 = vsub.f32 %v10448_v17, %v10549_v25 }
  0xb4   :  { %v1535_v29 = vand.u32 2147483647, %v18187_v38  ;;  %v1533_v7 = vand.u32 2147483647, %v18191_v11  ;;  %v10945_v13 = vmax.f32 %v2107_v61, 0.0  ;;  %18206 = vst [vmem:[#allocation41_spill] sm:$0xff] %v10989_v52 }
  0xb5   :  { %v10900_v38 = vpop.permute.xlu1 %348  ;;  %v10902_v26 = vpop.permute.xlu0 %343  ;;  %v1542_v12 = vand.u32 2147483647, %v18199_v19  ;;  %v18203_v19 = vsub.f32 %v10448_v17, %v10547_v24 }
  0xb6   :  { %18188 = vst [vmem:[#allocation30_spill] sm:$0xff] %v10900_v38  ;;  %18189 = vst [vmem:[#allocation31_spill] sm:$0xff] %v10902_v26  ;;  %668 = vperm.xlu1 %10177, %v120_v37   ;;  %663 = vperm.xlu0 %10176, %v119_v36   ;;  %v2111_v60 = vsub.f32 1.0, %v1535_v29  ;;  %v121_v36 = vld [vmem:[%s17900_s2 + $0x2e0] sm:$0xff]  ;;  %v1544_v37 = vand.u32 2147483647, %v18198_v4  ;;  %v18204_v4 = vsub.f32 %v10459_v23, %v10549_v25 }
  0xb7   :  { %18197 = vst [vmem:[#allocation36_spill] sm:$0xff] %v10945_v13  ;;  %v2109_v11 = vsub.f32 1.0, %v1533_v7  ;;  %v2116_v38 = vsub.f32 1.0, %v1540_v56  ;;  %v124_v7 = vld [vmem:[%s17900_s2 + $0x2f8] sm:$0xff]  ;;  %v1546_v33 = vand.u32 2147483647, %v18203_v19 }
  0xb8   :  { %v10962_v27 = vmax.f32 %v2111_v60, 0.0  ;;  %v2120_v56 = vsub.f32 1.0, %v1544_v37  ;;  %v2118_v60 = vsub.f32 1.0, %v1542_v12 }
  0xb9   :  { %v10939_v29 = vpop.permute.xlu1 %358  ;;  %v10941_v10 = vpop.permute.xlu0 %353  ;;  %v10991_v58 = vmax.f32 %v2116_v38, 0.0  ;;  %v2122_v19 = vsub.f32 1.0, %v1546_v33  ;;  %v18211_v38 = vsub.f32 %v10459_v23, %v10547_v24  ;;  %v128_v33 = vld [vmem:[%s17900_s2 + $0x318] sm:$0xff] }
  0xba   :  { %18194 = vst [vmem:[#allocation33_spill] sm:$0xff] %v10939_v29  ;;  %18195 = vst [vmem:[#allocation34_spill] sm:$0xff] %v10941_v10  ;;  %678 = vperm.xlu1 %10177, %v122_v62   ;;  %673 = vperm.xlu0 %10176, %v121_v36   ;;  %v123_v36 = vld [vmem:[%s17900_s2 + $0x2f0] sm:$0xff]  ;;  %v1539_v62 = vand.u32 2147483647, %v18204_v4  ;;  %v10987_v29 = vmax.f32 %v2109_v11, 0.0 }
  0xbb   :  { %18200 = vst [vmem:[#allocation37_spill] sm:$0xff] %v10962_v27  ;;  %18207 = vst [vmem:[#allocation42_spill] sm:$0xff] %v10991_v58  ;;  %v11019_v37 = vmax.f32 %v2120_v56, 0.0  ;;  %v11024_v12 = vand.u32 2147483647, %v18211_v38  ;;  %v127_v56 = vld [vmem:[%s17900_s2 + $0x310] sm:$0xff] }
  0xbc   :  { %18205 = vst [vmem:[#allocation40_spill] sm:$0xff] %v10987_v29  ;;  %v2115_v11 = vsub.f32 1.0, %v1539_v62 }
  0xbd   :  { %v10977_v61 = vpop.permute.xlu1 %368  ;;  %v10979_v26 = vpop.permute.xlu0 %363  ;;  %18210 = vst [vmem:[#allocation45_spill] sm:$0xff] %v11019_v37 }
  0xbe   :  { %18201 = vst [vmem:[#allocation38_spill] sm:$0xff] %v10977_v61  ;;  %18202 = vst [vmem:[#allocation39_spill] sm:$0xff] %v10979_v26  ;;  %688 = vperm.xlu1 %10177, %v124_v7   ;;  %683 = vperm.xlu0 %10176, %v123_v36   ;;  %v125_v7 = vld [vmem:[%s17900_s2 + $0x300] sm:$0xff]  ;;  %v11032_v26 = vmax.f32 %v2118_v60, 0.0 }
  0xc0   :  { %18212 = vst [vmem:[#allocation46_spill] sm:$0xff] %v11032_v26  ;;  %v11057_v26 = vmax.f32 %v2115_v11, 0.0  ;;  %v130_v11 = vld [vmem:[%s17900_s2 + $0x328] sm:$0xff] }
  0xc1   :  { %v11015_v10 = vpop.permute.xlu1 %378  ;;  %v11017_v4 = vpop.permute.xlu0 %373 }
  0xc2   :  { %18208 = vst [vmem:[#allocation43_spill] sm:$0xff] %v11015_v10  ;;  %18209 = vst [vmem:[#allocation44_spill] sm:$0xff] %v11017_v4  ;;  %v1063_v61 = vsub.f32 %v10459_v23, %v11015_v10  ;;  %v1065_v36 = vsub.f32 %v10469_v28, %v11015_v10  ;;  %698 = vperm.xlu1 %10177, %v126_v35   ;;  %v1059_v38 = vsub.f32 %v10459_v23, %v11017_v4 }
  0xc3   :  { %v1061_v46 = vsub.f32 %v10469_v28, %v11017_v4  ;;  %693 = vperm.xlu0 %10176, %v125_v7   ;;  %v11050_v10 = vmax.f32 %v2122_v19, 0.0  ;;  %18216 = vst [vmem:[#allocation50_spill] sm:$0xff] %v11057_v26 }
  0xc4   :  { %v1639_v35 = vand.u32 2147483647, %v1063_v61  ;;  %v1641_v60 = vand.u32 2147483647, %v1065_v36  ;;  %v1635_v62 = vand.u32 2147483647, %v1059_v38 }
  0xc5   :  { %18213 = vst [vmem:[#allocation47_spill] sm:$0xff] %v11050_v10  ;;  %v1637_v14 = vand.u32 2147483647, %v1061_v46  ;;  %v11052_v21 = vpop.permute.xlu1 %388  ;;  %v11054_v7 = vpop.permute.xlu0 %383 }
  0xc6   :  { %18214 = vst [vmem:[#allocation48_spill] sm:$0xff] %v11052_v21  ;;  %18215 = vst [vmem:[#allocation49_spill] sm:$0xff] %v11054_v7  ;;  %v2215_v61 = vsub.f32 1.0, %v1639_v35  ;;  %v2217_v36 = vsub.f32 1.0, %v1641_v60  ;;  %v1071_v15 = vsub.f32 %v10459_v23, %v11052_v21  ;;  %708 = vperm.xlu1 %10177, %v128_v33   ;;  %v2211_v19 = vsub.f32 1.0, %v1635_v62 }
  0xc7   :  { %v2213_v38 = vsub.f32 1.0, %v1637_v14  ;;  %v1073_v46 = vsub.f32 %v10469_v28, %v11052_v21  ;;  %703 = vperm.xlu0 %10176, %v127_v56   ;;  %v1067_v33 = vsub.f32 %v10459_v23, %v11054_v7  ;;  %v129_v14 = vld [vmem:[%s17900_s2 + $0x320] sm:$0xff]  ;;  %v1069_v21 = vsub.f32 %v10469_v28, %v11054_v7 }
  0xc8   :  { %v11070_v35 = vmax.f32 %v2215_v61, 0.0  ;;  %v11072_v60 = vmax.f32 %v2217_v36, 0.0  ;;  %v1647_v54 = vand.u32 2147483647, %v1071_v15  ;;  %v11079_v62 = vmax.f32 %v2211_v19, 0.0 }
  0xc9   :  { %v11081_v10 = vmax.f32 %v2213_v38, 0.0  ;;  %v1649_v56 = vand.u32 2147483647, %v1073_v46  ;;  %v11085_v61 = vpop.permute.xlu1 %398  ;;  %v11087_v36 = vpop.permute.xlu0 %393 }
  0xca   :  { %18217 = vst [vmem:[#allocation51_spill] sm:$0xff] %v11070_v35  ;;  %18218 = vst [vmem:[#allocation52_spill] sm:$0xff] %v11072_v60  ;;  %v2223_v15 = vsub.f32 1.0, %v1647_v54  ;;  %v1643_v35 = vand.u32 2147483647, %v1067_v33  ;;  %718 = vperm.xlu1 %10177, %v130_v11   ;;  %v1079_v38 = vsub.f32 %v10459_v23, %v11085_v61  ;;  %v1081_v4 = vsub.f32 %v10469_v28, %v11085_v61  ;;  %v132_v54 = vld [vmem:[%s17900_s2 + $0x338] sm:$0xff] }
  0xcb   :  { %18219 = vst [vmem:[#allocation53_spill] sm:$0xff] %v11079_v62  ;;  %18220 = vst [vmem:[#allocation54_spill] sm:$0xff] %v11081_v10  ;;  %v2225_v19 = vsub.f32 1.0, %v1649_v56  ;;  %713 = vperm.xlu0 %10176, %v129_v14   ;;  %v1645_v60 = vand.u32 2147483647, %v1069_v21  ;;  %v131_v56 = vld [vmem:[%s17900_s2 + $0x330] sm:$0xff]  ;;  %v1075_v14 = vsub.f32 %v10459_v23, %v11087_v36 }
  0xcc   :  { %18221 = vst [vmem:[#allocation55_spill] sm:$0xff] %v11085_v61  ;;  %18222 = vst [vmem:[#allocation56_spill] sm:$0xff] %v11087_v36  ;;  %v11102_v10 = vmax.f32 %v2223_v15, 0.0  ;;  %v2219_v33 = vsub.f32 1.0, %v1643_v35  ;;  %v1655_v7 = vand.u32 2147483647, %v1079_v38  ;;  %v1077_v61 = vsub.f32 %v10469_v28, %v11087_v36 }
  0xcd   :  { %v11109_v46 = vmax.f32 %v2225_v19, 0.0  ;;  %v1657_v62 = vand.u32 2147483647, %v1081_v4  ;;  %v11113_v26 = vpop.permute.xlu1 %408  ;;  %v11115_v15 = vpop.permute.xlu0 %403  ;;  %v2221_v21 = vsub.f32 1.0, %v1645_v60  ;;  %v134_v60 = vld [vmem:[%s17900_s2 + $0x348] sm:$0xff] }
  0xce   :  { %18223 = vst [vmem:[#allocation57_spill] sm:$0xff] %v11102_v10  ;;  %18225 = vst [vmem:[#allocation59_spill] sm:$0xff] %v11113_v26  ;;  %v11117_v35 = vmax.f32 %v2219_v33, 0.0  ;;  %728 = vperm.xlu1 %10177, %v132_v54   ;;  %v2231_v19 = vsub.f32 1.0, %v1655_v7  ;;  %v1653_v10 = vand.u32 2147483647, %v1077_v61  ;;  %v1087_v11 = vsub.f32 %v10459_v23, %v11113_v26 }
  0xcf   :  { %18224 = vst [vmem:[#allocation58_spill] sm:$0xff] %v11109_v46  ;;  %18226 = vst [vmem:[#allocation60_spill] sm:$0xff] %v11115_v15  ;;  %v2233_v38 = vsub.f32 1.0, %v1657_v62  ;;  %v1651_v46 = vand.u32 2147483647, %v1075_v14  ;;  %723 = vperm.xlu0 %10176, %v131_v56   ;;  %v11128_v33 = vmax.f32 %v2221_v21, 0.0  ;;  %v1089_v21 = vsub.f32 %v10469_v28, %v11113_v26 }
  0xd0   :  { %18227 = vst [vmem:[#allocation61_spill] sm:$0xff] %v11117_v35  ;;  %v133_v7 = vld [vmem:[%s17900_s2 + $0x340] sm:$0xff]  ;;  %v11137_v62 = vmax.f32 %v2231_v19, 0.0  ;;  %v2229_v36 = vsub.f32 1.0, %v1653_v10  ;;  %v1083_v35 = vsub.f32 %v10459_v23, %v11115_v15  ;;  %v136_v10 = vld [vmem:[%s17900_s2 + $0x358] sm:$0xff] }
  0xd1   :  { %18228 = vst [vmem:[#allocation62_spill] sm:$0xff] %v11128_v33  ;;  %v11139_v56 = vmax.f32 %v2233_v38, 0.0  ;;  %v2227_v14 = vsub.f32 1.0, %v1651_v46  ;;  %v11143_v4 = vpop.permute.xlu1 %418  ;;  %v11145_v61 = vpop.permute.xlu0 %413  ;;  %v1663_v33 = vand.u32 2147483647, %v1087_v11 }
  0xd2   :  { %18229 = vst [vmem:[#allocation63_spill] sm:$0xff] %v11137_v62  ;;  %18231 = vst [vmem:[#allocation65_spill] sm:$0xff] %v11143_v4  ;;  %738 = vperm.xlu1 %10177, %v134_v60   ;;  %v1665_v38 = vand.u32 2147483647, %v1089_v21  ;;  %v11160_v54 = vmax.f32 %v2229_v36, 0.0  ;;  %v135_v21 = vld [vmem:[%s17900_s2 + $0x350] sm:$0xff]  ;;  %v1091_v62 = vsub.f32 %v10459_v23, %v11145_v61 }
  0xd3   :  { %18230 = vst [vmem:[#allocation64_spill] sm:$0xff] %v11139_v56  ;;  %18232 = vst [vmem:[#allocation66_spill] sm:$0xff] %v11145_v61  ;;  %v11151_v19 = vmax.f32 %v2227_v14, 0.0  ;;  %v1085_v56 = vsub.f32 %v10469_v28, %v11115_v15  ;;  %733 = vperm.xlu0 %10176, %v133_v7   ;;  %v2239_v11 = vsub.f32 1.0, %v1663_v33  ;;  %v1659_v14 = vand.u32 2147483647, %v1083_v35 }
  0xd4   :  { %18234 = vst [vmem:[#allocation68_spill] sm:$0xff] %v11160_v54  ;;  %v2241_v46 = vsub.f32 1.0, %v1665_v38  ;;  %v1095_v7 = vsub.f32 %v10459_v23, %v11143_v4  ;;  %v1097_v35 = vsub.f32 %v10469_v28, %v11143_v4  ;;  %v1667_v38 = vand.u32 2147483647, %v1091_v62 }
  0xd5   :  { %18233 = vst [vmem:[#allocation67_spill] sm:$0xff] %v11151_v19  ;;  %v1661_v26 = vand.u32 2147483647, %v1085_v56  ;;  %v11171_v19 = vpop.permute.xlu1 %428  ;;  %v11173_v36 = vpop.permute.xlu0 %423  ;;  %v11175_v33 = vmax.f32 %v2239_v11, 0.0  ;;  %v2235_v60 = vsub.f32 1.0, %v1659_v14  ;;  %v138_v11 = vld [vmem:[%s17900_s2 + $0x368] sm:$0xff] }
  0xd6   :  { %18235 = vst [vmem:[#allocation69_spill] sm:$0xff] %v11171_v19  ;;  %18236 = vst [vmem:[#allocation70_spill] sm:$0xff] %v11173_v36  ;;  %748 = vperm.xlu1 %10177, %v136_v10   ;;  %v11181_v56 = vmax.f32 %v2241_v46, 0.0  ;;  %v1671_v54 = vand.u32 2147483647, %v1095_v7  ;;  %v1093_v46 = vsub.f32 %v10469_v28, %v11145_v61  ;;  %v1105_v7 = vsub.f32 %v10469_v28, %v11171_v19 }
  0xd7   :  { %18237 = vst [vmem:[#allocation71_spill] sm:$0xff] %v11175_v33  ;;  %v2237_v15 = vsub.f32 1.0, %v1661_v26  ;;  %743 = vperm.xlu0 %10176, %v135_v21   ;;  %v11188_v14 = vmax.f32 %v2235_v60, 0.0  ;;  %v1673_v33 = vand.u32 2147483647, %v1097_v35  ;;  %v137_v26 = vld [vmem:[%s17900_s2 + $0x360] sm:$0xff]  ;;  %v1101_v62 = vsub.f32 %v10469_v28, %v11173_v36 }
  0xd8   :  { %18238 = vst [vmem:[#allocation72_spill] sm:$0xff] %v11181_v56  ;;  %v2247_v21 = vsub.f32 1.0, %v1671_v54  ;;  %v1669_v37 = vand.u32 2147483647, %v1093_v46  ;;  %v1103_v56 = vsub.f32 %v10459_v23, %v11171_v19  ;;  %v2243_v54 = vsub.f32 1.0, %v1667_v38  ;;  %v139_v38 = vld [vmem:[%s17900_s2 + $0x370] sm:$0xff] }
  0xd9   :  { %18239 = vst [vmem:[#allocation73_spill] sm:$0xff] %v11188_v14  ;;  %v11197_v10 = vmax.f32 %v2237_v15, 0.0  ;;  %v11201_v60 = vpop.permute.xlu1 %438  ;;  %v11203_v35 = vpop.permute.xlu0 %433  ;;  %v2249_v4 = vsub.f32 1.0, %v1673_v33  ;;  %v140_v33 = vld [vmem:[%s17900_s2 + $0x378] sm:$0xff]  ;;  %v1681_v14 = vand.u32 2147483647, %v1105_v7 }
  0xda   :  { %18241 = vst [vmem:[#allocation75_spill] sm:$0xff] %v11201_v60  ;;  %18242 = vst [vmem:[#allocation76_spill] sm:$0xff] %v11203_v35  ;;  %758 = vperm.xlu1 %10177, %v138_v11   ;;  %v11209_v15 = vmax.f32 %v2247_v21, 0.0  ;;  %v2245_v61 = vsub.f32 1.0, %v1669_v37  ;;  %v1099_v11 = vsub.f32 %v10459_v23, %v11173_v36  ;;  %v11225_v21 = vmax.f32 %v2243_v54, 0.0 }
  0xdb   :  { %18240 = vst [vmem:[#allocation74_spill] sm:$0xff] %v11197_v10  ;;  %753 = vperm.xlu0 %10176, %v137_v26   ;;  %v11218_v46 = vmax.f32 %v2249_v4, 0.0  ;;  %v1679_v10 = vand.u32 2147483647, %v1103_v56  ;;  %v2257_v54 = vsub.f32 1.0, %v1681_v14  ;;  %v1111_v26 = vsub.f32 %v10459_v23, %v11201_v60 }
  0xdc   :  { %18243 = vst [vmem:[#allocation77_spill] sm:$0xff] %v11209_v15  ;;  %18245 = vst [vmem:[#allocation79_spill] sm:$0xff] %v11225_v21  ;;  %v11235_v56 = vmax.f32 %v2245_v61, 0.0  ;;  %v1675_v15 = vand.u32 2147483647, %v1099_v11  ;;  %v142_v61 = vld [vmem:[%s17900_s2 + $0x388] sm:$0xff]  ;;  %v1113_v11 = vsub.f32 %v10469_v28, %v11201_v60  ;;  %v1109_v60 = vsub.f32 %v10469_v28, %v11203_v35 }
  0xdd   :  { %18244 = vst [vmem:[#allocation78_spill] sm:$0xff] %v11218_v46  ;;  %v11231_v4 = vpop.permute.xlu1 %448  ;;  %v11233_v37 = vpop.permute.xlu0 %443  ;;  %v2255_v19 = vsub.f32 1.0, %v1679_v10  ;;  %v1677_v7 = vand.u32 2147483647, %v1101_v62  ;;  %v141_v62 = vld [vmem:[%s17900_s2 + $0x380] sm:$0xff]  ;;  %v1107_v46 = vsub.f32 %v10459_v23, %v11203_v35 }
  0xde   :  { %18246 = vst [vmem:[#allocation80_spill] sm:$0xff] %v11231_v4  ;;  %18247 = vst [vmem:[#allocation81_spill] sm:$0xff] %v11233_v37  ;;  %768 = vperm.xlu1 %10177, %v140_v33   ;;  %v2251_v10 = vsub.f32 1.0, %v1675_v15  ;;  %v11255_v33 = vmax.f32 %v2257_v54, 0.0  ;;  %v1687_v21 = vand.u32 2147483647, %v1111_v26  ;;  %v1119_v14 = vsub.f32 %v10459_v23, %v11231_v4 }
  0xdf   :  { %18248 = vst [vmem:[#allocation82_spill] sm:$0xff] %v11235_v56  ;;  %763 = vperm.xlu0 %10176, %v139_v38   ;;  %v11246_v56 = vmax.f32 %v2255_v19, 0.0  ;;  %v2253_v38 = vsub.f32 1.0, %v1677_v7  ;;  %v1689_v36 = vand.u32 2147483647, %v1113_v11  ;;  %v1115_v58 = vsub.f32 %v10459_v23, %v11233_v37 }
  0xe0   :  { %18250 = vst [vmem:[#allocation84_spill] sm:$0xff] %v11255_v33  ;;  %v2263_v26 = vsub.f32 1.0, %v1687_v21  ;;  %v1683_v33 = vand.u32 2147483647, %v1107_v46  ;;  %v143_v21 = vld [vmem:[%s17900_s2 + $0x390] sm:$0xff] }
  0xe1   :  { %18249 = vst [vmem:[#allocation83_spill] sm:$0xff] %v11246_v56  ;;  %v11259_v19 = vpop.permute.xlu1 %458  ;;  %v11261_v15 = vpop.permute.xlu0 %453  ;;  %v11263_v56 = vmax.f32 %v2251_v10, 0.0  ;;  %v11269_v54 = vmax.f32 %v2253_v38, 0.0  ;;  %v144_v10 = vld [vmem:[%s17900_s2 + $0x398] sm:$0xff]  ;;  %v2265_v11 = vsub.f32 1.0, %v1689_v36  ;;  %v1117_v36 = vsub.f32 %v10469_v28, %v11233_v37 }
  0xe2   :  { %18251 = vst [vmem:[#allocation85_spill] sm:$0xff] %v11259_v19  ;;  %18252 = vst [vmem:[#allocation86_spill] sm:$0xff] %v11261_v15  ;;  %778 = vperm.xlu1 %10177, %v142_v61   ;;  %v11283_v38 = vmax.f32 %v2263_v26, 0.0  ;;  %v2259_v46 = vsub.f32 1.0, %v1683_v33 }
  0xe3   :  { %18253 = vst [vmem:[#allocation87_spill] sm:$0xff] %v11263_v56  ;;  %18254 = vst [vmem:[#allocation88_spill] sm:$0xff] %v11269_v54  ;;  %773 = vperm.xlu0 %10176, %v141_v62   ;;  %v1685_v56 = vand.u32 2147483647, %v1109_v60  ;;  %v1121_v62 = vsub.f32 %v10469_v28, %v11231_v4  ;;  %v11293_v35 = vmax.f32 %v2265_v11, 0.0  ;;  %v146_v11 = vld [vmem:[%s17900_s2 + $0x3a8] sm:$0xff] }
  0xe4   :  { %18255 = vst [vmem:[#allocation89_spill] sm:$0xff] %v11283_v38  ;;  %v1695_v54 = vand.u32 2147483647, %v1119_v14  ;;  %v11297_v26 = vmax.f32 %v2259_v46, 0.0  ;;  %v1691_v46 = vand.u32 2147483647, %v1115_v58  ;;  %v1129_v58 = vsub.f32 %v10469_v28, %v11259_v19 }
  0xe5   :  { %v11289_v60 = vpop.permute.xlu1 %468  ;;  %v11291_v7 = vpop.permute.xlu0 %463  ;;  %18258 = vst [vmem:[#allocation92_spill] sm:$0xff] %v11293_v35  ;;  %v2261_v61 = vsub.f32 1.0, %v1685_v56  ;;  %v1697_v33 = vand.u32 2147483647, %v1121_v62  ;;  %v145_v62 = vld [vmem:[%s17900_s2 + $0x3a0] sm:$0xff]  ;;  %v1123_v35 = vsub.f32 %v10459_v23, %v11261_v15 }
  0xe6   :  { %18256 = vst [vmem:[#allocation90_spill] sm:$0xff] %v11289_v60  ;;  %18257 = vst [vmem:[#allocation91_spill] sm:$0xff] %v11291_v7  ;;  %788 = vperm.xlu1 %10177, %v144_v10   ;;  %v2271_v14 = vsub.f32 1.0, %v1695_v54  ;;  %v1693_v4 = vand.u32 2147483647, %v1117_v36  ;;  %v2267_v10 = vsub.f32 1.0, %v1691_v46 }
  0xe7   :  { %18259 = vst [vmem:[#allocation93_spill] sm:$0xff] %v11297_v26  ;;  %783 = vperm.xlu0 %10176, %v143_v21   ;;  %v11306_v56 = vmax.f32 %v2261_v61, 0.0  ;;  %v2273_v38 = vsub.f32 1.0, %v1697_v33  ;;  %v1127_v21 = vsub.f32 %v10459_v23, %v11259_v19  ;;  %v1699_v33 = vand.u32 2147483647, %v1123_v35 }
  0xe8   :  { %v11321_v54 = vmax.f32 %v2271_v14, 0.0  ;;  %v2269_v37 = vsub.f32 1.0, %v1693_v4  ;;  %v148_v14 = vld [vmem:[%s17900_s2 + $0x3b8] sm:$0xff]  ;;  %v11334_v46 = vmax.f32 %v2267_v10, 0.0  ;;  %v147_v4 = vld [vmem:[%s17900_s2 + $0x3b0] sm:$0xff]  ;;  %v1133_v35 = vsub.f32 %v10469_v28, %v11291_v7 }
  0xe9   :  { %18260 = vst [vmem:[#allocation94_spill] sm:$0xff] %v11306_v56  ;;  %v11317_v26 = vpop.permute.xlu1 %478  ;;  %v11319_v61 = vpop.permute.xlu0 %473  ;;  %v11327_v36 = vmax.f32 %v2273_v38, 0.0  ;;  %v1703_v56 = vand.u32 2147483647, %v1127_v21  ;;  %v1125_v38 = vsub.f32 %v10469_v28, %v11261_v15  ;;  %v1137_v21 = vsub.f32 %v10469_v28, %v11289_v60 }
  0xea   :  { %18261 = vst [vmem:[#allocation95_spill] sm:$0xff] %v11317_v26  ;;  %18262 = vst [vmem:[#allocation96_spill] sm:$0xff] %v11319_v61  ;;  %798 = vperm.xlu1 %10177, %v146_v11   ;;  %v11343_v11 = vmax.f32 %v2269_v37, 0.0 }
  0xeb   :  { %18263 = vst [vmem:[#allocation97_spill] sm:$0xff] %v11321_v54  ;;  %18264 = vst [vmem:[#allocation98_spill] sm:$0xff] %v11327_v36  ;;  %793 = vperm.xlu0 %10176, %v145_v62   ;;  %v1705_v54 = vand.u32 2147483647, %v1129_v58  ;;  %v2279_v62 = vsub.f32 1.0, %v1703_v56  ;;  %v1135_v36 = vsub.f32 %v10459_v23, %v11289_v60  ;;  %v2275_v56 = vsub.f32 1.0, %v1699_v33 }
  0xec   :  { %18265 = vst [vmem:[#allocation99_spill] sm:$0xff] %v11334_v46  ;;  %18266 = vst [vmem:[#allocation100_spill] sm:$0xff] %v11343_v11  ;;  %v1701_v52 = vand.u32 2147483647, %v1125_v38  ;;  %v149_v33 = vld [vmem:[%s17900_s2 + $0x3c0] sm:$0xff] }
  0xed   :  { %v11347_v10 = vpop.permute.xlu1 %488  ;;  %v11349_v58 = vpop.permute.xlu0 %483  ;;  %v2281_v19 = vsub.f32 1.0, %v1705_v54  ;;  %v11355_v37 = vmax.f32 %v2279_v62, 0.0  ;;  %v150_v54 = vld [vmem:[%s17900_s2 + $0x3c8] sm:$0xff]  ;;  %v1711_v11 = vand.u32 2147483647, %v1135_v36  ;;  %v11371_v62 = vmax.f32 %v2275_v56, 0.0 }
  0xee   :  { %18267 = vst [vmem:[#allocation101_spill] sm:$0xff] %v11347_v10  ;;  %18268 = vst [vmem:[#allocation102_spill] sm:$0xff] %v11349_v58  ;;  %808 = vperm.xlu1 %10177, %v148_v14   ;;  %v2277_v15 = vsub.f32 1.0, %v1701_v52  ;;  %v1131_v14 = vsub.f32 %v10459_v23, %v11291_v7  ;;  %v1713_v46 = vand.u32 2147483647, %v1137_v21  ;;  %v1147_v29 = vsub.f32 %v10459_v23, %v11349_v58 }
  0xef   :  { %18269 = vst [vmem:[#allocation103_spill] sm:$0xff] %v11355_v37  ;;  %803 = vperm.xlu0 %10176, %v147_v4   ;;  %v11364_v38 = vmax.f32 %v2281_v19, 0.0  ;;  %18271 = vst [vmem:[#allocation105_spill] sm:$0xff] %v11371_v62  ;;  %v2287_v60 = vsub.f32 1.0, %v1711_v11  ;;  %v1709_v21 = vand.u32 2147483647, %v1133_v35  ;;  %v1143_v4 = vsub.f32 %v10459_v23, %v11317_v26 }
  0xf0   :  { %v11381_v36 = vmax.f32 %v2277_v15, 0.0  ;;  %v1707_v37 = vand.u32 2147483647, %v1131_v14  ;;  %v2289_v56 = vsub.f32 1.0, %v1713_v46  ;;  %v152_v15 = vld [vmem:[%s17900_s2 + $0x3d8] sm:$0xff]  ;;  %v1145_v14 = vsub.f32 %v10469_v28, %v11317_v26  ;;  %v151_v35 = vld [vmem:[%s17900_s2 + $0x3d0] sm:$0xff] }
  0xf1   :  { %18270 = vst [vmem:[#allocation104_spill] sm:$0xff] %v11364_v38  ;;  %v11377_v19 = vpop.permute.xlu1 %498  ;;  %v11379_v52 = vpop.permute.xlu0 %493  ;;  %v1719_v62 = vand.u32 2147483647, %v1143_v4  ;;  %v1139_v38 = vsub.f32 %v10459_v23, %v11319_v61  ;;  %v1141_v26 = vsub.f32 %v10469_v28, %v11319_v61  ;;  %v1151_v46 = vsub.f32 %v10459_v23, %v11347_v10 }
  0xf2   :  { %18272 = vst [vmem:[#allocation106_spill] sm:$0xff] %v11377_v19  ;;  %18273 = vst [vmem:[#allocation107_spill] sm:$0xff] %v11379_v52  ;;  %818 = vperm.xlu1 %10177, %v150_v54   ;;  %v2283_v11 = vsub.f32 1.0, %v1707_v37  ;;  %v11401_v54 = vmax.f32 %v2289_v56, 0.0  ;;  %v1721_v7 = vand.u32 2147483647, %v1145_v14 }
  0xf3   :  { %18274 = vst [vmem:[#allocation108_spill] sm:$0xff] %v11381_v36  ;;  %813 = vperm.xlu0 %10176, %v149_v33   ;;  %v11392_v36 = vmax.f32 %v2287_v60, 0.0  ;;  %v2285_v33 = vsub.f32 1.0, %v1709_v21  ;;  %v2295_v4 = vsub.f32 1.0, %v1719_v62  ;;  %v153_v62 = vld [vmem:[%s17900_s2 + $0x3e0] sm:$0xff] }
  0xf4   :  { %18276 = vst [vmem:[#allocation110_spill] sm:$0xff] %v11401_v54  ;;  %v1715_v54 = vand.u32 2147483647, %v1139_v38  ;;  %v2297_v14 = vsub.f32 1.0, %v1721_v7  ;;  %v1149_v7 = vsub.f32 %v10469_v28, %v11349_v58 }
  0xf5   :  { %18275 = vst [vmem:[#allocation109_spill] sm:$0xff] %v11392_v36  ;;  %v11405_v60 = vpop.permute.xlu1 %508  ;;  %v11407_v37 = vpop.permute.xlu0 %503  ;;  %v11409_v36 = vmax.f32 %v2283_v11, 0.0  ;;  %v11415_v56 = vmax.f32 %v2285_v33, 0.0  ;;  %v154_v11 = vld [vmem:[%s17900_s2 + $0x3e8] sm:$0xff]  ;;  %v11429_v33 = vmax.f32 %v2295_v4, 0.0 }
  0xf6   :  { %18277 = vst [vmem:[#allocation111_spill] sm:$0xff] %v11405_v60  ;;  %18278 = vst [vmem:[#allocation112_spill] sm:$0xff] %v11407_v37  ;;  %828 = vperm.xlu1 %10177, %v152_v15   ;;  %v2291_v38 = vsub.f32 1.0, %v1715_v54  ;;  %v11439_v61 = vmax.f32 %v2297_v14, 0.0  ;;  %v156_v14 = vld [vmem:[%s17900_s2 + $0x3f8] sm:$0xff]  ;;  %v1167_v27 = vsub.f32 %v10459_v23, %v11405_v60 }
  0xf7   :  { %18279 = vst [vmem:[#allocation113_spill] sm:$0xff] %v11409_v36  ;;  %18280 = vst [vmem:[#allocation114_spill] sm:$0xff] %v11415_v56  ;;  %823 = vperm.xlu0 %10176, %v151_v35   ;;  %v1717_v36 = vand.u32 2147483647, %v1141_v26  ;;  %v1153_v35 = vsub.f32 %v10469_v28, %v11347_v10  ;;  %v1727_v56 = vand.u32 2147483647, %v1151_v46 }
  0xf8   :  { %18281 = vst [vmem:[#allocation115_spill] sm:$0xff] %v11429_v33  ;;  %18284 = vst [vmem:[#allocation118_spill] sm:$0xff] %v11439_v61  ;;  %v11443_v4 = vmax.f32 %v2291_v38, 0.0  ;;  %v1723_v38 = vand.u32 2147483647, %v1147_v29  ;;  %v1161_v29 = vsub.f32 %v10469_v28, %v11377_v19  ;;  %v1155_v61 = vsub.f32 %v10459_v23, %v11379_v52 }
  0xf9   :  { %v11435_v26 = vpop.permute.xlu1 %518  ;;  %v11437_v21 = vpop.permute.xlu0 %513  ;;  %v2293_v15 = vsub.f32 1.0, %v1717_v36  ;;  %v1729_v54 = vand.u32 2147483647, %v1153_v35  ;;  %v2303_v46 = vsub.f32 1.0, %v1727_v56  ;;  %v155_v35 = vld [vmem:[%s17900_s2 + $0x3f0] sm:$0xff] }
  0xfa   :  { %18282 = vst [vmem:[#allocation116_spill] sm:$0xff] %v11435_v26  ;;  %18283 = vst [vmem:[#allocation117_spill] sm:$0xff] %v11437_v21  ;;  %838 = vperm.xlu1 %10177, %v154_v11   ;;  %v1725_v10 = vand.u32 2147483647, %v1149_v7  ;;  %v2299_v11 = vsub.f32 1.0, %v1723_v38 }
  0xfb   :  { %18285 = vst [vmem:[#allocation119_spill] sm:$0xff] %v11443_v4  ;;  %833 = vperm.xlu0 %10176, %v153_v62   ;;  %v11452_v36 = vmax.f32 %v2293_v15, 0.0  ;;  %v2305_v33 = vsub.f32 1.0, %v1729_v54  ;;  %v1159_v62 = vsub.f32 %v10459_v23, %v11377_v19  ;;  %v11467_v56 = vmax.f32 %v2303_v46, 0.0  ;;  %v158_v46 = vld [vmem:[%s17900_s2 + $0x408] sm:$0xff] }
  0xfc   :  { %v2301_v58 = vsub.f32 1.0, %v1725_v10  ;;  %v11480_v38 = vmax.f32 %v2299_v11, 0.0  ;;  %v157_v10 = vld [vmem:[%s17900_s2 + $0x400] sm:$0xff]  ;;  %v1731_v54 = vand.u32 2147483647, %v1155_v61  ;;  %v1165_v61 = vsub.f32 %v10469_v28, %v11407_v37 }
  0xfd   :  { %18286 = vst [vmem:[#allocation120_spill] sm:$0xff] %v11452_v36  ;;  %v11463_v4 = vpop.permute.xlu1 %528  ;;  %v11465_v15 = vpop.permute.xlu0 %523  ;;  %18289 = vst [vmem:[#allocation123_spill] sm:$0xff] %v11467_v56  ;;  %v11473_v7 = vmax.f32 %v2305_v33, 0.0  ;;  %v1735_v36 = vand.u32 2147483647, %v1159_v62  ;;  %v1157_v33 = vsub.f32 %v10469_v28, %v11379_v52  ;;  %v1169_v62 = vsub.f32 %v10469_v28, %v11405_v60 }
  0xfe   :  { %18287 = vst [vmem:[#allocation121_spill] sm:$0xff] %v11463_v4  ;;  %18288 = vst [vmem:[#allocation122_spill] sm:$0xff] %v11465_v15  ;;  %848 = vperm.xlu1 %10177, %v156_v14   ;;  %v1737_v56 = vand.u32 2147483647, %v1161_v29  ;;  %v11489_v14 = vmax.f32 %v2301_v58, 0.0 }
  0xff   :  { %18290 = vst [vmem:[#allocation124_spill] sm:$0xff] %v11473_v7  ;;  %843 = vperm.xlu0 %10176, %v155_v35   ;;  %18291 = vst [vmem:[#allocation125_spill] sm:$0xff] %v11480_v38  ;;  %v2311_v35 = vsub.f32 1.0, %v1735_v36  ;;  %v1733_v19 = vand.u32 2147483647, %v1157_v33  ;;  %v2307_v36 = vsub.f32 1.0, %v1731_v54 }
 0x100   :  { %18292 = vst [vmem:[#allocation126_spill] sm:$0xff] %v11489_v14  ;;  %v2313_v29 = vsub.f32 1.0, %v1737_v56  ;;  %v160_v56 = vld [vmem:[%s17900_s2 + $0x418] sm:$0xff]  ;;  %v1743_v52 = vand.u32 2147483647, %v1167_v27  ;;  %v159_v54 = vld [vmem:[%s17900_s2 + $0x410] sm:$0xff] }
 0x101   :  { %v11493_v11 = vpop.permute.xlu1 %538  ;;  %v11499_v38 = vpop.permute.xlu0 %533  ;;  %v11501_v58 = vmax.f32 %v2311_v35, 0.0  ;;  %v2309_v7 = vsub.f32 1.0, %v1733_v19  ;;  %v11517_v35 = vmax.f32 %v2307_v36, 0.0 }
 0x102   :  { %18293 = vst [vmem:[#allocation127_spill] sm:$0xff] %v11493_v11  ;;  %18294 = vst [vmem:[#allocation128_spill] sm:$0xff] %v11499_v38  ;;  %858 = vperm.xlu1 %10177, %v158_v46   ;;  %v11510_v33 = vmax.f32 %v2313_v29, 0.0  ;;  %v1163_v46 = vsub.f32 %v10459_v23, %v11407_v37  ;;  %v2319_v27 = vsub.f32 1.0, %v1743_v52  ;;  %v3236_v52 = vld [vmem:[%s17901_s3 + $0x8] sm:$0xff]  ;;  %v1171_v37 = vsub.f32 %v10459_v23, %v11437_v21 }
 0x103   :  { %18295 = vst [vmem:[#allocation129_spill] sm:$0xff] %v11501_v58  ;;  %853 = vperm.xlu0 %10176, %v157_v10   ;;  %18297 = vst [vmem:[#allocation131_spill] sm:$0xff] %v11517_v35  ;;  %v1745_v58 = vand.u32 2147483647, %v1169_v62  ;;  %v11525_v19 = vmax.f32 %v2309_v7, 0.0  ;;  %v1175_v10 = vsub.f32 %v10459_v23, %v11435_v26 }
 0x104   :  { %18296 = vst [vmem:[#allocation130_spill] sm:$0xff] %v11510_v33  ;;  %v1739_v33 = vand.u32 2147483647, %v1163_v46  ;;  %v1741_v62 = vand.u32 2147483647, %v1165_v61  ;;  %v11538_v7 = vmax.f32 %v2319_v27, 0.0  ;;  %v1177_v46 = vsub.f32 %v10469_v28, %v11435_v26 }
 0x105   :  { %v11523_v29 = vpop.permute.xlu1 %548  ;;  %18299 = vst [vmem:[#allocation133_spill] sm:$0xff] %v11525_v19  ;;  %v11529_v14 = vpop.permute.xlu0 %543  ;;  %v2321_v36 = vsub.f32 1.0, %v1745_v58  ;;  %v3235_v61 = vld [vmem:[%s17901_s3] sm:$0xff]  ;;  %v1751_v35 = vand.u32 2147483647, %v1175_v10  ;;  %v1173_v58 = vsub.f32 %v10469_v28, %v11437_v21 }
 0x106   :  { %18298 = vst [vmem:[#allocation132_spill] sm:$0xff] %v11523_v29  ;;  %18300 = vst [vmem:[#allocation134_spill] sm:$0xff] %v11529_v14  ;;  %868 = vperm.xlu1 %10177, %v160_v56   ;;  %v2315_v60 = vsub.f32 1.0, %v1739_v33 }
 0x107   :  { %863 = vperm.xlu0 %10176, %v159_v54   ;;  %18301 = vst [vmem:[#allocation135_spill] sm:$0xff] %v11538_v7  ;;  %v11547_v56 = vmax.f32 %v2321_v36, 0.0  ;;  %v2317_v54 = vsub.f32 1.0, %v1741_v62  ;;  %v1753_v7 = vand.u32 2147483647, %v1177_v46  ;;  %v2327_v10 = vsub.f32 1.0, %v1751_v35 }
 0x108   :  { %v11553_v33 = vmax.f32 %v2315_v60, 0.0  ;;  %v3238_v60 = vld [vmem:[%s17901_s3 + $0x18] sm:$0xff]  ;;  %v1749_v19 = vand.u32 2147483647, %v1173_v58  ;;  %v3237_v35 = vld [vmem:[%s17901_s3 + $0x10] sm:$0xff] }
 0x109   :  { %18302 = vst [vmem:[#allocation136_spill] sm:$0xff] %v11547_v56  ;;  %v11551_v27 = vpop.permute.xlu1 %558  ;;  %v11559_v26 = vpop.permute.xlu0 %553  ;;  %v11561_v36 = vmax.f32 %v2317_v54, 0.0  ;;  %v1747_v56 = vand.u32 2147483647, %v1171_v37  ;;  %v2329_v46 = vsub.f32 1.0, %v1753_v7  ;;  %v11575_v54 = vmax.f32 %v2327_v10, 0.0 }
 0x10a   :  { %18303 = vst [vmem:[#allocation137_spill] sm:$0xff] %v11551_v27  ;;  %18304 = vst [vmem:[#allocation138_spill] sm:$0xff] %v11553_v33  ;;  %3422 = vperm.xlu1 %10177, %v3236_v52   ;;  %v1183_v33 = vsub.f32 %v10459_v23, %v11463_v4  ;;  %v2325_v21 = vsub.f32 1.0, %v1749_v19  ;;  %v1179_v52 = vsub.f32 %v10459_v23, %v11465_v15  ;;  %v3240_v19 = vld [vmem:[%s17901_s3 + $0x28] sm:$0xff] }
 0x10b   :  { %18305 = vst [vmem:[#allocation139_spill] sm:$0xff] %v11559_v26  ;;  %18306 = vst [vmem:[#allocation140_spill] sm:$0xff] %v11561_v36  ;;  %3417 = vperm.xlu0 %10176, %v3235_v61   ;;  %v2323_v37 = vsub.f32 1.0, %v1747_v56  ;;  %v1185_v61 = vsub.f32 %v10469_v28, %v11463_v4  ;;  %v11583_v62 = vmax.f32 %v2329_v46, 0.0  ;;  %v1181_v7 = vsub.f32 %v10469_v28, %v11465_v15 }
 0x10c   :  { %18307 = vst [vmem:[#allocation141_spill] sm:$0xff] %v11575_v54  ;;  %v1759_v36 = vand.u32 2147483647, %v1183_v33  ;;  %v11598_v33 = vmax.f32 %v2325_v21, 0.0 }
 0x10d   :  { %v11581_v58 = vpop.permute.xlu1 %568  ;;  %18309 = vst [vmem:[#allocation143_spill] sm:$0xff] %v11583_v62  ;;  %v11587_v13 = vpop.permute.xlu0 %563  ;;  %v11589_v10 = vmax.f32 %v2323_v37, 0.0  ;;  %v1761_v56 = vand.u32 2147483647, %v1185_v61  ;;  %v1755_v37 = vand.u32 2147483647, %v1179_v52  ;;  %v1193_v52 = vsub.f32 %v10469_v28, %v11493_v11 }
 0x10e   :  { %18308 = vst [vmem:[#allocation142_spill] sm:$0xff] %v11581_v58  ;;  %18310 = vst [vmem:[#allocation144_spill] sm:$0xff] %v11587_v13  ;;  %3432 = vperm.xlu1 %10177, %v3238_v60   ;;  %v2335_v46 = vsub.f32 1.0, %v1759_v36  ;;  %v3239_v61 = vld [vmem:[%s17901_s3 + $0x20] sm:$0xff]  ;;  %v1757_v4 = vand.u32 2147483647, %v1181_v7  ;;  %v1187_v62 = vsub.f32 %v10459_v23, %v11499_v38  ;;  %v1199_v60 = vsub.f32 %v10459_v23, %v11523_v29 }
 0x10f   :  { %18311 = vst [vmem:[#allocation145_spill] sm:$0xff] %v11589_v10  ;;  %3427 = vperm.xlu0 %10176, %v3237_v35   ;;  %18312 = vst [vmem:[#allocation146_spill] sm:$0xff] %v11598_v33  ;;  %v2337_v54 = vsub.f32 1.0, %v1761_v56  ;;  %v1191_v35 = vsub.f32 %v10459_v23, %v11493_v11  ;;  %v2331_v36 = vsub.f32 1.0, %v1755_v37 }
 0x110   :  { %v11611_v21 = vmax.f32 %v2335_v46, 0.0  ;;  %v2333_v56 = vsub.f32 1.0, %v1757_v4  ;;  %v3242_v46 = vld [vmem:[%s17901_s3 + $0x38] sm:$0xff]  ;;  %v3241_v4 = vld [vmem:[%s17901_s3 + $0x30] sm:$0xff]  ;;  %v1763_v11 = vand.u32 2147483647, %v1187_v62  ;;  %v1197_v62 = vsub.f32 %v10469_v28, %v11529_v14 }
 0x111   :  { %v11609_v10 = vpop.permute.xlu1 %578  ;;  %v11617_v15 = vpop.permute.xlu0 %573  ;;  %v11619_v7 = vmax.f32 %v2337_v54, 0.0  ;;  %v1767_v33 = vand.u32 2147483647, %v1191_v35  ;;  %v11626_v37 = vmax.f32 %v2331_v36, 0.0  ;;  %v1189_v54 = vsub.f32 %v10469_v28, %v11499_v38 }
 0x112   :  { %18313 = vst [vmem:[#allocation147_spill] sm:$0xff] %v11609_v10  ;;  %18314 = vst [vmem:[#allocation148_spill] sm:$0xff] %v11611_v21  ;;  %3442 = vperm.xlu1 %10177, %v3240_v19   ;;  %v1769_v21 = vand.u32 2147483647, %v1193_v52  ;;  %v11635_v19 = vmax.f32 %v2333_v56, 0.0  ;;  %v1201_v35 = vsub.f32 %v10469_v28, %v11523_v29 }
 0x113   :  { %18315 = vst [vmem:[#allocation149_spill] sm:$0xff] %v11617_v15  ;;  %18316 = vst [vmem:[#allocation150_spill] sm:$0xff] %v11619_v7  ;;  %3437 = vperm.xlu0 %10176, %v3239_v61   ;;  %v2343_v61 = vsub.f32 1.0, %v1767_v33  ;;  %v1765_v7 = vand.u32 2147483647, %v1189_v54  ;;  %v2339_v33 = vsub.f32 1.0, %v1763_v11 }
 0x114   :  { %18317 = vst [vmem:[#allocation151_spill] sm:$0xff] %v11626_v37  ;;  %18318 = vst [vmem:[#allocation152_spill] sm:$0xff] %v11635_v19  ;;  %v2345_v52 = vsub.f32 1.0, %v1769_v21  ;;  %v3244_v21 = vld [vmem:[%s17901_s3 + $0x48] sm:$0xff]  ;;  %v1775_v38 = vand.u32 2147483647, %v1199_v60 }
 0x115   :  { %v11639_v36 = vpop.permute.xlu1 %588  ;;  %v11645_v53 = vpop.permute.xlu0 %583  ;;  %v11647_v56 = vmax.f32 %v2343_v61, 0.0  ;;  %v2341_v37 = vsub.f32 1.0, %v1765_v7  ;;  %v3243_v11 = vld [vmem:[%s17901_s3 + $0x40] sm:$0xff]  ;;  %v11663_v61 = vmax.f32 %v2339_v33, 0.0 }
 0x116   :  { %18319 = vst [vmem:[#allocation153_spill] sm:$0xff] %v11639_v36  ;;  %18320 = vst [vmem:[#allocation154_spill] sm:$0xff] %v11645_v53  ;;  %3452 = vperm.xlu1 %10177, %v3242_v46   ;;  %v11656_v54 = vmax.f32 %v2345_v52, 0.0  ;;  %v1195_v46 = vsub.f32 %v10459_v23, %v11529_v14  ;;  %v2351_v60 = vsub.f32 1.0, %v1775_v38  ;;  %v3246_v38 = vld [vmem:[%s17901_s3 + $0x58] sm:$0xff]  ;;  %v1203_v14 = vsub.f32 %v10459_v23, %v11559_v26 }
 0x117   :  { %18321 = vst [vmem:[#allocation155_spill] sm:$0xff] %v11647_v56  ;;  %3447 = vperm.xlu0 %10176, %v3241_v4   ;;  %18323 = vst [vmem:[#allocation157_spill] sm:$0xff] %v11663_v61  ;;  %v1777_v56 = vand.u32 2147483647, %v1201_v35  ;;  %v11671_v7 = vmax.f32 %v2341_v37, 0.0  ;;  %v1207_v4 = vsub.f32 %v10459_v23, %v11551_v27 }
 0x118   :  { %18322 = vst [vmem:[#allocation156_spill] sm:$0xff] %v11656_v54  ;;  %v1771_v54 = vand.u32 2147483647, %v1195_v46  ;;  %v1773_v35 = vand.u32 2147483647, %v1197_v62  ;;  %v11684_v37 = vmax.f32 %v2351_v60, 0.0  ;;  %v1209_v46 = vsub.f32 %v10469_v28, %v11551_v27 }
 0x119   :  { %v11669_v52 = vpop.permute.xlu1 %598  ;;  %18325 = vst [vmem:[#allocation159_spill] sm:$0xff] %v11671_v7  ;;  %v11675_v19 = vpop.permute.xlu0 %593  ;;  %v2353_v33 = vsub.f32 1.0, %v1777_v56  ;;  %v3245_v62 = vld [vmem:[%s17901_s3 + $0x50] sm:$0xff]  ;;  %v1783_v61 = vand.u32 2147483647, %v1207_v4  ;;  %v1205_v56 = vsub.f32 %v10469_v28, %v11559_v26 }
 0x11a   :  { %18324 = vst [vmem:[#allocation158_spill] sm:$0xff] %v11669_v52  ;;  %18326 = vst [vmem:[#allocation160_spill] sm:$0xff] %v11675_v19  ;;  %3462 = vperm.xlu1 %10177, %v3244_v21   ;;  %v2347_v29 = vsub.f32 1.0, %v1771_v54 }
 0x11b   :  { %3457 = vperm.xlu0 %10176, %v3243_v11   ;;  %18327 = vst [vmem:[#allocation161_spill] sm:$0xff] %v11684_v37  ;;  %v11693_v21 = vmax.f32 %v2353_v33, 0.0  ;;  %v2349_v11 = vsub.f32 1.0, %v1773_v35  ;;  %v1785_v37 = vand.u32 2147483647, %v1209_v46  ;;  %v2359_v4 = vsub.f32 1.0, %v1783_v61 }
 0x11c   :  { %v11699_v54 = vmax.f32 %v2347_v29, 0.0  ;;  %v3248_v29 = vld [vmem:[%s17901_s3 + $0x68] sm:$0xff]  ;;  %v1781_v7 = vand.u32 2147483647, %v1205_v56  ;;  %v3247_v61 = vld [vmem:[%s17901_s3 + $0x60] sm:$0xff] }
 0x11d   :  { %18328 = vst [vmem:[#allocation162_spill] sm:$0xff] %v11693_v21  ;;  %v11697_v60 = vpop.permute.xlu1 %608  ;;  %v11705_v27 = vpop.permute.xlu0 %603  ;;  %v11707_v33 = vmax.f32 %v2349_v11, 0.0  ;;  %v1779_v21 = vand.u32 2147483647, %v1203_v14  ;;  %v2361_v46 = vsub.f32 1.0, %v1785_v37  ;;  %v11721_v11 = vmax.f32 %v2359_v4, 0.0 }
 0x11e   :  { %18329 = vst [vmem:[#allocation163_spill] sm:$0xff] %v11697_v60  ;;  %18330 = vst [vmem:[#allocation164_spill] sm:$0xff] %v11699_v54  ;;  %3472 = vperm.xlu1 %10177, %v3246_v38   ;;  %v1215_v54 = vsub.f32 %v10459_v23, %v11581_v58  ;;  %v2357_v26 = vsub.f32 1.0, %v1781_v7  ;;  %v1211_v38 = vsub.f32 %v10459_v23, %v11587_v13  ;;  %v3250_v7 = vld [vmem:[%s17901_s3 + $0x78] sm:$0xff] }
 0x11f   :  { %18331 = vst [vmem:[#allocation165_spill] sm:$0xff] %v11705_v27  ;;  %18332 = vst [vmem:[#allocation166_spill] sm:$0xff] %v11707_v33  ;;  %3467 = vperm.xlu0 %10176, %v3245_v62   ;;  %v2355_v14 = vsub.f32 1.0, %v1779_v21  ;;  %v1217_v62 = vsub.f32 %v10469_v28, %v11581_v58  ;;  %v11729_v35 = vmax.f32 %v2361_v46, 0.0  ;;  %v1213_v37 = vsub.f32 %v10469_v28, %v11587_v13 }
 0x120   :  { %18333 = vst [vmem:[#allocation167_spill] sm:$0xff] %v11721_v11  ;;  %v1791_v33 = vand.u32 2147483647, %v1215_v54  ;;  %v11744_v54 = vmax.f32 %v2357_v26, 0.0 }
 0x121   :  { %v11727_v56 = vpop.permute.xlu1 %618  ;;  %18335 = vst [vmem:[#allocation169_spill] sm:$0xff] %v11729_v35  ;;  %v11733_v6 = vpop.permute.xlu0 %613  ;;  %v11735_v4 = vmax.f32 %v2355_v14, 0.0  ;;  %v1793_v21 = vand.u32 2147483647, %v1217_v62  ;;  %v1787_v14 = vand.u32 2147483647, %v1211_v38  ;;  %v1225_v38 = vsub.f32 %v10469_v28, %v11609_v10 }
 0x122   :  { %18334 = vst [vmem:[#allocation168_spill] sm:$0xff] %v11727_v56  ;;  %18336 = vst [vmem:[#allocation170_spill] sm:$0xff] %v11733_v6  ;;  %3482 = vperm.xlu1 %10177, %v3248_v29   ;;  %v2367_v46 = vsub.f32 1.0, %v1791_v33  ;;  %v3249_v62 = vld [vmem:[%s17901_s3 + $0x70] sm:$0xff]  ;;  %v1789_v58 = vand.u32 2147483647, %v1213_v37  ;;  %v1219_v35 = vsub.f32 %v10459_v23, %v11617_v15  ;;  %v1231_v29 = vsub.f32 %v10459_v23, %v11639_v36 }
 0x123   :  { %18337 = vst [vmem:[#allocation171_spill] sm:$0xff] %v11735_v4  ;;  %3477 = vperm.xlu0 %10176, %v3247_v61   ;;  %18338 = vst [vmem:[#allocation172_spill] sm:$0xff] %v11744_v54  ;;  %v2369_v11 = vsub.f32 1.0, %v1793_v21  ;;  %v1223_v61 = vsub.f32 %v10459_v23, %v11609_v10  ;;  %v2363_v33 = vsub.f32 1.0, %v1787_v14 }
 0x124   :  { %v11757_v26 = vmax.f32 %v2367_v46, 0.0  ;;  %v2365_v21 = vsub.f32 1.0, %v1789_v58  ;;  %v3252_v46 = vld [vmem:[%s17901_s3 + $0x88] sm:$0xff]  ;;  %v3251_v58 = vld [vmem:[%s17901_s3 + $0x80] sm:$0xff]  ;;  %v1795_v10 = vand.u32 2147483647, %v1219_v35  ;;  %v1229_v35 = vsub.f32 %v10469_v28, %v11645_v53 }
 0x125   :  { %v11755_v4 = vpop.permute.xlu1 %628  ;;  %v11763_v13 = vpop.permute.xlu0 %623  ;;  %v11765_v37 = vmax.f32 %v2369_v11, 0.0  ;;  %v1799_v54 = vand.u32 2147483647, %v1223_v61  ;;  %v11772_v14 = vmax.f32 %v2363_v33, 0.0  ;;  %v1221_v11 = vsub.f32 %v10469_v28, %v11617_v15 }
 0x126   :  { %18339 = vst [vmem:[#allocation173_spill] sm:$0xff] %v11755_v4  ;;  %18340 = vst [vmem:[#allocation174_spill] sm:$0xff] %v11757_v26  ;;  %3492 = vperm.xlu1 %10177, %v3250_v7   ;;  %v1801_v26 = vand.u32 2147483647, %v1225_v38  ;;  %v11781_v7 = vmax.f32 %v2365_v21, 0.0  ;;  %v1233_v61 = vsub.f32 %v10469_v28, %v11639_v36 }
 0x127   :  { %18341 = vst [vmem:[#allocation175_spill] sm:$0xff] %v11763_v13  ;;  %18342 = vst [vmem:[#allocation176_spill] sm:$0xff] %v11765_v37  ;;  %3487 = vperm.xlu0 %10176, %v3249_v62   ;;  %v2375_v62 = vsub.f32 1.0, %v1799_v54  ;;  %v1797_v37 = vand.u32 2147483647, %v1221_v11  ;;  %v2371_v54 = vsub.f32 1.0, %v1795_v10 }
 0x128   :  { %18343 = vst [vmem:[#allocation177_spill] sm:$0xff] %v11772_v14  ;;  %18344 = vst [vmem:[#allocation178_spill] sm:$0xff] %v11781_v7  ;;  %v2377_v38 = vsub.f32 1.0, %v1801_v26  ;;  %v3254_v26 = vld [vmem:[%s17901_s3 + $0x98] sm:$0xff]  ;;  %v1807_v15 = vand.u32 2147483647, %v1231_v29 }
 0x129   :  { %v11785_v33 = vpop.permute.xlu1 %638  ;;  %v11791_v42 = vpop.permute.xlu0 %633  ;;  %v11793_v21 = vmax.f32 %v2375_v62, 0.0  ;;  %v2373_v14 = vsub.f32 1.0, %v1797_v37  ;;  %v3253_v10 = vld [vmem:[%s17901_s3 + $0x90] sm:$0xff]  ;;  %v11809_v62 = vmax.f32 %v2371_v54, 0.0  ;;  %v1809_v7 = vand.u32 2147483647, %v1233_v61 }
 0x12a   :  { %18345 = vst [vmem:[#allocation179_spill] sm:$0xff] %v11785_v33  ;;  %18346 = vst [vmem:[#allocation180_spill] sm:$0xff] %v11791_v42  ;;  %3502 = vperm.xlu1 %10177, %v3252_v46   ;;  %v11802_v11 = vmax.f32 %v2377_v38, 0.0  ;;  %v1227_v46 = vsub.f32 %v10459_v23, %v11645_v53  ;;  %v2383_v29 = vsub.f32 1.0, %v1807_v15  ;;  %v1805_v61 = vand.u32 2147483647, %v1229_v35 }
 0x12b   :  { %18347 = vst [vmem:[#allocation181_spill] sm:$0xff] %v11793_v21  ;;  %3497 = vperm.xlu0 %10176, %v3251_v58   ;;  %18349 = vst [vmem:[#allocation183_spill] sm:$0xff] %v11809_v62  ;;  %v11817_v37 = vmax.f32 %v2373_v14, 0.0  ;;  %v2385_v54 = vsub.f32 1.0, %v1809_v7  ;;  %v1239_v58 = vsub.f32 %v10459_v23, %v11669_v52  ;;  %v3256_v15 = vld [vmem:[%s17901_s3 + $0xa8] sm:$0xff]  ;;  %v3255_v35 = vld [vmem:[%s17901_s3 + $0xa0] sm:$0xff]  ;;  %v1235_v53 = vsub.f32 %v10459_v23, %v11675_v19 }
 0x12c   :  { %18348 = vst [vmem:[#allocation182_spill] sm:$0xff] %v11802_v11  ;;  %v1803_v11 = vand.u32 2147483647, %v1227_v46  ;;  %v11830_v14 = vmax.f32 %v2383_v29, 0.0  ;;  %v1241_v46 = vsub.f32 %v10469_v28, %v11669_v52  ;;  %v1237_v7 = vsub.f32 %v10469_v28, %v11675_v19 }
 0x12d   :  { %v11815_v38 = vpop.permute.xlu1 %648  ;;  %18351 = vst [vmem:[#allocation185_spill] sm:$0xff] %v11817_v37  ;;  %v11821_v21 = vpop.permute.xlu0 %643  ;;  %v1815_v62 = vand.u32 2147483647, %v1239_v58 }
 0x12e   :  { %18350 = vst [vmem:[#allocation184_spill] sm:$0xff] %v11815_v38  ;;  %18352 = vst [vmem:[#allocation186_spill] sm:$0xff] %v11821_v21  ;;  %3512 = vperm.xlu1 %10177, %v3254_v26   ;;  %v2379_v36 = vsub.f32 1.0, %v1803_v11  ;;  %v11839_v26 = vmax.f32 %v2385_v54, 0.0  ;;  %v1817_v37 = vand.u32 2147483647, %v1241_v46 }
 0x12f   :  { %3507 = vperm.xlu0 %10176, %v3253_v10   ;;  %18353 = vst [vmem:[#allocation187_spill] sm:$0xff] %v11830_v14  ;;  %v2381_v10 = vsub.f32 1.0, %v1805_v61  ;;  %v2391_v58 = vsub.f32 1.0, %v1815_v62  ;;  %v1813_v14 = vand.u32 2147483647, %v1237_v7  ;;  %v3257_v62 = vld [vmem:[%s17901_s3 + $0xb0] sm:$0xff] }
 0x130   :  { %18354 = vst [vmem:[#allocation188_spill] sm:$0xff] %v11839_v26  ;;  %v11845_v11 = vmax.f32 %v2379_v36, 0.0  ;;  %v1811_v26 = vand.u32 2147483647, %v1235_v53  ;;  %v3258_v36 = vld [vmem:[%s17901_s3 + $0xb8] sm:$0xff]  ;;  %v2393_v46 = vsub.f32 1.0, %v1817_v37  ;;  %v1245_v37 = vsub.f32 %v10469_v28, %v11705_v27 }
 0x131   :  { %v11843_v29 = vpop.permute.xlu1 %658  ;;  %v11851_v52 = vpop.permute.xlu0 %653  ;;  %v11853_v54 = vmax.f32 %v2381_v10, 0.0  ;;  %v11867_v10 = vmax.f32 %v2391_v58, 0.0  ;;  %v2389_v19 = vsub.f32 1.0, %v1813_v14  ;;  %v3260_v14 = vld [vmem:[%s17901_s3 + $0xc8] sm:$0xff] }
 0x132   :  { %18355 = vst [vmem:[#allocation189_spill] sm:$0xff] %v11843_v29  ;;  %18356 = vst [vmem:[#allocation190_spill] sm:$0xff] %v11845_v11  ;;  %3522 = vperm.xlu1 %10177, %v3256_v15   ;;  %v1247_v11 = vsub.f32 %v10459_v23, %v11697_v60  ;;  %v2387_v53 = vsub.f32 1.0, %v1811_v26  ;;  %v11875_v61 = vmax.f32 %v2393_v46, 0.0  ;;  %v1243_v15 = vsub.f32 %v10459_v23, %v11705_v27 }
 0x133   :  { %18357 = vst [vmem:[#allocation191_spill] sm:$0xff] %v11851_v52  ;;  %18358 = vst [vmem:[#allocation192_spill] sm:$0xff] %v11853_v54  ;;  %3517 = vperm.xlu0 %10176, %v3255_v35   ;;  %v1249_v35 = vsub.f32 %v10469_v28, %v11697_v60  ;;  %v1821_v60 = vand.u32 2147483647, %v1245_v37 }
 0x134   :  { %18359 = vst [vmem:[#allocation193_spill] sm:$0xff] %v11867_v10  ;;  %18361 = vst [vmem:[#allocation195_spill] sm:$0xff] %v11875_v61  ;;  %v1823_v54 = vand.u32 2147483647, %v1247_v11  ;;  %v11881_v58 = vmax.f32 %v2387_v53, 0.0  ;;  %v11890_v11 = vmax.f32 %v2389_v19, 0.0 }
 0x135   :  { %v11873_v7 = vpop.permute.xlu1 %668  ;;  %v11879_v41 = vpop.permute.xlu0 %663  ;;  %v1825_v26 = vand.u32 2147483647, %v1249_v35  ;;  %v1819_v53 = vand.u32 2147483647, %v1243_v15  ;;  %v3259_v35 = vld [vmem:[%s17901_s3 + $0xc0] sm:$0xff]  ;;  %v1257_v15 = vsub.f32 %v10469_v28, %v11727_v56 }
 0x136   :  { %18360 = vst [vmem:[#allocation194_spill] sm:$0xff] %v11873_v7  ;;  %18362 = vst [vmem:[#allocation196_spill] sm:$0xff] %v11879_v41  ;;  %3532 = vperm.xlu1 %10177, %v3258_v36   ;;  %v2399_v46 = vsub.f32 1.0, %v1823_v54  ;;  %v1263_v36 = vsub.f32 %v10459_v23, %v11755_v4 }
 0x137   :  { %18363 = vst [vmem:[#allocation197_spill] sm:$0xff] %v11881_v58  ;;  %3527 = vperm.xlu0 %10176, %v3257_v62   ;;  %18364 = vst [vmem:[#allocation198_spill] sm:$0xff] %v11890_v11  ;;  %v2401_v10 = vsub.f32 1.0, %v1825_v26  ;;  %v1255_v62 = vsub.f32 %v10459_v23, %v11727_v56  ;;  %v2395_v54 = vsub.f32 1.0, %v1819_v53  ;;  %v2397_v26 = vsub.f32 1.0, %v1821_v60  ;;  %v3261_v60 = vld [vmem:[%s17901_s3 + $0xd0] sm:$0xff] }
 0x138   :  { %v11903_v19 = vmax.f32 %v2399_v46, 0.0  ;;  %v1251_v58 = vsub.f32 %v10459_v23, %v11733_v6  ;;  %v3262_v46 = vld [vmem:[%s17901_s3 + $0xd8] sm:$0xff] }
 0x139   :  { %v11901_v61 = vpop.permute.xlu1 %678  ;;  %v11909_v27 = vpop.permute.xlu0 %673  ;;  %v11911_v37 = vmax.f32 %v2401_v10, 0.0  ;;  %v1831_v11 = vand.u32 2147483647, %v1255_v62  ;;  %v11918_v53 = vmax.f32 %v2395_v54, 0.0  ;;  %v1253_v10 = vsub.f32 %v10469_v28, %v11733_v6 }
 0x13a   :  { %18365 = vst [vmem:[#allocation199_spill] sm:$0xff] %v11901_v61  ;;  %18366 = vst [vmem:[#allocation200_spill] sm:$0xff] %v11903_v19  ;;  %3542 = vperm.xlu1 %10177, %v3260_v14   ;;  %v1833_v19 = vand.u32 2147483647, %v1257_v15  ;;  %v11927_v14 = vmax.f32 %v2397_v26, 0.0 }
 0x13b   :  { %18367 = vst [vmem:[#allocation201_spill] sm:$0xff] %v11909_v27  ;;  %18368 = vst [vmem:[#allocation202_spill] sm:$0xff] %v11911_v37  ;;  %3537 = vperm.xlu0 %10176, %v3259_v35   ;;  %v2407_v35 = vsub.f32 1.0, %v1831_v11  ;;  %v1827_v56 = vand.u32 2147483647, %v1251_v58  ;;  %v1265_v11 = vsub.f32 %v10469_v28, %v11755_v4  ;;  %v1261_v4 = vsub.f32 %v10469_v28, %v11763_v13 }
 0x13c   :  { %18369 = vst [vmem:[#allocation203_spill] sm:$0xff] %v11918_v53  ;;  %18370 = vst [vmem:[#allocation204_spill] sm:$0xff] %v11927_v14  ;;  %v2409_v15 = vsub.f32 1.0, %v1833_v19  ;;  %v1829_v53 = vand.u32 2147483647, %v1253_v10  ;;  %v3264_v19 = vld [vmem:[%s17901_s3 + $0xe8] sm:$0xff] }
 0x13d   :  { %v11931_v54 = vpop.permute.xlu1 %688  ;;  %v11937_v34 = vmax.f32 %v2407_v35, 0.0  ;;  %v2403_v26 = vsub.f32 1.0, %v1827_v56  ;;  %v11943_v62 = vpop.permute.xlu0 %683  ;;  %v1259_v56 = vsub.f32 %v10459_v23, %v11763_v13  ;;  %v3263_v35 = vld [vmem:[%s17901_s3 + $0xe0] sm:$0xff]  ;;  %v1841_v58 = vand.u32 2147483647, %v1265_v11 }
 0x13e   :  { %18371 = vst [vmem:[#allocation205_spill] sm:$0xff] %v11931_v54  ;;  %3552 = vperm.xlu1 %10177, %v3262_v46   ;;  %18373 = vst [vmem:[#allocation207_spill] sm:$0xff] %v11943_v62  ;;  %v11948_v10 = vmax.f32 %v2409_v15, 0.0  ;;  %v2405_v37 = vsub.f32 1.0, %v1829_v53  ;;  %v1839_v46 = vand.u32 2147483647, %v1263_v36  ;;  %v1271_v11 = vsub.f32 %v10459_v23, %v11785_v33 }
 0x13f   :  { %18372 = vst [vmem:[#allocation206_spill] sm:$0xff] %v11937_v34  ;;  %3547 = vperm.xlu0 %10176, %v3261_v60   ;;  %v11955_v6 = vmax.f32 %v2403_v26, 0.0  ;;  %v2417_v14 = vsub.f32 1.0, %v1841_v58  ;;  %v1837_v26 = vand.u32 2147483647, %v1261_v4  ;;  %v3265_v58 = vld [vmem:[%s17901_s3 + $0xf0] sm:$0xff]  ;;  %v1267_v13 = vsub.f32 %v10459_v23, %v11791_v42 }
 0x140   :  { %18374 = vst [vmem:[#allocation208_spill] sm:$0xff] %v11948_v10  ;;  %v11961_v15 = vmax.f32 %v2405_v37, 0.0  ;;  %v2415_v53 = vsub.f32 1.0, %v1839_v46  ;;  %v1835_v10 = vand.u32 2147483647, %v1259_v56  ;;  %v3266_v37 = vld [vmem:[%s17901_s3 + $0xf8] sm:$0xff]  ;;  %v1273_v56 = vsub.f32 %v10469_v28, %v11785_v33 }
 0x141   :  { %18375 = vst [vmem:[#allocation209_spill] sm:$0xff] %v11955_v6  ;;  %v11965_v34 = vpop.permute.xlu1 %698  ;;  %v1847_v60 = vand.u32 2147483647, %v1271_v11  ;;  %v1269_v4 = vsub.f32 %v10469_v28, %v11791_v42  ;;  %v1843_v11 = vand.u32 2147483647, %v1267_v13 }
 0x142   :  { %18376 = vst [vmem:[#allocation210_spill] sm:$0xff] %v11961_v15  ;;  %18377 = vst [vmem:[#allocation211_spill] sm:$0xff] %v11965_v34  ;;  %3562 = vperm.xlu1 %10177, %v3264_v19   ;;  %v11974_v46 = vmax.f32 %v2415_v53, 0.0  ;;  %v2411_v36 = vsub.f32 1.0, %v1835_v10  ;;  %v11983_v19 = vmax.f32 %v2417_v14, 0.0  ;;  %v11987_v53 = vpop.permute.xlu0 %693  ;;  %v1279_v15 = vsub.f32 %v10459_v23, %v11815_v38 }
 0x143   :  { %3557 = vperm.xlu0 %10176, %v3263_v35   ;;  %v2413_v35 = vsub.f32 1.0, %v1837_v26  ;;  %18380 = vst [vmem:[#allocation214_spill] sm:$0xff] %v11987_v53  ;;  %v2423_v14 = vsub.f32 1.0, %v1847_v60  ;;  %v3267_v60 = vld [vmem:[%s17901_s3 + $0x100] sm:$0xff]  ;;  %v1281_v26 = vsub.f32 %v10469_v28, %v11815_v38 }
 0x144   :  { %18378 = vst [vmem:[#allocation212_spill] sm:$0xff] %v11974_v46  ;;  %18379 = vst [vmem:[#allocation213_spill] sm:$0xff] %v11983_v19  ;;  %v11989_v10 = vmax.f32 %v2411_v36, 0.0  ;;  %v1849_v46 = vand.u32 2147483647, %v1273_v56  ;;  %v3268_v36 = vld [vmem:[%s17901_s3 + $0x108] sm:$0xff] }
 0x145   :  { %v11995_v33 = vmax.f32 %v2413_v35, 0.0  ;;  %v12006_v35 = vpop.permute.xlu1 %708  ;;  %v12011_v13 = vmax.f32 %v2423_v14, 0.0  ;;  %v1857_v6 = vand.u32 2147483647, %v1281_v26 }
 0x146   :  { %18381 = vst [vmem:[#allocation215_spill] sm:$0xff] %v11989_v10  ;;  %3572 = vperm.xlu1 %10177, %v3266_v37   ;;  %v2425_v56 = vsub.f32 1.0, %v1849_v46  ;;  %v1845_v10 = vand.u32 2147483647, %v1269_v4  ;;  %18383 = vst [vmem:[#allocation217_spill] sm:$0xff] %v12006_v35  ;;  %v1275_v37 = vsub.f32 %v10459_v23, %v11821_v21 }
 0x147   :  { %18382 = vst [vmem:[#allocation216_spill] sm:$0xff] %v11995_v33  ;;  %3567 = vperm.xlu0 %10176, %v3265_v58   ;;  %18384 = vst [vmem:[#allocation218_spill] sm:$0xff] %v12011_v13  ;;  %v2419_v58 = vsub.f32 1.0, %v1843_v11  ;;  %v1855_v33 = vand.u32 2147483647, %v1279_v15  ;;  %v1277_v11 = vsub.f32 %v10469_v28, %v11821_v21  ;;  %v12027_v13 = vpop.permute.xlu0 %703  ;;  %v3270_v15 = vld [vmem:[%s17901_s3 + $0x118] sm:$0xff] }
 0x148   :  { %v12017_v4 = vmax.f32 %v2425_v56, 0.0  ;;  %v2421_v42 = vsub.f32 1.0, %v1845_v10  ;;  %18387 = vst [vmem:[#allocation221_spill] sm:$0xff] %v12027_v13  ;;  %v1851_v26 = vand.u32 2147483647, %v1275_v37  ;;  %v2433_v46 = vsub.f32 1.0, %v1857_v6 }
 0x149   :  { %v12021_v19 = vmax.f32 %v2419_v58, 0.0  ;;  %v2431_v56 = vsub.f32 1.0, %v1855_v33  ;;  %v3269_v58 = vld [vmem:[%s17901_s3 + $0x110] sm:$0xff]  ;;  %v1853_v14 = vand.u32 2147483647, %v1277_v11  ;;  %v1289_v33 = vsub.f32 %v10469_v28, %v11843_v29 }
 0x14a   :  { %18385 = vst [vmem:[#allocation219_spill] sm:$0xff] %v12017_v4  ;;  %3582 = vperm.xlu1 %10177, %v3268_v36   ;;  %v12032_v10 = vmax.f32 %v2421_v42, 0.0  ;;  %v2427_v42 = vsub.f32 1.0, %v1851_v26  ;;  %v12049_v36 = vpop.permute.xlu1 %718  ;;  %v12051_v6 = vmax.f32 %v2433_v46, 0.0  ;;  %v1285_v46 = vsub.f32 %v10469_v28, %v11851_v52 }
 0x14b   :  { %18386 = vst [vmem:[#allocation220_spill] sm:$0xff] %v12021_v19  ;;  %3577 = vperm.xlu0 %10176, %v3267_v60   ;;  %v1287_v60 = vsub.f32 %v10459_v23, %v11843_v29  ;;  %v12043_v19 = vmax.f32 %v2431_v56, 0.0  ;;  %18390 = vst [vmem:[#allocation224_spill] sm:$0xff] %v12049_v36  ;;  %v2429_v11 = vsub.f32 1.0, %v1853_v14  ;;  %v3272_v56 = vld [vmem:[%s17901_s3 + $0x128] sm:$0xff]  ;;  %v3271_v14 = vld [vmem:[%s17901_s3 + $0x120] sm:$0xff]  ;;  %v1295_v37 = vsub.f32 %v10459_v23, %v11873_v7 }
 0x14c   :  { %18388 = vst [vmem:[#allocation222_spill] sm:$0xff] %v12032_v10  ;;  %18391 = vst [vmem:[#allocation225_spill] sm:$0xff] %v12051_v6  ;;  %v1283_v10 = vsub.f32 %v10459_v23, %v11851_v52  ;;  %v12058_v26 = vmax.f32 %v2427_v42, 0.0  ;;  %v1865_v38 = vand.u32 2147483647, %v1289_v33  ;;  %v12071_v42 = vpop.permute.xlu0 %713 }
 0x14d   :  { %18389 = vst [vmem:[#allocation223_spill] sm:$0xff] %v12043_v19  ;;  %v1863_v21 = vand.u32 2147483647, %v1287_v60  ;;  %18394 = vst [vmem:[#allocation228_spill] sm:$0xff] %v12071_v42  ;;  %v1871_v52 = vand.u32 2147483647, %v1295_v37 }
 0x14e   :  { %3592 = vperm.xlu1 %10177, %v3270_v15   ;;  %18392 = vst [vmem:[#allocation226_spill] sm:$0xff] %v12058_v26  ;;  %v12067_v15 = vmax.f32 %v2429_v11, 0.0  ;;  %v1859_v29 = vand.u32 2147483647, %v1283_v10  ;;  %v2441_v33 = vsub.f32 1.0, %v1865_v38  ;;  %v3274_v38 = vld [vmem:[%s17901_s3 + $0x138] sm:$0xff] }
 0x14f   :  { %3587 = vperm.xlu0 %10176, %v3269_v58   ;;  %v2439_v58 = vsub.f32 1.0, %v1863_v21  ;;  %v1861_v26 = vand.u32 2147483647, %v1285_v46  ;;  %v1297_v21 = vsub.f32 %v10469_v28, %v11873_v7  ;;  %v2447_v37 = vsub.f32 1.0, %v1871_v52  ;;  %v3276_v52 = vld [vmem:[%s17901_s3 + $0x148] sm:$0xff] }
 0x150   :  { %18393 = vst [vmem:[#allocation227_spill] sm:$0xff] %v12067_v15  ;;  %v2435_v11 = vsub.f32 1.0, %v1859_v29  ;;  %v12086_v46 = vmax.f32 %v2441_v33, 0.0  ;;  %v3273_v29 = vld [vmem:[%s17901_s3 + $0x130] sm:$0xff]  ;;  %v1293_v33 = vsub.f32 %v10469_v28, %v11879_v41  ;;  %v12109_v10 = vpop.permute.xlu0 %723 }
 0x151   :  { %v12077_v19 = vmax.f32 %v2439_v58, 0.0  ;;  %v2437_v60 = vsub.f32 1.0, %v1861_v26  ;;  %v12090_v58 = vpop.permute.xlu1 %728  ;;  %18400 = vst [vmem:[#allocation234_spill] sm:$0xff] %v12109_v10 }
 0x152   :  { %3602 = vperm.xlu1 %10177, %v3272_v56   ;;  %18396 = vst [vmem:[#allocation230_spill] sm:$0xff] %v12086_v46  ;;  %v1291_v56 = vsub.f32 %v10459_v23, %v11879_v41  ;;  %18397 = vst [vmem:[#allocation231_spill] sm:$0xff] %v12090_v58  ;;  %v12095_v6 = vmax.f32 %v2435_v11, 0.0  ;;  %v1869_v15 = vand.u32 2147483647, %v1293_v33  ;;  %v1303_v11 = vsub.f32 %v10459_v23, %v11901_v61 }
 0x153   :  { %18395 = vst [vmem:[#allocation229_spill] sm:$0xff] %v12077_v19  ;;  %3597 = vperm.xlu0 %10176, %v3271_v14   ;;  %v1873_v14 = vand.u32 2147483647, %v1297_v21  ;;  %v12101_v26 = vmax.f32 %v2437_v60, 0.0  ;;  %v12114_v60 = vmax.f32 %v2447_v37, 0.0  ;;  %v1299_v41 = vsub.f32 %v10459_v23, %v11909_v27 }
 0x154   :  { %18398 = vst [vmem:[#allocation232_spill] sm:$0xff] %v12095_v6  ;;  %v1867_v46 = vand.u32 2147483647, %v1291_v56  ;;  %v1879_v21 = vand.u32 2147483647, %v1303_v11  ;;  %v1301_v56 = vsub.f32 %v10469_v28, %v11909_v27 }
 0x155   :  { %18399 = vst [vmem:[#allocation233_spill] sm:$0xff] %v12101_v26  ;;  %v2449_v19 = vsub.f32 1.0, %v1873_v14  ;;  %18401 = vst [vmem:[#allocation235_spill] sm:$0xff] %v12114_v60  ;;  %v3275_v14 = vld [vmem:[%s17901_s3 + $0x140] sm:$0xff]  ;;  %v1875_v11 = vand.u32 2147483647, %v1299_v41 }
 0x156   :  { %3612 = vperm.xlu1 %10177, %v3274_v38   ;;  %v2443_v7 = vsub.f32 1.0, %v1867_v46  ;;  %v1305_v38 = vsub.f32 %v10469_v28, %v11901_v61  ;;  %v12133_v61 = vpop.permute.xlu1 %738  ;;  %v1877_v60 = vand.u32 2147483647, %v1301_v56  ;;  %v12155_v56 = vpop.permute.xlu0 %733 }
 0x157   :  { %3607 = vperm.xlu0 %10176, %v3273_v29   ;;  %v12123_v33 = vmax.f32 %v2449_v19, 0.0  ;;  %v2445_v29 = vsub.f32 1.0, %v1869_v15  ;;  %18404 = vst [vmem:[#allocation238_spill] sm:$0xff] %v12133_v61  ;;  %v2455_v19 = vsub.f32 1.0, %v1879_v21  ;;  %v3277_v21 = vld [vmem:[%s17901_s3 + $0x150] sm:$0xff]  ;;  %v2451_v41 = vsub.f32 1.0, %v1875_v11 }
 0x158   :  { %v12127_v37 = vmax.f32 %v2443_v7, 0.0  ;;  %v1881_v46 = vand.u32 2147483647, %v1305_v38  ;;  %v3278_v7 = vld [vmem:[%s17901_s3 + $0x158] sm:$0xff]  ;;  %18407 = vst [vmem:[#allocation241_spill] sm:$0xff] %v12155_v56  ;;  %v2453_v27 = vsub.f32 1.0, %v1877_v60 }
 0x159   :  { %18402 = vst [vmem:[#allocation236_spill] sm:$0xff] %v12123_v33  ;;  %v12135_v26 = vmax.f32 %v2445_v29, 0.0  ;;  %v12149_v29 = vmax.f32 %v2455_v19, 0.0  ;;  %v12161_v33 = vmax.f32 %v2451_v41, 0.0 }
 0x15a   :  { %18403 = vst [vmem:[#allocation237_spill] sm:$0xff] %v12127_v37  ;;  %3622 = vperm.xlu1 %10177, %v3276_v52   ;;  %v2457_v38 = vsub.f32 1.0, %v1881_v46  ;;  %v1311_v37 = vsub.f32 %v10459_v23, %v11931_v54  ;;  %v1307_v52 = vsub.f32 %v10459_v23, %v11943_v62  ;;  %v12170_v60 = vmax.f32 %v2453_v27, 0.0  ;;  %v12174_v46 = vpop.permute.xlu1 %748 }
 0x15b   :  { %18405 = vst [vmem:[#allocation239_spill] sm:$0xff] %v12135_v26  ;;  %3617 = vperm.xlu0 %10176, %v3275_v14   ;;  %18406 = vst [vmem:[#allocation240_spill] sm:$0xff] %v12149_v29  ;;  %v1313_v14 = vsub.f32 %v10469_v28, %v11931_v54  ;;  %v1309_v29 = vsub.f32 %v10469_v28, %v11943_v62 }
 0x15c   :  { %v12157_v15 = vmax.f32 %v2457_v38, 0.0  ;;  %v1887_v26 = vand.u32 2147483647, %v1311_v37  ;;  %18409 = vst [vmem:[#allocation243_spill] sm:$0xff] %v12161_v33  ;;  %v3280_v38 = vld [vmem:[%s17901_s3 + $0x168] sm:$0xff]  ;;  %18410 = vst [vmem:[#allocation244_spill] sm:$0xff] %v12170_v60  ;;  %v1315_v33 = vsub.f32 %v10459_v23, %v11987_v53 }
 0x15d   :  { %v1889_v19 = vand.u32 2147483647, %v1313_v14  ;;  %v1883_v41 = vand.u32 2147483647, %v1307_v52  ;;  %18411 = vst [vmem:[#allocation245_spill] sm:$0xff] %v12174_v46  ;;  %v3279_v14 = vld [vmem:[%s17901_s3 + $0x160] sm:$0xff]  ;;  %v1321_v52 = vsub.f32 %v10469_v28, %v11965_v34 }
 0x15e   :  { %18408 = vst [vmem:[#allocation242_spill] sm:$0xff] %v12157_v15  ;;  %3632 = vperm.xlu1 %10177, %v3278_v7   ;;  %v2463_v37 = vsub.f32 1.0, %v1887_v26  ;;  %v1885_v54 = vand.u32 2147483647, %v1309_v29  ;;  %v12193_v15 = vpop.permute.xlu0 %743 }
 0x15f   :  { %3627 = vperm.xlu0 %10176, %v3277_v21   ;;  %v2465_v11 = vsub.f32 1.0, %v1889_v19  ;;  %v1319_v21 = vsub.f32 %v10459_v23, %v11965_v34  ;;  %v2459_v26 = vsub.f32 1.0, %v1883_v41  ;;  %18414 = vst [vmem:[#allocation248_spill] sm:$0xff] %v12193_v15  ;;  %v1897_v27 = vand.u32 2147483647, %v1321_v52 }
 0x160   :  { %v12183_v60 = vmax.f32 %v2463_v37, 0.0  ;;  %v2461_v19 = vsub.f32 1.0, %v1885_v54  ;;  %v3282_v37 = vld [vmem:[%s17901_s3 + $0x178] sm:$0xff]  ;;  %v1317_v54 = vsub.f32 %v10469_v28, %v11987_v53  ;;  %v1891_v34 = vand.u32 2147483647, %v1315_v33 }
 0x161   :  { %v12189_v62 = vmax.f32 %v2465_v11, 0.0  ;;  %v1895_v29 = vand.u32 2147483647, %v1319_v21  ;;  %v12198_v41 = vmax.f32 %v2459_v26, 0.0  ;;  %v3281_v11 = vld [vmem:[%s17901_s3 + $0x170] sm:$0xff]  ;;  %v2473_v26 = vsub.f32 1.0, %v1897_v27 }
 0x162   :  { %18412 = vst [vmem:[#allocation246_spill] sm:$0xff] %v12183_v60  ;;  %3642 = vperm.xlu1 %10177, %v3280_v38   ;;  %v12207_v21 = vmax.f32 %v2461_v19, 0.0  ;;  %v1327_v52 = vsub.f32 %v10459_v23, %v12006_v35  ;;  %v2467_v19 = vsub.f32 1.0, %v1891_v34  ;;  %v3284_v27 = vld [vmem:[%s17901_s3 + $0x188] sm:$0xff]  ;;  %v3283_v34 = vld [vmem:[%s17901_s3 + $0x180] sm:$0xff]  ;;  %v1325_v33 = vsub.f32 %v10469_v28, %v12027_v13 }
 0x163   :  { %18413 = vst [vmem:[#allocation247_spill] sm:$0xff] %v12189_v62  ;;  %3637 = vperm.xlu0 %10176, %v3279_v14   ;;  %18415 = vst [vmem:[#allocation249_spill] sm:$0xff] %v12198_v41  ;;  %v2471_v14 = vsub.f32 1.0, %v1895_v29  ;;  %v1893_v41 = vand.u32 2147483647, %v1317_v54  ;;  %v12215_v62 = vpop.permute.xlu1 %758  ;;  %v1329_v29 = vsub.f32 %v10469_v28, %v12006_v35  ;;  %v12226_v54 = vmax.f32 %v2473_v26, 0.0  ;;  %v12239_v26 = vpop.permute.xlu0 %753 }
 0x164   :  { %18416 = vst [vmem:[#allocation250_spill] sm:$0xff] %v12207_v21  ;;  %18417 = vst [vmem:[#allocation251_spill] sm:$0xff] %v12215_v62  ;;  %v1903_v7 = vand.u32 2147483647, %v1327_v52 }
 0x165   :  { %v12217_v60 = vmax.f32 %v2471_v14, 0.0  ;;  %18419 = vst [vmem:[#allocation253_spill] sm:$0xff] %v12226_v54  ;;  %v2469_v38 = vsub.f32 1.0, %v1893_v41  ;;  %v12233_v14 = vmax.f32 %v2467_v19, 0.0  ;;  %v1905_v53 = vand.u32 2147483647, %v1329_v29 }
 0x166   :  { %3652 = vperm.xlu1 %10177, %v3282_v37   ;;  %v1323_v37 = vsub.f32 %v10459_v23, %v12027_v13  ;;  %18421 = vst [vmem:[#allocation255_spill] sm:$0xff] %v12239_v26  ;;  %v2479_v52 = vsub.f32 1.0, %v1903_v7  ;;  %v1901_v19 = vand.u32 2147483647, %v1325_v33  ;;  %v1335_v29 = vsub.f32 %v10459_v23, %v12049_v36 }
 0x167   :  { %18418 = vst [vmem:[#allocation252_spill] sm:$0xff] %v12217_v60  ;;  %3647 = vperm.xlu0 %10176, %v3281_v11   ;;  %18420 = vst [vmem:[#allocation254_spill] sm:$0xff] %v12233_v14  ;;  %v12241_v41 = vmax.f32 %v2469_v38, 0.0  ;;  %v2481_v60 = vsub.f32 1.0, %v1905_v53  ;;  %v3286_v38 = vld [vmem:[%s17901_s3 + $0x198] sm:$0xff]  ;;  %v12258_v33 = vpop.permute.xlu1 %768  ;;  %v1333_v53 = vsub.f32 %v10469_v28, %v12071_v42 }
 0x168   :  { %v1899_v54 = vand.u32 2147483647, %v1323_v37  ;;  %v1337_v37 = vsub.f32 %v10469_v28, %v12049_v36  ;;  %18424 = vst [vmem:[#allocation258_spill] sm:$0xff] %v12258_v33  ;;  %v2477_v11 = vsub.f32 1.0, %v1901_v19  ;;  %v1911_v35 = vand.u32 2147483647, %v1335_v29  ;;  %v12277_v29 = vpop.permute.xlu0 %763 }
 0x169   :  { %18422 = vst [vmem:[#allocation256_spill] sm:$0xff] %v12241_v41  ;;  %v12252_v41 = vmax.f32 %v2479_v52, 0.0  ;;  %v1331_v52 = vsub.f32 %v10459_v23, %v12071_v42  ;;  %18428 = vst [vmem:[#allocation262_spill] sm:$0xff] %v12277_v29 }
 0x16a   :  { %3662 = vperm.xlu1 %10177, %v3284_v27   ;;  %v2475_v7 = vsub.f32 1.0, %v1899_v54  ;;  %v3285_v27 = vld [vmem:[%s17901_s3 + $0x190] sm:$0xff]  ;;  %v1913_v13 = vand.u32 2147483647, %v1337_v37  ;;  %v12273_v36 = vmax.f32 %v2477_v11, 0.0  ;;  %v2487_v14 = vsub.f32 1.0, %v1911_v35 }
 0x16b   :  { %3657 = vperm.xlu0 %10176, %v3283_v34   ;;  %18423 = vst [vmem:[#allocation257_spill] sm:$0xff] %v12252_v41  ;;  %v12263_v34 = vmax.f32 %v2481_v60, 0.0  ;;  %v1907_v19 = vand.u32 2147483647, %v1331_v52  ;;  %v1909_v41 = vand.u32 2147483647, %v1333_v53  ;;  %v1339_v11 = vsub.f32 %v10459_v23, %v12109_v10 }
 0x16c   :  { %v12267_v54 = vmax.f32 %v2475_v7, 0.0  ;;  %18427 = vst [vmem:[#allocation261_spill] sm:$0xff] %v12273_v36  ;;  %v3288_v7 = vld [vmem:[%s17901_s3 + $0x1a8] sm:$0xff]  ;;  %v2489_v37 = vsub.f32 1.0, %v1913_v13  ;;  %v3287_v35 = vld [vmem:[%s17901_s3 + $0x1a0] sm:$0xff]  ;;  %v12299_v36 = vpop.permute.xlu1 %778 }
 0x16d   :  { %18425 = vst [vmem:[#allocation259_spill] sm:$0xff] %v12263_v34  ;;  %v2483_v52 = vsub.f32 1.0, %v1907_v19  ;;  %v2485_v60 = vsub.f32 1.0, %v1909_v41  ;;  %18431 = vst [vmem:[#allocation265_spill] sm:$0xff] %v12299_v36  ;;  %v3290_v41 = vld [vmem:[%s17901_s3 + $0x1b8] sm:$0xff] }
 0x16e   :  { %18426 = vst [vmem:[#allocation260_spill] sm:$0xff] %v12267_v54  ;;  %3672 = vperm.xlu1 %10177, %v3286_v38   ;;  %v1343_v54 = vsub.f32 %v10459_v23, %v12090_v58  ;;  %v12289_v38 = vmax.f32 %v2487_v14, 0.0  ;;  %v12295_v53 = vmax.f32 %v2489_v37, 0.0 }
 0x16f   :  { %3667 = vperm.xlu0 %10176, %v3285_v27   ;;  %v1345_v27 = vsub.f32 %v10469_v28, %v12090_v58  ;;  %v12301_v34 = vmax.f32 %v2483_v52, 0.0  ;;  %v1915_v52 = vand.u32 2147483647, %v1339_v11  ;;  %v1353_v11 = vsub.f32 %v10469_v28, %v12133_v61 }
 0x170   :  { %18429 = vst [vmem:[#allocation263_spill] sm:$0xff] %v12289_v38  ;;  %18430 = vst [vmem:[#allocation264_spill] sm:$0xff] %v12295_v53  ;;  %v1919_v42 = vand.u32 2147483647, %v1343_v54  ;;  %v1341_v38 = vsub.f32 %v10469_v28, %v12109_v10  ;;  %v12310_v54 = vmax.f32 %v2485_v60, 0.0 }
 0x171   :  { %18432 = vst [vmem:[#allocation266_spill] sm:$0xff] %v12301_v34  ;;  %v1921_v14 = vand.u32 2147483647, %v1345_v27  ;;  %v3289_v27 = vld [vmem:[%s17901_s3 + $0x1b0] sm:$0xff]  ;;  %v12321_v34 = vpop.permute.xlu0 %773  ;;  %v1929_v58 = vand.u32 2147483647, %v1353_v11 }
 0x172   :  { %3682 = vperm.xlu1 %10177, %v3288_v7   ;;  %18433 = vst [vmem:[#allocation267_spill] sm:$0xff] %v12310_v54  ;;  %v2495_v37 = vsub.f32 1.0, %v1919_v42  ;;  %v1917_v19 = vand.u32 2147483647, %v1341_v38  ;;  %18434 = vst [vmem:[#allocation268_spill] sm:$0xff] %v12321_v34  ;;  %v2491_v42 = vsub.f32 1.0, %v1915_v52  ;;  %v1347_v54 = vsub.f32 %v10459_v23, %v12155_v56 }
 0x173   :  { %3677 = vperm.xlu0 %10176, %v3287_v35   ;;  %v2497_v13 = vsub.f32 1.0, %v1921_v14  ;;  %v1351_v35 = vsub.f32 %v10459_v23, %v12133_v61  ;;  %v2505_v11 = vsub.f32 1.0, %v1929_v58  ;;  %v3294_v58 = vld [vmem:[%s17901_s3 + $0x1d8] sm:$0xff] }
 0x174   :  { %v12323_v60 = vmax.f32 %v2495_v37, 0.0  ;;  %v2493_v38 = vsub.f32 1.0, %v1917_v19  ;;  %v3292_v37 = vld [vmem:[%s17901_s3 + $0x1c8] sm:$0xff]  ;;  %v12336_v52 = vmax.f32 %v2491_v42, 0.0  ;;  %v3291_v19 = vld [vmem:[%s17901_s3 + $0x1c0] sm:$0xff] }
 0x175   :  { %v12329_v14 = vmax.f32 %v2497_v13, 0.0  ;;  %v1927_v10 = vand.u32 2147483647, %v1351_v35  ;;  %v1349_v13 = vsub.f32 %v10469_v28, %v12155_v56  ;;  %v1923_v7 = vand.u32 2147483647, %v1347_v54  ;;  %v12361_v42 = vpop.permute.xlu0 %783 }
 0x176   :  { %18435 = vst [vmem:[#allocation269_spill] sm:$0xff] %v12323_v60  ;;  %3692 = vperm.xlu1 %10177, %v3290_v41   ;;  %18437 = vst [vmem:[#allocation271_spill] sm:$0xff] %v12336_v52  ;;  %v12342_v41 = vpop.permute.xlu1 %788  ;;  %v1359_v60 = vsub.f32 %v10459_v23, %v12174_v46  ;;  %v12366_v54 = vmax.f32 %v2505_v11, 0.0 }
 0x177   :  { %18436 = vst [vmem:[#allocation270_spill] sm:$0xff] %v12329_v14  ;;  %3687 = vperm.xlu0 %10176, %v3289_v27   ;;  %18438 = vst [vmem:[#allocation272_spill] sm:$0xff] %v12342_v41  ;;  %v12347_v27 = vmax.f32 %v2493_v38, 0.0  ;;  %v2503_v35 = vsub.f32 1.0, %v1927_v10  ;;  %v1925_v61 = vand.u32 2147483647, %v1349_v13  ;;  %v1361_v38 = vsub.f32 %v10469_v28, %v12174_v46 }
 0x178   :  { %v2499_v53 = vsub.f32 1.0, %v1923_v7  ;;  %18441 = vst [vmem:[#allocation275_spill] sm:$0xff] %v12361_v42  ;;  %18442 = vst [vmem:[#allocation276_spill] sm:$0xff] %v12366_v54  ;;  %v1355_v7 = vsub.f32 %v10459_v23, %v12193_v15  ;;  %v1357_v46 = vsub.f32 %v10469_v28, %v12193_v15  ;;  %v1363_v15 = vsub.f32 %v10459_v23, %v12239_v26 }
 0x179   :  { %18439 = vst [vmem:[#allocation273_spill] sm:$0xff] %v12347_v27  ;;  %v12355_v14 = vmax.f32 %v2503_v35, 0.0  ;;  %v2501_v13 = vsub.f32 1.0, %v1925_v61  ;;  %v3293_v35 = vld [vmem:[%s17901_s3 + $0x1d0] sm:$0xff]  ;;  %v1937_v10 = vand.u32 2147483647, %v1361_v38  ;;  %v1367_v38 = vsub.f32 %v10459_v23, %v12215_v62 }
 0x17a   :  { %3702 = vperm.xlu1 %10177, %v3292_v37   ;;  %v1935_v37 = vand.u32 2147483647, %v1359_v60  ;;  %v12373_v52 = vmax.f32 %v2499_v53, 0.0  ;;  %v1931_v56 = vand.u32 2147483647, %v1355_v7  ;;  %v12383_v54 = vpop.permute.xlu1 %798  ;;  %v1369_v7 = vsub.f32 %v10469_v28, %v12215_v62 }
 0x17b   :  { %18440 = vst [vmem:[#allocation274_spill] sm:$0xff] %v12355_v14  ;;  %3697 = vperm.xlu0 %10176, %v3291_v19   ;;  %v12379_v11 = vmax.f32 %v2501_v13, 0.0  ;;  %18445 = vst [vmem:[#allocation279_spill] sm:$0xff] %v12383_v54  ;;  %v2513_v14 = vsub.f32 1.0, %v1937_v10  ;;  %v1933_v53 = vand.u32 2147483647, %v1357_v46  ;;  %v1365_v46 = vsub.f32 %v10469_v28, %v12239_v26 }
 0x17c   :  { %18443 = vst [vmem:[#allocation277_spill] sm:$0xff] %v12373_v52  ;;  %v2511_v61 = vsub.f32 1.0, %v1935_v37  ;;  %v3296_v13 = vld [vmem:[%s17901_s3 + $0x1e8] sm:$0xff]  ;;  %v2507_v60 = vsub.f32 1.0, %v1931_v56  ;;  %v3295_v10 = vld [vmem:[%s17901_s3 + $0x1e0] sm:$0xff] }
 0x17d   :  { %18444 = vst [vmem:[#allocation278_spill] sm:$0xff] %v12379_v11  ;;  %v1943_v19 = vand.u32 2147483647, %v1367_v38  ;;  %v1939_v38 = vand.u32 2147483647, %v1363_v15  ;;  %v1375_v11 = vsub.f32 %v10459_v23, %v12258_v33 }
 0x17e   :  { %3712 = vperm.xlu1 %10177, %v3294_v58   ;;  %v12392_v37 = vmax.f32 %v2511_v61, 0.0  ;;  %v12401_v58 = vmax.f32 %v2513_v14, 0.0  ;;  %v12405_v61 = vpop.permute.xlu0 %793  ;;  %v12407_v56 = vmax.f32 %v2507_v60, 0.0  ;;  %v3298_v60 = vld [vmem:[%s17901_s3 + $0x1f8] sm:$0xff] }
 0x17f   :  { %3707 = vperm.xlu0 %10176, %v3293_v35   ;;  %v2509_v35 = vsub.f32 1.0, %v1933_v53  ;;  %18448 = vst [vmem:[#allocation282_spill] sm:$0xff] %v12405_v61  ;;  %v2519_v14 = vsub.f32 1.0, %v1943_v19  ;;  %v3297_v19 = vld [vmem:[%s17901_s3 + $0x1f0] sm:$0xff]  ;;  %v1377_v53 = vsub.f32 %v10469_v28, %v12258_v33 }
 0x180   :  { %18446 = vst [vmem:[#allocation280_spill] sm:$0xff] %v12392_v37  ;;  %18447 = vst [vmem:[#allocation281_spill] sm:$0xff] %v12401_v58  ;;  %v1945_v37 = vand.u32 2147483647, %v1369_v7 }
 0x181   :  { %18449 = vst [vmem:[#allocation283_spill] sm:$0xff] %v12407_v56  ;;  %v12413_v62 = vmax.f32 %v2509_v35, 0.0  ;;  %v1941_v56 = vand.u32 2147483647, %v1365_v46  ;;  %v12424_v35 = vpop.permute.xlu1 %808  ;;  %v12429_v15 = vmax.f32 %v2519_v14, 0.0 }
 0x182   :  { %3722 = vperm.xlu1 %10177, %v3296_v13   ;;  %v2521_v7 = vsub.f32 1.0, %v1945_v37  ;;  %18451 = vst [vmem:[#allocation285_spill] sm:$0xff] %v12424_v35  ;;  %v1371_v13 = vsub.f32 %v10459_v23, %v12277_v29  ;;  %v1953_v52 = vand.u32 2147483647, %v1377_v53 }
 0x183   :  { %18450 = vst [vmem:[#allocation284_spill] sm:$0xff] %v12413_v62  ;;  %3717 = vperm.xlu0 %10176, %v3295_v10   ;;  %18452 = vst [vmem:[#allocation286_spill] sm:$0xff] %v12429_v15  ;;  %v2515_v10 = vsub.f32 1.0, %v1939_v38  ;;  %v2517_v26 = vsub.f32 1.0, %v1941_v56  ;;  %v1951_v62 = vand.u32 2147483647, %v1375_v11  ;;  %v1373_v38 = vsub.f32 %v10469_v28, %v12277_v29  ;;  %v12445_v15 = vpop.permute.xlu0 %803 }
 0x184   :  { %v12435_v46 = vmax.f32 %v2521_v7, 0.0  ;;  %18455 = vst [vmem:[#allocation289_spill] sm:$0xff] %v12445_v15  ;;  %v3300_v11 = vld [vmem:[%s17901_s3 + $0x208] sm:$0xff]  ;;  %v1947_v53 = vand.u32 2147483647, %v1371_v13  ;;  %v2529_v37 = vsub.f32 1.0, %v1953_v52  ;;  %v1391_v13 = vsub.f32 %v10459_v23, %v12342_v41 }
 0x185   :  { %v12439_v58 = vmax.f32 %v2515_v10, 0.0  ;;  %v12450_v56 = vmax.f32 %v2517_v26, 0.0  ;;  %v2527_v7 = vsub.f32 1.0, %v1951_v62  ;;  %v3299_v10 = vld [vmem:[%s17901_s3 + $0x200] sm:$0xff]  ;;  %v1949_v14 = vand.u32 2147483647, %v1373_v38 }
 0x186   :  { %18453 = vst [vmem:[#allocation287_spill] sm:$0xff] %v12435_v46  ;;  %3732 = vperm.xlu1 %10177, %v3298_v60   ;;  %v2523_v26 = vsub.f32 1.0, %v1947_v53  ;;  %v1385_v62 = vsub.f32 %v10469_v28, %v12299_v36  ;;  %v12467_v60 = vpop.permute.xlu1 %818  ;;  %v12469_v52 = vmax.f32 %v2529_v37, 0.0  ;;  %v1381_v37 = vsub.f32 %v10469_v28, %v12321_v34 }
 0x187   :  { %18454 = vst [vmem:[#allocation288_spill] sm:$0xff] %v12439_v58  ;;  %3727 = vperm.xlu0 %10176, %v3297_v19   ;;  %18456 = vst [vmem:[#allocation290_spill] sm:$0xff] %v12450_v56  ;;  %v1383_v19 = vsub.f32 %v10459_v23, %v12299_v36  ;;  %v12461_v58 = vmax.f32 %v2527_v7, 0.0  ;;  %v2525_v38 = vsub.f32 1.0, %v1949_v14  ;;  %v1379_v56 = vsub.f32 %v10459_v23, %v12321_v34  ;;  %v3302_v7 = vld [vmem:[%s17901_s3 + $0x218] sm:$0xff]  ;;  %v3301_v14 = vld [vmem:[%s17901_s3 + $0x210] sm:$0xff] }
 0x188   :  { %18458 = vst [vmem:[#allocation292_spill] sm:$0xff] %v12467_v60  ;;  %18459 = vst [vmem:[#allocation293_spill] sm:$0xff] %v12469_v52  ;;  %v12476_v53 = vmax.f32 %v2523_v26, 0.0  ;;  %v1961_v33 = vand.u32 2147483647, %v1385_v62  ;;  %v12489_v26 = vpop.permute.xlu0 %813 }
 0x189   :  { %18457 = vst [vmem:[#allocation291_spill] sm:$0xff] %v12461_v58  ;;  %v1959_v29 = vand.u32 2147483647, %v1383_v19  ;;  %v1955_v36 = vand.u32 2147483647, %v1379_v56  ;;  %18462 = vst [vmem:[#allocation296_spill] sm:$0xff] %v12489_v26 }
 0x18a   :  { %3742 = vperm.xlu1 %10177, %v3300_v11   ;;  %18460 = vst [vmem:[#allocation294_spill] sm:$0xff] %v12476_v53  ;;  %v12485_v11 = vmax.f32 %v2525_v38, 0.0  ;;  %v2537_v62 = vsub.f32 1.0, %v1961_v33  ;;  %v1957_v53 = vand.u32 2147483647, %v1381_v37  ;;  %v3304_v33 = vld [vmem:[%s17901_s3 + $0x228] sm:$0xff] }
 0x18b   :  { %3737 = vperm.xlu0 %10176, %v3299_v10   ;;  %v2535_v10 = vsub.f32 1.0, %v1959_v29  ;;  %v2531_v38 = vsub.f32 1.0, %v1955_v36  ;;  %v1393_v29 = vsub.f32 %v10469_v28, %v12342_v41  ;;  %v1967_v34 = vand.u32 2147483647, %v1391_v13  ;;  %v3303_v36 = vld [vmem:[%s17901_s3 + $0x220] sm:$0xff] }
 0x18c   :  { %18461 = vst [vmem:[#allocation295_spill] sm:$0xff] %v12485_v11  ;;  %v12504_v37 = vmax.f32 %v2537_v62, 0.0  ;;  %v2533_v19 = vsub.f32 1.0, %v1957_v53  ;;  %v1389_v62 = vsub.f32 %v10469_v28, %v12361_v42  ;;  %v12527_v56 = vpop.permute.xlu0 %823 }
 0x18d   :  { %v12495_v58 = vmax.f32 %v2535_v10, 0.0  ;;  %v12508_v10 = vpop.permute.xlu1 %828  ;;  %v12513_v52 = vmax.f32 %v2531_v38, 0.0  ;;  %v2543_v13 = vsub.f32 1.0, %v1967_v34  ;;  %v1399_v38 = vsub.f32 %v10459_v23, %v12383_v54  ;;  %18468 = vst [vmem:[#allocation302_spill] sm:$0xff] %v12527_v56  ;;  %v3306_v34 = vld [vmem:[%s17901_s3 + $0x238] sm:$0xff] }
 0x18e   :  { %3752 = vperm.xlu1 %10177, %v3302_v7   ;;  %18464 = vst [vmem:[#allocation298_spill] sm:$0xff] %v12504_v37  ;;  %v1387_v7 = vsub.f32 %v10459_v23, %v12361_v42  ;;  %18465 = vst [vmem:[#allocation299_spill] sm:$0xff] %v12508_v10  ;;  %v12519_v53 = vmax.f32 %v2533_v19, 0.0  ;;  %v1965_v11 = vand.u32 2147483647, %v1389_v62  ;;  %v1395_v42 = vsub.f32 %v10459_v23, %v12405_v61 }
 0x18f   :  { %18463 = vst [vmem:[#allocation297_spill] sm:$0xff] %v12495_v58  ;;  %3747 = vperm.xlu0 %10176, %v3301_v14   ;;  %18466 = vst [vmem:[#allocation300_spill] sm:$0xff] %v12513_v52  ;;  %v1969_v14 = vand.u32 2147483647, %v1393_v29  ;;  %v12532_v19 = vmax.f32 %v2543_v13, 0.0 }
 0x190   :  { %18467 = vst [vmem:[#allocation301_spill] sm:$0xff] %v12519_v53  ;;  %v1963_v37 = vand.u32 2147483647, %v1387_v7  ;;  %v1975_v29 = vand.u32 2147483647, %v1399_v38  ;;  %v1397_v7 = vsub.f32 %v10469_v28, %v12405_v61 }
 0x191   :  { %v2545_v58 = vsub.f32 1.0, %v1969_v14  ;;  %18469 = vst [vmem:[#allocation303_spill] sm:$0xff] %v12532_v19  ;;  %v3305_v14 = vld [vmem:[%s17901_s3 + $0x230] sm:$0xff]  ;;  %v1971_v38 = vand.u32 2147483647, %v1395_v42 }
 0x192   :  { %3762 = vperm.xlu1 %10177, %v3304_v33   ;;  %v2539_v41 = vsub.f32 1.0, %v1963_v37  ;;  %v1401_v33 = vsub.f32 %v10469_v28, %v12383_v54  ;;  %v12551_v54 = vpop.permute.xlu1 %838  ;;  %v1973_v19 = vand.u32 2147483647, %v1397_v7  ;;  %v12573_v7 = vpop.permute.xlu0 %833 }
 0x193   :  { %3757 = vperm.xlu0 %10176, %v3303_v36   ;;  %v12541_v62 = vmax.f32 %v2545_v58, 0.0  ;;  %v2541_v36 = vsub.f32 1.0, %v1965_v11  ;;  %18472 = vst [vmem:[#allocation306_spill] sm:$0xff] %v12551_v54  ;;  %v2551_v58 = vsub.f32 1.0, %v1975_v29  ;;  %v3307_v29 = vld [vmem:[%s17901_s3 + $0x240] sm:$0xff]  ;;  %v2547_v42 = vsub.f32 1.0, %v1971_v38 }
 0x194   :  { %v12545_v13 = vmax.f32 %v2539_v41, 0.0  ;;  %v1977_v37 = vand.u32 2147483647, %v1401_v33  ;;  %v3308_v41 = vld [vmem:[%s17901_s3 + $0x248] sm:$0xff]  ;;  %18475 = vst [vmem:[#allocation309_spill] sm:$0xff] %v12573_v7  ;;  %v2549_v61 = vsub.f32 1.0, %v1973_v19 }
 0x195   :  { %18470 = vst [vmem:[#allocation304_spill] sm:$0xff] %v12541_v62  ;;  %v12553_v53 = vmax.f32 %v2541_v36, 0.0  ;;  %v12567_v36 = vmax.f32 %v2551_v58, 0.0  ;;  %v12579_v62 = vmax.f32 %v2547_v42, 0.0 }
 0x196   :  { %18471 = vst [vmem:[#allocation305_spill] sm:$0xff] %v12545_v13  ;;  %3772 = vperm.xlu1 %10177, %v3306_v34   ;;  %v2553_v33 = vsub.f32 1.0, %v1977_v37  ;;  %v1407_v13 = vsub.f32 %v10459_v23, %v12424_v35  ;;  %v1403_v34 = vsub.f32 %v10459_v23, %v12445_v15  ;;  %v12588_v19 = vmax.f32 %v2549_v61, 0.0  ;;  %v12592_v37 = vpop.permute.xlu1 %848 }
 0x197   :  { %18473 = vst [vmem:[#allocation307_spill] sm:$0xff] %v12553_v53  ;;  %3767 = vperm.xlu0 %10176, %v3305_v14   ;;  %18474 = vst [vmem:[#allocation308_spill] sm:$0xff] %v12567_v36  ;;  %v1409_v14 = vsub.f32 %v10469_v28, %v12424_v35  ;;  %v1405_v36 = vsub.f32 %v10469_v28, %v12445_v15 }
 0x198   :  { %v12575_v11 = vmax.f32 %v2553_v33, 0.0  ;;  %v1983_v53 = vand.u32 2147483647, %v1407_v13  ;;  %18477 = vst [vmem:[#allocation311_spill] sm:$0xff] %v12579_v62  ;;  %v3310_v33 = vld [vmem:[%s17901_s3 + $0x258] sm:$0xff]  ;;  %18478 = vst [vmem:[#allocation312_spill] sm:$0xff] %v12588_v19  ;;  %v1411_v62 = vsub.f32 %v10459_v23, %v12489_v26 }
 0x199   :  { %v1985_v58 = vand.u32 2147483647, %v1409_v14  ;;  %v1979_v42 = vand.u32 2147483647, %v1403_v34  ;;  %18479 = vst [vmem:[#allocation313_spill] sm:$0xff] %v12592_v37  ;;  %v3309_v14 = vld [vmem:[%s17901_s3 + $0x250] sm:$0xff]  ;;  %v1417_v34 = vsub.f32 %v10469_v28, %v12467_v60 }
 0x19a   :  { %18476 = vst [vmem:[#allocation310_spill] sm:$0xff] %v12575_v11  ;;  %3782 = vperm.xlu1 %10177, %v3308_v41   ;;  %v2559_v13 = vsub.f32 1.0, %v1983_v53  ;;  %v1981_v35 = vand.u32 2147483647, %v1405_v36  ;;  %v12611_v11 = vpop.permute.xlu0 %843 }
 0x19b   :  { %3777 = vperm.xlu0 %10176, %v3307_v29   ;;  %v2561_v38 = vsub.f32 1.0, %v1985_v58  ;;  %v1415_v29 = vsub.f32 %v10459_v23, %v12467_v60  ;;  %v2555_v53 = vsub.f32 1.0, %v1979_v42  ;;  %18482 = vst [vmem:[#allocation316_spill] sm:$0xff] %v12611_v11  ;;  %v1993_v61 = vand.u32 2147483647, %v1417_v34 }
 0x19c   :  { %v12601_v19 = vmax.f32 %v2559_v13, 0.0  ;;  %v2557_v58 = vsub.f32 1.0, %v1981_v35  ;;  %v3312_v13 = vld [vmem:[%s17901_s3 + $0x268] sm:$0xff]  ;;  %v1413_v35 = vsub.f32 %v10469_v28, %v12489_v26  ;;  %v1987_v60 = vand.u32 2147483647, %v1411_v62 }
 0x19d   :  { %v12607_v15 = vmax.f32 %v2561_v38, 0.0  ;;  %v1991_v36 = vand.u32 2147483647, %v1415_v29  ;;  %v12616_v42 = vmax.f32 %v2555_v53, 0.0  ;;  %v3311_v38 = vld [vmem:[%s17901_s3 + $0x260] sm:$0xff]  ;;  %v2569_v53 = vsub.f32 1.0, %v1993_v61 }
 0x19e   :  { %18480 = vst [vmem:[#allocation314_spill] sm:$0xff] %v12601_v19  ;;  %3792 = vperm.xlu1 %10177, %v3310_v33   ;;  %v12625_v29 = vmax.f32 %v2557_v58, 0.0  ;;  %v1423_v34 = vsub.f32 %v10459_v23, %v12508_v10  ;;  %v2563_v58 = vsub.f32 1.0, %v1987_v60  ;;  %v3314_v61 = vld [vmem:[%s17901_s3 + $0x278] sm:$0xff]  ;;  %v3313_v60 = vld [vmem:[%s17901_s3 + $0x270] sm:$0xff]  ;;  %v1421_v62 = vsub.f32 %v10469_v28, %v12527_v56 }
 0x19f   :  { %18481 = vst [vmem:[#allocation315_spill] sm:$0xff] %v12607_v15  ;;  %3787 = vperm.xlu0 %10176, %v3309_v14   ;;  %18483 = vst [vmem:[#allocation317_spill] sm:$0xff] %v12616_v42  ;;  %v2567_v14 = vsub.f32 1.0, %v1991_v36  ;;  %v1989_v42 = vand.u32 2147483647, %v1413_v35  ;;  %v12633_v15 = vpop.permute.xlu1 %858  ;;  %v1425_v36 = vsub.f32 %v10469_v28, %v12508_v10  ;;  %v12644_v35 = vmax.f32 %v2569_v53, 0.0  ;;  %v12657_v53 = vpop.permute.xlu0 %853 }
 0x1a0   :  { %18484 = vst [vmem:[#allocation318_spill] sm:$0xff] %v12625_v29  ;;  %18485 = vst [vmem:[#allocation319_spill] sm:$0xff] %v12633_v15  ;;  %v1999_v41 = vand.u32 2147483647, %v1423_v34 }
 0x1a1   :  { %v12635_v19 = vmax.f32 %v2567_v14, 0.0  ;;  %18487 = vst [vmem:[#allocation321_spill] sm:$0xff] %v12644_v35  ;;  %v2565_v33 = vsub.f32 1.0, %v1989_v42  ;;  %v12651_v14 = vmax.f32 %v2563_v58, 0.0  ;;  %v2001_v26 = vand.u32 2147483647, %v1425_v36 }
 0x1a2   :  { %3802 = vperm.xlu1 %10177, %v3312_v13   ;;  %v1419_v13 = vsub.f32 %v10459_v23, %v12527_v56  ;;  %18489 = vst [vmem:[#allocation323_spill] sm:$0xff] %v12657_v53  ;;  %v2575_v34 = vsub.f32 1.0, %v1999_v41  ;;  %v1997_v58 = vand.u32 2147483647, %v1421_v62  ;;  %v1431_v36 = vsub.f32 %v10459_v23, %v12551_v54 }
 0x1a3   :  { %18486 = vst [vmem:[#allocation320_spill] sm:$0xff] %v12635_v19  ;;  %3797 = vperm.xlu0 %10176, %v3311_v38   ;;  %18488 = vst [vmem:[#allocation322_spill] sm:$0xff] %v12651_v14  ;;  %v12659_v42 = vmax.f32 %v2565_v33, 0.0  ;;  %v2577_v19 = vsub.f32 1.0, %v2001_v26  ;;  %v3316_v33 = vld [vmem:[%s17901_s3 + $0x288] sm:$0xff]  ;;  %v12676_v62 = vpop.permute.xlu1 %868  ;;  %v1429_v26 = vsub.f32 %v10469_v28, %v12573_v7 }
 0x1a4   :  { %v1995_v35 = vand.u32 2147483647, %v1419_v13  ;;  %v1433_v13 = vsub.f32 %v10469_v28, %v12551_v54  ;;  %18492 = vst [vmem:[#allocation326_spill] sm:$0xff] %v12676_v62  ;;  %v2573_v38 = vsub.f32 1.0, %v1997_v58  ;;  %v2007_v10 = vand.u32 2147483647, %v1431_v36  ;;  %v12695_v36 = vpop.permute.xlu0 %863 }
 0x1a5   :  { %18490 = vst [vmem:[#allocation324_spill] sm:$0xff] %v12659_v42  ;;  %v12670_v42 = vmax.f32 %v2575_v34, 0.0  ;;  %v1427_v34 = vsub.f32 %v10459_v23, %v12573_v7  ;;  %18496 = vst [vmem:[#allocation330_spill] sm:$0xff] %v12695_v36 }
 0x1a6   :  { %3812 = vperm.xlu1 %10177, %v3314_v61   ;;  %v2571_v41 = vsub.f32 1.0, %v1995_v35  ;;  %v3315_v61 = vld [vmem:[%s17901_s3 + $0x280] sm:$0xff]  ;;  %v2009_v56 = vand.u32 2147483647, %v1433_v13  ;;  %v12691_v54 = vmax.f32 %v2573_v38, 0.0  ;;  %v2583_v14 = vsub.f32 1.0, %v2007_v10 }
 0x1a7   :  { %3807 = vperm.xlu0 %10176, %v3313_v60   ;;  %18491 = vst [vmem:[#allocation325_spill] sm:$0xff] %v12670_v42  ;;  %v12681_v60 = vmax.f32 %v2577_v19, 0.0  ;;  %v2003_v58 = vand.u32 2147483647, %v1427_v34  ;;  %v2005_v42 = vand.u32 2147483647, %v1429_v26  ;;  %v1435_v38 = vsub.f32 %v10459_v23, %v12611_v11 }
 0x1a8   :  { %v12685_v35 = vmax.f32 %v2571_v41, 0.0  ;;  %18495 = vst [vmem:[#allocation329_spill] sm:$0xff] %v12691_v54  ;;  %v3318_v41 = vld [vmem:[%s17901_s3 + $0x298] sm:$0xff]  ;;  %v2585_v13 = vsub.f32 1.0, %v2009_v56  ;;  %v3317_v10 = vld [vmem:[%s17901_s3 + $0x290] sm:$0xff]  ;;  %v12717_v54 = vpop.permute.xlu1 %3422 }
 0x1a9   :  { %18493 = vst [vmem:[#allocation327_spill] sm:$0xff] %v12681_v60  ;;  %v2579_v34 = vsub.f32 1.0, %v2003_v58  ;;  %v2581_v19 = vsub.f32 1.0, %v2005_v42  ;;  %v3320_v42 = vld [vmem:[%s17901_s3 + $0x2a8] sm:$0xff] }
 0x1aa   :  { %18494 = vst [vmem:[#allocation328_spill] sm:$0xff] %v12685_v35  ;;  %3822 = vperm.xlu1 %10177, %v3316_v33   ;;  %v1439_v35 = vsub.f32 %v10459_v23, %v12592_v37  ;;  %v12707_v33 = vmax.f32 %v2583_v14, 0.0  ;;  %v12713_v26 = vmax.f32 %v2585_v13, 0.0 }
 0x1ab   :  { %3817 = vperm.xlu0 %10176, %v3315_v61   ;;  %v1441_v61 = vsub.f32 %v10469_v28, %v12592_v37  ;;  %v12719_v60 = vmax.f32 %v2579_v34, 0.0  ;;  %v2011_v34 = vand.u32 2147483647, %v1435_v38  ;;  %v1449_v38 = vsub.f32 %v10469_v28, %v12633_v15 }
 0x1ac   :  { %18497 = vst [vmem:[#allocation331_spill] sm:$0xff] %v12707_v33  ;;  %18498 = vst [vmem:[#allocation332_spill] sm:$0xff] %v12713_v26  ;;  %v2015_v7 = vand.u32 2147483647, %v1439_v35  ;;  %v1437_v33 = vsub.f32 %v10469_v28, %v12611_v11  ;;  %v12728_v35 = vmax.f32 %v2581_v19, 0.0  ;;  %v12757_v26 = vpop.permute.xlu1 %3432 }
 0x1ad   :  { %18499 = vst [vmem:[#allocation333_spill] sm:$0xff] %v12719_v60  ;;  %v2017_v14 = vand.u32 2147483647, %v1441_v61  ;;  %v3319_v61 = vld [vmem:[%s17901_s3 + $0x2a0] sm:$0xff]  ;;  %v12739_v60 = vpop.permute.xlu0 %3417 }
 0x1ae   :  { %3832 = vperm.xlu1 %10177, %v3318_v41   ;;  %18500 = vst [vmem:[#allocation334_spill] sm:$0xff] %v12728_v35  ;;  %v2591_v13 = vsub.f32 1.0, %v2015_v7  ;;  %v2013_v58 = vand.u32 2147483647, %v1437_v33  ;;  %v2587_v7 = vsub.f32 1.0, %v2011_v34  ;;  %v1443_v35 = vsub.f32 %v10459_v23, %v12657_v53 }
 0x1af   :  { %3827 = vperm.xlu0 %10176, %v3317_v10   ;;  %v2593_v56 = vsub.f32 1.0, %v2017_v14  ;;  %v1447_v10 = vsub.f32 %v10459_v23, %v12633_v15 }
 0x1b0   :  { %v12741_v19 = vmax.f32 %v2591_v13, 0.0  ;;  %v2589_v33 = vsub.f32 1.0, %v2013_v58  ;;  %v12751_v37 = vmax.f32 %v2587_v7, 0.0  ;;  %v2025_v13 = vand.u32 2147483647, %v1449_v38 }
 0x1b1   :  { %v12747_v14 = vmax.f32 %v2593_v56, 0.0  ;;  %v2023_v11 = vand.u32 2147483647, %v1447_v10  ;;  %v2019_v10 = vand.u32 2147483647, %v1443_v35  ;;  %v1455_v7 = vsub.f32 %v10459_v23, %v12676_v62  ;;  %v3322_v35 = vld [vmem:[%s17901_s3 + $0x2b8] sm:$0xff] }
 0x1b2   :  { %18501 = vst [vmem:[#allocation335_spill] sm:$0xff] %v12741_v19  ;;  %3842 = vperm.xlu1 %10177, %v3320_v42   ;;  %18503 = vst [vmem:[#allocation337_spill] sm:$0xff] %v12751_v37  ;;  %v1445_v19 = vsub.f32 %v10469_v28, %v12657_v53  ;;  %v12759_v42 = vmax.f32 %v2589_v33, 0.0  ;;  %v2601_v41 = vsub.f32 1.0, %v2025_v13  ;;  %v1457_v33 = vsub.f32 %v10469_v28, %v12676_v62 }
 0x1b3   :  { %18502 = vst [vmem:[#allocation336_spill] sm:$0xff] %v12747_v14  ;;  %3837 = vperm.xlu0 %10176, %v3319_v61   ;;  %v2599_v56 = vsub.f32 1.0, %v2023_v11  ;;  %v2595_v15 = vsub.f32 1.0, %v2019_v10  ;;  %v2031_v10 = vand.u32 2147483647, %v1455_v7  ;;  %v1451_v38 = vsub.f32 %v10459_v23, %v12695_v36 }
 0x1b4   :  { %18504 = vst [vmem:[#allocation338_spill] sm:$0xff] %v12759_v42  ;;  %v2021_v61 = vand.u32 2147483647, %v1445_v19  ;;  %v12773_v42 = vpop.permute.xlu0 %3427  ;;  %v3321_v19 = vld [vmem:[%s17901_s3 + $0x2b0] sm:$0xff]  ;;  %v12781_v13 = vmax.f32 %v2601_v41, 0.0  ;;  %v1453_v53 = vsub.f32 %v10469_v28, %v12695_v36  ;;  %v18510_v37 = vsub.f32 1.0, %v11024_v12 }
 0x1b5   :  { %v12767_v34 = vmax.f32 %v2599_v56, 0.0  ;;  %v12785_v11 = vmax.f32 %v2595_v15, 0.0  ;;  %v2033_v58 = vand.u32 2147483647, %v1457_v33  ;;  %v2607_v41 = vsub.f32 1.0, %v2031_v10 }
 0x1b6   :  { %18506 = vst [vmem:[#allocation340_spill] sm:$0xff] %v12781_v13  ;;  %v2597_v56 = vsub.f32 1.0, %v2021_v61  ;;  %3852 = vperm.xlu1 %10177, %v3322_v35   ;;  %v2027_v7 = vand.u32 2147483647, %v1451_v38  ;;  %v12795_v13 = vpop.permute.xlu1 %3442  ;;  %v3381_v15 = vsub.s32 0, %v10423_v2  ;;  %v3385_v33 = vsub.s32 4, %v10423_v2 }
 0x1b7   :  { %18505 = vst [vmem:[#allocation339_spill] sm:$0xff] %v12767_v34  ;;  %3847 = vperm.xlu0 %10176, %v3321_v19   ;;  %18507 = vst [vmem:[#allocation341_spill] sm:$0xff] %v12785_v11  ;;  %v2609_v35 = vsub.f32 1.0, %v2033_v58  ;;  %v2029_v19 = vand.u32 2147483647, %v1453_v53  ;;  %v12799_v11 = vmax.f32 %v2607_v41, 0.0  ;;  %v18511_v10 = vsub.f32 %v10469_v28, %v10549_v25 }
 0x1b8   :  { %v12791_v34 = vmax.f32 %v2597_v56, 0.0  ;;  %v2603_v62 = vsub.f32 1.0, %v2027_v7  ;;  %v12803_v56 = vmax.f32 %v18510_v37, 0.0  ;;  %v3382_v53 = vrot.slane %v10432_v8, %v3381_v15  ;;  %v12814_v2 = vpop.permute.xlu0 %3437 }
 0x1b9   :  { %18509 = vst [vmem:[#allocation343_spill] sm:$0xff] %v12799_v11  ;;  %v12808_v61 = vand.u32 2147483647, %v18511_v10  ;;  %v12810_v38 = vmax.f32 %v2609_v35, 0.0  ;;  %v2605_v58 = vsub.f32 1.0, %v2029_v19  ;;  %v3386_v36 = vrot.slane %v10432_v8, %v3385_v33  ;;  %v3323_v11 = vld [vmem:[%s17901_s3 + $0x2c0] sm:$0xff] }
 0x1ba   :  { %18508 = vst [vmem:[#allocation342_spill] sm:$0xff] %v12791_v34  ;;  %v12816_v41 = vmax.f32 %v2603_v62, 0.0  ;;  %v3390_v12 = vrot.slane %v10434_v9, %v3381_v15  ;;  %v3394_v37 = vrot.slane %v10434_v9, %v3385_v33  ;;  %v18514_v25 = vsub.f32 %v10469_v28, %v10547_v24 }
 0x1bb   :  { %18512 = vst [vmem:[#allocation344_spill] sm:$0xff] %v12810_v38  ;;  %v12825_v35 = vmax.f32 %v2605_v58, 0.0  ;;  %v12827_v19 = vrot.slane %v3382_v53, %v3381_v15  ;;  %v12829_v10 = vrot.slane %v3386_v36, %v3381_v15  ;;  %v18516_v24 = vsub.f32 %v10446_v16, %v10582_v55  ;;  %3857 = vperm.xlu0 %10176, %v3323_v11  }
 0x1bc   :  { %18513 = vst [vmem:[#allocation345_spill] sm:$0xff] %v12816_v41  ;;  %v12823_v7 = vand.u32 2147483647, %v18514_v25  ;;  %v12832_v38 = vrot.slane %v3390_v12, %v3381_v15  ;;  %v12834_v62 = vrot.slane %v3394_v37, %v3381_v15  ;;  %v12836_v41 = vpop.permute.xlu1 %3452  ;;  %v12868_v36 = vpop.permute.xlu0 %3447 }
 0x1bd   :  { %18515 = vst [vmem:[#allocation346_spill] sm:$0xff] %v12825_v35  ;;  %v12842_v25 = vand.u32 2147483647, %v18516_v24  ;;  %v4136_v33 = vsub.f32 %v12829_v10, %v12739_v60  ;;  %v4140_v24 = vsub.f32 %v12829_v10, %v12717_v54  ;;  %v4135_v58 = vsub.f32 %v12827_v19, %v12739_v60  ;;  %v3324_v35 = vld [vmem:[%s17901_s3 + $0x2c8] sm:$0xff] }
 0x1be   :  { %v4138_v37 = vsub.f32 %v12834_v62, %v12739_v60  ;;  %v4142_v12 = vsub.f32 %v12834_v62, %v12717_v54  ;;  %v4139_v53 = vsub.f32 %v12827_v19, %v12717_v54  ;;  %v4137_v8 = vsub.f32 %v12832_v38, %v12739_v60  ;;  %3862 = vperm.xlu1 %10177, %v3324_v35  }
 0x1bf   :  { %18517 = vst [vmem:[#allocation347_spill] sm:$0xff] %v12842_v25  ;;  %v4141_v9 = vsub.f32 %v12832_v38, %v12717_v54  ;;  %v4712_v34 = vand.u32 2147483647, %v4136_v33  ;;  %v4716_v14 = vand.u32 2147483647, %v4140_v24 }
 0x1c0   :  { %v12894_v15 = vpop.permute.xlu1 %3462  ;;  %v4714_v29 = vand.u32 2147483647, %v4138_v37  ;;  %v4718_v60 = vand.u32 2147483647, %v4142_v12  ;;  %v4711_v46 = vand.u32 2147483647, %v4135_v58 }
 0x1c1   :  { %v4715_v27 = vand.u32 2147483647, %v4139_v53  ;;  %v5288_v21 = vsub.f32 1.0, %v4712_v34  ;;  %v5292_v6 = vsub.f32 1.0, %v4716_v14  ;;  %v4713_v28 = vand.u32 2147483647, %v4137_v8  ;;  %v12925_v8 = vpop.permute.xlu0 %3457 }
 0x1c2   :  { %v5290_v4 = vsub.f32 1.0, %v4714_v29  ;;  %v5294_v23 = vsub.f32 1.0, %v4718_v60  ;;  %v5287_v55 = vsub.f32 1.0, %v4711_v46  ;;  %v4717_v24 = vand.u32 2147483647, %v4141_v9 }
 0x1c3   :  { %v5291_v33 = vsub.f32 1.0, %v4715_v27  ;;  %v5864_v37 = vmax.f32 %v5288_v21, 0.0  ;;  %v5868_v17 = vmax.f32 %v5292_v6, 0.0  ;;  %v5289_v52 = vsub.f32 1.0, %v4713_v28 }
 0x1c4   :  { %v5866_v25 = vmax.f32 %v5290_v4, 0.0  ;;  %v5870_v35 = vmax.f32 %v5294_v23, 0.0  ;;  %v5863_v11 = vmax.f32 %v5287_v55, 0.0  ;;  %v5293_v58 = vsub.f32 1.0, %v4717_v24 }
 0x1c5   :  { %v5867_v12 = vmax.f32 %v5291_v33, 0.0  ;;  %v6440_v53 = vmul.f32 %v5864_v37, %v10520_v63  ;;  %v6444_v54 = vmul.f32 %v5868_v17, %v10574_v44  ;;  %v5865_v29 = vmax.f32 %v5289_v52, 0.0 }
 0x1c6   :  { %v6442_v14 = vmul.f32 %v5866_v25, %v10522_v0  ;;  %v6446_v27 = vmul.f32 %v5870_v35, %v10576_v45  ;;  %v6439_v9 = vmul.f32 %v5863_v11, %v10578_v51  ;;  %v5869_v28 = vmax.f32 %v5293_v58, 0.0  ;;  %v12938_v51 = vpop.permute.xlu1 %3472 }
 0x1c7   :  { %v6443_v4 = vmul.f32 %v5867_v12, %v10610_v30  ;;  %v9356_v23 = vpack.c.bf16 %v6444_v54, %v6440_v53  ;;  %v6441_v55 = vmul.f32 %v5865_v29, %v10584_v57  ;;  %v4173_v63 = vsub.f32 %v12832_v38, %v12894_v15 }
 0x1c8   :  { %v4174_v17 = vsub.f32 %v12834_v62, %v12894_v15  ;;  %v9644_v0 = vpack.c.bf16 %v6446_v27, %v6442_v14  ;;  %v6445_v6 = vmul.f32 %v5869_v28, %v10625_v1  ;;  %v4167_v45 = vsub.f32 %v12827_v19, %v12925_v8 }
 0x1c9   :  { %v9358_v44 = vpack.c.bf16 %v6443_v4, %v6439_v9  ;;  %9357 = vmatprep.subr.bf16.mxu0 %v9356_v23  ;;  %v4168_v30 = vsub.f32 %v12829_v10, %v12925_v8  ;;  %v4169_v57 = vsub.f32 %v12832_v38, %v12925_v8  ;;  %v4170_v21 = vsub.f32 %v12834_v62, %v12925_v8  ;;  %v18558_v8 = vld [vmem:[#allocation47_spill] sm:$0xff] }
 0x1ca   :  { %v18518_v46 = vsub.f32 %v12829_v10, %v12773_v42  ;;  %9645 = vmatprep.subr.bf16.mxu1 %v9644_v0  ;;  %v9646_v1 = vpack.c.bf16 %v6445_v6, %v6441_v55  ;;  %v18519_v34 = vsub.f32 %v12829_v10, %v12757_v26  ;;  %v18520_v60 = vsub.f32 %v12834_v62, %v12773_v42 }
 0x1cb   :  { %9359 = vmatpush1.bf16.msra.mxu0 %v9358_v44  ;;  %v18521_v33 = vsub.f32 %v12834_v62, %v12757_v26  ;;  %v18522_v35 = vsub.f32 %v12827_v19, %v12773_v42  ;;  %v18523_v12 = vsub.f32 %v12827_v19, %v12757_v26  ;;  %v4179_v53 = vsub.f32 %v12827_v19, %v12938_v51 }
 0x1cc   :  { %v4720_v52 = vand.u32 2147483647, %v18518_v46  ;;  %v4724_v25 = vand.u32 2147483647, %v18519_v34  ;;  %v4722_v54 = vand.u32 2147483647, %v18520_v60  ;;  %9647 = vmatpush1.bf16.msra.mxu1 %v9646_v1  ;;  %v18524_v9 = vsub.f32 %v12832_v38, %v12773_v42 }
 0x1cd   :  { %v4726_v24 = vand.u32 2147483647, %v18521_v33  ;;  %v4719_v11 = vand.u32 2147483647, %v18522_v35  ;;  %v4723_v58 = vand.u32 2147483647, %v18523_v12  ;;  %v18525_v0 = vsub.f32 %v12832_v38, %v12757_v26 }
 0x1ce   :  { %v5296_v37 = vsub.f32 1.0, %v4720_v52  ;;  %v5300_v14 = vsub.f32 1.0, %v4724_v25  ;;  %v5298_v29 = vsub.f32 1.0, %v4722_v54  ;;  %v4721_v4 = vand.u32 2147483647, %v18524_v9  ;;  %v3326_v42 = vld [vmem:[%s17901_s3 + $0x2d8] sm:$0xff] }
 0x1cf   :  { %v5302_v27 = vsub.f32 1.0, %v4726_v24  ;;  %v5295_v23 = vsub.f32 1.0, %v4719_v11  ;;  %v5299_v55 = vsub.f32 1.0, %v4723_v58  ;;  %v4725_v44 = vand.u32 2147483647, %v18525_v0  ;;  %v3325_v33 = vld [vmem:[%s17901_s3 + $0x2d0] sm:$0xff]  ;;  %v12982_v11 = vpop.permute.xlu0 %3467  ;;  %3872 = vperm.xlu1 %10177, %v3326_v42  }
 0x1d0   :  { %v5872_v28 = vmax.f32 %v5296_v37, 0.0  ;;  %v5876_v6 = vmax.f32 %v5300_v14, 0.0  ;;  %v5874_v46 = vmax.f32 %v5298_v29, 0.0  ;;  %v5297_v34 = vsub.f32 1.0, %v4721_v4  ;;  %3867 = vperm.xlu0 %10176, %v3325_v33  }
 0x1d1   :  { %v5878_v52 = vmax.f32 %v5302_v27, 0.0  ;;  %v5871_v25 = vmax.f32 %v5295_v23, 0.0  ;;  %v5875_v60 = vmax.f32 %v5299_v55, 0.0  ;;  %v5301_v54 = vsub.f32 1.0, %v4725_v44 }
 0x1d2   :  { %v6448_v1 = vmul.f32 %v5872_v28, %v10586_v59  ;;  %v6452_v26 = vmul.f32 %v5876_v6, %v10627_v47  ;;  %v6450_v24 = vmul.f32 %v5874_v46, %v10653_v48  ;;  %v5873_v35 = vmax.f32 %v5297_v34, 0.0 }
 0x1d3   :  { %v6454_v37 = vmul.f32 %v5878_v52, %v10692_v40  ;;  %v6447_v59 = vmul.f32 %v5871_v25, %v10668_v31  ;;  %v6451_v12 = vmul.f32 %v5875_v60, %v10694_v20  ;;  %v5877_v58 = vmax.f32 %v5301_v54, 0.0  ;;  %v12996_v31 = vpop.permute.xlu1 %3482 }
 0x1d4   :  { %v4180_v14 = vsub.f32 %v12829_v10, %v12938_v51  ;;  %v9360_v29 = vpack.c.bf16 %v6452_v26, %v6448_v1  ;;  %v6449_v47 = vmul.f32 %v5873_v35, %v10722_v22  ;;  %v4181_v48 = vsub.f32 %v12832_v38, %v12938_v51 }
 0x1d5   :  { %v9648_v27 = vpack.c.bf16 %v6454_v37, %v6450_v24  ;;  %v9362_v40 = vpack.c.bf16 %v6451_v12, %v6447_v59  ;;  %v6453_v9 = vmul.f32 %v5877_v58, %v10732_v43  ;;  %v4182_v4 = vsub.f32 %v12834_v62, %v12938_v51  ;;  %v3332_v51 = vld [vmem:[%s17901_s3 + $0x308] sm:$0xff] }
 0x1d6   :  { %v4175_v20 = vsub.f32 %v12827_v19, %v12982_v11  ;;  %9361 = vmatprep.subr.bf16.mxu0 %v9360_v29  ;;  %v4176_v28 = vsub.f32 %v12829_v10, %v12982_v11  ;;  %v4177_v22 = vsub.f32 %v12832_v38, %v12982_v11  ;;  %v4178_v23 = vsub.f32 %v12834_v62, %v12982_v11 }
 0x1d7   :  { %9649 = vmatprep.subr.bf16.mxu1 %v9648_v27  ;;  %v18526_v43 = vsub.f32 %v12829_v10, %v12814_v2  ;;  %9363 = vmatpush1.bf16.msra.mxu0 %v9362_v40  ;;  %v9650_v0 = vpack.c.bf16 %v6453_v9, %v6449_v47  ;;  %v18527_v44 = vsub.f32 %v12829_v10, %v12795_v13 }
 0x1d8   :  { %v18528_v46 = vsub.f32 %v12834_v62, %v12814_v2  ;;  %v18529_v34 = vsub.f32 %v12834_v62, %v12795_v13  ;;  %v18530_v60 = vsub.f32 %v12827_v19, %v12814_v2  ;;  %v18531_v42 = vsub.f32 %v12827_v19, %v12795_v13 }
 0x1d9   :  { %v4728_v55 = vand.u32 2147483647, %v18526_v43  ;;  %v4732_v6 = vand.u32 2147483647, %v18527_v44  ;;  %v4187_v26 = vsub.f32 %v12827_v19, %v12996_v31  ;;  %9651 = vmatpush1.bf16.msra.mxu1 %v9650_v0  ;;  %v18532_v59 = vsub.f32 %v12832_v38, %v12814_v2 }
 0x1da   :  { %v4730_v52 = vand.u32 2147483647, %v18528_v46  ;;  %v4734_v1 = vand.u32 2147483647, %v18529_v34  ;;  %v4727_v54 = vand.u32 2147483647, %v18530_v60  ;;  %v18533_v47 = vsub.f32 %v12832_v38, %v12795_v13  ;;  %v13034_v60 = vpop.permute.xlu0 %3477 }
 0x1db   :  { %v5304_v25 = vsub.f32 1.0, %v4728_v55  ;;  %v4731_v33 = vand.u32 2147483647, %v18531_v42  ;;  %v5308_v24 = vsub.f32 1.0, %v4732_v6  ;;  %v4729_v12 = vand.u32 2147483647, %v18532_v59 }
 0x1dc   :  { %v5306_v37 = vsub.f32 1.0, %v4730_v52  ;;  %v5310_v35 = vsub.f32 1.0, %v4734_v1  ;;  %v5303_v29 = vsub.f32 1.0, %v4727_v54  ;;  %v4733_v40 = vand.u32 2147483647, %v18533_v47 }
 0x1dd   :  { %v5880_v58 = vmax.f32 %v5304_v25, 0.0  ;;  %v5307_v27 = vsub.f32 1.0, %v4731_v33  ;;  %v5884_v9 = vmax.f32 %v5308_v24, 0.0  ;;  %v5305_v44 = vsub.f32 1.0, %v4729_v12 }
 0x1de   :  { %v5882_v43 = vmax.f32 %v5306_v37, 0.0  ;;  %v5886_v55 = vmax.f32 %v5310_v35, 0.0  ;;  %v5879_v6 = vmax.f32 %v5303_v29, 0.0  ;;  %v5309_v52 = vsub.f32 1.0, %v4733_v40 }
 0x1df   :  { %v6456_v0 = vmul.f32 %v5880_v58, %v10758_v50  ;;  %v5883_v46 = vmax.f32 %v5307_v27, 0.0  ;;  %v6460_v34 = vmul.f32 %v5884_v9, %v10760_v5  ;;  %v5881_v25 = vmax.f32 %v5305_v44, 0.0  ;;  %v13092_v5 = vpop.permute.xlu0 %3487 }
 0x1e0   :  { %v6458_v2 = vmul.f32 %v5882_v43, %v10775_v18  ;;  %v6462_v1 = vmul.f32 %v5886_v55, %v10802_v49  ;;  %v6455_v13 = vmul.f32 %v5879_v6, %v10816_v3  ;;  %v5885_v42 = vmax.f32 %v5309_v52, 0.0  ;;  %v18534_v49 = vld [vmem:[#allocation27_spill] sm:$0xff]  ;;  %v13048_v3 = vpop.permute.xlu1 %3492 }
 0x1e1   :  { %v6459_v54 = vmul.f32 %v5883_v46, %v10840_v32  ;;  %v4188_v50 = vsub.f32 %v12829_v10, %v12996_v31  ;;  %v9364_v33 = vpack.c.bf16 %v6460_v34, %v6456_v0  ;;  %v6457_v37 = vmul.f32 %v5881_v25, %v10842_v39  ;;  %v3328_v25 = vld [vmem:[%s17901_s3 + $0x2e8] sm:$0xff] }
 0x1e2   :  { %v9652_v24 = vpack.c.bf16 %v6462_v1, %v6458_v2  ;;  %v6461_v35 = vmul.f32 %v5885_v42, %v18534_v49  ;;  %v4190_v59 = vsub.f32 %v12834_v62, %v12996_v31  ;;  %v4183_v32 = vsub.f32 %v12827_v19, %v13034_v60  ;;  %3882 = vperm.xlu1 %10177, %v3328_v25  }
 0x1e3   :  { %v9366_v18 = vpack.c.bf16 %v6459_v54, %v6455_v13  ;;  %9365 = vmatprep.subr.bf16.mxu0 %v9364_v33  ;;  %v4184_v12 = vsub.f32 %v12829_v10, %v13034_v60  ;;  %v4185_v39 = vsub.f32 %v12832_v38, %v13034_v60  ;;  %v4186_v58 = vsub.f32 %v12834_v62, %v13034_v60 }
 0x1e4   :  { %9653 = vmatprep.subr.bf16.mxu1 %v9652_v24  ;;  %v18535_v29 = vsub.f32 %v12829_v10, %v12868_v36  ;;  %v9654_v47 = vpack.c.bf16 %v6461_v35, %v6457_v37  ;;  %v18536_v40 = vsub.f32 %v12829_v10, %v12836_v41  ;;  %v18537_v43 = vsub.f32 %v12834_v62, %v12868_v36  ;;  %v3327_v37 = vld [vmem:[%s17901_s3 + $0x2e0] sm:$0xff] }
 0x1e5   :  { %9367 = vmatpush1.bf16.msra.mxu0 %v9366_v18  ;;  %v18538_v44 = vsub.f32 %v12834_v62, %v12836_v41  ;;  %v18539_v46 = vsub.f32 %v12827_v19, %v12868_v36  ;;  %v18540_v34 = vsub.f32 %v12827_v19, %v12836_v41  ;;  %v18541_v33 = vsub.f32 %v12832_v38, %v12868_v36 }
 0x1e6   :  { %v4736_v27 = vand.u32 2147483647, %v18535_v29  ;;  %v4740_v9 = vand.u32 2147483647, %v18536_v40  ;;  %v4738_v55 = vand.u32 2147483647, %v18537_v43  ;;  %9655 = vmatpush1.bf16.msra.mxu1 %v9654_v47  ;;  %v18542_v29 = vsub.f32 %v12832_v38, %v12836_v41  ;;  %3877 = vperm.xlu0 %10176, %v3327_v37  }
 0x1e7   :  { %v4742_v0 = vand.u32 2147483647, %v18538_v44  ;;  %v4735_v52 = vand.u32 2147483647, %v18539_v46  ;;  %v4739_v2 = vand.u32 2147483647, %v18540_v34 }
 0x1e8   :  { %v5312_v6 = vsub.f32 1.0, %v4736_v27  ;;  %v5316_v13 = vsub.f32 1.0, %v4740_v9  ;;  %v5314_v54 = vsub.f32 1.0, %v4738_v55  ;;  %v4737_v24 = vand.u32 2147483647, %v18541_v33  ;;  %v18543_v55 = vld [vmem:[#allocation28_spill] sm:$0xff] }
 0x1e9   :  { %v5318_v42 = vsub.f32 1.0, %v4742_v0  ;;  %v5311_v49 = vsub.f32 1.0, %v4735_v52  ;;  %v5315_v35 = vsub.f32 1.0, %v4739_v2  ;;  %v4741_v27 = vand.u32 2147483647, %v18542_v29  ;;  %v18544_v34 = vld [vmem:[#allocation29_spill] sm:$0xff] }
 0x1ea   :  { %v5888_v18 = vmax.f32 %v5312_v6, 0.0  ;;  %v5892_v47 = vmax.f32 %v5316_v13, 0.0  ;;  %v5890_v40 = vmax.f32 %v5314_v54, 0.0  ;;  %v5313_v43 = vsub.f32 1.0, %v4737_v24  ;;  %v18545_v33 = vld [vmem:[#allocation32_spill] sm:$0xff]  ;;  %v18546_v52 = vld [vmem:[#allocation35_spill] sm:$0xff] }
 0x1eb   :  { %v5894_v9 = vmax.f32 %v5318_v42, 0.0  ;;  %v5887_v44 = vmax.f32 %v5311_v49, 0.0  ;;  %v5891_v0 = vmax.f32 %v5315_v35, 0.0  ;;  %v5317_v46 = vsub.f32 1.0, %v4741_v27  ;;  %v18547_v41 = vld [vmem:[#allocation36_spill] sm:$0xff]  ;;  %v18548_v13 = vld [vmem:[#allocation37_spill] sm:$0xff] }
 0x1ec   :  { %v6464_v36 = vmul.f32 %v5888_v18, %v18543_v55  ;;  %v6468_v25 = vmul.f32 %v5892_v47, %v18544_v34  ;;  %v6466_v6 = vmul.f32 %v5890_v40, %v18545_v33  ;;  %v5889_v1 = vmax.f32 %v5313_v43, 0.0  ;;  %v18549_v35 = vld [vmem:[#allocation40_spill] sm:$0xff]  ;;  %v18550_v40 = vld [vmem:[#allocation41_spill] sm:$0xff] }
 0x1ed   :  { %v6470_v2 = vmul.f32 %v5894_v9, %v18546_v52  ;;  %v6463_v37 = vmul.f32 %v5887_v44, %v18547_v41  ;;  %v6467_v54 = vmul.f32 %v5891_v0, %v18548_v13  ;;  %v5893_v42 = vmax.f32 %v5317_v46, 0.0 }
 0x1ee   :  { %v4196_v24 = vsub.f32 %v12829_v10, %v13048_v3  ;;  %v9368_v18 = vpack.c.bf16 %v6468_v25, %v6464_v36  ;;  %v6465_v29 = vmul.f32 %v5889_v1, %v18549_v35  ;;  %v4197_v27 = vsub.f32 %v12832_v38, %v13048_v3 }
 0x1ef   :  { %v9656_v49 = vpack.c.bf16 %v6470_v2, %v6466_v6  ;;  %v9370_v47 = vpack.c.bf16 %v6467_v54, %v6463_v37  ;;  %v6469_v9 = vmul.f32 %v5893_v42, %v18550_v40  ;;  %v4198_v43 = vsub.f32 %v12834_v62, %v13048_v3 }
 0x1f0   :  { %v4191_v55 = vsub.f32 %v12827_v19, %v13092_v5  ;;  %9369 = vmatprep.subr.bf16.mxu0 %v9368_v18  ;;  %v4192_v36 = vsub.f32 %v12829_v10, %v13092_v5  ;;  %v4193_v1 = vsub.f32 %v12832_v38, %v13092_v5  ;;  %v4194_v44 = vsub.f32 %v12834_v62, %v13092_v5 }
 0x1f1   :  { %9657 = vmatprep.subr.bf16.mxu1 %v9656_v49  ;;  %v4744_v0 = vand.u32 2147483647, %v4168_v30  ;;  %9371 = vmatpush1.bf16.msra.mxu0 %v9370_v47  ;;  %v9658_v46 = vpack.c.bf16 %v6469_v9, %v6465_v29  ;;  %v18551_v34 = vsub.f32 %v12829_v10, %v12894_v15  ;;  %v4746_v33 = vand.u32 2147483647, %v4170_v21 }
 0x1f2   :  { %v4750_v6 = vand.u32 2147483647, %v4174_v17  ;;  %v4743_v2 = vand.u32 2147483647, %v4167_v45  ;;  %v18552_v30 = vsub.f32 %v12827_v19, %v12894_v15  ;;  %v18553_v37 = vsub.f32 1.0, %v12808_v61  ;;  %v3329_v15 = vld [vmem:[%s17901_s3 + $0x2f0] sm:$0xff] }
 0x1f3   :  { %v4748_v25 = vand.u32 2147483647, %v18551_v34  ;;  %v5320_v52 = vsub.f32 1.0, %v4744_v0  ;;  %9659 = vmatpush1.bf16.msra.mxu1 %v9658_v46  ;;  %v5322_v42 = vsub.f32 1.0, %v4746_v33  ;;  %v18554_v18 = vsub.f32 1.0, %v12823_v7  ;;  %v13140_v0 = vpop.permute.xlu1 %3502  ;;  %v18555_v46 = vld [vmem:[#allocation42_spill] sm:$0xff]  ;;  %3887 = vperm.xlu0 %10176, %v3329_v15  }
 0x1f4   :  { %v4747_v41 = vand.u32 2147483647, %v18552_v30  ;;  %v2693_v13 = vmax.f32 %v18553_v37, 0.0  ;;  %v5326_v21 = vsub.f32 1.0, %v4750_v6  ;;  %v5319_v35 = vsub.f32 1.0, %v4743_v2  ;;  %v18556_v6 = vld [vmem:[#allocation45_spill] sm:$0xff] }
 0x1f5   :  { %v5324_v54 = vsub.f32 1.0, %v4748_v25  ;;  %v2697_v49 = vmax.f32 %v18554_v18, 0.0  ;;  %v5896_v17 = vmax.f32 %v5320_v52, 0.0  ;;  %v4745_v45 = vand.u32 2147483647, %v4169_v57  ;;  %v18557_v2 = vld [vmem:[#allocation46_spill] sm:$0xff] }
 0x1f6   :  { %v5323_v29 = vsub.f32 1.0, %v4747_v41  ;;  %v5898_v40 = vmax.f32 %v5322_v42, 0.0  ;;  %v5902_v9 = vmax.f32 %v5326_v21, 0.0  ;;  %v4749_v61 = vand.u32 2147483647, %v4173_v63  ;;  %v3330_v37 = vld [vmem:[%s17901_s3 + $0x2f8] sm:$0xff] }
 0x1f7   :  { %v5900_v47 = vmax.f32 %v5324_v54, 0.0  ;;  %v6472_v34 = vmul.f32 %v5896_v17, %v18555_v46  ;;  %v5895_v7 = vmax.f32 %v5319_v35, 0.0  ;;  %v5321_v33 = vsub.f32 1.0, %v4745_v45  ;;  %v18559_v63 = vld [vmem:[#allocation50_spill] sm:$0xff]  ;;  %v13156_v17 = vpop.permute.xlu0 %3497  ;;  %3892 = vperm.xlu1 %10177, %v3330_v37   ;;  %v18563_v37 = vld [vmem:[#allocation8_spill] sm:$0xff] }
 0x1f8   :  { %v5899_v25 = vmax.f32 %v5323_v29, 0.0  ;;  %v6474_v30 = vmul.f32 %v5898_v40, %v18557_v2  ;;  %v6478_v57 = vmul.f32 %v5902_v9, %v18558_v8  ;;  %v5325_v41 = vsub.f32 1.0, %v4749_v61  ;;  %v18562_v2 = vld [vmem:[#allocation347_spill] sm:$0xff]  ;;  %v18564_v15 = vld [vmem:[#allocation12_spill] sm:$0xff] }
 0x1f9   :  { %v6476_v52 = vmul.f32 %v5900_v47, %v18556_v6  ;;  %v6471_v54 = vmul.f32 %v5895_v7, %v18559_v63  ;;  %v5897_v21 = vmax.f32 %v5321_v33, 0.0  ;;  %v4204_v47 = vsub.f32 %v12829_v10, %v13140_v0 }
 0x1fa   :  { %v6475_v42 = vmul.f32 %v5899_v25, %v12803_v56  ;;  %v9660_v29 = vpack.c.bf16 %v6478_v57, %v6474_v30  ;;  %v5901_v45 = vmax.f32 %v5325_v41, 0.0  ;;  %v4206_v56 = vsub.f32 %v12834_v62, %v13140_v0  ;;  %v18560_v25 = vld [vmem:[#allocation11_spill] sm:$0xff] }
 0x1fb   :  { %v9372_v35 = vpack.c.bf16 %v6476_v52, %v6472_v34  ;;  %v6473_v9 = vmul.f32 %v5897_v21, %v2693_v13  ;;  %v4199_v7 = vsub.f32 %v12827_v19, %v13156_v17  ;;  %v4200_v34 = vsub.f32 %v12829_v10, %v13156_v17  ;;  %3902 = vperm.xlu1 %10177, %v3332_v51  }
 0x1fc   :  { %v9374_v40 = vpack.c.bf16 %v6475_v42, %v6471_v54  ;;  %9661 = vmatprep.subr.bf16.mxu1 %v9660_v29  ;;  %v6477_v46 = vmul.f32 %v5901_v45, %v2697_v49  ;;  %v18561_v33 = vsub.f32 %v10446_v16, %v18560_v25  ;;  %v4202_v52 = vsub.f32 %v12834_v62, %v13156_v17 }
 0x1fd   :  { %9373 = vmatprep.subr.bf16.mxu0 %v9372_v35  ;;  %v2124_v30 = vsub.f32 1.0, %v18562_v2  ;;  %v4752_v49 = vand.u32 2147483647, %v4176_v28  ;;  %v4756_v41 = vand.u32 2147483647, %v4180_v14  ;;  %v18565_v63 = vsub.f32 %v18563_v37, %v18564_v15  ;;  %v18567_v2 = vld [vmem:[#allocation9_spill] sm:$0xff] }
 0x1fe   :  { %v1552_v6 = vand.u32 2147483647, %v18561_v33  ;;  %9375 = vmatpush1.bf16.msra.mxu0 %v9374_v40  ;;  %v9662_v8 = vpack.c.bf16 %v6477_v46, %v6473_v9  ;;  %v18566_v35 = vsub.f32 %v18563_v37, %v18560_v25  ;;  %v4754_v28 = vand.u32 2147483647, %v4178_v23 }
 0x1ff   :  { %v1550_v54 = vand.u32 2147483647, %v18565_v63  ;;  %v2700_v42 = vmax.f32 %v2124_v30, 0.0  ;;  %v5328_v21 = vsub.f32 1.0, %v4752_v49  ;;  %v5332_v40 = vsub.f32 1.0, %v4756_v41 }
 0x200   :  { %v2128_v57 = vsub.f32 1.0, %v1552_v6  ;;  %v1554_v29 = vand.u32 2147483647, %v18566_v35  ;;  %9663 = vmatpush1.bf16.msra.mxu1 %v9662_v8  ;;  %v4758_v14 = vand.u32 2147483647, %v4182_v4  ;;  %v5330_v6 = vsub.f32 1.0, %v4754_v28 }
 0x201   :  { %v2126_v9 = vsub.f32 1.0, %v1550_v54  ;;  %v5904_v46 = vmax.f32 %v5328_v21, 0.0  ;;  %v18568_v30 = vsub.f32 %v18567_v2, %v18564_v15  ;;  %v5908_v63 = vmax.f32 %v5332_v40, 0.0 }
 0x202   :  { %v2704_v45 = vmax.f32 %v2128_v57, 0.0  ;;  %v2130_v33 = vsub.f32 1.0, %v1554_v29  ;;  %v5334_v61 = vsub.f32 1.0, %v4758_v14  ;;  %v18569_v23 = vsub.f32 %v18567_v2, %v18560_v25 }
 0x203   :  { %v1547_v49 = vand.u32 2147483647, %v18568_v30  ;;  %v2702_v35 = vmax.f32 %v2126_v9, 0.0  ;;  %v6480_v57 = vmul.f32 %v5904_v46, %v2700_v42  ;;  %v5906_v54 = vmax.f32 %v5330_v6, 0.0  ;;  %v18570_v9 = vld [vmem:[#allocation10_spill] sm:$0xff]  ;;  %v13209_v46 = vpop.permute.xlu1 %3512 }
 0x204   :  { %v1551_v8 = vand.u32 2147483647, %v18569_v23  ;;  %v2706_v41 = vmax.f32 %v2130_v33, 0.0  ;;  %v6484_v18 = vmul.f32 %v5908_v63, %v2704_v45  ;;  %v5910_v4 = vmax.f32 %v5334_v61, 0.0 }
 0x205   :  { %v2123_v13 = vsub.f32 1.0, %v1547_v49  ;;  %v4751_v29 = vand.u32 2147483647, %v4175_v20  ;;  %v6482_v28 = vmul.f32 %v5906_v54, %v2702_v35  ;;  %v4755_v40 = vand.u32 2147483647, %v4179_v53  ;;  %v13222_v54 = vpop.permute.xlu0 %3507 }
 0x206   :  { %v2127_v21 = vsub.f32 1.0, %v1551_v8  ;;  %v18571_v14 = vsub.f32 %v18570_v9, %v18564_v15  ;;  %v9376_v33 = vpack.c.bf16 %v6484_v18, %v6480_v57  ;;  %v6486_v45 = vmul.f32 %v5910_v4, %v2706_v41 }
 0x207   :  { %v2699_v30 = vmax.f32 %v2123_v13, 0.0  ;;  %v5327_v6 = vsub.f32 1.0, %v4751_v29  ;;  %v5331_v49 = vsub.f32 1.0, %v4755_v40  ;;  %v18572_v20 = vsub.f32 %v18570_v9, %v18560_v25 }
 0x208   :  { %v1549_v42 = vand.u32 2147483647, %v18571_v14  ;;  %v2703_v61 = vmax.f32 %v2127_v21, 0.0  ;;  %v4753_v53 = vand.u32 2147483647, %v4177_v22  ;;  %9377 = vmatprep.subr.bf16.mxu0 %v9376_v33  ;;  %v9664_v35 = vpack.c.bf16 %v6486_v45, %v6482_v28 }
 0x209   :  { %v1553_v63 = vand.u32 2147483647, %v18572_v20  ;;  %v5903_v15 = vmax.f32 %v5327_v6, 0.0  ;;  %v4757_v18 = vand.u32 2147483647, %v4181_v48  ;;  %v4211_v23 = vsub.f32 %v12827_v19, %v13209_v46  ;;  %v3331_v48 = vld [vmem:[%s17901_s3 + $0x300] sm:$0xff]  ;;  %v13242_v6 = vpop.permute.xlu1 %3522 }
 0x20a   :  { %v2125_v13 = vsub.f32 1.0, %v1549_v42  ;;  %v5907_v8 = vmax.f32 %v5331_v49, 0.0  ;;  %v5329_v25 = vsub.f32 1.0, %v4753_v53  ;;  %9665 = vmatprep.subr.bf16.mxu1 %v9664_v35  ;;  %v4212_v22 = vsub.f32 %v12829_v10, %v13209_v46  ;;  %3897 = vperm.xlu0 %10176, %v3331_v48  }
 0x20b   :  { %v2129_v57 = vsub.f32 1.0, %v1553_v63  ;;  %v6479_v4 = vmul.f32 %v5903_v15, %v2699_v30  ;;  %v5333_v11 = vsub.f32 1.0, %v4757_v18  ;;  %v4214_v30 = vsub.f32 %v12834_v62, %v13209_v46  ;;  %v18573_v63 = vld [vmem:[#allocation14_spill] sm:$0xff]  ;;  %v18575_v15 = vld [vmem:[#allocation13_spill] sm:$0xff] }
 0x20c   :  { %v2701_v41 = vmax.f32 %v2125_v13, 0.0  ;;  %v6483_v29 = vmul.f32 %v5907_v8, %v2703_v61  ;;  %v5905_v40 = vmax.f32 %v5329_v25, 0.0  ;;  %v4207_v42 = vsub.f32 %v12827_v19, %v13222_v54 }
 0x20d   :  { %v2705_v28 = vmax.f32 %v2129_v57, 0.0  ;;  %v5909_v14 = vmax.f32 %v5333_v11, 0.0  ;;  %v4208_v33 = vsub.f32 %v12829_v10, %v13222_v54  ;;  %v4209_v45 = vsub.f32 %v12832_v38, %v13222_v54 }
 0x20e   :  { %v9378_v61 = vpack.c.bf16 %v6483_v29, %v6479_v4  ;;  %v6481_v49 = vmul.f32 %v5905_v40, %v2701_v41  ;;  %v4210_v20 = vsub.f32 %v12834_v62, %v13222_v54  ;;  %v18574_v13 = vsub.f32 %v10446_v16, %v18573_v63 }
 0x20f   :  { %v6485_v35 = vmul.f32 %v5909_v14, %v2705_v28  ;;  %v18576_v18 = vsub.f32 %v10446_v16, %v18575_v15  ;;  %v4760_v57 = vand.u32 2147483647, %v4184_v12  ;;  %v4764_v41 = vand.u32 2147483647, %v4188_v50 }
 0x210   :  { %v1556_v53 = vand.u32 2147483647, %v18574_v13  ;;  %9379 = vmatpush1.bf16.msra.mxu0 %v9378_v61  ;;  %v18577_v4 = vsub.f32 %v18563_v37, %v18573_v63  ;;  %v18578_v51 = vsub.f32 %v18563_v37, %v18575_v15  ;;  %v4762_v61 = vand.u32 2147483647, %v4186_v58 }
 0x211   :  { %v1560_v8 = vand.u32 2147483647, %v18576_v18  ;;  %v9666_v28 = vpack.c.bf16 %v6485_v35, %v6481_v49  ;;  %v5336_v12 = vsub.f32 1.0, %v4760_v57  ;;  %v5340_v14 = vsub.f32 1.0, %v4764_v41 }
 0x212   :  { %v2132_v25 = vsub.f32 1.0, %v1556_v53  ;;  %v1558_v11 = vand.u32 2147483647, %v18577_v4  ;;  %v1562_v48 = vand.u32 2147483647, %v18578_v51  ;;  %v5338_v35 = vsub.f32 1.0, %v4762_v61 }
 0x213   :  { %v2136_v40 = vsub.f32 1.0, %v1560_v8  ;;  %9667 = vmatpush1.bf16.msra.mxu1 %v9666_v28  ;;  %v5912_v4 = vmax.f32 %v5336_v12, 0.0  ;;  %v5916_v21 = vmax.f32 %v5340_v14, 0.0  ;;  %v4766_v51 = vand.u32 2147483647, %v4190_v59 }
 0x214   :  { %v2708_v13 = vmax.f32 %v2132_v25, 0.0  ;;  %v2134_v18 = vsub.f32 1.0, %v1558_v11  ;;  %v2138_v50 = vsub.f32 1.0, %v1562_v48  ;;  %v18579_v8 = vsub.f32 %v18567_v2, %v18573_v63 }
 0x215   :  { %v2712_v53 = vmax.f32 %v2136_v40, 0.0  ;;  %v5342_v11 = vsub.f32 1.0, %v4766_v51  ;;  %v18580_v58 = vsub.f32 %v18567_v2, %v18575_v15  ;;  %v5914_v28 = vmax.f32 %v5338_v35, 0.0 }
 0x216   :  { %v2710_v29 = vmax.f32 %v2134_v18, 0.0  ;;  %v2714_v49 = vmax.f32 %v2138_v50, 0.0  ;;  %v1555_v57 = vand.u32 2147483647, %v18579_v8  ;;  %v6488_v41 = vmul.f32 %v5912_v4, %v2708_v13 }
 0x217   :  { %v6492_v25 = vmul.f32 %v5916_v21, %v2712_v53  ;;  %v1559_v48 = vand.u32 2147483647, %v18580_v58  ;;  %v4759_v59 = vand.u32 2147483647, %v4183_v32  ;;  %v4763_v12 = vand.u32 2147483647, %v4187_v26 }
 0x218   :  { %v2131_v40 = vsub.f32 1.0, %v1555_v57  ;;  %v5918_v18 = vmax.f32 %v5342_v11, 0.0  ;;  %v18581_v21 = vsub.f32 %v18570_v9, %v18573_v63  ;;  %v6490_v61 = vmul.f32 %v5914_v28, %v2710_v29  ;;  %v13296_v11 = vpop.permute.xlu0 %3517 }
 0x219   :  { %v9380_v14 = vpack.c.bf16 %v6492_v25, %v6488_v41  ;;  %v2135_v50 = vsub.f32 1.0, %v1559_v48  ;;  %v5335_v4 = vsub.f32 1.0, %v4759_v59  ;;  %v5339_v51 = vsub.f32 1.0, %v4763_v12 }
 0x21a   :  { %v1557_v13 = vand.u32 2147483647, %v18581_v21  ;;  %v2707_v53 = vmax.f32 %v2131_v40, 0.0  ;;  %v6494_v35 = vmul.f32 %v5918_v18, %v2714_v49  ;;  %v18582_v32 = vsub.f32 %v18570_v9, %v18575_v15 }
 0x21b   :  { %9381 = vmatprep.subr.bf16.mxu0 %v9380_v14  ;;  %v2711_v8 = vmax.f32 %v2135_v50, 0.0  ;;  %v5911_v26 = vmax.f32 %v5335_v4, 0.0  ;;  %v5915_v41 = vmax.f32 %v5339_v51, 0.0  ;;  %v4761_v25 = vand.u32 2147483647, %v4185_v39  ;;  %v18584_v51 = vld [vmem:[#allocation16_spill] sm:$0xff] }
 0x21c   :  { %v1561_v57 = vand.u32 2147483647, %v18582_v32  ;;  %v2133_v58 = vsub.f32 1.0, %v1557_v13  ;;  %v18583_v63 = vsub.f32 %v12832_v38, %v12996_v31  ;;  %v9668_v48 = vpack.c.bf16 %v6494_v35, %v6490_v61  ;;  %v18586_v32 = vld [vmem:[#allocation15_spill] sm:$0xff] }
 0x21d   :  { %v4220_v15 = vsub.f32 %v12829_v10, %v13242_v6  ;;  %v6487_v40 = vmul.f32 %v5911_v26, %v2707_v53  ;;  %v6491_v59 = vmul.f32 %v5915_v41, %v2711_v8  ;;  %v5337_v12 = vsub.f32 1.0, %v4761_v25  ;;  %v3334_v26 = vld [vmem:[%s17901_s3 + $0x318] sm:$0xff]  ;;  %v3333_v41 = vld [vmem:[%s17901_s3 + $0x310] sm:$0xff] }
 0x21e   :  { %v4765_v29 = vand.u32 2147483647, %v18583_v63  ;;  %v2137_v49 = vsub.f32 1.0, %v1561_v57  ;;  %v2709_v28 = vmax.f32 %v2133_v58, 0.0  ;;  %9669 = vmatprep.subr.bf16.mxu1 %v9668_v48  ;;  %v4221_v60 = vsub.f32 %v12832_v38, %v13242_v6  ;;  %3912 = vperm.xlu1 %10177, %v3334_v26  }
 0x21f   :  { %v4222_v31 = vsub.f32 %v12834_v62, %v13242_v6  ;;  %v4215_v39 = vsub.f32 %v12827_v19, %v13296_v11  ;;  %v9382_v50 = vpack.c.bf16 %v6491_v59, %v6487_v40  ;;  %v5913_v21 = vmax.f32 %v5337_v12, 0.0  ;;  %3907 = vperm.xlu0 %10176, %v3333_v41  }
 0x220   :  { %v5341_v14 = vsub.f32 1.0, %v4765_v29  ;;  %v2713_v18 = vmax.f32 %v2137_v49, 0.0  ;;  %v4216_v61 = vsub.f32 %v12829_v10, %v13296_v11  ;;  %v4217_v53 = vsub.f32 %v12832_v38, %v13296_v11 }
 0x221   :  { %v4218_v4 = vsub.f32 %v12834_v62, %v13296_v11  ;;  %v18585_v35 = vsub.f32 %v10446_v16, %v18584_v51  ;;  %v18587_v57 = vsub.f32 %v10446_v16, %v18586_v32  ;;  %9383 = vmatpush1.bf16.msra.mxu0 %v9382_v50  ;;  %v6489_v25 = vmul.f32 %v5913_v21, %v2709_v28 }
 0x222   :  { %v5917_v13 = vmax.f32 %v5341_v14, 0.0  ;;  %v4768_v29 = vand.u32 2147483647, %v4192_v36  ;;  %v4772_v48 = vand.u32 2147483647, %v4196_v24  ;;  %v18588_v59 = vsub.f32 %v18563_v37, %v18584_v51 }
 0x223   :  { %v1564_v8 = vand.u32 2147483647, %v18585_v35  ;;  %v1568_v58 = vand.u32 2147483647, %v18587_v57  ;;  %v18589_v14 = vsub.f32 %v18563_v37, %v18586_v32  ;;  %v4770_v36 = vand.u32 2147483647, %v4194_v44 }
 0x224   :  { %v6493_v63 = vmul.f32 %v5917_v13, %v2713_v18  ;;  %v1566_v12 = vand.u32 2147483647, %v18588_v59  ;;  %v5344_v50 = vsub.f32 1.0, %v4768_v29  ;;  %v5348_v21 = vsub.f32 1.0, %v4772_v48 }
 0x225   :  { %v2140_v49 = vsub.f32 1.0, %v1564_v8  ;;  %v2144_v40 = vsub.f32 1.0, %v1568_v58  ;;  %v1570_v28 = vand.u32 2147483647, %v18589_v14  ;;  %v4774_v26 = vand.u32 2147483647, %v4198_v43 }
 0x226   :  { %v9670_v18 = vpack.c.bf16 %v6493_v63, %v6489_v25  ;;  %v2142_v35 = vsub.f32 1.0, %v1566_v12  ;;  %v5920_v57 = vmax.f32 %v5344_v50, 0.0  ;;  %v5924_v58 = vmax.f32 %v5348_v21, 0.0 }
 0x227   :  { %v2716_v24 = vmax.f32 %v2140_v49, 0.0  ;;  %v2720_v13 = vmax.f32 %v2144_v40, 0.0  ;;  %v2146_v8 = vsub.f32 1.0, %v1570_v28  ;;  %v5346_v59 = vsub.f32 1.0, %v4770_v36 }
 0x228   :  { %9671 = vmatpush1.bf16.msra.mxu1 %v9670_v18  ;;  %v2718_v41 = vmax.f32 %v2142_v35, 0.0  ;;  %v18590_v63 = vsub.f32 %v18567_v2, %v18584_v51  ;;  %v18591_v44 = vsub.f32 %v18567_v2, %v18586_v32  ;;  %v5350_v12 = vsub.f32 1.0, %v4774_v26 }
 0x229   :  { %v2722_v25 = vmax.f32 %v2146_v8, 0.0  ;;  %v6496_v49 = vmul.f32 %v5920_v57, %v2716_v24  ;;  %v6500_v40 = vmul.f32 %v5924_v58, %v2720_v13  ;;  %v5922_v14 = vmax.f32 %v5346_v59, 0.0  ;;  %v13357_v13 = vpop.permute.xlu1 %3532 }
 0x22a   :  { %v1563_v29 = vand.u32 2147483647, %v18590_v63  ;;  %v1567_v48 = vand.u32 2147483647, %v18591_v44  ;;  %v4767_v43 = vand.u32 2147483647, %v4191_v55  ;;  %v18592_v50 = vsub.f32 %v12827_v19, %v13048_v3 }
 0x22b   :  { %v9384_v36 = vpack.c.bf16 %v6500_v40, %v6496_v49  ;;  %v5926_v35 = vmax.f32 %v5350_v12, 0.0  ;;  %v6498_v8 = vmul.f32 %v5922_v14, %v2718_v41  ;;  %v18593_v63 = vsub.f32 %v18570_v9, %v18584_v51 }
 0x22c   :  { %v2139_v28 = vsub.f32 1.0, %v1563_v29  ;;  %v2143_v18 = vsub.f32 1.0, %v1567_v48  ;;  %v4771_v21 = vand.u32 2147483647, %v18592_v50  ;;  %v5343_v26 = vsub.f32 1.0, %v4767_v43 }
 0x22d   :  { %v1565_v24 = vand.u32 2147483647, %v18593_v63  ;;  %9385 = vmatprep.subr.bf16.mxu0 %v9384_v36  ;;  %v6502_v29 = vmul.f32 %v5926_v35, %v2722_v25  ;;  %v18594_v55 = vsub.f32 %v18570_v9, %v18586_v32  ;;  %v4769_v41 = vand.u32 2147483647, %v4193_v1  ;;  %v13370_v32 = vpop.permute.xlu0 %3527 }
 0x22e   :  { %v2715_v57 = vmax.f32 %v2139_v28, 0.0  ;;  %v2719_v58 = vmax.f32 %v2143_v18, 0.0  ;;  %v5347_v59 = vsub.f32 1.0, %v4771_v21  ;;  %v5919_v49 = vmax.f32 %v5343_v26, 0.0 }
 0x22f   :  { %v1569_v44 = vand.u32 2147483647, %v18594_v55  ;;  %v2141_v48 = vsub.f32 1.0, %v1565_v24  ;;  %v4773_v40 = vand.u32 2147483647, %v4197_v27  ;;  %v4227_v12 = vsub.f32 %v12827_v19, %v13357_v13 }
 0x230   :  { %v5923_v51 = vmax.f32 %v5347_v59, 0.0  ;;  %v9672_v14 = vpack.c.bf16 %v6502_v29, %v6498_v8  ;;  %v5345_v18 = vsub.f32 1.0, %v4769_v41  ;;  %v6495_v43 = vmul.f32 %v5919_v49, %v2715_v57  ;;  %v13382_v57 = vpop.permute.xlu1 %3542  ;;  %v18595_v29 = vld [vmem:[#allocation18_spill] sm:$0xff]  ;;  %v18597_v41 = vld [vmem:[#allocation17_spill] sm:$0xff] }
 0x231   :  { %v2145_v25 = vsub.f32 1.0, %v1569_v44  ;;  %v2717_v28 = vmax.f32 %v2141_v48, 0.0  ;;  %v5349_v21 = vsub.f32 1.0, %v4773_v40  ;;  %v4228_v5 = vsub.f32 %v12829_v10, %v13357_v13 }
 0x232   :  { %v6499_v50 = vmul.f32 %v5923_v51, %v2719_v58  ;;  %9673 = vmatprep.subr.bf16.mxu1 %v9672_v14  ;;  %v5921_v36 = vmax.f32 %v5345_v18, 0.0  ;;  %v4230_v27 = vsub.f32 %v12834_v62, %v13357_v13  ;;  %v4223_v63 = vsub.f32 %v12827_v19, %v13370_v32 }
 0x233   :  { %v2721_v1 = vmax.f32 %v2145_v25, 0.0  ;;  %v5925_v8 = vmax.f32 %v5349_v21, 0.0  ;;  %v4224_v24 = vsub.f32 %v12829_v10, %v13370_v32  ;;  %v4226_v59 = vsub.f32 %v12834_v62, %v13370_v32 }
 0x234   :  { %v9386_v35 = vpack.c.bf16 %v6499_v50, %v6495_v43  ;;  %v6497_v58 = vmul.f32 %v5921_v36, %v2717_v28  ;;  %v18596_v55 = vsub.f32 %v10446_v16, %v18595_v29  ;;  %v18598_v49 = vsub.f32 %v10446_v16, %v18597_v41 }
 0x235   :  { %v6501_v48 = vmul.f32 %v5925_v8, %v2721_v1  ;;  %v4776_v40 = vand.u32 2147483647, %v4200_v34  ;;  %v4780_v14 = vand.u32 2147483647, %v4204_v47  ;;  %v18599_v28 = vsub.f32 %v18563_v37, %v18595_v29  ;;  %v3336_v47 = vld [vmem:[%s17901_s3 + $0x328] sm:$0xff]  ;;  %v3335_v8 = vld [vmem:[%s17901_s3 + $0x320] sm:$0xff] }
 0x236   :  { %v1572_v44 = vand.u32 2147483647, %v18596_v55  ;;  %9387 = vmatpush1.bf16.msra.mxu0 %v9386_v35  ;;  %v1576_v51 = vand.u32 2147483647, %v18598_v49  ;;  %v18600_v43 = vsub.f32 %v18563_v37, %v18597_v41  ;;  %3922 = vperm.xlu1 %10177, %v3336_v47   ;;  %v18603_v47 = vsub.f32 %v12827_v19, %v13140_v0 }
 0x237   :  { %v1574_v18 = vand.u32 2147483647, %v18599_v28  ;;  %v9674_v1 = vpack.c.bf16 %v6501_v48, %v6497_v58  ;;  %v5352_v35 = vsub.f32 1.0, %v4776_v40  ;;  %v5356_v34 = vsub.f32 1.0, %v4780_v14  ;;  %3917 = vperm.xlu0 %10176, %v3335_v8  }
 0x238   :  { %v2148_v25 = vsub.f32 1.0, %v1572_v44  ;;  %v1578_v50 = vand.u32 2147483647, %v18600_v43  ;;  %v2152_v36 = vsub.f32 1.0, %v1576_v51  ;;  %v4778_v28 = vand.u32 2147483647, %v4202_v52 }
 0x239   :  { %v2150_v44 = vsub.f32 1.0, %v1574_v18  ;;  %9675 = vmatpush1.bf16.msra.mxu1 %v9674_v1  ;;  %v5928_v48 = vmax.f32 %v5352_v35, 0.0  ;;  %v5932_v51 = vmax.f32 %v5356_v34, 0.0  ;;  %v4782_v40 = vand.u32 2147483647, %v4206_v56 }
 0x23a   :  { %v2724_v55 = vmax.f32 %v2148_v25, 0.0  ;;  %v2154_v49 = vsub.f32 1.0, %v1578_v50  ;;  %v2728_v58 = vmax.f32 %v2152_v36, 0.0  ;;  %v5354_v21 = vsub.f32 1.0, %v4778_v28 }
 0x23b   :  { %v2726_v14 = vmax.f32 %v2150_v44, 0.0  ;;  %v18601_v25 = vsub.f32 %v18567_v2, %v18595_v29  ;;  %v5358_v52 = vsub.f32 1.0, %v4782_v40  ;;  %v18602_v1 = vsub.f32 %v18567_v2, %v18597_v41 }
 0x23c   :  { %v2730_v43 = vmax.f32 %v2154_v49, 0.0  ;;  %v6504_v50 = vmul.f32 %v5928_v48, %v2724_v55  ;;  %v6508_v3 = vmul.f32 %v5932_v51, %v2728_v58  ;;  %v5930_v35 = vmax.f32 %v5354_v21, 0.0 }
 0x23d   :  { %v1571_v18 = vand.u32 2147483647, %v18601_v25  ;;  %v1575_v36 = vand.u32 2147483647, %v18602_v1  ;;  %v4775_v56 = vand.u32 2147483647, %v4199_v7  ;;  %v18604_v55 = vsub.f32 %v18570_v9, %v18595_v29 }
 0x23e   :  { %v4779_v8 = vand.u32 2147483647, %v18603_v47  ;;  %v9388_v44 = vpack.c.bf16 %v6508_v3, %v6504_v50  ;;  %v5934_v49 = vmax.f32 %v5358_v52, 0.0  ;;  %v6506_v48 = vmul.f32 %v5930_v35, %v2726_v14 }
 0x23f   :  { %v2147_v34 = vsub.f32 1.0, %v1571_v18  ;;  %v2151_v28 = vsub.f32 1.0, %v1575_v36  ;;  %v1573_v58 = vand.u32 2147483647, %v18604_v55  ;;  %v5351_v40 = vsub.f32 1.0, %v4775_v56  ;;  %v13444_v36 = vpop.permute.xlu0 %3537 }
 0x240   :  { %v5355_v21 = vsub.f32 1.0, %v4779_v8  ;;  %9389 = vmatprep.subr.bf16.mxu0 %v9388_v44  ;;  %v6510_v25 = vmul.f32 %v5934_v49, %v2730_v43  ;;  %v18605_v7 = vsub.f32 %v18570_v9, %v18597_v41  ;;  %v18606_v50 = vsub.f32 %v12832_v38, %v13156_v17 }
 0x241   :  { %v2723_v51 = vmax.f32 %v2147_v34, 0.0  ;;  %v2727_v18 = vmax.f32 %v2151_v28, 0.0  ;;  %v2149_v26 = vsub.f32 1.0, %v1573_v58  ;;  %v5927_v47 = vmax.f32 %v5351_v40, 0.0 }
 0x242   :  { %v1577_v1 = vand.u32 2147483647, %v18605_v7  ;;  %v5931_v3 = vmax.f32 %v5355_v21, 0.0  ;;  %v4777_v52 = vand.u32 2147483647, %v18606_v50  ;;  %v18607_v29 = vsub.f32 %v12832_v38, %v13140_v0 }
 0x243   :  { %v9676_v35 = vpack.c.bf16 %v6510_v25, %v6506_v48  ;;  %v2725_v34 = vmax.f32 %v2149_v26, 0.0  ;;  %v4236_v41 = vsub.f32 %v12829_v10, %v13382_v57  ;;  %v6503_v56 = vmul.f32 %v5927_v47, %v2723_v51  ;;  %v18608_v25 = vld [vmem:[#allocation20_spill] sm:$0xff] }
 0x244   :  { %v4781_v14 = vand.u32 2147483647, %v18607_v29  ;;  %v2153_v43 = vsub.f32 1.0, %v1577_v1  ;;  %v6507_v8 = vmul.f32 %v5931_v3, %v2727_v18  ;;  %v5353_v44 = vsub.f32 1.0, %v4777_v52  ;;  %v18610_v1 = vld [vmem:[#allocation19_spill] sm:$0xff] }
 0x245   :  { %9677 = vmatprep.subr.bf16.mxu1 %v9676_v35  ;;  %v4237_v17 = vsub.f32 %v12832_v38, %v13382_v57  ;;  %v4238_v0 = vsub.f32 %v12834_v62, %v13382_v57  ;;  %v4231_v55 = vsub.f32 %v12827_v19, %v13444_v36  ;;  %v4232_v51 = vsub.f32 %v12829_v10, %v13444_v36 }
 0x246   :  { %v5357_v49 = vsub.f32 1.0, %v4781_v14  ;;  %v2729_v28 = vmax.f32 %v2153_v43, 0.0  ;;  %v9390_v58 = vpack.c.bf16 %v6507_v8, %v6503_v56  ;;  %v5929_v26 = vmax.f32 %v5353_v44, 0.0 }
 0x247   :  { %v4233_v40 = vsub.f32 %v12832_v38, %v13444_v36  ;;  %v4234_v21 = vsub.f32 %v12834_v62, %v13444_v36  ;;  %v18609_v18 = vsub.f32 %v10446_v16, %v18608_v25  ;;  %v18611_v47 = vsub.f32 %v10446_v16, %v18610_v1  ;;  %v3345_v36 = vld [vmem:[%s17901_s3 + $0x370] sm:$0xff] }
 0x248   :  { %v5933_v48 = vmax.f32 %v5357_v49, 0.0  ;;  %9391 = vmatpush1.bf16.msra.mxu0 %v9390_v58  ;;  %v6505_v50 = vmul.f32 %v5929_v26, %v2725_v34  ;;  %v4784_v29 = vand.u32 2147483647, %v4208_v33  ;;  %v4788_v14 = vand.u32 2147483647, %v4212_v22 }
 0x249   :  { %v1580_v7 = vand.u32 2147483647, %v18609_v18  ;;  %v1584_v3 = vand.u32 2147483647, %v18611_v47  ;;  %v18612_v56 = vsub.f32 %v18563_v37, %v18608_v25  ;;  %v18613_v44 = vsub.f32 %v18563_v37, %v18610_v1 }
 0x24a   :  { %v6509_v52 = vmul.f32 %v5933_v48, %v2729_v28  ;;  %v5360_v28 = vsub.f32 1.0, %v4784_v29  ;;  %v5364_v58 = vsub.f32 1.0, %v4788_v14  ;;  %v4786_v33 = vand.u32 2147483647, %v4210_v20 }
 0x24b   :  { %v2156_v35 = vsub.f32 1.0, %v1580_v7  ;;  %v2160_v43 = vsub.f32 1.0, %v1584_v3  ;;  %v1582_v8 = vand.u32 2147483647, %v18612_v56  ;;  %v1586_v49 = vand.u32 2147483647, %v18613_v44 }
 0x24c   :  { %v9678_v34 = vpack.c.bf16 %v6509_v52, %v6505_v50  ;;  %v5936_v7 = vmax.f32 %v5360_v28, 0.0  ;;  %v5940_v47 = vmax.f32 %v5364_v58, 0.0  ;;  %v4790_v3 = vand.u32 2147483647, %v4214_v30  ;;  %v3338_v30 = vld [vmem:[%s17901_s3 + $0x338] sm:$0xff]  ;;  %v3337_v28 = vld [vmem:[%s17901_s3 + $0x330] sm:$0xff] }
 0x24d   :  { %v2732_v26 = vmax.f32 %v2156_v35, 0.0  ;;  %v2736_v48 = vmax.f32 %v2160_v43, 0.0  ;;  %v2158_v22 = vsub.f32 1.0, %v1582_v8  ;;  %v2162_v18 = vsub.f32 1.0, %v1586_v49  ;;  %3932 = vperm.xlu1 %10177, %v3338_v30   ;;  %3927 = vperm.xlu0 %10176, %v3337_v28  }
 0x24e   :  { %9679 = vmatpush1.bf16.msra.mxu1 %v9678_v34  ;;  %v5362_v56 = vsub.f32 1.0, %v4786_v33  ;;  %v18614_v52 = vsub.f32 %v18567_v2, %v18608_v25  ;;  %v18615_v20 = vsub.f32 %v18567_v2, %v18610_v1  ;;  %v5366_v8 = vsub.f32 1.0, %v4790_v3  ;;  %v7016_v34 = vld [vmem:[%s17899_s1 + $0x8] sm:$0xff] }
 0x24f   :  { %v2734_v44 = vmax.f32 %v2158_v22, 0.0  ;;  %v2738_v50 = vmax.f32 %v2162_v18, 0.0  ;;  %v6512_v35 = vmul.f32 %v5936_v7, %v2732_v26  ;;  %v6516_v43 = vmul.f32 %v5940_v47, %v2736_v48  ;;  %7214 = vmatprep.mubr.f32.mxu0 %v7016_v34  ;;  %7989 = vmatprep.mubr.f32.mxu1 %v7016_v34 }
 0x250   :  { %v1579_v29 = vand.u32 2147483647, %v18614_v52  ;;  %v1583_v14 = vand.u32 2147483647, %v18615_v20  ;;  %v5938_v49 = vmax.f32 %v5362_v56, 0.0  ;;  %v5942_v18 = vmax.f32 %v5366_v8, 0.0  ;;  %v13508_v56 = vpop.permute.xlu1 %3552 }
 0x251   :  { %v4783_v26 = vand.u32 2147483647, %v4207_v42  ;;  %v4787_v48 = vand.u32 2147483647, %v4211_v23  ;;  %v9392_v22 = vpack.c.bf16 %v6516_v43, %v6512_v35  ;;  %v18616_v47 = vsub.f32 %v18570_v9, %v18608_v25 }
 0x252   :  { %v2155_v58 = vsub.f32 1.0, %v1579_v29  ;;  %v2159_v33 = vsub.f32 1.0, %v1583_v14  ;;  %v6514_v7 = vmul.f32 %v5938_v49, %v2734_v44  ;;  %v6518_v14 = vmul.f32 %v5942_v18, %v2738_v50 }
 0x253   :  { %v1581_v3 = vand.u32 2147483647, %v18616_v47  ;;  %v5359_v42 = vsub.f32 1.0, %v4783_v26  ;;  %v5363_v20 = vsub.f32 1.0, %v4787_v48  ;;  %9393 = vmatprep.subr.bf16.mxu0 %v9392_v22  ;;  %v18617_v23 = vsub.f32 %v18570_v9, %v18610_v1  ;;  %v13521_v1 = vpop.permute.xlu0 %3547 }
 0x254   :  { %v2731_v52 = vmax.f32 %v2155_v58, 0.0  ;;  %v2735_v29 = vmax.f32 %v2159_v33, 0.0  ;;  %v4785_v25 = vand.u32 2147483647, %v4209_v45  ;;  %v18618_v49 = vsub.f32 %v12832_v38, %v13209_v46 }
 0x255   :  { %v1585_v35 = vand.u32 2147483647, %v18617_v23  ;;  %v2157_v43 = vsub.f32 1.0, %v1581_v3  ;;  %v5935_v44 = vmax.f32 %v5359_v42, 0.0  ;;  %v5939_v8 = vmax.f32 %v5363_v20, 0.0 }
 0x256   :  { %v4789_v34 = vand.u32 2147483647, %v18618_v49  ;;  %v9680_v28 = vpack.c.bf16 %v6518_v14, %v6514_v7  ;;  %v5361_v33 = vsub.f32 1.0, %v4785_v25  ;;  %v4244_v54 = vsub.f32 %v12829_v10, %v13508_v56 }
 0x257   :  { %v2161_v50 = vsub.f32 1.0, %v1585_v35  ;;  %v2733_v58 = vmax.f32 %v2157_v43, 0.0  ;;  %v6511_v26 = vmul.f32 %v5935_v44, %v2731_v52  ;;  %v6515_v48 = vmul.f32 %v5939_v8, %v2735_v29  ;;  %v13533_v29 = vpop.permute.xlu1 %3562  ;;  %v18619_v35 = vld [vmem:[#allocation22_spill] sm:$0xff]  ;;  %v18621_v8 = vld [vmem:[#allocation21_spill] sm:$0xff] }
 0x258   :  { %v5365_v22 = vsub.f32 1.0, %v4789_v34  ;;  %9681 = vmatprep.subr.bf16.mxu1 %v9680_v28  ;;  %v5937_v18 = vmax.f32 %v5361_v33, 0.0  ;;  %v4246_v7 = vsub.f32 %v12834_v62, %v13508_v56  ;;  %v4239_v42 = vsub.f32 %v12827_v19, %v13521_v1 }
 0x259   :  { %v2737_v45 = vmax.f32 %v2161_v50, 0.0  ;;  %v9394_v47 = vpack.c.bf16 %v6515_v48, %v6511_v26  ;;  %v4240_v52 = vsub.f32 %v12829_v10, %v13521_v1  ;;  %v4242_v23 = vsub.f32 %v12834_v62, %v13521_v1 }
 0x25a   :  { %v5941_v3 = vmax.f32 %v5365_v22, 0.0  ;;  %v6513_v20 = vmul.f32 %v5937_v18, %v2733_v58  ;;  %v18620_v43 = vsub.f32 %v10446_v16, %v18619_v35  ;;  %v18622_v49 = vsub.f32 %v10446_v16, %v18621_v8 }
 0x25b   :  { %9395 = vmatpush1.bf16.msra.mxu0 %v9394_v47  ;;  %v4792_v28 = vand.u32 2147483647, %v4216_v61  ;;  %v4796_v50 = vand.u32 2147483647, %v4220_v15  ;;  %v18623_v33 = vsub.f32 %v18563_v37, %v18619_v35  ;;  %v18624_v48 = vsub.f32 %v18563_v37, %v18621_v8 }
 0x25c   :  { %v1588_v25 = vand.u32 2147483647, %v18620_v43  ;;  %v6517_v44 = vmul.f32 %v5941_v3, %v2737_v45  ;;  %v1592_v34 = vand.u32 2147483647, %v18622_v49  ;;  %v4794_v15 = vand.u32 2147483647, %v4218_v4 }
 0x25d   :  { %v1590_v26 = vand.u32 2147483647, %v18623_v33  ;;  %v1594_v22 = vand.u32 2147483647, %v18624_v48  ;;  %v5368_v3 = vsub.f32 1.0, %v4792_v28  ;;  %v5372_v61 = vsub.f32 1.0, %v4796_v50 }
 0x25e   :  { %v2164_v58 = vsub.f32 1.0, %v1588_v25  ;;  %v9682_v18 = vpack.c.bf16 %v6517_v44, %v6513_v20  ;;  %v2168_v47 = vsub.f32 1.0, %v1592_v34  ;;  %v3340_v25 = vld [vmem:[%s17901_s3 + $0x348] sm:$0xff]  ;;  %v4798_v20 = vand.u32 2147483647, %v4222_v31  ;;  %v3339_v44 = vld [vmem:[%s17901_s3 + $0x340] sm:$0xff] }
 0x25f   :  { %v2166_v49 = vsub.f32 1.0, %v1590_v26  ;;  %v2170_v46 = vsub.f32 1.0, %v1594_v22  ;;  %v5944_v48 = vmax.f32 %v5368_v3, 0.0  ;;  %v5948_v14 = vmax.f32 %v5372_v61, 0.0  ;;  %3942 = vperm.xlu1 %10177, %v3340_v25   ;;  %3937 = vperm.xlu0 %10176, %v3339_v44  }
 0x260   :  { %v2740_v43 = vmax.f32 %v2164_v58, 0.0  ;;  %9683 = vmatpush1.bf16.msra.mxu1 %v9682_v18  ;;  %v2744_v33 = vmax.f32 %v2168_v47, 0.0  ;;  %v5370_v4 = vsub.f32 1.0, %v4794_v15  ;;  %v18625_v50 = vsub.f32 %v18567_v2, %v18619_v35 }
 0x261   :  { %v2742_v34 = vmax.f32 %v2166_v49, 0.0  ;;  %v2746_v28 = vmax.f32 %v2170_v46, 0.0  ;;  %v5374_v18 = vsub.f32 1.0, %v4798_v20  ;;  %v18626_v47 = vsub.f32 %v18567_v2, %v18621_v8 }
 0x262   :  { %v1587_v58 = vand.u32 2147483647, %v18625_v50  ;;  %v6520_v26 = vmul.f32 %v5944_v48, %v2740_v43  ;;  %v6524_v22 = vmul.f32 %v5948_v14, %v2744_v33  ;;  %v5946_v3 = vmax.f32 %v5370_v4, 0.0 }
 0x263   :  { %v1591_v31 = vand.u32 2147483647, %v18626_v47  ;;  %v4791_v49 = vand.u32 2147483647, %v4215_v39  ;;  %v18627_v46 = vsub.f32 %v12827_v19, %v13242_v6  ;;  %v5950_v50 = vmax.f32 %v5374_v18, 0.0 }
 0x264   :  { %v2163_v61 = vsub.f32 1.0, %v1587_v58  ;;  %v9396_v25 = vpack.c.bf16 %v6524_v22, %v6520_v26  ;;  %v18628_v14 = vsub.f32 %v18570_v9, %v18619_v35  ;;  %v6522_v33 = vmul.f32 %v5946_v3, %v2742_v34  ;;  %v13595_v34 = vpop.permute.xlu0 %3557 }
 0x265   :  { %v4795_v15 = vand.u32 2147483647, %v18627_v46  ;;  %v2167_v44 = vsub.f32 1.0, %v1591_v31  ;;  %v5367_v20 = vsub.f32 1.0, %v4791_v49  ;;  %v6526_v58 = vmul.f32 %v5950_v50, %v2746_v28 }
 0x266   :  { %v1589_v43 = vand.u32 2147483647, %v18628_v14  ;;  %v2739_v48 = vmax.f32 %v2163_v61, 0.0  ;;  %9397 = vmatprep.subr.bf16.mxu0 %v9396_v25  ;;  %v18629_v39 = vsub.f32 %v18570_v9, %v18621_v8  ;;  %v4793_v22 = vand.u32 2147483647, %v4217_v53 }
 0x267   :  { %v5371_v4 = vsub.f32 1.0, %v4795_v15  ;;  %v2743_v47 = vmax.f32 %v2167_v44, 0.0  ;;  %v5943_v46 = vmax.f32 %v5367_v20, 0.0  ;;  %v4797_v35 = vand.u32 2147483647, %v4221_v60  ;;  %v18632_v20 = vld [vmem:[#allocation23_spill] sm:$0xff] }
 0x268   :  { %v1593_v45 = vand.u32 2147483647, %v18629_v39  ;;  %v2165_v30 = vsub.f32 1.0, %v1589_v43  ;;  %v9684_v18 = vpack.c.bf16 %v6526_v58, %v6522_v33  ;;  %v4252_v8 = vsub.f32 %v12829_v10, %v13533_v29  ;;  %v18630_v43 = vld [vmem:[#allocation24_spill] sm:$0xff] }
 0x269   :  { %v5947_v26 = vmax.f32 %v5371_v4, 0.0  ;;  %v6519_v3 = vmul.f32 %v5943_v46, %v2739_v48  ;;  %v5369_v49 = vsub.f32 1.0, %v4793_v22  ;;  %v5373_v15 = vsub.f32 1.0, %v4797_v35  ;;  %v3342_v22 = vld [vmem:[%s17901_s3 + $0x358] sm:$0xff]  ;;  %v3341_v35 = vld [vmem:[%s17901_s3 + $0x350] sm:$0xff] }
 0x26a   :  { %v2169_v28 = vsub.f32 1.0, %v1593_v45  ;;  %v2741_v31 = vmax.f32 %v2165_v30, 0.0  ;;  %9685 = vmatprep.subr.bf16.mxu1 %v9684_v18  ;;  %v4253_v11 = vsub.f32 %v12832_v38, %v13533_v29  ;;  %v4254_v6 = vsub.f32 %v12834_v62, %v13533_v29  ;;  %3952 = vperm.xlu1 %10177, %v3342_v22  }
 0x26b   :  { %v6523_v61 = vmul.f32 %v5947_v26, %v2743_v47  ;;  %v4247_v60 = vsub.f32 %v12827_v19, %v13595_v34  ;;  %v5945_v30 = vmax.f32 %v5369_v49, 0.0  ;;  %v5949_v45 = vmax.f32 %v5373_v15, 0.0  ;;  %3947 = vperm.xlu0 %10176, %v3341_v35  }
 0x26c   :  { %v2745_v25 = vmax.f32 %v2169_v28, 0.0  ;;  %v4248_v50 = vsub.f32 %v12829_v10, %v13595_v34  ;;  %v4249_v44 = vsub.f32 %v12832_v38, %v13595_v34  ;;  %v4250_v14 = vsub.f32 %v12834_v62, %v13595_v34 }
 0x26d   :  { %v9398_v53 = vpack.c.bf16 %v6523_v61, %v6519_v3  ;;  %v18631_v33 = vsub.f32 %v10446_v16, %v18630_v43  ;;  %v18633_v4 = vsub.f32 %v10446_v16, %v18632_v20  ;;  %v6521_v47 = vmul.f32 %v5945_v30, %v2741_v31 }
 0x26e   :  { %v6525_v39 = vmul.f32 %v5949_v45, %v2745_v25  ;;  %v4800_v46 = vand.u32 2147483647, %v4224_v24  ;;  %v4804_v26 = vand.u32 2147483647, %v4228_v5  ;;  %v18634_v31 = vsub.f32 %v18563_v37, %v18630_v43 }
 0x26f   :  { %v1596_v48 = vand.u32 2147483647, %v18631_v33  ;;  %v1600_v58 = vand.u32 2147483647, %v18633_v4  ;;  %9399 = vmatpush1.bf16.msra.mxu0 %v9398_v53  ;;  %v18635_v24 = vsub.f32 %v18563_v37, %v18632_v20  ;;  %v4802_v25 = vand.u32 2147483647, %v4226_v59 }
 0x270   :  { %v1598_v3 = vand.u32 2147483647, %v18634_v31  ;;  %v9686_v5 = vpack.c.bf16 %v6525_v39, %v6521_v47  ;;  %v5376_v49 = vsub.f32 1.0, %v4800_v46  ;;  %v5380_v15 = vsub.f32 1.0, %v4804_v26 }
 0x271   :  { %v2172_v18 = vsub.f32 1.0, %v1596_v48  ;;  %v2176_v28 = vsub.f32 1.0, %v1600_v58  ;;  %v1602_v61 = vand.u32 2147483647, %v18635_v24  ;;  %v4806_v58 = vand.u32 2147483647, %v4230_v27 }
 0x272   :  { %v2174_v45 = vsub.f32 1.0, %v1598_v3  ;;  %9687 = vmatpush1.bf16.msra.mxu1 %v9686_v5  ;;  %v5952_v48 = vmax.f32 %v5376_v49, 0.0  ;;  %v5956_v4 = vmax.f32 %v5380_v15, 0.0  ;;  %v5378_v22 = vsub.f32 1.0, %v4802_v25 }
 0x273   :  { %v2748_v53 = vmax.f32 %v2172_v18, 0.0  ;;  %v2752_v30 = vmax.f32 %v2176_v28, 0.0  ;;  %v2178_v33 = vsub.f32 1.0, %v1602_v61  ;;  %v18636_v39 = vsub.f32 %v18567_v2, %v18630_v43 }
 0x274   :  { %v2750_v35 = vmax.f32 %v2174_v45, 0.0  ;;  %v18637_v59 = vsub.f32 %v18567_v2, %v18632_v20  ;;  %v5382_v31 = vsub.f32 1.0, %v4806_v58  ;;  %v5954_v3 = vmax.f32 %v5378_v22, 0.0 }
 0x275   :  { %v2754_v47 = vmax.f32 %v2178_v33, 0.0  ;;  %v1595_v46 = vand.u32 2147483647, %v18636_v39  ;;  %v6528_v18 = vmul.f32 %v5952_v48, %v2748_v53  ;;  %v6532_v28 = vmul.f32 %v5956_v4, %v2752_v30  ;;  %v13656_v30 = vpop.permute.xlu1 %3572 }
 0x276   :  { %v1599_v26 = vand.u32 2147483647, %v18637_v59  ;;  %v4799_v27 = vand.u32 2147483647, %v4223_v63  ;;  %v4803_v5 = vand.u32 2147483647, %v4227_v12  ;;  %v6530_v25 = vmul.f32 %v5954_v3, %v2750_v35 }
 0x277   :  { %v2171_v24 = vsub.f32 1.0, %v1595_v46  ;;  %v9400_v49 = vpack.c.bf16 %v6532_v28, %v6528_v18  ;;  %v5958_v15 = vmax.f32 %v5382_v31, 0.0  ;;  %v18638_v45 = vsub.f32 %v18570_v9, %v18630_v43 }
 0x278   :  { %v2175_v61 = vsub.f32 1.0, %v1599_v26  ;;  %v5375_v4 = vsub.f32 1.0, %v4799_v27  ;;  %v5379_v58 = vsub.f32 1.0, %v4803_v5  ;;  %v18639_v63 = vsub.f32 %v18570_v9, %v18632_v20  ;;  %v13669_v20 = vpop.permute.xlu0 %3567 }
 0x279   :  { %v1597_v53 = vand.u32 2147483647, %v18638_v45  ;;  %v2747_v33 = vmax.f32 %v2171_v24, 0.0  ;;  %9401 = vmatprep.subr.bf16.mxu0 %v9400_v49  ;;  %v6534_v22 = vmul.f32 %v5958_v15, %v2754_v47  ;;  %v18640_v35 = vsub.f32 %v12832_v38, %v13370_v32  ;;  %v3344_v45 = vld [vmem:[%s17901_s3 + $0x368] sm:$0xff] }
 0x27a   :  { %v2751_v48 = vmax.f32 %v2175_v61, 0.0  ;;  %v1601_v39 = vand.u32 2147483647, %v18639_v63  ;;  %v5951_v59 = vmax.f32 %v5375_v4, 0.0  ;;  %v5955_v43 = vmax.f32 %v5379_v58, 0.0  ;;  %3962 = vperm.xlu1 %10177, %v3344_v45  }
 0x27b   :  { %v2173_v12 = vsub.f32 1.0, %v1597_v53  ;;  %v4801_v46 = vand.u32 2147483647, %v18640_v35  ;;  %v18641_v26 = vsub.f32 %v12832_v38, %v13357_v13  ;;  %v9688_v31 = vpack.c.bf16 %v6534_v22, %v6530_v25  ;;  %v3343_v53 = vld [vmem:[%s17901_s3 + $0x360] sm:$0xff]  ;;  %v13687_v22 = vpop.permute.xlu1 %3582  ;;  %v18642_v35 = vld [vmem:[#allocation26_spill] sm:$0xff] }
 0x27c   :  { %v2177_v47 = vsub.f32 1.0, %v1601_v39  ;;  %v6527_v61 = vmul.f32 %v5951_v59, %v2747_v33  ;;  %v6531_v27 = vmul.f32 %v5955_v43, %v2751_v48  ;;  %v4260_v32 = vsub.f32 %v12829_v10, %v13656_v30  ;;  %3957 = vperm.xlu0 %10176, %v3343_v53  }
 0x27d   :  { %v4805_v18 = vand.u32 2147483647, %v18641_v26  ;;  %v2749_v3 = vmax.f32 %v2173_v12, 0.0  ;;  %v5377_v24 = vsub.f32 1.0, %v4801_v46  ;;  %9689 = vmatprep.subr.bf16.mxu1 %v9688_v31  ;;  %v4262_v25 = vsub.f32 %v12834_v62, %v13656_v30  ;;  %v18644_v26 = vld [vmem:[#allocation25_spill] sm:$0xff] }
 0x27e   :  { %v2753_v49 = vmax.f32 %v2177_v47, 0.0  ;;  %v9402_v33 = vpack.c.bf16 %v6531_v27, %v6527_v61  ;;  %v4255_v4 = vsub.f32 %v12827_v19, %v13669_v20  ;;  %v4256_v58 = vsub.f32 %v12829_v10, %v13669_v20 }
 0x27f   :  { %v5381_v5 = vsub.f32 1.0, %v4805_v18  ;;  %v5953_v15 = vmax.f32 %v5377_v24, 0.0  ;;  %v4258_v12 = vsub.f32 %v12834_v62, %v13669_v20  ;;  %v18643_v46 = vsub.f32 %v10446_v16, %v18642_v35 }
 0x280   :  { %9403 = vmatpush1.bf16.msra.mxu0 %v9402_v33  ;;  %v18645_v18 = vsub.f32 %v10446_v16, %v18644_v26  ;;  %v4808_v47 = vand.u32 2147483647, %v4232_v51  ;;  %v18646_v61 = vsub.f32 %v18563_v37, %v18642_v35  ;;  %3967 = vperm.xlu0 %10176, %v3345_v36   ;;  %v18655_v36 = vld [vmem:[#allocation30_spill] sm:$0xff] }
 0x281   :  { %v5957_v48 = vmax.f32 %v5381_v5, 0.0  ;;  %v6529_v63 = vmul.f32 %v5953_v15, %v2749_v3  ;;  %v1604_v59 = vand.u32 2147483647, %v18643_v46  ;;  %v4812_v3 = vand.u32 2147483647, %v4236_v41 }
 0x282   :  { %v1608_v31 = vand.u32 2147483647, %v18645_v18  ;;  %v1606_v27 = vand.u32 2147483647, %v18646_v61  ;;  %v18647_v5 = vsub.f32 %v18563_v37, %v18644_v26  ;;  %v4267_v15 = vsub.f32 %v12827_v19, %v13687_v22 }
 0x283   :  { %v6533_v43 = vmul.f32 %v5957_v48, %v2753_v49  ;;  %v2180_v24 = vsub.f32 1.0, %v1604_v59  ;;  %v5384_v33 = vsub.f32 1.0, %v4808_v47  ;;  %v5388_v51 = vsub.f32 1.0, %v4812_v3 }
 0x284   :  { %v1610_v49 = vand.u32 2147483647, %v18647_v5  ;;  %v2184_v53 = vsub.f32 1.0, %v1608_v31  ;;  %v2182_v46 = vsub.f32 1.0, %v1606_v27  ;;  %v4810_v41 = vand.u32 2147483647, %v4234_v21 }
 0x285   :  { %v9690_v45 = vpack.c.bf16 %v6533_v43, %v6529_v63  ;;  %v2756_v48 = vmax.f32 %v2180_v24, 0.0  ;;  %v5960_v61 = vmax.f32 %v5384_v33, 0.0  ;;  %v5964_v13 = vmax.f32 %v5388_v51, 0.0 }
 0x286   :  { %v2186_v18 = vsub.f32 1.0, %v1610_v49  ;;  %v2760_v59 = vmax.f32 %v2184_v53, 0.0  ;;  %v4814_v5 = vand.u32 2147483647, %v4238_v0  ;;  %v2758_v39 = vmax.f32 %v2182_v46, 0.0 }
 0x287   :  { %9691 = vmatpush1.bf16.msra.mxu1 %v9690_v45  ;;  %v5386_v43 = vsub.f32 1.0, %v4810_v41  ;;  %v18648_v31 = vsub.f32 %v18567_v2, %v18642_v35  ;;  %v6536_v3 = vmul.f32 %v5960_v61, %v2756_v48  ;;  %v18649_v21 = vsub.f32 %v18567_v2, %v18644_v26 }
 0x288   :  { %v2762_v63 = vmax.f32 %v2186_v18, 0.0  ;;  %v6540_v24 = vmul.f32 %v5964_v13, %v2760_v59  ;;  %v5390_v27 = vsub.f32 1.0, %v4814_v5  ;;  %v4807_v0 = vand.u32 2147483647, %v4231_v55 }
 0x289   :  { %v1603_v47 = vand.u32 2147483647, %v18648_v31  ;;  %v1607_v49 = vand.u32 2147483647, %v18649_v21  ;;  %v5962_v45 = vmax.f32 %v5386_v43, 0.0  ;;  %v18650_v33 = vsub.f32 %v12827_v19, %v13382_v57 }
 0x28a   :  { %v9404_v46 = vpack.c.bf16 %v6540_v24, %v6536_v3  ;;  %v5966_v18 = vmax.f32 %v5390_v27, 0.0  ;;  %v18651_v13 = vsub.f32 %v18570_v9, %v18642_v35  ;;  %v5383_v5 = vsub.f32 1.0, %v4807_v0 }
 0x28b   :  { %v2179_v53 = vsub.f32 1.0, %v1603_v47  ;;  %v4811_v51 = vand.u32 2147483647, %v18650_v33  ;;  %v2183_v41 = vsub.f32 1.0, %v1607_v49  ;;  %v6538_v59 = vmul.f32 %v5962_v45, %v2758_v39  ;;  %v13745_v45 = vpop.permute.xlu0 %3577 }
 0x28c   :  { %v1605_v48 = vand.u32 2147483647, %v18651_v13  ;;  %9405 = vmatprep.subr.bf16.mxu0 %v9404_v46  ;;  %v6542_v31 = vmul.f32 %v5966_v18, %v2762_v63  ;;  %v18652_v55 = vsub.f32 %v18570_v9, %v18644_v26  ;;  %v5959_v33 = vmax.f32 %v5383_v5, 0.0  ;;  %v3346_v26 = vld [vmem:[%s17901_s3 + $0x378] sm:$0xff] }
 0x28d   :  { %v2755_v61 = vmax.f32 %v2179_v53, 0.0  ;;  %v5387_v43 = vsub.f32 1.0, %v4811_v51  ;;  %v2759_v47 = vmax.f32 %v2183_v41, 0.0  ;;  %v4809_v24 = vand.u32 2147483647, %v4233_v40  ;;  %3972 = vperm.xlu1 %10177, %v3346_v26  }
 0x28e   :  { %v1609_v21 = vand.u32 2147483647, %v18652_v55  ;;  %v2181_v28 = vsub.f32 1.0, %v1605_v48  ;;  %v4813_v39 = vand.u32 2147483647, %v4237_v17  ;;  %v9692_v35 = vpack.c.bf16 %v6542_v31, %v6538_v59 }
 0x28f   :  { %v5963_v3 = vmax.f32 %v5387_v43, 0.0  ;;  %v4268_v63 = vsub.f32 %v12829_v10, %v13687_v22  ;;  %v6535_v40 = vmul.f32 %v5959_v33, %v2755_v61  ;;  %v5385_v57 = vsub.f32 1.0, %v4809_v24  ;;  %v18653_v24 = vld [vmem:[#allocation31_spill] sm:$0xff] }
 0x290   :  { %v2185_v27 = vsub.f32 1.0, %v1609_v21  ;;  %v2757_v49 = vmax.f32 %v2181_v28, 0.0  ;;  %v5389_v17 = vsub.f32 1.0, %v4813_v39  ;;  %9693 = vmatprep.subr.bf16.mxu1 %v9692_v35  ;;  %v4269_v0 = vsub.f32 %v12832_v38, %v13687_v22 }
 0x291   :  { %v6539_v53 = vmul.f32 %v5963_v3, %v2759_v47  ;;  %v4270_v51 = vsub.f32 %v12834_v62, %v13687_v22  ;;  %v4843_v46 = vand.u32 2147483647, %v4267_v15  ;;  %v5961_v41 = vmax.f32 %v5385_v57, 0.0  ;;  %v7033_v22 = vld [vmem:[%s17899_s1 + $0x90] sm:$0xff] }
 0x292   :  { %v2761_v28 = vmax.f32 %v2185_v27, 0.0  ;;  %v5965_v13 = vmax.f32 %v5389_v17, 0.0  ;;  %v4263_v48 = vsub.f32 %v12827_v19, %v13745_v45  ;;  %v4845_v59 = vand.u32 2147483647, %v4269_v0 }
 0x293   :  { %v9406_v18 = vpack.c.bf16 %v6539_v53, %v6535_v40  ;;  %v5419_v61 = vsub.f32 1.0, %v4843_v46  ;;  %v4264_v5 = vsub.f32 %v12829_v10, %v13745_v45  ;;  %v4265_v43 = vsub.f32 %v12832_v38, %v13745_v45 }
 0x294   :  { %v6537_v31 = vmul.f32 %v5961_v41, %v2757_v49  ;;  %v6541_v47 = vmul.f32 %v5965_v13, %v2761_v28  ;;  %v4266_v15 = vsub.f32 %v12834_v62, %v13745_v45  ;;  %v4839_v55 = vand.u32 2147483647, %v4263_v48 }
 0x295   :  { %9407 = vmatpush1.bf16.msra.mxu0 %v9406_v18  ;;  %v5421_v21 = vsub.f32 1.0, %v4845_v59  ;;  %v13765_v33 = vmax.f32 %v5419_v61, 0.0  ;;  %v4841_v3 = vand.u32 2147483647, %v4265_v43  ;;  %v18654_v39 = vsub.f32 %v10446_v16, %v18653_v24 }
 0x296   :  { %v9694_v27 = vpack.c.bf16 %v6541_v47, %v6537_v31  ;;  %v5415_v26 = vsub.f32 1.0, %v4839_v55  ;;  %v18656_v40 = vsub.f32 %v10446_v16, %v18655_v36  ;;  %v4816_v49 = vand.u32 2147483647, %v4240_v52 }
 0x297   :  { %v1612_v35 = vand.u32 2147483647, %v18654_v39  ;;  %v13776_v57 = vmax.f32 %v5421_v21, 0.0  ;;  %v5417_v17 = vsub.f32 1.0, %v4841_v3  ;;  %v4820_v0 = vand.u32 2147483647, %v4244_v54 }
 0x298   :  { %v1616_v53 = vand.u32 2147483647, %v18656_v40  ;;  %9695 = vmatpush1.bf16.msra.mxu1 %v9694_v27  ;;  %v13781_v46 = vmax.f32 %v5415_v26, 0.0  ;;  %v5392_v41 = vsub.f32 1.0, %v4816_v49  ;;  %v18657_v13 = vsub.f32 %v18563_v37, %v18653_v24 }
 0x299   :  { %v2188_v28 = vsub.f32 1.0, %v1612_v35  ;;  %v13786_v59 = vmax.f32 %v5417_v17, 0.0  ;;  %v5396_v61 = vsub.f32 1.0, %v4820_v0  ;;  %v18658_v43 = vsub.f32 %v18563_v37, %v18655_v36  ;;  %v3347_v0 = vld [vmem:[%s17901_s3 + $0x380] sm:$0xff] }
 0x29a   :  { %v2192_v18 = vsub.f32 1.0, %v1616_v53  ;;  %v1614_v48 = vand.u32 2147483647, %v18657_v13  ;;  %v5968_v55 = vmax.f32 %v5392_v41, 0.0  ;;  %v4818_v21 = vand.u32 2147483647, %v4242_v23  ;;  %3977 = vperm.xlu0 %10176, %v3347_v0  }
 0x29b   :  { %v2764_v52 = vmax.f32 %v2188_v28, 0.0  ;;  %v1618_v31 = vand.u32 2147483647, %v18658_v43  ;;  %v5972_v3 = vmax.f32 %v5396_v61, 0.0  ;;  %v4822_v35 = vand.u32 2147483647, %v4246_v7 }
 0x29c   :  { %v2768_v47 = vmax.f32 %v2192_v18, 0.0  ;;  %v2190_v54 = vsub.f32 1.0, %v1614_v48  ;;  %v18659_v27 = vsub.f32 %v18567_v2, %v18653_v24  ;;  %v5394_v49 = vsub.f32 1.0, %v4818_v21  ;;  %v3348_v23 = vld [vmem:[%s17901_s3 + $0x388] sm:$0xff] }
 0x29d   :  { %v2194_v39 = vsub.f32 1.0, %v1618_v31  ;;  %v6544_v40 = vmul.f32 %v5968_v55, %v2764_v52  ;;  %v18660_v17 = vsub.f32 %v18567_v2, %v18655_v36  ;;  %v5398_v41 = vsub.f32 1.0, %v4822_v35  ;;  %3982 = vperm.xlu1 %10177, %v3348_v23  }
 0x29e   :  { %v1611_v26 = vand.u32 2147483647, %v18659_v27  ;;  %v2766_v53 = vmax.f32 %v2190_v54, 0.0  ;;  %v6548_v7 = vmul.f32 %v5972_v3, %v2768_v47  ;;  %v5970_v48 = vmax.f32 %v5394_v49, 0.0 }
 0x29f   :  { %v1615_v28 = vand.u32 2147483647, %v18660_v17  ;;  %v2770_v18 = vmax.f32 %v2194_v39, 0.0  ;;  %v4815_v61 = vand.u32 2147483647, %v4239_v42  ;;  %v18661_v43 = vsub.f32 %v12827_v19, %v13508_v56  ;;  %v13818_v39 = vpop.permute.xlu1 %3592 }
 0x2a0   :  { %v2187_v13 = vsub.f32 1.0, %v1611_v26  ;;  %v9408_v55 = vpack.c.bf16 %v6548_v7, %v6544_v40  ;;  %v5974_v54 = vmax.f32 %v5398_v41, 0.0  ;;  %v18662_v47 = vsub.f32 %v18570_v9, %v18653_v24 }
 0x2a1   :  { %v2191_v52 = vsub.f32 1.0, %v1615_v28  ;;  %v4819_v31 = vand.u32 2147483647, %v18661_v43  ;;  %v6546_v35 = vmul.f32 %v5970_v48, %v2766_v53  ;;  %v5391_v26 = vsub.f32 1.0, %v4815_v61 }
 0x2a2   :  { %v2763_v21 = vmax.f32 %v2187_v13, 0.0  ;;  %v1613_v3 = vand.u32 2147483647, %v18662_v47  ;;  %9409 = vmatprep.subr.bf16.mxu0 %v9408_v55  ;;  %v6550_v17 = vmul.f32 %v5974_v54, %v2770_v18  ;;  %v18663_v42 = vsub.f32 %v18570_v9, %v18655_v36  ;;  %v13831_v36 = vpop.permute.xlu0 %3587 }
 0x2a3   :  { %v2767_v27 = vmax.f32 %v2191_v52, 0.0  ;;  %v5395_v49 = vsub.f32 1.0, %v4819_v31  ;;  %v18664_v40 = vsub.f32 %v12832_v38, %v13521_v1  ;;  %v5967_v7 = vmax.f32 %v5391_v26, 0.0 }
 0x2a4   :  { %v1617_v28 = vand.u32 2147483647, %v18663_v42  ;;  %v2189_v23 = vsub.f32 1.0, %v1613_v3  ;;  %v18665_v41 = vsub.f32 %v12832_v38, %v13508_v56  ;;  %v4275_v13 = vsub.f32 %v12827_v19, %v13818_v39 }
 0x2a5   :  { %v4817_v0 = vand.u32 2147483647, %v18664_v40  ;;  %v5971_v24 = vmax.f32 %v5395_v49, 0.0  ;;  %v9696_v48 = vpack.c.bf16 %v6550_v17, %v6546_v35  ;;  %v6543_v43 = vmul.f32 %v5967_v7, %v2763_v21 }
 0x2a6   :  { %v4821_v53 = vand.u32 2147483647, %v18665_v41  ;;  %v2193_v18 = vsub.f32 1.0, %v1617_v28  ;;  %v2765_v52 = vmax.f32 %v2189_v23, 0.0  ;;  %v4277_v56 = vsub.f32 %v12832_v38, %v13818_v39 }
 0x2a7   :  { %v5393_v61 = vsub.f32 1.0, %v4817_v0  ;;  %v6547_v31 = vmul.f32 %v5971_v24, %v2767_v27  ;;  %9697 = vmatprep.subr.bf16.mxu1 %v9696_v48  ;;  %v4851_v49 = vand.u32 2147483647, %v4275_v13  ;;  %v4271_v21 = vsub.f32 %v12827_v19, %v13831_v36  ;;  %v13841_v27 = vpop.permute.xlu1 %3602  ;;  %v18666_v13 = vld [vmem:[#allocation34_spill] sm:$0xff] }
 0x2a8   :  { %v5397_v55 = vsub.f32 1.0, %v4821_v53  ;;  %v2769_v54 = vmax.f32 %v2193_v18, 0.0  ;;  %v4853_v42 = vand.u32 2147483647, %v4277_v56  ;;  %v4273_v23 = vsub.f32 %v12832_v38, %v13831_v36  ;;  %v3350_v56 = vld [vmem:[%s17901_s3 + $0x398] sm:$0xff] }
 0x2a9   :  { %v5969_v47 = vmax.f32 %v5393_v61, 0.0  ;;  %v9410_v35 = vpack.c.bf16 %v6547_v31, %v6543_v43  ;;  %v5427_v0 = vsub.f32 1.0, %v4851_v49  ;;  %v4847_v24 = vand.u32 2147483647, %v4271_v21  ;;  %3992 = vperm.xlu1 %10177, %v3350_v56  }
 0x2aa   :  { %v5973_v26 = vmax.f32 %v5397_v55, 0.0  ;;  %v5429_v41 = vsub.f32 1.0, %v4853_v42  ;;  %v4849_v53 = vand.u32 2147483647, %v4273_v23  ;;  %v18667_v48 = vsub.f32 %v10446_v16, %v18666_v13  ;;  %v18668_v55 = vld [vmem:[#allocation33_spill] sm:$0xff] }
 0x2ab   :  { %v6545_v17 = vmul.f32 %v5969_v47, %v2765_v52  ;;  %9411 = vmatpush1.bf16.msra.mxu0 %v9410_v35  ;;  %v4283_v52 = vsub.f32 %v12827_v19, %v13841_v27  ;;  %v13854_v43 = vmax.f32 %v5427_v0, 0.0  ;;  %v5423_v31 = vsub.f32 1.0, %v4847_v24  ;;  %v3349_v35 = vld [vmem:[%s17901_s3 + $0x390] sm:$0xff] }
 0x2ac   :  { %v6549_v40 = vmul.f32 %v5973_v26, %v2769_v54  ;;  %v1620_v18 = vand.u32 2147483647, %v18667_v48  ;;  %v18669_v54 = vsub.f32 %v10446_v16, %v18668_v55  ;;  %v13865_v26 = vmax.f32 %v5429_v41, 0.0  ;;  %3987 = vperm.xlu0 %10176, %v3349_v35  }
 0x2ad   :  { %v5425_v49 = vsub.f32 1.0, %v4849_v53  ;;  %v13870_v42 = vmax.f32 %v5423_v31, 0.0  ;;  %v18670_v0 = vsub.f32 %v18563_v37, %v18666_v13  ;;  %v4830_v35 = vand.u32 2147483647, %v4254_v6 }
 0x2ae   :  { %v9698_v61 = vpack.c.bf16 %v6549_v40, %v6545_v17  ;;  %v1624_v47 = vand.u32 2147483647, %v18669_v54  ;;  %v2196_v21 = vsub.f32 1.0, %v1620_v18  ;;  %v4824_v17 = vand.u32 2147483647, %v4248_v50 }
 0x2af   :  { %v4828_v40 = vand.u32 2147483647, %v4252_v8  ;;  %v1622_v24 = vand.u32 2147483647, %v18670_v0  ;;  %v13878_v41 = vmax.f32 %v5425_v49, 0.0  ;;  %v18671_v50 = vsub.f32 %v18563_v37, %v18668_v55 }
 0x2b0   :  { %9699 = vmatpush1.bf16.msra.mxu1 %v9698_v61  ;;  %v2200_v23 = vsub.f32 1.0, %v1624_v47  ;;  %v2772_v53 = vmax.f32 %v2196_v21, 0.0  ;;  %v5400_v48 = vsub.f32 1.0, %v4824_v17  ;;  %v4826_v47 = vand.u32 2147483647, %v4250_v14 }
 0x2b1   :  { %v1626_v18 = vand.u32 2147483647, %v18671_v50  ;;  %v5404_v31 = vsub.f32 1.0, %v4828_v40  ;;  %v2198_v54 = vsub.f32 1.0, %v1622_v24  ;;  %v18672_v49 = vsub.f32 %v18567_v2, %v18666_v13 }
 0x2b2   :  { %v2776_v61 = vmax.f32 %v2200_v23, 0.0  ;;  %v5976_v8 = vmax.f32 %v5400_v48, 0.0  ;;  %v5402_v50 = vsub.f32 1.0, %v4826_v47  ;;  %v18673_v23 = vsub.f32 %v18567_v2, %v18668_v55 }
 0x2b3   :  { %v2202_v56 = vsub.f32 1.0, %v1626_v18  ;;  %v1619_v21 = vand.u32 2147483647, %v18672_v49  ;;  %v5980_v17 = vmax.f32 %v5404_v31, 0.0  ;;  %v2774_v0 = vmax.f32 %v2198_v54, 0.0 }
 0x2b4   :  { %v1623_v40 = vand.u32 2147483647, %v18673_v23  ;;  %v6552_v24 = vmul.f32 %v5976_v8, %v2772_v53  ;;  %v5406_v14 = vsub.f32 1.0, %v4830_v35  ;;  %v5978_v7 = vmax.f32 %v5402_v50, 0.0 }
 0x2b5   :  { %v2778_v3 = vmax.f32 %v2202_v56, 0.0  ;;  %v2195_v48 = vsub.f32 1.0, %v1619_v21  ;;  %v6556_v18 = vmul.f32 %v5980_v17, %v2776_v61  ;;  %v4823_v6 = vand.u32 2147483647, %v4247_v60 }
 0x2b6   :  { %v2199_v1 = vsub.f32 1.0, %v1623_v40  ;;  %v5982_v28 = vmax.f32 %v5406_v14, 0.0  ;;  %v18674_v31 = vsub.f32 %v12827_v19, %v13533_v29  ;;  %v18675_v47 = vsub.f32 %v18570_v9, %v18666_v13  ;;  %v3352_v29 = vld [vmem:[%s17901_s3 + $0x3a8] sm:$0xff] }
 0x2b7   :  { %v2771_v49 = vmax.f32 %v2195_v48, 0.0  ;;  %v9412_v8 = vpack.c.bf16 %v6556_v18, %v6552_v24  ;;  %v6554_v56 = vmul.f32 %v5978_v7, %v2774_v0  ;;  %v5399_v61 = vsub.f32 1.0, %v4823_v6  ;;  %4002 = vperm.xlu1 %10177, %v3352_v29  }
 0x2b8   :  { %v4827_v54 = vand.u32 2147483647, %v18674_v31  ;;  %v1621_v53 = vand.u32 2147483647, %v18675_v47  ;;  %v2775_v35 = vmax.f32 %v2199_v1, 0.0  ;;  %v6558_v21 = vmul.f32 %v5982_v28, %v2778_v3 }
 0x2b9   :  { %v18676_v50 = vsub.f32 %v18570_v9, %v18668_v55  ;;  %9413 = vmatprep.subr.bf16.mxu0 %v9412_v8  ;;  %v5975_v40 = vmax.f32 %v5399_v61, 0.0  ;;  %v4825_v14 = vand.u32 2147483647, %v4249_v44  ;;  %v4829_v13 = vand.u32 2147483647, %v4253_v11  ;;  %v13915_v55 = vpop.permute.xlu0 %3597  ;;  %v3351_v11 = vld [vmem:[%s17901_s3 + $0x3a0] sm:$0xff] }
 0x2ba   :  { %v5403_v17 = vsub.f32 1.0, %v4827_v54  ;;  %v2197_v23 = vsub.f32 1.0, %v1621_v53  ;;  %v4284_v1 = vsub.f32 %v12829_v10, %v13841_v27  ;;  %v9700_v3 = vpack.c.bf16 %v6558_v21, %v6554_v56  ;;  %v13932_v56 = vpop.permute.xlu1 %3612  ;;  %3997 = vperm.xlu0 %10176, %v3351_v11  }
 0x2bb   :  { %v1625_v60 = vand.u32 2147483647, %v18676_v50  ;;  %v6551_v24 = vmul.f32 %v5975_v40, %v2771_v49  ;;  %v5401_v48 = vsub.f32 1.0, %v4825_v14  ;;  %v5405_v18 = vsub.f32 1.0, %v4829_v13 }
 0x2bc   :  { %v5979_v28 = vmax.f32 %v5403_v17, 0.0  ;;  %v2773_v0 = vmax.f32 %v2197_v23, 0.0  ;;  %v4285_v34 = vsub.f32 %v12832_v38, %v13841_v27  ;;  %9701 = vmatprep.subr.bf16.mxu1 %v9700_v3  ;;  %v4286_v31 = vsub.f32 %v12834_v62, %v13841_v27 }
 0x2bd   :  { %v2201_v7 = vsub.f32 1.0, %v1625_v60  ;;  %v4859_v49 = vand.u32 2147483647, %v4283_v52  ;;  %v5977_v54 = vmax.f32 %v5401_v48, 0.0  ;;  %v5981_v47 = vmax.f32 %v5405_v18, 0.0  ;;  %v18679_v18 = vld [vmem:[#allocation38_spill] sm:$0xff] }
 0x2be   :  { %v6555_v44 = vmul.f32 %v5979_v28, %v2775_v35  ;;  %v4861_v53 = vand.u32 2147483647, %v4285_v34  ;;  %v4279_v8 = vsub.f32 %v12827_v19, %v13915_v55  ;;  %v4280_v21 = vsub.f32 %v12829_v10, %v13915_v55 }
 0x2bf   :  { %v2777_v6 = vmax.f32 %v2201_v7, 0.0  ;;  %v5435_v35 = vsub.f32 1.0, %v4859_v49  ;;  %v4281_v17 = vsub.f32 %v12832_v38, %v13915_v55  ;;  %v6553_v50 = vmul.f32 %v5977_v54, %v2773_v0 }
 0x2c0   :  { %v9414_v61 = vpack.c.bf16 %v6555_v44, %v6551_v24  ;;  %v5437_v60 = vsub.f32 1.0, %v4861_v53  ;;  %v4282_v23 = vsub.f32 %v12834_v62, %v13915_v55  ;;  %v4855_v14 = vand.u32 2147483647, %v4279_v8  ;;  %v18677_v24 = vld [vmem:[#allocation39_spill] sm:$0xff]  ;;  %v7097_v55 = vld [vmem:[%s17899_s1 + $0x290] sm:$0xff] }
 0x2c1   :  { %v6557_v52 = vmul.f32 %v5981_v47, %v2777_v6  ;;  %v13940_v40 = vmax.f32 %v5435_v35, 0.0  ;;  %v4857_v13 = vand.u32 2147483647, %v4281_v17  ;;  %v4291_v3 = vsub.f32 %v12827_v19, %v13932_v56 }
 0x2c2   :  { %9415 = vmatpush1.bf16.msra.mxu0 %v9414_v61  ;;  %v13944_v7 = vmax.f32 %v5437_v60, 0.0  ;;  %v18678_v48 = vsub.f32 %v10446_v16, %v18677_v24  ;;  %v18680_v34 = vsub.f32 %v10446_v16, %v18679_v18  ;;  %v5431_v11 = vsub.f32 1.0, %v4855_v14 }
 0x2c3   :  { %v9702_v28 = vpack.c.bf16 %v6557_v52, %v6553_v50  ;;  %v5433_v44 = vsub.f32 1.0, %v4857_v13  ;;  %v4832_v6 = vand.u32 2147483647, %v4256_v58  ;;  %v4836_v49 = vand.u32 2147483647, %v4260_v32 }
 0x2c4   :  { %v1628_v0 = vand.u32 2147483647, %v18678_v48  ;;  %v1632_v29 = vand.u32 2147483647, %v18680_v34  ;;  %v18681_v53 = vsub.f32 %v18563_v37, %v18677_v24  ;;  %v18682_v61 = vsub.f32 %v18563_v37, %v18679_v18 }
 0x2c5   :  { %9703 = vmatpush1.bf16.msra.mxu1 %v9702_v28  ;;  %v13964_v17 = vmax.f32 %v5431_v11, 0.0  ;;  %v13966_v50 = vmax.f32 %v5433_v44, 0.0  ;;  %v5408_v58 = vsub.f32 1.0, %v4832_v6  ;;  %v5412_v52 = vsub.f32 1.0, %v4836_v49 }
 0x2c6   :  { %v2204_v54 = vsub.f32 1.0, %v1628_v0  ;;  %v2208_v47 = vsub.f32 1.0, %v1632_v29  ;;  %v1630_v8 = vand.u32 2147483647, %v18681_v53  ;;  %v1634_v35 = vand.u32 2147483647, %v18682_v61 }
 0x2c7   :  { %v5984_v28 = vmax.f32 %v5408_v58, 0.0  ;;  %v5988_v48 = vmax.f32 %v5412_v52, 0.0  ;;  %v4834_v0 = vand.u32 2147483647, %v4258_v12  ;;  %v4838_v34 = vand.u32 2147483647, %v4262_v25 }
 0x2c8   :  { %v2780_v60 = vmax.f32 %v2204_v54, 0.0  ;;  %v2784_v14 = vmax.f32 %v2208_v47, 0.0  ;;  %v2206_v32 = vsub.f32 1.0, %v1630_v8  ;;  %v2210_v13 = vsub.f32 1.0, %v1634_v35 }
 0x2c9   :  { %v18683_v44 = vsub.f32 %v18567_v2, %v18677_v24  ;;  %v18684_v49 = vsub.f32 %v18567_v2, %v18679_v18  ;;  %v5410_v8 = vsub.f32 1.0, %v4834_v0  ;;  %v5414_v61 = vsub.f32 1.0, %v4838_v34 }
 0x2ca   :  { %v2782_v29 = vmax.f32 %v2206_v32, 0.0  ;;  %v2786_v11 = vmax.f32 %v2210_v13, 0.0  ;;  %v6560_v47 = vmul.f32 %v5984_v28, %v2780_v60  ;;  %v6564_v53 = vmul.f32 %v5988_v48, %v2784_v14  ;;  %v3354_v14 = vld [vmem:[%s17901_s3 + $0x3b8] sm:$0xff]  ;;  %v3353_v28 = vld [vmem:[%s17901_s3 + $0x3b0] sm:$0xff] }
 0x2cb   :  { %v1627_v6 = vand.u32 2147483647, %v18683_v44  ;;  %v1631_v54 = vand.u32 2147483647, %v18684_v49  ;;  %v4831_v25 = vand.u32 2147483647, %v4255_v4  ;;  %v18685_v58 = vsub.f32 %v12827_v19, %v13656_v30  ;;  %4012 = vperm.xlu1 %10177, %v3354_v14   ;;  %4007 = vperm.xlu0 %10176, %v3353_v28  }
 0x2cc   :  { %v9416_v32 = vpack.c.bf16 %v6564_v53, %v6560_v47  ;;  %v5986_v13 = vmax.f32 %v5410_v8, 0.0  ;;  %v5990_v44 = vmax.f32 %v5414_v61, 0.0  ;;  %v18686_v49 = vsub.f32 %v18570_v9, %v18677_v24 }
 0x2cd   :  { %v2203_v35 = vsub.f32 1.0, %v1627_v6  ;;  %v2207_v12 = vsub.f32 1.0, %v1631_v54  ;;  %v4835_v52 = vand.u32 2147483647, %v18685_v58  ;;  %v5407_v0 = vsub.f32 1.0, %v4831_v25 }
 0x2ce   :  { %v1629_v60 = vand.u32 2147483647, %v18686_v49  ;;  %9417 = vmatprep.subr.bf16.mxu0 %v9416_v32  ;;  %v6562_v6 = vmul.f32 %v5986_v13, %v2782_v29  ;;  %v6566_v54 = vmul.f32 %v5990_v44, %v2786_v11  ;;  %v18687_v24 = vsub.f32 %v18570_v9, %v18679_v18  ;;  %v14006_v11 = vpop.permute.xlu0 %3607 }
 0x2cf   :  { %v2779_v4 = vmax.f32 %v2203_v35, 0.0  ;;  %v2783_v48 = vmax.f32 %v2207_v12, 0.0  ;;  %v5411_v34 = vsub.f32 1.0, %v4835_v52  ;;  %v5983_v8 = vmax.f32 %v5407_v0, 0.0 }
 0x2d0   :  { %v1633_v47 = vand.u32 2147483647, %v18687_v24  ;;  %v2205_v53 = vsub.f32 1.0, %v1629_v60  ;;  %v18688_v58 = vsub.f32 %v12832_v38, %v13669_v20  ;;  %v18689_v35 = vsub.f32 %v12832_v38, %v13656_v30 }
 0x2d1   :  { %v5987_v61 = vmax.f32 %v5411_v34, 0.0  ;;  %v9704_v25 = vpack.c.bf16 %v6566_v54, %v6562_v6  ;;  %v4292_v29 = vsub.f32 %v12829_v10, %v13932_v56  ;;  %v6559_v18 = vmul.f32 %v5983_v8, %v2779_v4 }
 0x2d2   :  { %v4833_v49 = vand.u32 2147483647, %v18688_v58  ;;  %v4837_v12 = vand.u32 2147483647, %v18689_v35  ;;  %v2209_v52 = vsub.f32 1.0, %v1633_v47  ;;  %v2781_v32 = vmax.f32 %v2205_v53, 0.0 }
 0x2d3   :  { %v6563_v13 = vmul.f32 %v5987_v61, %v2783_v48  ;;  %9705 = vmatprep.subr.bf16.mxu1 %v9704_v25  ;;  %v4293_v20 = vsub.f32 %v12832_v38, %v13932_v56  ;;  %v4867_v28 = vand.u32 2147483647, %v4291_v3  ;;  %v4287_v4 = vsub.f32 %v12827_v19, %v14006_v11  ;;  %v7015_v58 = vld [vmem:[%s17899_s1] sm:$0xff]  ;;  %v18713_v3 = vld [vmem:[#allocation58_spill] sm:$0xff] }
 0x2d4   :  { %v5409_v44 = vsub.f32 1.0, %v4833_v49  ;;  %v5413_v60 = vsub.f32 1.0, %v4837_v12  ;;  %v2785_v14 = vmax.f32 %v2209_v52, 0.0  ;;  %v4288_v24 = vsub.f32 %v12829_v10, %v14006_v11  ;;  %v7025_v49 = vld [vmem:[%s17899_s1 + $0x50] sm:$0xff]  ;;  %v18690_v52 = vld [vmem:[#allocation44_spill] sm:$0xff] }
 0x2d5   :  { %v9418_v0 = vpack.c.bf16 %v6563_v13, %v6559_v18  ;;  %v4869_v48 = vand.u32 2147483647, %v4293_v20  ;;  %v5443_v54 = vsub.f32 1.0, %v4867_v28  ;;  %v4289_v47 = vsub.f32 %v12832_v38, %v14006_v11 }
 0x2d6   :  { %v5985_v34 = vmax.f32 %v5409_v44, 0.0  ;;  %v5989_v6 = vmax.f32 %v5413_v60, 0.0  ;;  %v4863_v61 = vand.u32 2147483647, %v4287_v4  ;;  %v18692_v60 = vld [vmem:[#allocation43_spill] sm:$0xff] }
 0x2d7   :  { %9419 = vmatpush1.bf16.msra.mxu0 %v9418_v0  ;;  %v5445_v35 = vsub.f32 1.0, %v4869_v48  ;;  %v14029_v12 = vmax.f32 %v5443_v54, 0.0  ;;  %v4865_v25 = vand.u32 2147483647, %v4289_v47  ;;  %v4840_v28 = vand.u32 2147483647, %v4264_v5 }
 0x2d8   :  { %v6561_v53 = vmul.f32 %v5985_v34, %v2781_v32  ;;  %v6565_v8 = vmul.f32 %v5989_v6, %v2785_v14  ;;  %v18691_v32 = vsub.f32 %v10446_v16, %v18690_v52  ;;  %v5439_v44 = vsub.f32 1.0, %v4863_v61  ;;  %v7024_v0 = vld [vmem:[%s17899_s1 + $0x48] sm:$0xff]  ;;  %v7034_v54 = vld [vmem:[%s17899_s1 + $0x98] sm:$0xff] }
 0x2d9   :  { %v18693_v14 = vsub.f32 %v10446_v16, %v18692_v60  ;;  %v14043_v34 = vmax.f32 %v5445_v35, 0.0  ;;  %v5441_v6 = vsub.f32 1.0, %v4865_v25  ;;  %v4844_v48 = vand.u32 2147483647, %v4268_v63  ;;  %v3356_v35 = vld [vmem:[%s17901_s3 + $0x3c8] sm:$0xff] }
 0x2da   :  { %v1636_v18 = vand.u32 2147483647, %v18691_v32  ;;  %v9706_v13 = vpack.c.bf16 %v6565_v8, %v6561_v53  ;;  %7215 = vmatmul.mubr.f32.vlgmr.msra.gmra.mrb[0].mxu0 %v7015_v58  ;;  %v14051_v47 = vmax.f32 %v5439_v44, 0.0  ;;  %v5416_v53 = vsub.f32 1.0, %v4840_v28  ;;  %4022 = vperm.xlu1 %10177, %v3356_v35   ;;  %v3355_v44 = vld [vmem:[%s17901_s3 + $0x3c0] sm:$0xff]  ;;  %v14075_v35 = vpop.permute.xlu1 %3622 }
 0x2db   :  { %v1640_v20 = vand.u32 2147483647, %v18693_v14  ;;  %v18694_v8 = vsub.f32 %v18563_v37, %v18690_v52  ;;  %7220 = vmatprep.mubr.f32.mxu0 %v7025_v49  ;;  %v14059_v63 = vmax.f32 %v5441_v6, 0.0  ;;  %v5420_v32 = vsub.f32 1.0, %v4844_v48  ;;  %4017 = vperm.xlu0 %10176, %v3355_v44   ;;  %v18696_v48 = vld [vmem:[#allocation53_spill] sm:$0xff] }
 0x2dc   :  { %v2212_v4 = vsub.f32 1.0, %v1636_v18  ;;  %9707 = vmatpush1.bf16.msra.mxu1 %v9706_v13  ;;  %v18695_v18 = vsub.f32 %v18563_v37, %v18692_v60  ;;  %v5992_v14 = vmax.f32 %v5416_v53, 0.0  ;;  %v4842_v28 = vand.u32 2147483647, %v4266_v15 }
 0x2dd   :  { %v2216_v5 = vsub.f32 1.0, %v1640_v20  ;;  %v1638_v61 = vand.u32 2147483647, %v18694_v8  ;;  %v5996_v6 = vmax.f32 %v5420_v32, 0.0  ;;  %v4846_v60 = vand.u32 2147483647, %v4270_v51 }
 0x2de   :  { %v2788_v25 = vmax.f32 %v2212_v4, 0.0  ;;  %v1642_v13 = vand.u32 2147483647, %v18695_v18  ;;  %v6567_v8 = vmul.f32 %v13781_v46, %v18696_v48  ;;  %7221 = vmatmul.mubr.f32.gmra.mrb[2].mxu0 %v7024_v0  ;;  %v18697_v18 = vld [vmem:[#allocation51_spill] sm:$0xff]  ;;  %v18698_v46 = vld [vmem:[#allocation54_spill] sm:$0xff] }
 0x2df   :  { %v2792_v52 = vmax.f32 %v2216_v5, 0.0  ;;  %v2214_v20 = vsub.f32 1.0, %v1638_v61  ;;  %7990 = vmatmul.mubr.f32.vlgmr.msra.gmra.mrb[0].mxu1 %v7015_v58  ;;  %v5418_v61 = vsub.f32 1.0, %v4842_v28  ;;  %v6571_v45 = vmul.f32 %v13765_v33, %v18697_v18  ;;  %7226 = vmatprep.mubr.f32.mxu0 %v7034_v54 }
 0x2e0   :  { %v2218_v4 = vsub.f32 1.0, %v1642_v13  ;;  %v6568_v5 = vmul.f32 %v5992_v14, %v2788_v25  ;;  %7995 = vmatprep.mubr.f32.mxu1 %v7025_v49  ;;  %v5422_v32 = vsub.f32 1.0, %v4846_v60  ;;  %v6569_v58 = vmul.f32 %v13786_v59, %v18698_v46  ;;  %v7043_v25 = vld [vmem:[%s17899_s1 + $0xe0] sm:$0xff]  ;;  %v18699_v14 = vld [vmem:[#allocation52_spill] sm:$0xff] }
 0x2e1   :  { %v2790_v53 = vmax.f32 %v2214_v20, 0.0  ;;  %v6572_v51 = vmul.f32 %v5996_v6, %v2792_v52  ;;  %v5994_v13 = vmax.f32 %v5418_v61, 0.0  ;;  %v9422_v44 = vpack.c.bf16 %v6571_v45, %v6567_v8  ;;  %v14091_v20 = vpop.permute.xlu0 %3617  ;;  %v7042_v8 = vld [vmem:[%s17899_s1 + $0xd8] sm:$0xff] }
 0x2e2   :  { %v2794_v15 = vmax.f32 %v2218_v4, 0.0  ;;  %v6573_v33 = vmul.f32 %v13776_v57, %v18699_v14  ;;  %v4299_v49 = vsub.f32 %v12827_v19, %v14075_v35  ;;  %v5998_v28 = vmax.f32 %v5422_v32, 0.0  ;;  %7227 = vmatmul.mubr.f32.gmra.mrb[4].mxu0 %v7033_v22 }
 0x2e3   :  { %v9420_v52 = vpack.c.bf16 %v6572_v51, %v6568_v5  ;;  %v4301_v59 = vsub.f32 %v12832_v38, %v14075_v35  ;;  %7996 = vmatmul.mubr.f32.gmra.mrb[2].mxu1 %v7024_v0  ;;  %v6570_v4 = vmul.f32 %v5994_v13, %v2790_v53  ;;  %7232 = vmatprep.mubr.f32.mxu0 %v7043_v25  ;;  %v7052_v53 = vld [vmem:[%s17899_s1 + $0x128] sm:$0xff]  ;;  %v18712_v0 = vld [vmem:[#allocation62_spill] sm:$0xff] }
 0x2e4   :  { %v9710_v60 = vpack.c.bf16 %v6573_v33, %v6569_v58  ;;  %v4875_v48 = vand.u32 2147483647, %v4299_v49  ;;  %8001 = vmatprep.mubr.f32.mxu1 %v7034_v54  ;;  %v6574_v5 = vmul.f32 %v5998_v28, %v2794_v15  ;;  %v4295_v18 = vsub.f32 %v12827_v19, %v14091_v20  ;;  %v18700_v15 = vld [vmem:[#allocation49_spill] sm:$0xff]  ;;  %v18702_v33 = vld [vmem:[#allocation48_spill] sm:$0xff] }
 0x2e5   :  { %9421 = vmatprep.subr.bf16.mxu0 %v9420_v52  ;;  %v4877_v61 = vand.u32 2147483647, %v4301_v59  ;;  %v4297_v45 = vsub.f32 %v12832_v38, %v14091_v20  ;;  %v18701_v32 = vsub.f32 %v10446_v16, %v18700_v15  ;;  %v18703_v49 = vsub.f32 %v10446_v16, %v18702_v33 }
 0x2e6   :  { %9423 = vmatpush1.bf16.msra.mxu0 %v9422_v44  ;;  %v5451_v54 = vsub.f32 1.0, %v4875_v48  ;;  %v9708_v58 = vpack.c.bf16 %v6574_v5, %v6570_v4  ;;  %v4871_v14 = vand.u32 2147483647, %v4295_v18  ;;  %v7051_v44 = vld [vmem:[%s17899_s1 + $0x120] sm:$0xff]  ;;  %v18705_v18 = vsub.f32 %v12829_v10, %v13818_v39 }
 0x2e7   :  { %v1644_v46 = vand.u32 2147483647, %v18701_v32  ;;  %v5453_v13 = vsub.f32 1.0, %v4877_v61  ;;  %v1648_v52 = vand.u32 2147483647, %v18703_v49  ;;  %8002 = vmatmul.mubr.f32.gmra.mrb[4].mxu1 %v7033_v22  ;;  %7233 = vmatmul.mubr.f32.gmra.mrb[6].mxu0 %v7042_v8  ;;  %v18704_v32 = vsub.f32 %v12829_v10, %v13831_v36 }
 0x2e8   :  { %v14122_v28 = vmax.f32 %v5451_v54, 0.0  ;;  %v4873_v59 = vand.u32 2147483647, %v4297_v45  ;;  %8007 = vmatprep.mubr.f32.mxu1 %v7043_v25  ;;  %7238 = vmatprep.mubr.f32.mxu0 %v7052_v53  ;;  %v5447_v61 = vsub.f32 1.0, %v4871_v14  ;;  %v4852_v49 = vand.u32 2147483647, %v18705_v18 }
 0x2e9   :  { %v2220_v48 = vsub.f32 1.0, %v1644_v46  ;;  %v4848_v4 = vand.u32 2147483647, %v18704_v32  ;;  %9709 = vmatprep.subr.bf16.mxu1 %v9708_v58  ;;  %v14127_v5 = vmax.f32 %v5453_v13, 0.0  ;;  %v2224_v22 = vsub.f32 1.0, %v1648_v52  ;;  %v7061_v54 = vld [vmem:[%s17899_s1 + $0x170] sm:$0xff] }
 0x2ea   :  { %9711 = vmatpush1.bf16.msra.mxu1 %v9710_v60  ;;  %v5449_v45 = vsub.f32 1.0, %v4873_v59  ;;  %v18706_v25 = vsub.f32 %v18563_v37, %v18700_v15  ;;  %v3358_v13 = vld [vmem:[%s17901_s3 + $0x3d8] sm:$0xff]  ;;  %v14141_v14 = vmax.f32 %v5447_v61, 0.0  ;;  %v5428_v32 = vsub.f32 1.0, %v4852_v49  ;;  %v3357_v60 = vld [vmem:[%s17901_s3 + $0x3d0] sm:$0xff] }
 0x2eb   :  { %v2796_v46 = vmax.f32 %v2220_v48, 0.0  ;;  %v5424_v57 = vsub.f32 1.0, %v4848_v4  ;;  %v2800_v52 = vmax.f32 %v2224_v22, 0.0  ;;  %v18707_v18 = vsub.f32 %v18563_v37, %v18702_v33  ;;  %8008 = vmatmul.mubr.f32.gmra.mrb[6].mxu1 %v7042_v8  ;;  %7239 = vmatmul.mubr.f32.gmra.mrb[8].mxu0 %v7051_v44  ;;  %v7060_v33 = vld [vmem:[%s17899_s1 + $0x168] sm:$0xff] }
 0x2ec   :  { %v1646_v58 = vand.u32 2147483647, %v18706_v25  ;;  %v14149_v15 = vmax.f32 %v5449_v45, 0.0  ;;  %v18708_v4 = vsub.f32 %v12834_v62, %v13831_v36  ;;  %8013 = vmatprep.mubr.f32.mxu1 %v7052_v53  ;;  %7244 = vmatprep.mubr.f32.mxu0 %v7061_v54  ;;  %v6004_v8 = vmax.f32 %v5428_v32, 0.0  ;;  %v18710_v45 = vld [vmem:[#allocation61_spill] sm:$0xff]  ;;  %v7070_v36 = vld [vmem:[%s17899_s1 + $0x1b8] sm:$0xff] }
 0x2ed   :  { %v1650_v51 = vand.u32 2147483647, %v18707_v18  ;;  %v6000_v59 = vmax.f32 %v5424_v57, 0.0  ;;  %v18709_v49 = vsub.f32 %v12834_v62, %v13818_v39  ;;  %v6575_v57 = vmul.f32 %v13870_v42, %v18710_v45  ;;  %4032 = vperm.xlu1 %10177, %v3358_v13   ;;  %4027 = vperm.xlu0 %10176, %v3357_v60   ;;  %v18711_v32 = vld [vmem:[#allocation57_spill] sm:$0xff]  ;;  %v14175_v60 = vpop.permute.xlu0 %3627 }
 0x2ee   :  { %v2222_v48 = vsub.f32 1.0, %v1646_v58  ;;  %v4850_v61 = vand.u32 2147483647, %v18708_v4  ;;  %v14162_v58 = vpop.permute.xlu1 %3632  ;;  %v6580_v6 = vmul.f32 %v6004_v8, %v2800_v52  ;;  %v6577_v42 = vmul.f32 %v13878_v41, %v18712_v0 }
 0x2ef   :  { %v2226_v22 = vsub.f32 1.0, %v1650_v51  ;;  %v4854_v25 = vand.u32 2147483647, %v18709_v49  ;;  %v6576_v53 = vmul.f32 %v6000_v59, %v2796_v46  ;;  %v6579_v51 = vmul.f32 %v13854_v43, %v18711_v32  ;;  %8014 = vmatmul.mubr.f32.gmra.mrb[8].mxu1 %v7051_v44  ;;  %7245 = vmatmul.mubr.f32.gmra.mrb[10].mxu0 %v7060_v33 }
 0x2f0   :  { %v2798_v18 = vmax.f32 %v2222_v48, 0.0  ;;  %v5426_v4 = vsub.f32 1.0, %v4850_v61  ;;  %v6581_v13 = vmul.f32 %v13865_v26, %v18713_v3  ;;  %v4307_v46 = vsub.f32 %v12827_v19, %v14162_v58  ;;  %8019 = vmatprep.mubr.f32.mxu1 %v7061_v54  ;;  %7250 = vmatprep.mubr.f32.mxu0 %v7070_v36  ;;  %v7069_v48 = vld [vmem:[%s17899_s1 + $0x1b0] sm:$0xff] }
 0x2f1   :  { %v2802_v39 = vmax.f32 %v2226_v22, 0.0  ;;  %v5430_v49 = vsub.f32 1.0, %v4854_v25  ;;  %v9426_v30 = vpack.c.bf16 %v6579_v51, %v6575_v57  ;;  %v9424_v43 = vpack.c.bf16 %v6580_v6, %v6576_v53  ;;  %v7079_v22 = vld [vmem:[%s17899_s1 + $0x200] sm:$0xff] }
 0x2f2   :  { %v6002_v45 = vmax.f32 %v5426_v4, 0.0  ;;  %v4308_v59 = vsub.f32 %v12829_v10, %v14162_v58  ;;  %v4309_v41 = vsub.f32 %v12832_v38, %v14162_v58  ;;  %v9714_v44 = vpack.c.bf16 %v6581_v13, %v6577_v42 }
 0x2f3   :  { %v6006_v52 = vmax.f32 %v5430_v49, 0.0  ;;  %v4310_v26 = vsub.f32 %v12834_v62, %v14162_v58  ;;  %v4883_v3 = vand.u32 2147483647, %v4307_v46  ;;  %9425 = vmatprep.subr.bf16.mxu0 %v9424_v43  ;;  %v4303_v61 = vsub.f32 %v12827_v19, %v14175_v60  ;;  %8020 = vmatmul.mubr.f32.gmra.mrb[10].mxu1 %v7060_v33  ;;  %v18716_v49 = vld [vmem:[#allocation55_spill] sm:$0xff] }
 0x2f4   :  { %v6578_v0 = vmul.f32 %v6002_v45, %v2798_v18  ;;  %v4885_v6 = vand.u32 2147483647, %v4309_v41  ;;  %v4304_v8 = vsub.f32 %v12829_v10, %v14175_v60  ;;  %9427 = vmatpush1.bf16.msra.mxu0 %v9426_v30  ;;  %v4305_v57 = vsub.f32 %v12832_v38, %v14175_v60  ;;  %v18714_v18 = vld [vmem:[#allocation56_spill] sm:$0xff]  ;;  %8025 = vmatprep.mubr.f32.mxu1 %v7070_v36  ;;  %v7078_v30 = vld [vmem:[%s17899_s1 + $0x1f8] sm:$0xff] }
 0x2f5   :  { %v6582_v54 = vmul.f32 %v6006_v52, %v2802_v39  ;;  %v5459_v25 = vsub.f32 1.0, %v4883_v3  ;;  %v4306_v53 = vsub.f32 %v12834_v62, %v14175_v60  ;;  %v18715_v4 = vsub.f32 %v10446_v16, %v18714_v18  ;;  %7251 = vmatmul.mubr.f32.gmra.mrb[12].mxu0 %v7069_v48 }
 0x2f6   :  { %v5461_v39 = vsub.f32 1.0, %v4885_v6  ;;  %v4879_v33 = vand.u32 2147483647, %v4303_v61  ;;  %v18717_v42 = vsub.f32 %v10446_v16, %v18716_v49  ;;  %v4881_v46 = vand.u32 2147483647, %v4305_v57  ;;  %7256 = vmatprep.mubr.f32.mxu0 %v7079_v22 }
 0x2f7   :  { %v1652_v32 = vand.u32 2147483647, %v18715_v4  ;;  %v9712_v51 = vpack.c.bf16 %v6582_v54, %v6578_v0  ;;  %v14206_v13 = vmax.f32 %v5459_v25, 0.0  ;;  %v4856_v36 = vand.u32 2147483647, %v4280_v21  ;;  %8026 = vmatmul.mubr.f32.gmra.mrb[12].mxu1 %v7069_v48  ;;  %v7088_v54 = vld [vmem:[%s17899_s1 + $0x248] sm:$0xff] }
 0x2f8   :  { %v1656_v45 = vand.u32 2147483647, %v18717_v42  ;;  %v14211_v52 = vmax.f32 %v5461_v39, 0.0  ;;  %v5455_v41 = vsub.f32 1.0, %v4879_v33  ;;  %v4860_v3 = vand.u32 2147483647, %v4284_v1  ;;  %8031 = vmatprep.mubr.f32.mxu1 %v7079_v22 }
 0x2f9   :  { %v2228_v43 = vsub.f32 1.0, %v1652_v32  ;;  %9713 = vmatprep.subr.bf16.mxu1 %v9712_v51  ;;  %v5457_v6 = vsub.f32 1.0, %v4881_v46  ;;  %v5432_v25 = vsub.f32 1.0, %v4856_v36  ;;  %v18718_v21 = vsub.f32 %v18563_v37, %v18714_v18  ;;  %v3360_v4 = vld [vmem:[%s17901_s3 + $0x3e8] sm:$0xff]  ;;  %7257 = vmatmul.mubr.f32.gmra.mrb[14].mxu0 %v7078_v30  ;;  %v3359_v18 = vld [vmem:[%s17901_s3 + $0x3e0] sm:$0xff] }
 0x2fa   :  { %v2232_v0 = vsub.f32 1.0, %v1656_v45  ;;  %9715 = vmatpush1.bf16.msra.mxu1 %v9714_v44  ;;  %v14225_v32 = vmax.f32 %v5455_v41, 0.0  ;;  %v5436_v48 = vsub.f32 1.0, %v4860_v3  ;;  %v18719_v51 = vsub.f32 %v18563_v37, %v18716_v49  ;;  %4042 = vperm.xlu1 %10177, %v3360_v4   ;;  %v7087_v49 = vld [vmem:[%s17899_s1 + $0x240] sm:$0xff]  ;;  %v18722_v4 = vld [vmem:[#allocation68_spill] sm:$0xff] }
 0x2fb   :  { %v2804_v61 = vmax.f32 %v2228_v43, 0.0  ;;  %v1654_v57 = vand.u32 2147483647, %v18718_v21  ;;  %v14233_v39 = vmax.f32 %v5457_v6, 0.0  ;;  %v6008_v22 = vmax.f32 %v5432_v25, 0.0  ;;  %7262 = vmatprep.mubr.f32.mxu0 %v7088_v54  ;;  %4037 = vperm.xlu0 %10176, %v3359_v18   ;;  %v18720_v36 = vld [vmem:[#allocation67_spill] sm:$0xff]  ;;  %v14259_v18 = vpop.permute.xlu0 %3637 }
 0x2fc   :  { %v2808_v1 = vmax.f32 %v2232_v0, 0.0  ;;  %v1658_v44 = vand.u32 2147483647, %v18719_v51  ;;  %v4858_v42 = vand.u32 2147483647, %v4282_v23  ;;  %v6012_v45 = vmax.f32 %v5436_v48, 0.0  ;;  %v14246_v0 = vpop.permute.xlu1 %3642  ;;  %8032 = vmatmul.mubr.f32.gmra.mrb[14].mxu1 %v7078_v30 }
 0x2fd   :  { %v2230_v33 = vsub.f32 1.0, %v1654_v57  ;;  %v4862_v43 = vand.u32 2147483647, %v4286_v31  ;;  %v6583_v41 = vmul.f32 %v13964_v17, %v18720_v36  ;;  %v6584_v23 = vmul.f32 %v6008_v22, %v2804_v61  ;;  %v18721_v25 = vld [vmem:[#allocation63_spill] sm:$0xff]  ;;  %8037 = vmatprep.mubr.f32.mxu1 %v7088_v54  ;;  %7263 = vmatmul.mubr.f32.gmra.mrb[16].mxu0 %v7087_v49  ;;  %v18723_v51 = vld [vmem:[#allocation64_spill] sm:$0xff] }
 0x2fe   :  { %v2234_v46 = vsub.f32 1.0, %v1658_v44  ;;  %v5434_v6 = vsub.f32 1.0, %v4858_v42  ;;  %v6587_v21 = vmul.f32 %v13940_v40, %v18721_v25  ;;  %v6588_v57 = vmul.f32 %v6012_v45, %v2808_v1  ;;  %7268 = vmatprep.mubr.f32.mxu0 %v7097_v55  ;;  %v7096_v40 = vld [vmem:[%s17899_s1 + $0x288] sm:$0xff] }
 0x2ff   :  { %v2806_v3 = vmax.f32 %v2230_v33, 0.0  ;;  %v5438_v31 = vsub.f32 1.0, %v4862_v43  ;;  %v6585_v17 = vmul.f32 %v13966_v50, %v18722_v4  ;;  %v6589_v44 = vmul.f32 %v13944_v7, %v18723_v51  ;;  %v7106_v7 = vld [vmem:[%s17899_s1 + $0x2d8] sm:$0xff]  ;;  %v18726_v4 = vld [vmem:[#allocation59_spill] sm:$0xff] }
 0x300   :  { %v2810_v27 = vmax.f32 %v2234_v46, 0.0  ;;  %v6010_v48 = vmax.f32 %v5434_v6, 0.0  ;;  %v9430_v30 = vpack.c.bf16 %v6587_v21, %v6583_v41  ;;  %v4315_v61 = vsub.f32 %v12827_v19, %v14246_v0  ;;  %8038 = vmatmul.mubr.f32.gmra.mrb[16].mxu1 %v7087_v49 }
 0x301   :  { %v9428_v54 = vpack.c.bf16 %v6588_v57, %v6584_v23  ;;  %v6014_v1 = vmax.f32 %v5438_v31, 0.0  ;;  %v4316_v50 = vsub.f32 %v12829_v10, %v14246_v0  ;;  %v4317_v22 = vsub.f32 %v12832_v38, %v14246_v0  ;;  %8043 = vmatprep.mubr.f32.mxu1 %v7097_v55  ;;  %7269 = vmatmul.mubr.f32.gmra.mrb[18].mxu0 %v7096_v40  ;;  %v18724_v55 = vld [vmem:[#allocation60_spill] sm:$0xff] }
 0x302   :  { %v6586_v33 = vmul.f32 %v6010_v48, %v2806_v3  ;;  %v9718_v42 = vpack.c.bf16 %v6589_v44, %v6585_v17  ;;  %v4318_v45 = vsub.f32 %v12834_v62, %v14246_v0  ;;  %v4891_v46 = vand.u32 2147483647, %v4315_v61  ;;  %7274 = vmatprep.mubr.f32.mxu0 %v7106_v7 }
 0x303   :  { %9429 = vmatprep.subr.bf16.mxu0 %v9428_v54  ;;  %v6590_v43 = vmul.f32 %v6014_v1, %v2810_v27  ;;  %v4893_v36 = vand.u32 2147483647, %v4317_v22  ;;  %v4311_v41 = vsub.f32 %v12827_v19, %v14259_v18  ;;  %v4312_v49 = vsub.f32 %v12829_v10, %v14259_v18 }
 0x304   :  { %9431 = vmatpush1.bf16.msra.mxu0 %v9430_v30  ;;  %v5467_v23 = vsub.f32 1.0, %v4891_v46  ;;  %v4313_v3 = vsub.f32 %v12832_v38, %v14259_v18  ;;  %v4314_v6 = vsub.f32 %v12834_v62, %v14259_v18  ;;  %v18725_v25 = vsub.f32 %v10446_v16, %v18724_v55  ;;  %8044 = vmatmul.mubr.f32.gmra.mrb[18].mxu1 %v7096_v40  ;;  %v7105_v30 = vld [vmem:[%s17899_s1 + $0x2d0] sm:$0xff] }
 0x305   :  { %v9716_v57 = vpack.c.bf16 %v6590_v43, %v6586_v33  ;;  %v5469_v27 = vsub.f32 1.0, %v4893_v36  ;;  %v4887_v31 = vand.u32 2147483647, %v4311_v41  ;;  %v18727_v17 = vsub.f32 %v10446_v16, %v18726_v4  ;;  %8049 = vmatprep.mubr.f32.mxu1 %v7106_v7  ;;  %7275 = vmatmul.mubr.f32.gmra.mrb[20].mxu0 %v7105_v30 }
 0x306   :  { %v1660_v21 = vand.u32 2147483647, %v18725_v25  ;;  %v14290_v51 = vmax.f32 %v5467_v23, 0.0  ;;  %v4889_v44 = vand.u32 2147483647, %v4313_v3  ;;  %v18728_v41 = vsub.f32 %v18563_v37, %v18724_v55 }
 0x307   :  { %v1664_v48 = vand.u32 2147483647, %v18727_v17  ;;  %v4864_v54 = vand.u32 2147483647, %v4288_v24  ;;  %9717 = vmatprep.subr.bf16.mxu1 %v9716_v57  ;;  %v14295_v1 = vmax.f32 %v5469_v27, 0.0  ;;  %v5463_v22 = vsub.f32 1.0, %v4887_v31 }
 0x308   :  { %v2236_v61 = vsub.f32 1.0, %v1660_v21  ;;  %v4868_v40 = vand.u32 2147483647, %v4292_v29  ;;  %9719 = vmatpush1.bf16.msra.mxu1 %v9718_v42  ;;  %v5465_v46 = vsub.f32 1.0, %v4889_v44  ;;  %v1662_v23 = vand.u32 2147483647, %v18728_v41 }
 0x309   :  { %v2240_v33 = vsub.f32 1.0, %v1664_v48  ;;  %v5440_v36 = vsub.f32 1.0, %v4864_v54  ;;  %v3362_v24 = vld [vmem:[%s17901_s3 + $0x3f8] sm:$0xff]  ;;  %v14306_v7 = vmax.f32 %v5463_v22, 0.0  ;;  %v18729_v29 = vsub.f32 %v18563_v37, %v18726_v4  ;;  %8050 = vmatmul.mubr.f32.gmra.mrb[20].mxu1 %v7105_v30  ;;  %v3361_v42 = vld [vmem:[%s17901_s3 + $0x3f0] sm:$0xff]  ;;  %v7115_v4 = vld [vmem:[%s17899_s1 + $0x320] sm:$0xff] }
 0x30a   :  { %v2812_v43 = vmax.f32 %v2236_v61, 0.0  ;;  %v5444_v25 = vsub.f32 1.0, %v4868_v40  ;;  %4052 = vperm.xlu1 %10177, %v3362_v24   ;;  %v14314_v55 = vmax.f32 %v5465_v46, 0.0  ;;  %v2238_v27 = vsub.f32 1.0, %v1662_v23  ;;  %4047 = vperm.xlu0 %10176, %v3361_v42   ;;  %v18732_v54 = vld [vmem:[#allocation73_spill] sm:$0xff] }
 0x30b   :  { %v2816_v3 = vmax.f32 %v2240_v33, 0.0  ;;  %v1666_v21 = vand.u32 2147483647, %v18729_v29  ;;  %v6016_v57 = vmax.f32 %v5440_v36, 0.0  ;;  %v18730_v31 = vsub.f32 %v12834_v62, %v14006_v11  ;;  %v14327_v33 = vpop.permute.xlu1 %3652  ;;  %7280 = vmatprep.mubr.f32.mxu0 %v7115_v4  ;;  %8055 = vmatprep.mubr.f32.mxu1 %v7115_v4  ;;  %v18733_v36 = vld [vmem:[#allocation71_spill] sm:$0xff]  ;;  %v18734_v29 = vld [vmem:[#allocation74_spill] sm:$0xff] }
 0x30c   :  { %v6020_v48 = vmax.f32 %v5444_v25, 0.0  ;;  %v18731_v44 = vsub.f32 %v12834_v62, %v13932_v56  ;;  %v6591_v22 = vmul.f32 %v14051_v47, %v18732_v54  ;;  %v2814_v40 = vmax.f32 %v2238_v27, 0.0 }
 0x30d   :  { %v4866_v17 = vand.u32 2147483647, %v18730_v31  ;;  %v2242_v30 = vsub.f32 1.0, %v1666_v21  ;;  %v6592_v11 = vmul.f32 %v6016_v57, %v2812_v43  ;;  %v6595_v41 = vmul.f32 %v14029_v12, %v18733_v36  ;;  %v18735_v31 = vld [vmem:[#allocation72_spill] sm:$0xff]  ;;  %v14337_v43 = vpop.permute.xlu0 %3647  ;;  %v18749_v12 = vld [vmem:[#allocation78_spill] sm:$0xff] }
 0x30e   :  { %v4870_v61 = vand.u32 2147483647, %v18731_v44  ;;  %v6596_v23 = vmul.f32 %v6020_v48, %v2816_v3  ;;  %v6593_v56 = vmul.f32 %v14059_v63, %v18734_v29  ;;  %v6597_v47 = vmul.f32 %v14043_v34, %v18735_v31  ;;  %v18738_v29 = vld [vmem:[#allocation65_spill] sm:$0xff]  ;;  %v18748_v48 = vld [vmem:[#allocation82_spill] sm:$0xff] }
 0x30f   :  { %v5442_v46 = vsub.f32 1.0, %v4866_v17  ;;  %v2818_v24 = vmax.f32 %v2242_v30, 0.0  ;;  %v9434_v42 = vpack.c.bf16 %v6595_v41, %v6591_v22  ;;  %v4323_v4 = vsub.f32 %v12827_v19, %v14327_v33 }
 0x310   :  { %v5446_v25 = vsub.f32 1.0, %v4870_v61  ;;  %v9432_v57 = vpack.c.bf16 %v6596_v23, %v6592_v11  ;;  %v4325_v3 = vsub.f32 %v12832_v38, %v14327_v33  ;;  %v9722_v63 = vpack.c.bf16 %v6597_v47, %v6593_v56 }
 0x311   :  { %v6018_v21 = vmax.f32 %v5442_v46, 0.0  ;;  %v4899_v30 = vand.u32 2147483647, %v4323_v4  ;;  %v4319_v61 = vsub.f32 %v12827_v19, %v14337_v43  ;;  %v4320_v54 = vsub.f32 %v12829_v10, %v14337_v43  ;;  %v18736_v46 = vld [vmem:[#allocation66_spill] sm:$0xff] }
 0x312   :  { %v6022_v27 = vmax.f32 %v5446_v25, 0.0  ;;  %9433 = vmatprep.subr.bf16.mxu0 %v9432_v57  ;;  %v4901_v44 = vand.u32 2147483647, %v4325_v3  ;;  %v4321_v11 = vsub.f32 %v12832_v38, %v14337_v43  ;;  %v18737_v36 = vsub.f32 %v10446_v16, %v18736_v46 }
 0x313   :  { %v6594_v17 = vmul.f32 %v6018_v21, %v2814_v40  ;;  %9435 = vmatpush1.bf16.msra.mxu0 %v9434_v42  ;;  %v5475_v22 = vsub.f32 1.0, %v4899_v30  ;;  %v4895_v25 = vand.u32 2147483647, %v4319_v61  ;;  %v18739_v56 = vsub.f32 %v10446_v16, %v18738_v29  ;;  %v7114_v42 = vld [vmem:[%s17899_s1 + $0x318] sm:$0xff] }
 0x314   :  { %v6598_v34 = vmul.f32 %v6022_v27, %v2818_v24  ;;  %v1668_v41 = vand.u32 2147483647, %v18737_v36  ;;  %v5477_v24 = vsub.f32 1.0, %v4901_v44  ;;  %v4897_v47 = vand.u32 2147483647, %v4321_v11  ;;  %7281 = vmatmul.mubr.f32.gmra.mrb[22].mxu0 %v7114_v42  ;;  %8056 = vmatmul.mubr.f32.gmra.mrb[22].mxu1 %v7114_v42 }
 0x315   :  { %v1672_v21 = vand.u32 2147483647, %v18739_v56  ;;  %v14362_v31 = vmax.f32 %v5475_v22, 0.0  ;;  %v18740_v57 = vsub.f32 %v12829_v10, %v14091_v20  ;;  %v18742_v36 = vsub.f32 %v18563_v37, %v18736_v46 }
 0x316   :  { %v9720_v23 = vpack.c.bf16 %v6598_v34, %v6594_v17  ;;  %v2244_v4 = vsub.f32 1.0, %v1668_v41  ;;  %v14367_v3 = vmax.f32 %v5477_v24, 0.0  ;;  %v5471_v17 = vsub.f32 1.0, %v4895_v25 }
 0x317   :  { %v4872_v27 = vand.u32 2147483647, %v18740_v57  ;;  %v2248_v30 = vsub.f32 1.0, %v1672_v21  ;;  %v18741_v34 = vsub.f32 %v12829_v10, %v14075_v35  ;;  %v5473_v61 = vsub.f32 1.0, %v4897_v47 }
 0x318   :  { %9721 = vmatprep.subr.bf16.mxu1 %v9720_v23  ;;  %v2820_v22 = vmax.f32 %v2244_v4, 0.0  ;;  %v1670_v41 = vand.u32 2147483647, %v18742_v36  ;;  %v3364_v23 = vld [vmem:[%s17901_s3 + $0x408] sm:$0xff]  ;;  %v14378_v24 = vmax.f32 %v5471_v17, 0.0  ;;  %v18743_v21 = vsub.f32 %v18563_v37, %v18738_v29  ;;  %v18746_v36 = vld [vmem:[#allocation79_spill] sm:$0xff] }
 0x319   :  { %v4876_v44 = vand.u32 2147483647, %v18741_v34  ;;  %9723 = vmatpush1.bf16.msra.mxu1 %v9722_v63  ;;  %v5448_v11 = vsub.f32 1.0, %v4872_v27  ;;  %v2824_v25 = vmax.f32 %v2248_v30, 0.0  ;;  %4062 = vperm.xlu1 %10177, %v3364_v23   ;;  %v3363_v63 = vld [vmem:[%s17901_s3 + $0x400] sm:$0xff]  ;;  %v14386_v47 = vmax.f32 %v5473_v61, 0.0 }
 0x31a   :  { %v1674_v42 = vand.u32 2147483647, %v18743_v21  ;;  %v2246_v4 = vsub.f32 1.0, %v1670_v41  ;;  %v18744_v57 = vsub.f32 %v12834_v62, %v14091_v20  ;;  %4057 = vperm.xlu0 %10176, %v3363_v63   ;;  %v7124_v17 = vld [vmem:[%s17899_s1 + $0x368] sm:$0xff]  ;;  %v18745_v34 = vsub.f32 %v12834_v62, %v14075_v35  ;;  %v18747_v21 = vld [vmem:[#allocation77_spill] sm:$0xff] }
 0x31b   :  { %v5452_v56 = vsub.f32 1.0, %v4876_v44  ;;  %v6024_v46 = vmax.f32 %v5448_v11, 0.0  ;;  %v6599_v61 = vmul.f32 %v14141_v14, %v18746_v36  ;;  %v14399_v11 = vpop.permute.xlu1 %3662  ;;  %7286 = vmatprep.mubr.f32.mxu0 %v7124_v17  ;;  %8061 = vmatprep.mubr.f32.mxu1 %v7124_v17  ;;  %v6603_v63 = vmul.f32 %v14122_v28, %v18747_v21 }
 0x31c   :  { %v4874_v27 = vand.u32 2147483647, %v18744_v57  ;;  %v2250_v30 = vsub.f32 1.0, %v1674_v42  ;;  %v4878_v44 = vand.u32 2147483647, %v18745_v34  ;;  %v2822_v41 = vmax.f32 %v2246_v4, 0.0 }
 0x31d   :  { %v6028_v29 = vmax.f32 %v5452_v56, 0.0  ;;  %v6600_v20 = vmul.f32 %v6024_v46, %v2820_v22  ;;  %v6601_v35 = vmul.f32 %v14149_v15, %v18748_v48  ;;  %v9438_v40 = vpack.c.bf16 %v6603_v63, %v6599_v61  ;;  %v14409_v22 = vpop.permute.xlu0 %3657 }
 0x31e   :  { %v5450_v23 = vsub.f32 1.0, %v4874_v27  ;;  %v2826_v56 = vmax.f32 %v2250_v30, 0.0  ;;  %v5454_v42 = vsub.f32 1.0, %v4878_v44  ;;  %v6605_v14 = vmul.f32 %v14127_v5, %v18749_v12 }
 0x31f   :  { %v6604_v57 = vmul.f32 %v6028_v29, %v2824_v25  ;;  %v4331_v17 = vsub.f32 %v12827_v19, %v14399_v11  ;;  %v4332_v28 = vsub.f32 %v12829_v10, %v14399_v11  ;;  %v4333_v25 = vsub.f32 %v12832_v38, %v14399_v11 }
 0x320   :  { %v6026_v34 = vmax.f32 %v5450_v23, 0.0  ;;  %v6030_v4 = vmax.f32 %v5454_v42, 0.0  ;;  %v9726_v15 = vpack.c.bf16 %v6605_v14, %v6601_v35  ;;  %v4334_v48 = vsub.f32 %v12834_v62, %v14399_v11  ;;  %v18752_v42 = vld [vmem:[#allocation69_spill] sm:$0xff] }
 0x321   :  { %v9436_v46 = vpack.c.bf16 %v6604_v57, %v6600_v20  ;;  %v4907_v29 = vand.u32 2147483647, %v4331_v17  ;;  %v4909_v12 = vand.u32 2147483647, %v4333_v25  ;;  %v4327_v30 = vsub.f32 %v12827_v19, %v14409_v22 }
 0x322   :  { %v6602_v27 = vmul.f32 %v6026_v34, %v2822_v41  ;;  %v6606_v5 = vmul.f32 %v6030_v4, %v2826_v56  ;;  %v4328_v44 = vsub.f32 %v12829_v10, %v14409_v22  ;;  %v4329_v61 = vsub.f32 %v12832_v38, %v14409_v22  ;;  %v18750_v41 = vld [vmem:[#allocation70_spill] sm:$0xff] }
 0x323   :  { %9437 = vmatprep.subr.bf16.mxu0 %v9436_v46  ;;  %v5483_v36 = vsub.f32 1.0, %v4907_v29  ;;  %v4330_v20 = vsub.f32 %v12834_v62, %v14409_v22  ;;  %v18751_v23 = vsub.f32 %v10446_v16, %v18750_v41  ;;  %v5485_v57 = vsub.f32 1.0, %v4909_v12 }
 0x324   :  { %9439 = vmatpush1.bf16.msra.mxu0 %v9438_v40  ;;  %v9724_v63 = vpack.c.bf16 %v6606_v5, %v6602_v27  ;;  %v4903_v56 = vand.u32 2147483647, %v4327_v30  ;;  %v18753_v35 = vsub.f32 %v10446_v16, %v18752_v42  ;;  %v7123_v40 = vld [vmem:[%s17899_s1 + $0x360] sm:$0xff]  ;;  %v4905_v17 = vand.u32 2147483647, %v4329_v61 }
 0x325   :  { %v1676_v21 = vand.u32 2147483647, %v18751_v23  ;;  %v14434_v14 = vmax.f32 %v5483_v36, 0.0  ;;  %v4880_v4 = vand.u32 2147483647, %v4304_v8  ;;  %7287 = vmatmul.mubr.f32.gmra.mrb[24].mxu0 %v7123_v40  ;;  %8062 = vmatmul.mubr.f32.gmra.mrb[24].mxu1 %v7123_v40  ;;  %v14439_v25 = vmax.f32 %v5485_v57, 0.0 }
 0x326   :  { %v1680_v34 = vand.u32 2147483647, %v18753_v35  ;;  %9725 = vmatprep.subr.bf16.mxu1 %v9724_v63  ;;  %v5479_v27 = vsub.f32 1.0, %v4903_v56  ;;  %v4884_v5 = vand.u32 2147483647, %v4308_v59  ;;  %v5481_v12 = vsub.f32 1.0, %v4905_v17 }
 0x327   :  { %v2252_v46 = vsub.f32 1.0, %v1676_v21  ;;  %9727 = vmatpush1.bf16.msra.mxu1 %v9726_v15  ;;  %v5456_v36 = vsub.f32 1.0, %v4880_v4  ;;  %v18754_v61 = vsub.f32 %v18563_v37, %v18750_v41  ;;  %v3366_v8 = vld [vmem:[%s17901_s3 + $0x418] sm:$0xff]  ;;  %v18755_v56 = vsub.f32 %v18563_v37, %v18752_v42  ;;  %v3365_v15 = vld [vmem:[%s17901_s3 + $0x410] sm:$0xff] }
 0x328   :  { %v2256_v29 = vsub.f32 1.0, %v1680_v34  ;;  %v14450_v21 = vmax.f32 %v5479_v27, 0.0  ;;  %v5460_v57 = vsub.f32 1.0, %v4884_v5  ;;  %4072 = vperm.xlu1 %10177, %v3366_v8   ;;  %v14458_v35 = vmax.f32 %v5481_v12, 0.0  ;;  %4067 = vperm.xlu0 %10176, %v3365_v15   ;;  %v7133_v17 = vld [vmem:[%s17899_s1 + $0x3b0] sm:$0xff]  ;;  %v18756_v27 = vld [vmem:[#allocation87_spill] sm:$0xff]  ;;  %v14471_v5 = vpop.permute.xlu1 %3672 }
 0x329   :  { %v2828_v30 = vmax.f32 %v2252_v46, 0.0  ;;  %v1678_v23 = vand.u32 2147483647, %v18754_v61  ;;  %v1682_v59 = vand.u32 2147483647, %v18755_v56  ;;  %v6032_v41 = vmax.f32 %v5456_v36, 0.0  ;;  %7292 = vmatprep.mubr.f32.mxu0 %v7133_v17  ;;  %8067 = vmatprep.mubr.f32.mxu1 %v7133_v17 }
 0x32a   :  { %v2832_v63 = vmax.f32 %v2256_v29, 0.0  ;;  %v4882_v40 = vand.u32 2147483647, %v4306_v53  ;;  %v6036_v42 = vmax.f32 %v5460_v57, 0.0  ;;  %v4886_v4 = vand.u32 2147483647, %v4310_v26 }
 0x32b   :  { %v2254_v34 = vsub.f32 1.0, %v1678_v23  ;;  %v2258_v46 = vsub.f32 1.0, %v1682_v59  ;;  %v6607_v29 = vmul.f32 %v14225_v32, %v18756_v27  ;;  %v6608_v60 = vmul.f32 %v6032_v41, %v2828_v30  ;;  %v18757_v36 = vld [vmem:[#allocation83_spill] sm:$0xff]  ;;  %v18758_v56 = vld [vmem:[#allocation88_spill] sm:$0xff]  ;;  %v14481_v30 = vpop.permute.xlu0 %3667 }
 0x32c   :  { %v5458_v12 = vsub.f32 1.0, %v4882_v40  ;;  %v6611_v61 = vmul.f32 %v14206_v13, %v18757_v36  ;;  %v6612_v23 = vmul.f32 %v6036_v42, %v2832_v63  ;;  %v5462_v57 = vsub.f32 1.0, %v4886_v4  ;;  %v18759_v15 = vld [vmem:[#allocation84_spill] sm:$0xff] }
 0x32d   :  { %v2830_v53 = vmax.f32 %v2254_v34, 0.0  ;;  %v2834_v8 = vmax.f32 %v2258_v46, 0.0  ;;  %v6609_v58 = vmul.f32 %v14233_v39, %v18758_v56  ;;  %v6613_v32 = vmul.f32 %v14211_v52, %v18759_v15  ;;  %v18760_v36 = vld [vmem:[#allocation76_spill] sm:$0xff] }
 0x32e   :  { %v6034_v26 = vmax.f32 %v5458_v12, 0.0  ;;  %v9442_v59 = vpack.c.bf16 %v6611_v61, %v6607_v29  ;;  %v4339_v17 = vsub.f32 %v12827_v19, %v14471_v5  ;;  %v9440_v41 = vpack.c.bf16 %v6612_v23, %v6608_v60 }
 0x32f   :  { %v6038_v34 = vmax.f32 %v5462_v57, 0.0  ;;  %v4340_v13 = vsub.f32 %v12829_v10, %v14471_v5  ;;  %v4341_v63 = vsub.f32 %v12832_v38, %v14471_v5  ;;  %v9730_v39 = vpack.c.bf16 %v6613_v32, %v6609_v58  ;;  %v18762_v58 = vld [vmem:[#allocation75_spill] sm:$0xff] }
 0x330   :  { %v6610_v40 = vmul.f32 %v6034_v26, %v2830_v53  ;;  %v4342_v42 = vsub.f32 %v12834_v62, %v14471_v5  ;;  %v4915_v46 = vand.u32 2147483647, %v4339_v17  ;;  %9441 = vmatprep.subr.bf16.mxu0 %v9440_v41  ;;  %v4335_v27 = vsub.f32 %v12827_v19, %v14481_v30  ;;  %v3370_v5 = vld [vmem:[%s17901_s3 + $0x438] sm:$0xff] }
 0x331   :  { %v6614_v52 = vmul.f32 %v6038_v34, %v2834_v8  ;;  %v4917_v4 = vand.u32 2147483647, %v4341_v63  ;;  %v4336_v29 = vsub.f32 %v12829_v10, %v14481_v30  ;;  %9443 = vmatpush1.bf16.msra.mxu0 %v9442_v59  ;;  %v4337_v12 = vsub.f32 %v12832_v38, %v14481_v30  ;;  %v7132_v59 = vld [vmem:[%s17899_s1 + $0x3a8] sm:$0xff] }
 0x332   :  { %v5491_v60 = vsub.f32 1.0, %v4915_v46  ;;  %v4338_v53 = vsub.f32 %v12834_v62, %v14481_v30  ;;  %v18761_v61 = vsub.f32 %v10446_v16, %v18760_v36  ;;  %v4911_v56 = vand.u32 2147483647, %v4335_v27  ;;  %7293 = vmatmul.mubr.f32.gmra.mrb[26].mxu0 %v7132_v59  ;;  %8068 = vmatmul.mubr.f32.gmra.mrb[26].mxu1 %v7132_v59 }
 0x333   :  { %v9728_v8 = vpack.c.bf16 %v6614_v52, %v6610_v40  ;;  %v5493_v57 = vsub.f32 1.0, %v4917_v4  ;;  %v18763_v26 = vsub.f32 %v10446_v16, %v18762_v58  ;;  %v4913_v17 = vand.u32 2147483647, %v4337_v12 }
 0x334   :  { %v1684_v23 = vand.u32 2147483647, %v18761_v61  ;;  %v14506_v32 = vmax.f32 %v5491_v60, 0.0  ;;  %v4888_v34 = vand.u32 2147483647, %v4312_v49  ;;  %v5487_v40 = vsub.f32 1.0, %v4911_v56 }
 0x335   :  { %v1688_v15 = vand.u32 2147483647, %v18763_v26  ;;  %9729 = vmatprep.subr.bf16.mxu1 %v9728_v8  ;;  %v14511_v63 = vmax.f32 %v5493_v57, 0.0  ;;  %v4892_v52 = vand.u32 2147483647, %v4316_v50  ;;  %v5489_v4 = vsub.f32 1.0, %v4913_v17 }
 0x336   :  { %v2260_v41 = vsub.f32 1.0, %v1684_v23  ;;  %9731 = vmatpush1.bf16.msra.mxu1 %v9730_v39  ;;  %v5464_v60 = vsub.f32 1.0, %v4888_v34  ;;  %v18764_v12 = vsub.f32 %v18563_v37, %v18760_v36  ;;  %v162_v49 = vld [vmem:[%s17900_s2 + $0x428] sm:$0xff]  ;;  %v14522_v23 = vmax.f32 %v5487_v40, 0.0  ;;  %v161_v39 = vld [vmem:[%s17900_s2 + $0x420] sm:$0xff]  ;;  %v7142_v17 = vld [vmem:[%s17899_s1 + $0x3f8] sm:$0xff] }
 0x337   :  { %v2264_v46 = vsub.f32 1.0, %v1688_v15  ;;  %v5468_v57 = vsub.f32 1.0, %v4892_v52  ;;  %v18765_v56 = vsub.f32 %v18563_v37, %v18762_v58  ;;  %878 = vperm.xlu1 %10177, %v162_v49   ;;  %v14530_v26 = vmax.f32 %v5489_v4, 0.0  ;;  %873 = vperm.xlu0 %10176, %v161_v39   ;;  %v18766_v40 = vld [vmem:[#allocation93_spill] sm:$0xff]  ;;  %v14543_v52 = vpop.permute.xlu1 %3682  ;;  %v18769_v39 = vld [vmem:[#allocation92_spill] sm:$0xff] }
 0x338   :  { %v2836_v27 = vmax.f32 %v2260_v41, 0.0  ;;  %v1686_v61 = vand.u32 2147483647, %v18764_v12  ;;  %v6040_v36 = vmax.f32 %v5464_v60, 0.0  ;;  %v4890_v59 = vand.u32 2147483647, %v4314_v6  ;;  %7298 = vmatprep.mubr.f32.mxu0 %v7142_v17  ;;  %8073 = vmatprep.mubr.f32.mxu1 %v7142_v17 }
 0x339   :  { %v2840_v8 = vmax.f32 %v2264_v46, 0.0  ;;  %v1690_v50 = vand.u32 2147483647, %v18765_v56  ;;  %v6044_v58 = vmax.f32 %v5468_v57, 0.0  ;;  %v4894_v34 = vand.u32 2147483647, %v4318_v45 }
 0x33a   :  { %v2262_v15 = vsub.f32 1.0, %v1686_v61  ;;  %v6615_v46 = vmul.f32 %v14306_v7, %v18766_v40  ;;  %v6616_v18 = vmul.f32 %v6040_v36, %v2836_v27  ;;  %v5466_v4 = vsub.f32 1.0, %v4890_v59  ;;  %v18767_v60 = vld [vmem:[#allocation89_spill] sm:$0xff]  ;;  %v18768_v56 = vld [vmem:[#allocation94_spill] sm:$0xff]  ;;  %v14553_v27 = vpop.permute.xlu0 %3677 }
 0x33b   :  { %v2266_v41 = vsub.f32 1.0, %v1690_v50  ;;  %v6619_v12 = vmul.f32 %v14290_v51, %v18767_v60  ;;  %v6620_v61 = vmul.f32 %v6044_v58, %v2840_v8  ;;  %v5470_v57 = vsub.f32 1.0, %v4894_v34  ;;  %v18770_v60 = vld [vmem:[#allocation81_spill] sm:$0xff]  ;;  %v18781_v58 = vld [vmem:[#allocation100_spill] sm:$0xff]  ;;  %v18782_v51 = vld [vmem:[#allocation98_spill] sm:$0xff] }
 0x33c   :  { %v2838_v6 = vmax.f32 %v2262_v15, 0.0  ;;  %v6617_v0 = vmul.f32 %v14314_v55, %v18768_v56  ;;  %v6042_v45 = vmax.f32 %v5466_v4, 0.0  ;;  %v6621_v7 = vmul.f32 %v14295_v1, %v18769_v39 }
 0x33d   :  { %v2842_v49 = vmax.f32 %v2266_v41, 0.0  ;;  %v9446_v50 = vpack.c.bf16 %v6619_v12, %v6615_v46  ;;  %v4347_v17 = vsub.f32 %v12827_v19, %v14543_v52  ;;  %v9444_v36 = vpack.c.bf16 %v6620_v61, %v6616_v18 }
 0x33e   :  { %v6046_v15 = vmax.f32 %v5470_v57, 0.0  ;;  %v4349_v8 = vsub.f32 %v12832_v38, %v14543_v52  ;;  %v6618_v59 = vmul.f32 %v6042_v45, %v2838_v6  ;;  %v9734_v55 = vpack.c.bf16 %v6621_v7, %v6617_v0  ;;  %v18772_v0 = vld [vmem:[#allocation80_spill] sm:$0xff] }
 0x33f   :  { %v4923_v41 = vand.u32 2147483647, %v4347_v17  ;;  %9445 = vmatprep.subr.bf16.mxu0 %v9444_v36  ;;  %v4343_v40 = vsub.f32 %v12827_v19, %v14553_v27  ;;  %v4344_v46 = vsub.f32 %v12829_v10, %v14553_v27  ;;  %v4345_v4 = vsub.f32 %v12832_v38, %v14553_v27 }
 0x340   :  { %v6622_v1 = vmul.f32 %v6046_v15, %v2842_v49  ;;  %v4925_v34 = vand.u32 2147483647, %v4349_v8  ;;  %9447 = vmatpush1.bf16.msra.mxu0 %v9446_v50  ;;  %v18771_v12 = vsub.f32 %v10446_v16, %v18770_v60  ;;  %v18773_v45 = vsub.f32 %v10446_v16, %v18772_v0  ;;  %v7141_v50 = vld [vmem:[%s17899_s1 + $0x3f0] sm:$0xff] }
 0x341   :  { %v5499_v18 = vsub.f32 1.0, %v4923_v41  ;;  %v4919_v56 = vand.u32 2147483647, %v4343_v40  ;;  %v4921_v17 = vand.u32 2147483647, %v4345_v4  ;;  %7299 = vmatmul.mubr.f32.gmra.mrb[28].mxu0 %v7141_v50  ;;  %8074 = vmatmul.mubr.f32.gmra.mrb[28].mxu1 %v7141_v50 }
 0x342   :  { %v1692_v61 = vand.u32 2147483647, %v18771_v12  ;;  %v9732_v49 = vpack.c.bf16 %v6622_v1, %v6618_v59  ;;  %v5501_v57 = vsub.f32 1.0, %v4925_v34  ;;  %v1696_v39 = vand.u32 2147483647, %v18773_v45 }
 0x343   :  { %v14578_v7 = vmax.f32 %v5499_v18, 0.0  ;;  %v4896_v15 = vand.u32 2147483647, %v4320_v54  ;;  %v5495_v59 = vsub.f32 1.0, %v4919_v56  ;;  %v18774_v1 = vsub.f32 %v12829_v10, %v14327_v33  ;;  %v3368_v54 = vld [vmem:[%s17901_s3 + $0x428] sm:$0xff] }
 0x344   :  { %v2268_v36 = vsub.f32 1.0, %v1692_v61  ;;  %9733 = vmatprep.subr.bf16.mxu1 %v9732_v49  ;;  %v14583_v8 = vmax.f32 %v5501_v57, 0.0  ;;  %v2272_v41 = vsub.f32 1.0, %v1696_v39  ;;  %v5497_v40 = vsub.f32 1.0, %v4921_v17  ;;  %4082 = vperm.xlu1 %10177, %v3368_v54  }
 0x345   :  { %v4900_v34 = vand.u32 2147483647, %v18774_v1  ;;  %9735 = vmatpush1.bf16.msra.mxu1 %v9734_v55  ;;  %v5472_v4 = vsub.f32 1.0, %v4896_v15  ;;  %v18775_v12 = vsub.f32 %v18563_v37, %v18770_v60  ;;  %v14594_v49 = vmax.f32 %v5495_v59, 0.0  ;;  %v3367_v55 = vld [vmem:[%s17901_s3 + $0x420] sm:$0xff]  ;;  %v7018_v59 = vld [vmem:[%s17899_s1 + $0x18] sm:$0xff] }
 0x346   :  { %v2844_v18 = vmax.f32 %v2268_v36, 0.0  ;;  %v2848_v57 = vmax.f32 %v2272_v41, 0.0  ;;  %v18776_v45 = vsub.f32 %v18563_v37, %v18772_v0  ;;  %v14602_v50 = vmax.f32 %v5497_v40, 0.0  ;;  %4077 = vperm.xlu0 %10176, %v3367_v55   ;;  %7369 = vmatprep.mubr.f32.mxu0 %v7018_v59 }
 0x347   :  { %v1694_v61 = vand.u32 2147483647, %v18775_v12  ;;  %v5476_v56 = vsub.f32 1.0, %v4900_v34  ;;  %v6048_v60 = vmax.f32 %v5472_v4, 0.0  ;;  %v18777_v36 = vsub.f32 %v12834_v62, %v14337_v43  ;;  %v18779_v12 = vld [vmem:[#allocation99_spill] sm:$0xff]  ;;  %v14615_v4 = vpop.permute.xlu1 %3692  ;;  %8144 = vmatprep.mubr.f32.mxu1 %v7018_v59 }
 0x348   :  { %v1698_v39 = vand.u32 2147483647, %v18776_v45  ;;  %v18778_v1 = vsub.f32 %v12834_v62, %v14327_v33  ;;  %v6623_v40 = vmul.f32 %v14378_v24, %v18779_v12  ;;  %v18780_v45 = vld [vmem:[#allocation97_spill] sm:$0xff]  ;;  %v6625_v33 = vmul.f32 %v14386_v47, %v18781_v58 }
 0x349   :  { %v2270_v17 = vsub.f32 1.0, %v1694_v61  ;;  %v4898_v15 = vand.u32 2147483647, %v18777_v36  ;;  %v6052_v0 = vmax.f32 %v5476_v56, 0.0  ;;  %v6624_v43 = vmul.f32 %v6048_v60, %v2844_v18  ;;  %v14625_v18 = vpop.permute.xlu0 %3687 }
 0x34a   :  { %v2274_v41 = vsub.f32 1.0, %v1698_v39  ;;  %v4902_v34 = vand.u32 2147483647, %v18778_v1  ;;  %v6627_v55 = vmul.f32 %v14362_v31, %v18780_v45  ;;  %v6629_v24 = vmul.f32 %v14367_v3, %v18782_v51 }
 0x34b   :  { %v2846_v61 = vmax.f32 %v2270_v17, 0.0  ;;  %v5474_v54 = vsub.f32 1.0, %v4898_v15  ;;  %v6628_v36 = vmul.f32 %v6052_v0, %v2848_v57  ;;  %v4355_v59 = vsub.f32 %v12827_v19, %v14615_v4 }
 0x34c   :  { %v2850_v56 = vmax.f32 %v2274_v41, 0.0  ;;  %v5478_v39 = vsub.f32 1.0, %v4902_v34  ;;  %v9450_v6 = vpack.c.bf16 %v6627_v55, %v6623_v40  ;;  %v4356_v31 = vsub.f32 %v12829_v10, %v14615_v4 }
 0x34d   :  { %v6050_v1 = vmax.f32 %v5474_v54, 0.0  ;;  %v9448_v60 = vpack.c.bf16 %v6628_v36, %v6624_v43  ;;  %v4357_v57 = vsub.f32 %v12832_v38, %v14615_v4  ;;  %v9738_v47 = vpack.c.bf16 %v6629_v24, %v6625_v33 }
 0x34e   :  { %v6054_v17 = vmax.f32 %v5478_v39, 0.0  ;;  %v4358_v58 = vsub.f32 %v12834_v62, %v14615_v4  ;;  %v4931_v0 = vand.u32 2147483647, %v4355_v59  ;;  %v4351_v41 = vsub.f32 %v12827_v19, %v14625_v18  ;;  %v18785_v39 = vld [vmem:[#allocation85_spill] sm:$0xff] }
 0x34f   :  { %v6626_v15 = vmul.f32 %v6050_v1, %v2846_v61  ;;  %9449 = vmatprep.subr.bf16.mxu0 %v9448_v60  ;;  %v4933_v51 = vand.u32 2147483647, %v4357_v57  ;;  %v4352_v34 = vsub.f32 %v12829_v10, %v14625_v18  ;;  %v4353_v40 = vsub.f32 %v12832_v38, %v14625_v18  ;;  %v18783_v61 = vld [vmem:[#allocation86_spill] sm:$0xff] }
 0x350   :  { %v6630_v3 = vmul.f32 %v6054_v17, %v2850_v56  ;;  %9451 = vmatpush1.bf16.msra.mxu0 %v9450_v6  ;;  %v5507_v12 = vsub.f32 1.0, %v4931_v0  ;;  %v4354_v43 = vsub.f32 %v12834_v62, %v14625_v18  ;;  %v18784_v54 = vsub.f32 %v10446_v16, %v18783_v61 }
 0x351   :  { %v5509_v36 = vsub.f32 1.0, %v4933_v51  ;;  %v4927_v56 = vand.u32 2147483647, %v4351_v41  ;;  %v18786_v33 = vsub.f32 %v10446_v16, %v18785_v39  ;;  %v4929_v6 = vand.u32 2147483647, %v4353_v40 }
 0x352   :  { %v1700_v45 = vand.u32 2147483647, %v18784_v54  ;;  %v9736_v55 = vpack.c.bf16 %v6630_v3, %v6626_v15  ;;  %v14647_v24 = vmax.f32 %v5507_v12, 0.0  ;;  %v4904_v60 = vand.u32 2147483647, %v4328_v44  ;;  %v164_v44 = vld [vmem:[%s17900_s2 + $0x438] sm:$0xff] }
 0x353   :  { %v1704_v1 = vand.u32 2147483647, %v18786_v33  ;;  %v14652_v17 = vmax.f32 %v5509_v36, 0.0  ;;  %v5503_v57 = vsub.f32 1.0, %v4927_v56  ;;  %v4908_v15 = vand.u32 2147483647, %v4332_v28  ;;  %888 = vperm.xlu1 %10177, %v164_v44  }
 0x354   :  { %v2276_v59 = vsub.f32 1.0, %v1700_v45  ;;  %9737 = vmatprep.subr.bf16.mxu1 %v9736_v55  ;;  %v5505_v3 = vsub.f32 1.0, %v4929_v6  ;;  %v5480_v41 = vsub.f32 1.0, %v4904_v60  ;;  %v18787_v12 = vsub.f32 %v18563_v37, %v18783_v61  ;;  %v18789_v60 = vld [vmem:[#allocation105_spill] sm:$0xff] }
 0x355   :  { %v2280_v0 = vsub.f32 1.0, %v1704_v1  ;;  %9739 = vmatpush1.bf16.msra.mxu1 %v9738_v47  ;;  %v14663_v54 = vmax.f32 %v5503_v57, 0.0  ;;  %v5484_v55 = vsub.f32 1.0, %v4908_v15  ;;  %v18788_v36 = vsub.f32 %v18563_v37, %v18785_v39  ;;  %v163_v47 = vld [vmem:[%s17900_s2 + $0x430] sm:$0xff] }
 0x356   :  { %v2852_v51 = vmax.f32 %v2276_v59, 0.0  ;;  %v1702_v40 = vand.u32 2147483647, %v18787_v12  ;;  %v14671_v56 = vmax.f32 %v5505_v3, 0.0  ;;  %v6056_v61 = vmax.f32 %v5480_v41, 0.0  ;;  %883 = vperm.xlu0 %10176, %v163_v47   ;;  %v18790_v12 = vld [vmem:[#allocation103_spill] sm:$0xff] }
 0x357   :  { %v2856_v45 = vmax.f32 %v2280_v0, 0.0  ;;  %v1706_v28 = vand.u32 2147483647, %v18788_v36  ;;  %v4906_v1 = vand.u32 2147483647, %v4330_v20  ;;  %v6060_v6 = vmax.f32 %v5484_v55, 0.0  ;;  %v14681_v0 = vpop.permute.xlu1 %3702  ;;  %4092 = vperm.xlu1 %10177, %v3370_v5  }
 0x358   :  { %v2278_v33 = vsub.f32 1.0, %v1702_v40  ;;  %v4910_v39 = vand.u32 2147483647, %v4334_v48  ;;  %v6631_v57 = vmul.f32 %v14450_v21, %v18789_v60  ;;  %v6632_v15 = vmul.f32 %v6056_v61, %v2852_v51  ;;  %v18791_v55 = vld [vmem:[#allocation108_spill] sm:$0xff]  ;;  %v14691_v51 = vpop.permute.xlu0 %3697 }
 0x359   :  { %v2282_v59 = vsub.f32 1.0, %v1706_v28  ;;  %v5482_v41 = vsub.f32 1.0, %v4906_v1  ;;  %v6635_v40 = vmul.f32 %v14434_v14, %v18790_v12  ;;  %v6636_v22 = vmul.f32 %v6060_v6, %v2856_v45  ;;  %v18792_v48 = vld [vmem:[#allocation104_spill] sm:$0xff]  ;;  %v18793_v12 = vld [vmem:[#allocation91_spill] sm:$0xff] }
 0x35a   :  { %v2854_v3 = vmax.f32 %v2278_v33, 0.0  ;;  %v5486_v44 = vsub.f32 1.0, %v4910_v39  ;;  %v6633_v36 = vmul.f32 %v14458_v35, %v18791_v55  ;;  %v6637_v47 = vmul.f32 %v14439_v25, %v18792_v48 }
 0x35b   :  { %v2858_v20 = vmax.f32 %v2282_v59, 0.0  ;;  %v6058_v28 = vmax.f32 %v5482_v41, 0.0  ;;  %v9454_v11 = vpack.c.bf16 %v6635_v40, %v6631_v57  ;;  %v4363_v21 = vsub.f32 %v12827_v19, %v14681_v0 }
 0x35c   :  { %v9452_v61 = vpack.c.bf16 %v6636_v22, %v6632_v15  ;;  %v6062_v33 = vmax.f32 %v5486_v44, 0.0  ;;  %v4364_v14 = vsub.f32 %v12829_v10, %v14681_v0  ;;  %v4365_v45 = vsub.f32 %v12832_v38, %v14681_v0 }
 0x35d   :  { %v6634_v1 = vmul.f32 %v6058_v28, %v2854_v3  ;;  %v9742_v35 = vpack.c.bf16 %v6637_v47, %v6633_v36  ;;  %v4366_v6 = vsub.f32 %v12834_v62, %v14681_v0  ;;  %v4939_v59 = vand.u32 2147483647, %v4363_v21  ;;  %v18795_v36 = vld [vmem:[#allocation90_spill] sm:$0xff] }
 0x35e   :  { %9453 = vmatprep.subr.bf16.mxu0 %v9452_v61  ;;  %v6638_v25 = vmul.f32 %v6062_v33, %v2858_v20  ;;  %v4941_v39 = vand.u32 2147483647, %v4365_v45  ;;  %v4359_v60 = vsub.f32 %v12827_v19, %v14691_v51  ;;  %v4360_v57 = vsub.f32 %v12829_v10, %v14691_v51 }
 0x35f   :  { %9455 = vmatpush1.bf16.msra.mxu0 %v9454_v11  ;;  %v5515_v15 = vsub.f32 1.0, %v4939_v59  ;;  %v4361_v41 = vsub.f32 %v12832_v38, %v14691_v51  ;;  %v4362_v3 = vsub.f32 %v12834_v62, %v14691_v51  ;;  %v18794_v40 = vsub.f32 %v10446_v16, %v18793_v12 }
 0x360   :  { %v9740_v20 = vpack.c.bf16 %v6638_v25, %v6634_v1  ;;  %v5517_v44 = vsub.f32 1.0, %v4941_v39  ;;  %v4935_v55 = vand.u32 2147483647, %v4359_v60  ;;  %v18796_v28 = vsub.f32 %v10446_v16, %v18795_v36 }
 0x361   :  { %v1708_v22 = vand.u32 2147483647, %v18794_v40  ;;  %v14713_v47 = vmax.f32 %v5515_v15, 0.0  ;;  %v4937_v11 = vand.u32 2147483647, %v4361_v41  ;;  %v18797_v15 = vsub.f32 %v18563_v37, %v18793_v12 }
 0x362   :  { %v1712_v48 = vand.u32 2147483647, %v18796_v28  ;;  %v4912_v61 = vand.u32 2147483647, %v4336_v29  ;;  %9741 = vmatprep.subr.bf16.mxu1 %v9740_v20  ;;  %v14718_v33 = vmax.f32 %v5517_v44, 0.0  ;;  %v5511_v45 = vsub.f32 1.0, %v4935_v55 }
 0x363   :  { %v2284_v21 = vsub.f32 1.0, %v1708_v22  ;;  %v4916_v1 = vand.u32 2147483647, %v4340_v13  ;;  %9743 = vmatpush1.bf16.msra.mxu1 %v9742_v35  ;;  %v5513_v25 = vsub.f32 1.0, %v4937_v11  ;;  %v1710_v41 = vand.u32 2147483647, %v18797_v15 }
 0x364   :  { %v2288_v59 = vsub.f32 1.0, %v1712_v48  ;;  %v5488_v60 = vsub.f32 1.0, %v4912_v61  ;;  %v14726_v40 = vmax.f32 %v5511_v45, 0.0  ;;  %v18798_v20 = vsub.f32 %v18563_v37, %v18795_v36  ;;  %v14741_v45 = vpop.permute.xlu1 %3712 }
 0x365   :  { %v2860_v39 = vmax.f32 %v2284_v21, 0.0  ;;  %v5492_v22 = vsub.f32 1.0, %v4916_v1  ;;  %v14731_v55 = vmax.f32 %v5513_v25, 0.0  ;;  %v2286_v13 = vsub.f32 1.0, %v1710_v41  ;;  %v18799_v21 = vld [vmem:[#allocation113_spill] sm:$0xff]  ;;  %v18801_v41 = vld [vmem:[#allocation114_spill] sm:$0xff] }
 0x366   :  { %v2864_v29 = vmax.f32 %v2288_v59, 0.0  ;;  %v1714_v44 = vand.u32 2147483647, %v18798_v20  ;;  %v6064_v28 = vmax.f32 %v5488_v60, 0.0  ;;  %v4914_v35 = vand.u32 2147483647, %v4338_v53 }
 0x367   :  { %v6068_v48 = vmax.f32 %v5492_v22, 0.0  ;;  %v4918_v12 = vand.u32 2147483647, %v4342_v42  ;;  %v6639_v61 = vmul.f32 %v14522_v23, %v18799_v21  ;;  %v2862_v59 = vmax.f32 %v2286_v13, 0.0  ;;  %v18800_v25 = vld [vmem:[#allocation109_spill] sm:$0xff]  ;;  %v18802_v20 = vld [vmem:[#allocation110_spill] sm:$0xff] }
 0x368   :  { %v2290_v11 = vsub.f32 1.0, %v1714_v44  ;;  %v6640_v36 = vmul.f32 %v6064_v28, %v2860_v39  ;;  %v5490_v1 = vsub.f32 1.0, %v4914_v35  ;;  %v6643_v60 = vmul.f32 %v14506_v32, %v18800_v25  ;;  %v3369_v42 = vld [vmem:[%s17901_s3 + $0x430] sm:$0xff] }
 0x369   :  { %v6644_v15 = vmul.f32 %v6068_v48, %v2864_v29  ;;  %v5494_v53 = vsub.f32 1.0, %v4918_v12  ;;  %v6641_v22 = vmul.f32 %v14530_v26, %v18801_v41  ;;  %v6645_v44 = vmul.f32 %v14511_v63, %v18802_v20  ;;  %v14757_v29 = vpop.permute.xlu0 %3707  ;;  %4087 = vperm.xlu0 %10176, %v3369_v42   ;;  %v18805_v42 = vld [vmem:[#allocation95_spill] sm:$0xff] }
 0x36a   :  { %v2866_v30 = vmax.f32 %v2290_v11, 0.0  ;;  %v6066_v23 = vmax.f32 %v5490_v1, 0.0  ;;  %v9458_v39 = vpack.c.bf16 %v6643_v60, %v6639_v61  ;;  %v4371_v32 = vsub.f32 %v12827_v19, %v14741_v45 }
 0x36b   :  { %v9456_v26 = vpack.c.bf16 %v6644_v15, %v6640_v36  ;;  %v6070_v28 = vmax.f32 %v5494_v53, 0.0  ;;  %v4373_v35 = vsub.f32 %v12832_v38, %v14741_v45  ;;  %v9746_v11 = vpack.c.bf16 %v6645_v44, %v6641_v22  ;;  %v18803_v15 = vld [vmem:[#allocation96_spill] sm:$0xff] }
 0x36c   :  { %v6642_v48 = vmul.f32 %v6066_v23, %v2862_v59  ;;  %v4947_v12 = vand.u32 2147483647, %v4371_v32  ;;  %v4367_v1 = vsub.f32 %v12827_v19, %v14757_v29  ;;  %v4368_v36 = vsub.f32 %v12829_v10, %v14757_v29 }
 0x36d   :  { %9457 = vmatprep.subr.bf16.mxu0 %v9456_v26  ;;  %v6646_v21 = vmul.f32 %v6070_v28, %v2866_v30  ;;  %v4949_v61 = vand.u32 2147483647, %v4373_v35  ;;  %v4369_v60 = vsub.f32 %v12832_v38, %v14757_v29  ;;  %v18804_v53 = vsub.f32 %v10446_v16, %v18803_v15 }
 0x36e   :  { %9459 = vmatpush1.bf16.msra.mxu0 %v9458_v39  ;;  %v5523_v25 = vsub.f32 1.0, %v4947_v12  ;;  %v4943_v5 = vand.u32 2147483647, %v4367_v1  ;;  %v18806_v23 = vsub.f32 %v10446_v16, %v18805_v42  ;;  %v4920_v26 = vand.u32 2147483647, %v4344_v46 }
 0x36f   :  { %v1716_v41 = vand.u32 2147483647, %v18804_v53  ;;  %v9744_v30 = vpack.c.bf16 %v6646_v21, %v6642_v48  ;;  %v5525_v22 = vsub.f32 1.0, %v4949_v61  ;;  %v4945_v39 = vand.u32 2147483647, %v4369_v60 }
 0x370   :  { %v1720_v20 = vand.u32 2147483647, %v18806_v23  ;;  %v14779_v44 = vmax.f32 %v5523_v25, 0.0  ;;  %v5519_v35 = vsub.f32 1.0, %v4943_v5  ;;  %v18807_v48 = vsub.f32 %v12829_v10, %v14543_v52 }
 0x371   :  { %v2292_v32 = vsub.f32 1.0, %v1716_v41  ;;  %9745 = vmatprep.subr.bf16.mxu1 %v9744_v30  ;;  %v14784_v28 = vmax.f32 %v5525_v22, 0.0  ;;  %v5521_v61 = vsub.f32 1.0, %v4945_v39  ;;  %v5496_v25 = vsub.f32 1.0, %v4920_v26 }
 0x372   :  { %v2296_v12 = vsub.f32 1.0, %v1720_v20  ;;  %v4924_v21 = vand.u32 2147483647, %v18807_v48  ;;  %9747 = vmatpush1.bf16.msra.mxu1 %v9746_v11  ;;  %v18808_v60 = vsub.f32 %v18563_v37, %v18803_v15  ;;  %v14792_v41 = vmax.f32 %v5519_v35, 0.0 }
 0x373   :  { %v2868_v1 = vmax.f32 %v2292_v32, 0.0  ;;  %v18809_v22 = vsub.f32 %v18563_v37, %v18805_v42  ;;  %v14797_v23 = vmax.f32 %v5521_v61, 0.0  ;;  %v6072_v20 = vmax.f32 %v5496_v25, 0.0  ;;  %v18813_v25 = vld [vmem:[#allocation115_spill] sm:$0xff] }
 0x374   :  { %v1718_v53 = vand.u32 2147483647, %v18808_v60  ;;  %v2872_v46 = vmax.f32 %v2296_v12, 0.0  ;;  %v5500_v30 = vsub.f32 1.0, %v4924_v21  ;;  %v18810_v11 = vsub.f32 %v12834_v62, %v14553_v27  ;;  %v18812_v12 = vld [vmem:[#allocation119_spill] sm:$0xff]  ;;  %v14807_v60 = vpop.permute.xlu1 %3722 }
 0x375   :  { %v1722_v5 = vand.u32 2147483647, %v18809_v22  ;;  %v18811_v15 = vsub.f32 %v12834_v62, %v14543_v52  ;;  %v6647_v21 = vmul.f32 %v14594_v49, %v18812_v12  ;;  %v6648_v42 = vmul.f32 %v6072_v20, %v2868_v1  ;;  %v14817_v1 = vpop.permute.xlu0 %3717 }
 0x376   :  { %v2294_v48 = vsub.f32 1.0, %v1718_v53  ;;  %v4922_v39 = vand.u32 2147483647, %v18810_v11  ;;  %v6076_v32 = vmax.f32 %v5500_v30, 0.0  ;;  %v6651_v53 = vmul.f32 %v14578_v7, %v18813_v25  ;;  %v18814_v30 = vld [vmem:[#allocation120_spill] sm:$0xff] }
 0x377   :  { %v2298_v26 = vsub.f32 1.0, %v1722_v5  ;;  %v4926_v35 = vand.u32 2147483647, %v18811_v15  ;;  %v6649_v5 = vmul.f32 %v14602_v50, %v18814_v30  ;;  %v18815_v15 = vld [vmem:[#allocation118_spill] sm:$0xff]  ;;  %v4379_v49 = vsub.f32 %v12827_v19, %v14807_v60 }
 0x378   :  { %v2870_v61 = vmax.f32 %v2294_v48, 0.0  ;;  %v5498_v22 = vsub.f32 1.0, %v4922_v39  ;;  %v6652_v63 = vmul.f32 %v6076_v32, %v2872_v46  ;;  %v9462_v52 = vpack.c.bf16 %v6651_v53, %v6647_v21  ;;  %v166_v21 = vld [vmem:[%s17900_s2 + $0x448] sm:$0xff] }
 0x379   :  { %v2874_v27 = vmax.f32 %v2298_v26, 0.0  ;;  %v5502_v11 = vsub.f32 1.0, %v4926_v35  ;;  %v6653_v13 = vmul.f32 %v14583_v8, %v18815_v15  ;;  %v4380_v7 = vsub.f32 %v12829_v10, %v14807_v60  ;;  %898 = vperm.xlu1 %10177, %v166_v21  }
 0x37a   :  { %v6074_v59 = vmax.f32 %v5498_v22, 0.0  ;;  %v9460_v20 = vpack.c.bf16 %v6652_v63, %v6648_v42  ;;  %v4381_v46 = vsub.f32 %v12832_v38, %v14807_v60  ;;  %v4382_v32 = vsub.f32 %v12834_v62, %v14807_v60  ;;  %v18816_v22 = vld [vmem:[#allocation102_spill] sm:$0xff] }
 0x37b   :  { %v6078_v48 = vmax.f32 %v5502_v11, 0.0  ;;  %v9750_v50 = vpack.c.bf16 %v6653_v13, %v6649_v5  ;;  %v4955_v26 = vand.u32 2147483647, %v4379_v49  ;;  %v4375_v12 = vsub.f32 %v12827_v19, %v14817_v1  ;;  %v165_v13 = vld [vmem:[%s17900_s2 + $0x440] sm:$0xff]  ;;  %v18818_v5 = vld [vmem:[#allocation101_spill] sm:$0xff] }
 0x37c   :  { %v6650_v39 = vmul.f32 %v6074_v59, %v2870_v61  ;;  %9461 = vmatprep.subr.bf16.mxu0 %v9460_v20  ;;  %v4957_v35 = vand.u32 2147483647, %v4381_v46  ;;  %v4376_v63 = vsub.f32 %v12829_v10, %v14817_v1  ;;  %v4377_v42 = vsub.f32 %v12832_v38, %v14817_v1  ;;  %893 = vperm.xlu0 %10176, %v165_v13  }
 0x37d   :  { %v6654_v8 = vmul.f32 %v6078_v48, %v2874_v27  ;;  %9463 = vmatpush1.bf16.msra.mxu0 %v9462_v52  ;;  %v5531_v59 = vsub.f32 1.0, %v4955_v26  ;;  %v4378_v61 = vsub.f32 %v12834_v62, %v14817_v1  ;;  %v18817_v25 = vsub.f32 %v10446_v16, %v18816_v22 }
 0x37e   :  { %v5533_v11 = vsub.f32 1.0, %v4957_v35  ;;  %v4951_v30 = vand.u32 2147483647, %v4375_v12  ;;  %v18819_v15 = vsub.f32 %v10446_v16, %v18818_v5  ;;  %v4953_v20 = vand.u32 2147483647, %v4377_v42 }
 0x37f   :  { %v1724_v53 = vand.u32 2147483647, %v18817_v25  ;;  %v9748_v27 = vpack.c.bf16 %v6654_v8, %v6650_v39  ;;  %v14845_v52 = vmax.f32 %v5531_v59, 0.0  ;;  %v4928_v46 = vand.u32 2147483647, %v4352_v34 }
 0x380   :  { %v1728_v49 = vand.u32 2147483647, %v18819_v15  ;;  %v14850_v26 = vmax.f32 %v5533_v11, 0.0  ;;  %v5527_v21 = vsub.f32 1.0, %v4951_v30  ;;  %v4932_v8 = vand.u32 2147483647, %v4356_v31 }
 0x381   :  { %v2300_v48 = vsub.f32 1.0, %v1724_v53  ;;  %9749 = vmatprep.subr.bf16.mxu1 %v9748_v27  ;;  %v5529_v35 = vsub.f32 1.0, %v4953_v20  ;;  %v5504_v13 = vsub.f32 1.0, %v4928_v46  ;;  %v18820_v59 = vsub.f32 %v18563_v37, %v18816_v22 }
 0x382   :  { %v2304_v39 = vsub.f32 1.0, %v1728_v49  ;;  %9751 = vmatpush1.bf16.msra.mxu1 %v9750_v50  ;;  %v14858_v25 = vmax.f32 %v5527_v21, 0.0  ;;  %v5508_v53 = vsub.f32 1.0, %v4932_v8  ;;  %v18821_v27 = vsub.f32 %v18563_v37, %v18818_v5  ;;  %v14873_v21 = vpop.permute.xlu1 %3732 }
 0x383   :  { %v2876_v12 = vmax.f32 %v2300_v48, 0.0  ;;  %v1726_v42 = vand.u32 2147483647, %v18820_v59  ;;  %v14863_v30 = vmax.f32 %v5529_v35, 0.0  ;;  %v6080_v15 = vmax.f32 %v5504_v13, 0.0  ;;  %v18822_v48 = vld [vmem:[#allocation125_spill] sm:$0xff] }
 0x384   :  { %v2880_v34 = vmax.f32 %v2304_v39, 0.0  ;;  %v1730_v11 = vand.u32 2147483647, %v18821_v27  ;;  %v4930_v50 = vand.u32 2147483647, %v4354_v43  ;;  %v6084_v49 = vmax.f32 %v5508_v53, 0.0 }
 0x385   :  { %v2302_v31 = vsub.f32 1.0, %v1726_v42  ;;  %v4934_v22 = vand.u32 2147483647, %v4358_v58  ;;  %v6655_v46 = vmul.f32 %v14663_v54, %v18822_v48  ;;  %v6656_v5 = vmul.f32 %v6080_v15, %v2876_v12  ;;  %v18823_v35 = vld [vmem:[#allocation123_spill] sm:$0xff]  ;;  %v18824_v42 = vld [vmem:[#allocation126_spill] sm:$0xff]  ;;  %v18825_v58 = vld [vmem:[#allocation124_spill] sm:$0xff]  ;;  %v14883_v12 = vpop.permute.xlu0 %3727 }
 0x386   :  { %v2306_v20 = vsub.f32 1.0, %v1730_v11  ;;  %v5506_v8 = vsub.f32 1.0, %v4930_v50  ;;  %v6659_v13 = vmul.f32 %v14647_v24, %v18823_v35  ;;  %v6660_v59 = vmul.f32 %v6084_v49, %v2880_v34  ;;  %v18826_v35 = vld [vmem:[#allocation107_spill] sm:$0xff] }
 0x387   :  { %v2878_v39 = vmax.f32 %v2302_v31, 0.0  ;;  %v5510_v43 = vsub.f32 1.0, %v4934_v22  ;;  %v6657_v53 = vmul.f32 %v14671_v56, %v18824_v42  ;;  %v6661_v11 = vmul.f32 %v14652_v17, %v18825_v58 }
 0x388   :  { %v2882_v18 = vmax.f32 %v2306_v20, 0.0  ;;  %v6082_v27 = vmax.f32 %v5506_v8, 0.0  ;;  %v9466_v4 = vpack.c.bf16 %v6659_v13, %v6655_v46  ;;  %v4387_v54 = vsub.f32 %v12827_v19, %v14873_v21 }
 0x389   :  { %v9464_v15 = vpack.c.bf16 %v6660_v59, %v6656_v5  ;;  %v6086_v31 = vmax.f32 %v5510_v43, 0.0  ;;  %v4388_v24 = vsub.f32 %v12829_v10, %v14873_v21  ;;  %v4389_v34 = vsub.f32 %v12832_v38, %v14873_v21 }
 0x38a   :  { %v6658_v50 = vmul.f32 %v6082_v27, %v2878_v39  ;;  %v9754_v56 = vpack.c.bf16 %v6661_v11, %v6657_v53  ;;  %v4390_v49 = vsub.f32 %v12834_v62, %v14873_v21  ;;  %v4963_v20 = vand.u32 2147483647, %v4387_v54  ;;  %v18828_v53 = vld [vmem:[#allocation106_spill] sm:$0xff] }
 0x38b   :  { %9465 = vmatprep.subr.bf16.mxu0 %v9464_v15  ;;  %v6662_v17 = vmul.f32 %v6086_v31, %v2882_v18  ;;  %v4965_v22 = vand.u32 2147483647, %v4389_v34  ;;  %v4383_v48 = vsub.f32 %v12827_v19, %v14883_v12  ;;  %v4384_v46 = vsub.f32 %v12829_v10, %v14883_v12 }
 0x38c   :  { %9467 = vmatpush1.bf16.msra.mxu0 %v9466_v4  ;;  %v5539_v5 = vsub.f32 1.0, %v4963_v20  ;;  %v4385_v8 = vsub.f32 %v12832_v38, %v14883_v12  ;;  %v4386_v39 = vsub.f32 %v12834_v62, %v14883_v12  ;;  %v18827_v13 = vsub.f32 %v10446_v16, %v18826_v35 }
 0x38d   :  { %v9752_v18 = vpack.c.bf16 %v6662_v17, %v6658_v50  ;;  %v5541_v43 = vsub.f32 1.0, %v4965_v22  ;;  %v4959_v42 = vand.u32 2147483647, %v4383_v48  ;;  %v18829_v27 = vsub.f32 %v10446_v16, %v18828_v53  ;;  %v3372_v17 = vld [vmem:[%s17901_s3 + $0x448] sm:$0xff] }
 0x38e   :  { %v1732_v59 = vand.u32 2147483647, %v18827_v13  ;;  %v14905_v11 = vmax.f32 %v5539_v5, 0.0  ;;  %v4961_v4 = vand.u32 2147483647, %v4385_v8  ;;  %4102 = vperm.xlu1 %10177, %v3372_v17   ;;  %v3371_v13 = vld [vmem:[%s17901_s3 + $0x440] sm:$0xff] }
 0x38f   :  { %v1736_v58 = vand.u32 2147483647, %v18829_v27  ;;  %v4936_v15 = vand.u32 2147483647, %v4360_v57  ;;  %9753 = vmatprep.subr.bf16.mxu1 %v9752_v18  ;;  %v14910_v31 = vmax.f32 %v5541_v43, 0.0  ;;  %v5535_v34 = vsub.f32 1.0, %v4959_v42  ;;  %4097 = vperm.xlu0 %10176, %v3371_v13  }
 0x390   :  { %v2308_v54 = vsub.f32 1.0, %v1732_v59  ;;  %v4940_v50 = vand.u32 2147483647, %v4364_v14  ;;  %9755 = vmatpush1.bf16.msra.mxu1 %v9754_v56  ;;  %v5537_v22 = vsub.f32 1.0, %v4961_v4  ;;  %v18830_v57 = vsub.f32 %v18563_v37, %v18826_v35  ;;  %v18834_v13 = vld [vmem:[#allocation133_spill] sm:$0xff] }
 0x391   :  { %v2312_v20 = vsub.f32 1.0, %v1736_v58  ;;  %v5512_v5 = vsub.f32 1.0, %v4936_v15  ;;  %v14924_v59 = vmax.f32 %v5535_v34, 0.0  ;;  %v18831_v43 = vsub.f32 %v18563_v37, %v18828_v53  ;;  %v18832_v34 = vld [vmem:[#allocation131_spill] sm:$0xff]  ;;  %v14939_v53 = vpop.permute.xlu1 %3742 }
 0x392   :  { %v2884_v48 = vmax.f32 %v2308_v54, 0.0  ;;  %v1734_v8 = vand.u32 2147483647, %v18830_v57  ;;  %v5516_v18 = vsub.f32 1.0, %v4940_v50  ;;  %v14929_v42 = vmax.f32 %v5537_v22, 0.0 }
 0x393   :  { %v2888_v14 = vmax.f32 %v2312_v20, 0.0  ;;  %v1738_v56 = vand.u32 2147483647, %v18831_v43  ;;  %v6088_v27 = vmax.f32 %v5512_v5, 0.0  ;;  %v4938_v35 = vand.u32 2147483647, %v4362_v3 }
 0x394   :  { %v2310_v58 = vsub.f32 1.0, %v1734_v8  ;;  %v6092_v4 = vmax.f32 %v5516_v18, 0.0  ;;  %v4942_v15 = vand.u32 2147483647, %v4366_v6  ;;  %v6663_v20 = vmul.f32 %v14726_v40, %v18832_v34  ;;  %v18833_v5 = vld [vmem:[#allocation129_spill] sm:$0xff]  ;;  %v18835_v6 = vld [vmem:[#allocation130_spill] sm:$0xff] }
 0x395   :  { %v2314_v54 = vsub.f32 1.0, %v1738_v56  ;;  %v6664_v50 = vmul.f32 %v6088_v27, %v2884_v48  ;;  %v5514_v22 = vsub.f32 1.0, %v4938_v35  ;;  %v6667_v57 = vmul.f32 %v14713_v47, %v18833_v5  ;;  %v14949_v48 = vpop.permute.xlu0 %3737  ;;  %v18836_v5 = vld [vmem:[#allocation112_spill] sm:$0xff] }
 0x396   :  { %v2886_v17 = vmax.f32 %v2310_v58, 0.0  ;;  %v6668_v8 = vmul.f32 %v6092_v4, %v2888_v14  ;;  %v5518_v3 = vsub.f32 1.0, %v4942_v15  ;;  %v6665_v18 = vmul.f32 %v14731_v55, %v18834_v13  ;;  %v18848_v47 = vld [vmem:[#allocation136_spill] sm:$0xff] }
 0x397   :  { %v2890_v51 = vmax.f32 %v2314_v54, 0.0  ;;  %v6090_v43 = vmax.f32 %v5514_v22, 0.0  ;;  %v9470_v0 = vpack.c.bf16 %v6667_v57, %v6663_v20  ;;  %v6669_v56 = vmul.f32 %v14718_v33, %v18835_v6 }
 0x398   :  { %v4395_v40 = vsub.f32 %v12827_v19, %v14939_v53  ;;  %v9468_v27 = vpack.c.bf16 %v6668_v8, %v6664_v50  ;;  %v6094_v58 = vmax.f32 %v5518_v3, 0.0  ;;  %v4397_v14 = vsub.f32 %v12832_v38, %v14939_v53 }
 0x399   :  { %v6666_v35 = vmul.f32 %v6090_v43, %v2886_v17  ;;  %v9758_v55 = vpack.c.bf16 %v6669_v56, %v6665_v18  ;;  %v4391_v34 = vsub.f32 %v12827_v19, %v14949_v48  ;;  %v4392_v20 = vsub.f32 %v12829_v10, %v14949_v48  ;;  %v18838_v18 = vld [vmem:[#allocation111_spill] sm:$0xff] }
 0x39a   :  { %v4971_v54 = vand.u32 2147483647, %v4395_v40  ;;  %9469 = vmatprep.subr.bf16.mxu0 %v9468_v27  ;;  %v6670_v33 = vmul.f32 %v6094_v58, %v2890_v51  ;;  %v4973_v15 = vand.u32 2147483647, %v4397_v14  ;;  %v4393_v22 = vsub.f32 %v12832_v38, %v14949_v48 }
 0x39b   :  { %9471 = vmatpush1.bf16.msra.mxu0 %v9470_v0  ;;  %v18837_v57 = vsub.f32 %v10446_v16, %v18836_v5  ;;  %v4967_v13 = vand.u32 2147483647, %v4391_v34  ;;  %v18839_v43 = vsub.f32 %v10446_v16, %v18838_v18  ;;  %v4944_v27 = vand.u32 2147483647, %v4368_v36 }
 0x39c   :  { %v5547_v50 = vsub.f32 1.0, %v4971_v54  ;;  %v9756_v51 = vpack.c.bf16 %v6670_v33, %v6666_v35  ;;  %v5549_v3 = vsub.f32 1.0, %v4973_v15  ;;  %v4969_v0 = vand.u32 2147483647, %v4393_v22 }
 0x39d   :  { %v1740_v8 = vand.u32 2147483647, %v18837_v57  ;;  %v1744_v6 = vand.u32 2147483647, %v18839_v43  ;;  %v5543_v14 = vsub.f32 1.0, %v4967_v13  ;;  %v18840_v35 = vsub.f32 %v12829_v10, %v14741_v45  ;;  %v168_v43 = vld [vmem:[%s17900_s2 + $0x458] sm:$0xff] }
 0x39e   :  { %v14971_v56 = vmax.f32 %v5547_v50, 0.0  ;;  %9757 = vmatprep.subr.bf16.mxu1 %v9756_v51  ;;  %v14976_v58 = vmax.f32 %v5549_v3, 0.0  ;;  %v5545_v15 = vsub.f32 1.0, %v4969_v0  ;;  %v5520_v50 = vsub.f32 1.0, %v4944_v27  ;;  %908 = vperm.xlu1 %10177, %v168_v43   ;;  %v167_v27 = vld [vmem:[%s17900_s2 + $0x450] sm:$0xff] }
 0x39f   :  { %v2316_v40 = vsub.f32 1.0, %v1740_v8  ;;  %v2320_v54 = vsub.f32 1.0, %v1744_v6  ;;  %v4948_v33 = vand.u32 2147483647, %v18840_v35  ;;  %9759 = vmatpush1.bf16.msra.mxu1 %v9758_v55  ;;  %v18841_v22 = vsub.f32 %v18563_v37, %v18836_v5  ;;  %903 = vperm.xlu0 %10176, %v167_v27  }
 0x3a0   :  { %v14984_v8 = vmax.f32 %v5543_v14, 0.0  ;;  %v18842_v3 = vsub.f32 %v18563_v37, %v18838_v18  ;;  %v14992_v55 = vmax.f32 %v5545_v15, 0.0  ;;  %v6096_v6 = vmax.f32 %v5520_v50, 0.0  ;;  %v15005_v50 = vpop.permute.xlu1 %3752 }
 0x3a1   :  { %v2892_v34 = vmax.f32 %v2316_v40, 0.0  ;;  %v1742_v57 = vand.u32 2147483647, %v18841_v22  ;;  %v2896_v36 = vmax.f32 %v2320_v54, 0.0  ;;  %v5524_v51 = vsub.f32 1.0, %v4948_v33  ;;  %v18845_v33 = vld [vmem:[#allocation138_spill] sm:$0xff] }
 0x3a2   :  { %v1746_v13 = vand.u32 2147483647, %v18842_v3  ;;  %v18843_v5 = vsub.f32 %v12834_v62, %v14757_v29  ;;  %v18844_v54 = vsub.f32 %v12834_v62, %v14741_v45  ;;  %v6671_v15 = vmul.f32 %v14792_v41, %v18845_v33  ;;  %v18846_v3 = vld [vmem:[#allocation135_spill] sm:$0xff] }
 0x3a3   :  { %v2318_v0 = vsub.f32 1.0, %v1742_v57  ;;  %v6100_v14 = vmax.f32 %v5524_v51, 0.0  ;;  %v6672_v22 = vmul.f32 %v6096_v6, %v2892_v34  ;;  %v6675_v43 = vmul.f32 %v14779_v44, %v18846_v3  ;;  %v15015_v34 = vpop.permute.xlu0 %3747 }
 0x3a4   :  { %v4946_v40 = vand.u32 2147483647, %v18843_v5  ;;  %v2322_v18 = vsub.f32 1.0, %v1746_v13  ;;  %v4950_v35 = vand.u32 2147483647, %v18844_v54  ;;  %v18847_v13 = vld [vmem:[#allocation140_spill] sm:$0xff]  ;;  %v6677_v41 = vmul.f32 %v14784_v28, %v18848_v47 }
 0x3a5   :  { %v2894_v29 = vmax.f32 %v2318_v0, 0.0  ;;  %v6676_v5 = vmul.f32 %v6100_v14, %v2896_v36  ;;  %v6673_v17 = vmul.f32 %v14797_v23, %v18847_v13  ;;  %v9474_v54 = vpack.c.bf16 %v6675_v43, %v6671_v15 }
 0x3a6   :  { %v5522_v57 = vsub.f32 1.0, %v4946_v40  ;;  %v2898_v4 = vmax.f32 %v2322_v18, 0.0  ;;  %v5526_v51 = vsub.f32 1.0, %v4950_v35  ;;  %v4403_v27 = vsub.f32 %v12827_v19, %v15005_v50 }
 0x3a7   :  { %v9472_v6 = vpack.c.bf16 %v6676_v5, %v6672_v22  ;;  %v4404_v44 = vsub.f32 %v12829_v10, %v15005_v50  ;;  %v4405_v36 = vsub.f32 %v12832_v38, %v15005_v50  ;;  %v9762_v23 = vpack.c.bf16 %v6677_v41, %v6673_v17 }
 0x3a8   :  { %v6098_v45 = vmax.f32 %v5522_v57, 0.0  ;;  %v6102_v0 = vmax.f32 %v5526_v51, 0.0  ;;  %v4406_v14 = vsub.f32 %v12834_v62, %v15005_v50  ;;  %v4979_v18 = vand.u32 2147483647, %v4403_v27  ;;  %v18851_v51 = vld [vmem:[#allocation116_spill] sm:$0xff] }
 0x3a9   :  { %9473 = vmatprep.subr.bf16.mxu0 %v9472_v6  ;;  %v4981_v47 = vand.u32 2147483647, %v4405_v36  ;;  %v4399_v35 = vsub.f32 %v12827_v19, %v15015_v34  ;;  %v4400_v33 = vsub.f32 %v12829_v10, %v15015_v34  ;;  %v4401_v22 = vsub.f32 %v12832_v38, %v15015_v34 }
 0x3aa   :  { %v6674_v40 = vmul.f32 %v6098_v45, %v2894_v29  ;;  %v6678_v28 = vmul.f32 %v6102_v0, %v2898_v4  ;;  %9475 = vmatpush1.bf16.msra.mxu0 %v9474_v54  ;;  %v5555_v15 = vsub.f32 1.0, %v4979_v18  ;;  %v4402_v17 = vsub.f32 %v12834_v62, %v15015_v34  ;;  %v18849_v29 = vld [vmem:[#allocation117_spill] sm:$0xff] }
 0x3ab   :  { %v18850_v57 = vsub.f32 %v10446_v16, %v18849_v29  ;;  %v5557_v43 = vsub.f32 1.0, %v4981_v47  ;;  %v4975_v5 = vand.u32 2147483647, %v4399_v35  ;;  %v18852_v13 = vsub.f32 %v10446_v16, %v18851_v51 }
 0x3ac   :  { %v9760_v4 = vpack.c.bf16 %v6678_v28, %v6674_v40  ;;  %v15037_v41 = vmax.f32 %v5555_v15, 0.0  ;;  %v4977_v54 = vand.u32 2147483647, %v4401_v22  ;;  %v4952_v6 = vand.u32 2147483647, %v4376_v63 }
 0x3ad   :  { %v1748_v3 = vand.u32 2147483647, %v18850_v57  ;;  %v1752_v45 = vand.u32 2147483647, %v18852_v13  ;;  %v15042_v0 = vmax.f32 %v5557_v43, 0.0  ;;  %v5551_v36 = vsub.f32 1.0, %v4975_v5 }
 0x3ae   :  { %9761 = vmatprep.subr.bf16.mxu1 %v9760_v4  ;;  %v4956_v40 = vand.u32 2147483647, %v4380_v7  ;;  %v5553_v28 = vsub.f32 1.0, %v4977_v54  ;;  %v5528_v35 = vsub.f32 1.0, %v4952_v6  ;;  %v18853_v15 = vsub.f32 %v18563_v37, %v18849_v29  ;;  %v3374_v7 = vld [vmem:[%s17901_s3 + $0x458] sm:$0xff]  ;;  %v18855_v6 = vld [vmem:[#allocation145_spill] sm:$0xff] }
 0x3af   :  { %v2324_v27 = vsub.f32 1.0, %v1748_v3  ;;  %v2328_v18 = vsub.f32 1.0, %v1752_v45  ;;  %9763 = vmatpush1.bf16.msra.mxu1 %v9762_v23  ;;  %v15050_v57 = vmax.f32 %v5551_v36, 0.0  ;;  %v18854_v4 = vsub.f32 %v18563_v37, %v18851_v51  ;;  %4112 = vperm.xlu1 %10177, %v3374_v7   ;;  %v3373_v45 = vld [vmem:[%s17901_s3 + $0x450] sm:$0xff]  ;;  %v18858_v7 = vld [vmem:[#allocation143_spill] sm:$0xff] }
 0x3b0   :  { %v1750_v22 = vand.u32 2147483647, %v18853_v15  ;;  %v5532_v3 = vsub.f32 1.0, %v4956_v40  ;;  %v15058_v23 = vmax.f32 %v5553_v28, 0.0  ;;  %v6104_v5 = vmax.f32 %v5528_v35, 0.0  ;;  %4107 = vperm.xlu0 %10176, %v3373_v45   ;;  %v18856_v28 = vld [vmem:[#allocation141_spill] sm:$0xff] }
 0x3b1   :  { %v2900_v47 = vmax.f32 %v2324_v27, 0.0  ;;  %v2904_v63 = vmax.f32 %v2328_v18, 0.0  ;;  %v1754_v43 = vand.u32 2147483647, %v18854_v4  ;;  %v4954_v29 = vand.u32 2147483647, %v4378_v61  ;;  %v15071_v18 = vpop.permute.xlu1 %3762 }
 0x3b2   :  { %v2326_v13 = vsub.f32 1.0, %v1750_v22  ;;  %v6108_v54 = vmax.f32 %v5532_v3, 0.0  ;;  %v4958_v27 = vand.u32 2147483647, %v4382_v32  ;;  %v6679_v36 = vmul.f32 %v14858_v25, %v18855_v6  ;;  %v18857_v4 = vld [vmem:[#allocation146_spill] sm:$0xff] }
 0x3b3   :  { %v2330_v51 = vsub.f32 1.0, %v1754_v43  ;;  %v6680_v40 = vmul.f32 %v6104_v5, %v2900_v47  ;;  %v5530_v61 = vsub.f32 1.0, %v4954_v29  ;;  %v6683_v35 = vmul.f32 %v14845_v52, %v18856_v28  ;;  %v15081_v47 = vpop.permute.xlu0 %3757  ;;  %v18859_v28 = vld [vmem:[#allocation122_spill] sm:$0xff] }
 0x3b4   :  { %v2902_v1 = vmax.f32 %v2326_v13, 0.0  ;;  %v6684_v15 = vmul.f32 %v6108_v54, %v2904_v63  ;;  %v5534_v3 = vsub.f32 1.0, %v4958_v27  ;;  %v6681_v43 = vmul.f32 %v14863_v30, %v18857_v4 }
 0x3b5   :  { %v2906_v22 = vmax.f32 %v2330_v51, 0.0  ;;  %v6106_v60 = vmax.f32 %v5530_v61, 0.0  ;;  %v9478_v32 = vpack.c.bf16 %v6683_v35, %v6679_v36  ;;  %v6685_v25 = vmul.f32 %v14850_v26, %v18858_v7 }
 0x3b6   :  { %v4411_v45 = vsub.f32 %v12827_v19, %v15071_v18  ;;  %v9476_v5 = vpack.c.bf16 %v6684_v15, %v6680_v40  ;;  %v6110_v13 = vmax.f32 %v5534_v3, 0.0  ;;  %v4412_v52 = vsub.f32 %v12829_v10, %v15071_v18 }
 0x3b7   :  { %v4413_v63 = vsub.f32 %v12832_v38, %v15071_v18  ;;  %v6682_v29 = vmul.f32 %v6106_v60, %v2902_v1  ;;  %v9766_v30 = vpack.c.bf16 %v6685_v25, %v6681_v43  ;;  %v4414_v54 = vsub.f32 %v12834_v62, %v15071_v18  ;;  %v18861_v43 = vld [vmem:[#allocation121_spill] sm:$0xff] }
 0x3b8   :  { %v4987_v51 = vand.u32 2147483647, %v4411_v45  ;;  %9477 = vmatprep.subr.bf16.mxu0 %v9476_v5  ;;  %v6686_v26 = vmul.f32 %v6110_v13, %v2906_v22  ;;  %v4407_v6 = vsub.f32 %v12827_v19, %v15081_v47  ;;  %v4408_v36 = vsub.f32 %v12829_v10, %v15081_v47 }
 0x3b9   :  { %v4989_v27 = vand.u32 2147483647, %v4413_v63  ;;  %9479 = vmatpush1.bf16.msra.mxu0 %v9478_v32  ;;  %v4409_v61 = vsub.f32 %v12832_v38, %v15081_v47  ;;  %v4410_v1 = vsub.f32 %v12834_v62, %v15081_v47  ;;  %v18860_v35 = vsub.f32 %v10446_v16, %v18859_v28  ;;  %v18906_v47 = vld [vmem:[#allocation172_spill] sm:$0xff] }
 0x3ba   :  { %v5563_v40 = vsub.f32 1.0, %v4987_v51  ;;  %v9764_v22 = vpack.c.bf16 %v6686_v26, %v6682_v29  ;;  %v4983_v4 = vand.u32 2147483647, %v4407_v6  ;;  %v18862_v60 = vsub.f32 %v10446_v16, %v18861_v43 }
 0x3bb   :  { %v1756_v15 = vand.u32 2147483647, %v18860_v35  ;;  %v5565_v3 = vsub.f32 1.0, %v4989_v27  ;;  %v4985_v32 = vand.u32 2147483647, %v4409_v61 }
 0x3bc   :  { %v1760_v7 = vand.u32 2147483647, %v18862_v60  ;;  %v15103_v25 = vmax.f32 %v5563_v40, 0.0  ;;  %v4960_v5 = vand.u32 2147483647, %v4384_v46  ;;  %9765 = vmatprep.subr.bf16.mxu1 %v9764_v22  ;;  %v5559_v63 = vsub.f32 1.0, %v4983_v4 }
 0x3bd   :  { %v2332_v45 = vsub.f32 1.0, %v1756_v15  ;;  %v15108_v13 = vmax.f32 %v5565_v3, 0.0  ;;  %v4964_v29 = vand.u32 2147483647, %v4388_v24  ;;  %9767 = vmatpush1.bf16.msra.mxu1 %v9766_v30  ;;  %v5561_v26 = vsub.f32 1.0, %v4985_v32  ;;  %v170_v24 = vld [vmem:[%s17900_s2 + $0x468] sm:$0xff] }
 0x3be   :  { %v2336_v51 = vsub.f32 1.0, %v1760_v7  ;;  %v5536_v6 = vsub.f32 1.0, %v4960_v5  ;;  %v18863_v40 = vsub.f32 %v18563_v37, %v18859_v28  ;;  %v15116_v35 = vmax.f32 %v5559_v63, 0.0  ;;  %918 = vperm.xlu1 %10177, %v170_v24   ;;  %v169_v7 = vld [vmem:[%s17900_s2 + $0x460] sm:$0xff]  ;;  %v18868_v24 = vld [vmem:[#allocation150_spill] sm:$0xff] }
 0x3bf   :  { %v2908_v27 = vmax.f32 %v2332_v45, 0.0  ;;  %v5540_v15 = vsub.f32 1.0, %v4964_v29  ;;  %v18864_v22 = vsub.f32 %v18563_v37, %v18861_v43  ;;  %v15124_v30 = vmax.f32 %v5561_v26, 0.0  ;;  %v18865_v5 = vld [vmem:[#allocation151_spill] sm:$0xff]  ;;  %913 = vperm.xlu0 %10176, %v169_v7   ;;  %v18866_v26 = vld [vmem:[#allocation148_spill] sm:$0xff] }
 0x3c0   :  { %v1758_v61 = vand.u32 2147483647, %v18863_v40  ;;  %v2912_v46 = vmax.f32 %v2336_v51, 0.0  ;;  %v6112_v4 = vmax.f32 %v5536_v6, 0.0  ;;  %v4962_v28 = vand.u32 2147483647, %v4386_v39  ;;  %v15137_v51 = vpop.permute.xlu1 %3772 }
 0x3c1   :  { %v1762_v3 = vand.u32 2147483647, %v18864_v22  ;;  %v6116_v32 = vmax.f32 %v5540_v15, 0.0  ;;  %v4966_v45 = vand.u32 2147483647, %v4390_v49  ;;  %v6687_v63 = vmul.f32 %v14924_v59, %v18865_v5  ;;  %v18867_v22 = vld [vmem:[#allocation152_spill] sm:$0xff] }
 0x3c2   :  { %v2334_v60 = vsub.f32 1.0, %v1758_v61  ;;  %v6688_v29 = vmul.f32 %v6112_v4, %v2908_v27  ;;  %v5538_v39 = vsub.f32 1.0, %v4962_v28  ;;  %v6691_v6 = vmul.f32 %v14905_v11, %v18866_v26  ;;  %v15147_v27 = vpop.permute.xlu0 %3767  ;;  %v18869_v26 = vld [vmem:[#allocation128_spill] sm:$0xff] }
 0x3c3   :  { %v2338_v43 = vsub.f32 1.0, %v1762_v3  ;;  %v6692_v40 = vmul.f32 %v6116_v32, %v2912_v46  ;;  %v5542_v15 = vsub.f32 1.0, %v4966_v45  ;;  %v6689_v3 = vmul.f32 %v14929_v42, %v18867_v22 }
 0x3c4   :  { %v2910_v12 = vmax.f32 %v2334_v60, 0.0  ;;  %v6114_v21 = vmax.f32 %v5538_v39, 0.0  ;;  %v9482_v49 = vpack.c.bf16 %v6691_v6, %v6687_v63  ;;  %v6693_v59 = vmul.f32 %v14910_v31, %v18868_v24  ;;  %v18880_v63 = vld [vmem:[#allocation159_spill] sm:$0xff] }
 0x3c5   :  { %v2914_v61 = vmax.f32 %v2338_v43, 0.0  ;;  %v4419_v7 = vsub.f32 %v12827_v19, %v15137_v51  ;;  %v9480_v4 = vpack.c.bf16 %v6692_v40, %v6688_v29  ;;  %v6118_v60 = vmax.f32 %v5542_v15, 0.0 }
 0x3c6   :  { %v4421_v46 = vsub.f32 %v12832_v38, %v15137_v51  ;;  %v6690_v28 = vmul.f32 %v6114_v21, %v2910_v12  ;;  %v9770_v42 = vpack.c.bf16 %v6693_v59, %v6689_v3  ;;  %v4415_v5 = vsub.f32 %v12827_v19, %v15147_v27  ;;  %v18871_v21 = vld [vmem:[#allocation127_spill] sm:$0xff]  ;;  %v18878_v12 = vld [vmem:[#allocation157_spill] sm:$0xff] }
 0x3c7   :  { %v4995_v43 = vand.u32 2147483647, %v4419_v7  ;;  %9481 = vmatprep.subr.bf16.mxu0 %v9480_v4  ;;  %v6694_v31 = vmul.f32 %v6118_v60, %v2914_v61  ;;  %v4417_v39 = vsub.f32 %v12832_v38, %v15147_v27  ;;  %v18870_v6 = vsub.f32 %v10446_v16, %v18869_v26  ;;  %v7017_v61 = vld [vmem:[%s17899_s1 + $0x10] sm:$0xff]  ;;  %v7027_v59 = vld [vmem:[%s17899_s1 + $0x60] sm:$0xff] }
 0x3c8   :  { %v4997_v45 = vand.u32 2147483647, %v4421_v46  ;;  %9483 = vmatpush1.bf16.msra.mxu0 %v9482_v49  ;;  %v4991_v3 = vand.u32 2147483647, %v4415_v5  ;;  %v18872_v49 = vsub.f32 %v10446_v16, %v18871_v21  ;;  %v4968_v46 = vand.u32 2147483647, %v4392_v20 }
 0x3c9   :  { %v5571_v29 = vsub.f32 1.0, %v4995_v43  ;;  %v1764_v40 = vand.u32 2147483647, %v18870_v6  ;;  %v9768_v15 = vpack.c.bf16 %v6694_v31, %v6690_v28  ;;  %v4993_v4 = vand.u32 2147483647, %v4417_v39 }
 0x3ca   :  { %v5573_v22 = vsub.f32 1.0, %v4997_v45  ;;  %v1768_v24 = vand.u32 2147483647, %v18872_v49  ;;  %v5567_v43 = vsub.f32 1.0, %v4991_v3  ;;  %v18873_v45 = vsub.f32 %v12829_v10, %v14939_v53 }
 0x3cb   :  { %v15175_v7 = vmax.f32 %v5571_v29, 0.0  ;;  %v2340_v60 = vsub.f32 1.0, %v1764_v40  ;;  %9769 = vmatprep.subr.bf16.mxu1 %v9768_v15  ;;  %7370 = vmatmul.mubr.f32.vlgmr.msra.gmra.mrb[0].mxu0 %v7017_v61  ;;  %v7026_v29 = vld [vmem:[%s17899_s1 + $0x58] sm:$0xff]  ;;  %v5569_v39 = vsub.f32 1.0, %v4993_v4  ;;  %v5544_v40 = vsub.f32 1.0, %v4968_v46  ;;  %v3376_v4 = vld [vmem:[%s17901_s3 + $0x468] sm:$0xff] }
 0x3cc   :  { %v15180_v28 = vmax.f32 %v5573_v22, 0.0  ;;  %v2344_v31 = vsub.f32 1.0, %v1768_v24  ;;  %v4972_v5 = vand.u32 2147483647, %v18873_v45  ;;  %9771 = vmatpush1.bf16.msra.mxu1 %v9770_v42  ;;  %v18874_v20 = vsub.f32 %v18563_v37, %v18869_v26  ;;  %7375 = vmatprep.mubr.f32.mxu0 %v7027_v59  ;;  %v7036_v22 = vld [vmem:[%s17899_s1 + $0xa8] sm:$0xff] }
 0x3cd   :  { %v2916_v6 = vmax.f32 %v2340_v60, 0.0  ;;  %v15194_v3 = vmax.f32 %v5567_v43, 0.0  ;;  %v18875_v45 = vsub.f32 %v18563_v37, %v18871_v21  ;;  %v15202_v60 = vmax.f32 %v5569_v39, 0.0  ;;  %4122 = vperm.xlu1 %10177, %v3376_v4   ;;  %v3375_v43 = vld [vmem:[%s17901_s3 + $0x460] sm:$0xff] }
 0x3ce   :  { %v1766_v15 = vand.u32 2147483647, %v18874_v20  ;;  %v2920_v49 = vmax.f32 %v2344_v31, 0.0  ;;  %v5548_v24 = vsub.f32 1.0, %v4972_v5  ;;  %v6120_v26 = vmax.f32 %v5544_v40, 0.0  ;;  %v3783_v40 = vpop.permute.xlu1 %3782  ;;  %v18879_v4 = vld [vmem:[#allocation155_spill] sm:$0xff]  ;;  %4117 = vperm.xlu0 %10176, %v3375_v43  }
 0x3cf   :  { %v1770_v42 = vand.u32 2147483647, %v18875_v45  ;;  %v18876_v20 = vsub.f32 %v12834_v62, %v14949_v48  ;;  %v18877_v5 = vsub.f32 %v12834_v62, %v14939_v53  ;;  %v6695_v39 = vmul.f32 %v14984_v8, %v18878_v12  ;;  %8145 = vmatmul.mubr.f32.vlgmr.msra.gmra.mrb[0].mxu1 %v7017_v61  ;;  %7376 = vmatmul.mubr.f32.gmra.mrb[2].mxu0 %v7026_v29  ;;  %v7045_v12 = vld [vmem:[%s17899_s1 + $0xf0] sm:$0xff] }
 0x3d0   :  { %v2342_v46 = vsub.f32 1.0, %v1766_v15  ;;  %v6124_v31 = vmax.f32 %v5548_v24, 0.0  ;;  %v6696_v15 = vmul.f32 %v6120_v26, %v2916_v6  ;;  %v6699_v11 = vmul.f32 %v14971_v56, %v18879_v4  ;;  %8150 = vmatprep.mubr.f32.mxu1 %v7027_v59  ;;  %7381 = vmatprep.mubr.f32.mxu0 %v7036_v22  ;;  %v7035_v24 = vld [vmem:[%s17899_s1 + $0xa0] sm:$0xff]  ;;  %v18881_v56 = vld [vmem:[#allocation156_spill] sm:$0xff]  ;;  %v15228_v26 = vpop.permute.xlu0 %3777 }
 0x3d1   :  { %v4970_v32 = vand.u32 2147483647, %v18876_v20  ;;  %v2346_v21 = vsub.f32 1.0, %v1770_v42  ;;  %v4974_v45 = vand.u32 2147483647, %v18877_v5  ;;  %v6697_v8 = vmul.f32 %v14992_v55, %v18880_v63 }
 0x3d2   :  { %v2918_v48 = vmax.f32 %v2342_v46, 0.0  ;;  %v6700_v53 = vmul.f32 %v6124_v31, %v2920_v49  ;;  %v9486_v61 = vpack.c.bf16 %v6699_v11, %v6695_v39  ;;  %v6701_v59 = vmul.f32 %v14976_v58, %v18881_v56  ;;  %v7044_v58 = vld [vmem:[%s17899_s1 + $0xe8] sm:$0xff]  ;;  %v3793_v34 = vpop.permute.xlu1 %3792 }
 0x3d3   :  { %v5546_v20 = vsub.f32 1.0, %v4970_v32  ;;  %v2922_v42 = vmax.f32 %v2346_v21, 0.0  ;;  %v5550_v5 = vsub.f32 1.0, %v4974_v45  ;;  %v4427_v6 = vsub.f32 %v12827_v19, %v3783_v40  ;;  %8151 = vmatmul.mubr.f32.gmra.mrb[2].mxu1 %v7026_v29  ;;  %7382 = vmatmul.mubr.f32.gmra.mrb[4].mxu0 %v7035_v24  ;;  %v7054_v29 = vld [vmem:[%s17899_s1 + $0x138] sm:$0xff] }
 0x3d4   :  { %v9484_v49 = vpack.c.bf16 %v6700_v53, %v6696_v15  ;;  %v4428_v31 = vsub.f32 %v12829_v10, %v3783_v40  ;;  %v4429_v55 = vsub.f32 %v12832_v38, %v3783_v40  ;;  %v9774_v21 = vpack.c.bf16 %v6701_v59, %v6697_v8  ;;  %8156 = vmatprep.mubr.f32.mxu1 %v7036_v22  ;;  %v18893_v8 = vld [vmem:[#allocation162_spill] sm:$0xff] }
 0x3d5   :  { %v6122_v32 = vmax.f32 %v5546_v20, 0.0  ;;  %v6126_v46 = vmax.f32 %v5550_v5, 0.0  ;;  %v4430_v43 = vsub.f32 %v12834_v62, %v3783_v40  ;;  %v5003_v11 = vand.u32 2147483647, %v4427_v6  ;;  %7387 = vmatprep.mubr.f32.mxu0 %v7045_v12 }
 0x3d6   :  { %9485 = vmatprep.subr.bf16.mxu0 %v9484_v49  ;;  %v5004_v39 = vand.u32 2147483647, %v4428_v31  ;;  %v5005_v15 = vand.u32 2147483647, %v4429_v55  ;;  %v4423_v20 = vsub.f32 %v12827_v19, %v15228_v26  ;;  %v4424_v22 = vsub.f32 %v12829_v10, %v15228_v26 }
 0x3d7   :  { %v6698_v63 = vmul.f32 %v6122_v32, %v2918_v48  ;;  %v6702_v45 = vmul.f32 %v6126_v46, %v2922_v42  ;;  %9487 = vmatpush1.bf16.msra.mxu0 %v9486_v61  ;;  %v5006_v40 = vand.u32 2147483647, %v4430_v43  ;;  %v5579_v48 = vsub.f32 1.0, %v5003_v11  ;;  %8157 = vmatmul.mubr.f32.gmra.mrb[4].mxu1 %v7035_v24  ;;  %v7053_v32 = vld [vmem:[%s17899_s1 + $0x130] sm:$0xff]  ;;  %v7063_v61 = vld [vmem:[%s17899_s1 + $0x180] sm:$0xff]  ;;  %v18882_v24 = vld [vmem:[#allocation134_spill] sm:$0xff] }
 0x3d8   :  { %v4425_v4 = vsub.f32 %v12832_v38, %v15228_v26  ;;  %v5580_v42 = vsub.f32 1.0, %v5004_v39  ;;  %v5581_v5 = vsub.f32 1.0, %v5005_v15  ;;  %7388 = vmatmul.mubr.f32.gmra.mrb[6].mxu0 %v7044_v58  ;;  %v4999_v6 = vand.u32 2147483647, %v4423_v20  ;;  %8162 = vmatprep.mubr.f32.mxu1 %v7045_v12  ;;  %v18884_v43 = vld [vmem:[#allocation132_spill] sm:$0xff]  ;;  %v18886_v15 = vld [vmem:[#allocation181_spill] sm:$0xff] }
 0x3d9   :  { %v9772_v53 = vpack.c.bf16 %v6702_v45, %v6698_v63  ;;  %v5582_v56 = vsub.f32 1.0, %v5006_v40  ;;  %v6155_v59 = vmax.f32 %v5579_v48, 0.0  ;;  %7393 = vmatprep.mubr.f32.mxu0 %v7054_v29  ;;  %v18883_v55 = vsub.f32 %v10446_v16, %v18882_v24  ;;  %v7062_v48 = vld [vmem:[%s17899_s1 + $0x178] sm:$0xff] }
 0x3da   :  { %v5001_v49 = vand.u32 2147483647, %v4425_v4  ;;  %v15253_v46 = vmax.f32 %v5580_v42, 0.0  ;;  %v6157_v31 = vmax.f32 %v5581_v5, 0.0  ;;  %v18885_v11 = vsub.f32 %v10446_v16, %v18884_v43  ;;  %v18887_v4 = vld [vmem:[#allocation182_spill] sm:$0xff] }
 0x3db   :  { %9773 = vmatprep.subr.bf16.mxu1 %v9772_v53  ;;  %v1772_v63 = vand.u32 2147483647, %v18883_v55  ;;  %v15261_v39 = vmax.f32 %v5582_v56, 0.0  ;;  %v15264_v20 = vmul.f32 %v6155_v59, %v18886_v15  ;;  %v5575_v12 = vsub.f32 1.0, %v4999_v6  ;;  %8163 = vmatmul.mubr.f32.gmra.mrb[6].mxu1 %v7044_v58  ;;  %v172_v56 = vld [vmem:[%s17900_s2 + $0x478] sm:$0xff]  ;;  %v171_v59 = vld [vmem:[%s17900_s2 + $0x470] sm:$0xff] }
 0x3dc   :  { %v1776_v45 = vand.u32 2147483647, %v18885_v11  ;;  %9775 = vmatpush1.bf16.msra.mxu1 %v9774_v21  ;;  %v5577_v40 = vsub.f32 1.0, %v5001_v49  ;;  %v15270_v53 = vmul.f32 %v6157_v31, %v18887_v4  ;;  %v4976_v21 = vand.u32 2147483647, %v4400_v33  ;;  %7394 = vmatmul.mubr.f32.gmra.mrb[8].mxu0 %v7053_v32 }
 0x3dd   :  { %v2348_v42 = vsub.f32 1.0, %v1772_v63  ;;  %v15281_v6 = vmax.f32 %v5575_v12, 0.0  ;;  %v4980_v31 = vand.u32 2147483647, %v4404_v44  ;;  %v18888_v33 = vsub.f32 %v18563_v37, %v18882_v24  ;;  %8168 = vmatprep.mubr.f32.mxu1 %v7054_v29  ;;  %7399 = vmatprep.mubr.f32.mxu0 %v7063_v61  ;;  %v7072_v12 = vld [vmem:[%s17899_s1 + $0x1c8] sm:$0xff] }
 0x3de   :  { %v2352_v5 = vsub.f32 1.0, %v1776_v45  ;;  %v15283_v49 = vmax.f32 %v5577_v40, 0.0  ;;  %v5552_v11 = vsub.f32 1.0, %v4976_v21  ;;  %v18889_v45 = vsub.f32 %v18563_v37, %v18884_v43  ;;  %928 = vperm.xlu1 %10177, %v172_v56   ;;  %923 = vperm.xlu0 %10176, %v171_v59   ;;  %v18890_v43 = vld [vmem:[#allocation164_spill] sm:$0xff]  ;;  %v18891_v21 = vld [vmem:[#allocation161_spill] sm:$0xff] }
 0x3df   :  { %v1774_v58 = vand.u32 2147483647, %v18888_v33  ;;  %v2924_v55 = vmax.f32 %v2348_v42, 0.0  ;;  %v5556_v44 = vsub.f32 1.0, %v4980_v31  ;;  %v4978_v29 = vand.u32 2147483647, %v4402_v17  ;;  %8169 = vmatmul.mubr.f32.gmra.mrb[8].mxu1 %v7053_v32  ;;  %v3788_v32 = vpop.permute.xlu0 %3787 }
 0x3e0   :  { %v2928_v63 = vmax.f32 %v2352_v5, 0.0  ;;  %v1778_v15 = vand.u32 2147483647, %v18889_v45  ;;  %v4982_v24 = vand.u32 2147483647, %v4406_v14  ;;  %v6128_v4 = vmax.f32 %v5552_v11, 0.0  ;;  %7400 = vmatmul.mubr.f32.gmra.mrb[10].mxu0 %v7062_v48  ;;  %8174 = vmatprep.mubr.f32.mxu1 %v7063_v61 }
 0x3e1   :  { %v2350_v40 = vsub.f32 1.0, %v1774_v58  ;;  %v6703_v5 = vmul.f32 %v15050_v57, %v18890_v43  ;;  %v6707_v33 = vmul.f32 %v15037_v41, %v18891_v21  ;;  %v6132_v56 = vmax.f32 %v5556_v44, 0.0  ;;  %7405 = vmatprep.mubr.f32.mxu0 %v7072_v12  ;;  %v18892_v11 = vld [vmem:[#allocation166_spill] sm:$0xff]  ;;  %v7071_v44 = vld [vmem:[%s17899_s1 + $0x1c0] sm:$0xff] }
 0x3e2   :  { %v2354_v42 = vsub.f32 1.0, %v1778_v15  ;;  %v5554_v31 = vsub.f32 1.0, %v4978_v29  ;;  %v5558_v58 = vsub.f32 1.0, %v4982_v24  ;;  %v6704_v17 = vmul.f32 %v6128_v4, %v2924_v55 }
 0x3e3   :  { %v2926_v59 = vmax.f32 %v2350_v40, 0.0  ;;  %v9490_v14 = vpack.c.bf16 %v6707_v33, %v6703_v5  ;;  %v6705_v45 = vmul.f32 %v15058_v23, %v18892_v11  ;;  %v6708_v15 = vmul.f32 %v6132_v56, %v2928_v63  ;;  %8175 = vmatmul.mubr.f32.gmra.mrb[10].mxu1 %v7062_v48  ;;  %v7081_v23 = vld [vmem:[%s17899_s1 + $0x210] sm:$0xff] }
 0x3e4   :  { %v2930_v50 = vmax.f32 %v2354_v42, 0.0  ;;  %v6130_v57 = vmax.f32 %v5554_v31, 0.0  ;;  %v6134_v43 = vmax.f32 %v5558_v58, 0.0  ;;  %v6709_v41 = vmul.f32 %v15042_v0, %v18893_v8  ;;  %8180 = vmatprep.mubr.f32.mxu1 %v7072_v12  ;;  %7406 = vmatmul.mubr.f32.gmra.mrb[12].mxu0 %v7071_v44 }
 0x3e5   :  { %v4435_v61 = vsub.f32 %v12827_v19, %v3793_v34  ;;  %v4436_v55 = vsub.f32 %v12829_v10, %v3793_v34  ;;  %v4437_v40 = vsub.f32 %v12832_v38, %v3793_v34  ;;  %v4438_v29 = vsub.f32 %v12834_v62, %v3793_v34  ;;  %7411 = vmatprep.mubr.f32.mxu0 %v7081_v23 }
 0x3e6   :  { %v9488_v63 = vpack.c.bf16 %v6708_v15, %v6704_v17  ;;  %v6706_v0 = vmul.f32 %v6130_v57, %v2926_v59  ;;  %v6710_v8 = vmul.f32 %v6134_v43, %v2930_v50  ;;  %v9778_v24 = vpack.c.bf16 %v6709_v41, %v6705_v45  ;;  %v7080_v59 = vld [vmem:[%s17899_s1 + $0x208] sm:$0xff]  ;;  %v7090_v50 = vld [vmem:[%s17899_s1 + $0x258] sm:$0xff]  ;;  %v18894_v57 = vld [vmem:[#allocation171_spill] sm:$0xff] }
 0x3e7   :  { %v5011_v4 = vand.u32 2147483647, %v4435_v61  ;;  %v5012_v42 = vand.u32 2147483647, %v4436_v55  ;;  %v5013_v5 = vand.u32 2147483647, %v4437_v40  ;;  %v4431_v21 = vsub.f32 %v12827_v19, %v3788_v32  ;;  %8181 = vmatmul.mubr.f32.gmra.mrb[12].mxu1 %v7071_v44 }
 0x3e8   :  { %9489 = vmatprep.subr.bf16.mxu0 %v9488_v63  ;;  %v9776_v33 = vpack.c.bf16 %v6710_v8, %v6706_v0  ;;  %v5014_v56 = vand.u32 2147483647, %v4438_v29  ;;  %v4432_v48 = vsub.f32 %v12829_v10, %v3788_v32  ;;  %v4433_v31 = vsub.f32 %v12832_v38, %v3788_v32  ;;  %8186 = vmatprep.mubr.f32.mxu1 %v7081_v23  ;;  %v3378_v55 = vld [vmem:[%s17901_s3 + $0x478] sm:$0xff]  ;;  %v3377_v63 = vld [vmem:[%s17901_s3 + $0x470] sm:$0xff]  ;;  %v18895_v0 = vld [vmem:[#allocation187_spill] sm:$0xff] }
 0x3e9   :  { %9491 = vmatpush1.bf16.msra.mxu0 %v9490_v14  ;;  %v5587_v12 = vsub.f32 1.0, %v5011_v4  ;;  %v5588_v58 = vsub.f32 1.0, %v5012_v42  ;;  %v5589_v34 = vsub.f32 1.0, %v5013_v5  ;;  %v4434_v17 = vsub.f32 %v12834_v62, %v3788_v32  ;;  %v7089_v14 = vld [vmem:[%s17899_s1 + $0x250] sm:$0xff]  ;;  %4132 = vperm.xlu1 %10177, %v3378_v55   ;;  %v18897_v5 = vld [vmem:[#allocation139_spill] sm:$0xff] }
 0x3ea   :  { %9777 = vmatprep.subr.bf16.mxu1 %v9776_v33  ;;  %v5590_v11 = vsub.f32 1.0, %v5014_v56  ;;  %v5007_v45 = vand.u32 2147483647, %v4431_v21  ;;  %v5008_v15 = vand.u32 2147483647, %v4432_v48  ;;  %v15333_v43 = vmul.f32 %v15116_v35, %v18894_v57  ;;  %7412 = vmatmul.mubr.f32.gmra.mrb[14].mxu0 %v7080_v59  ;;  %v7099_v56 = vld [vmem:[%s17899_s1 + $0x2a0] sm:$0xff] }
 0x3eb   :  { %9779 = vmatpush1.bf16.msra.mxu1 %v9778_v24  ;;  %v6163_v41 = vmax.f32 %v5587_v12, 0.0  ;;  %v15338_v32 = vmax.f32 %v5588_v58, 0.0  ;;  %v6165_v44 = vmax.f32 %v5589_v34, 0.0  ;;  %v5009_v61 = vand.u32 2147483647, %v4433_v31  ;;  %7417 = vmatprep.mubr.f32.mxu0 %v7090_v50  ;;  %v18896_v24 = vld [vmem:[#allocation188_spill] sm:$0xff] }
 0x3ec   :  { %v15343_v40 = vmax.f32 %v5590_v11, 0.0  ;;  %v5010_v35 = vand.u32 2147483647, %v4434_v17  ;;  %v5583_v29 = vsub.f32 1.0, %v5007_v45  ;;  %v5584_v23 = vsub.f32 1.0, %v5008_v15  ;;  %8187 = vmatmul.mubr.f32.gmra.mrb[14].mxu1 %v7080_v59  ;;  %4127 = vperm.xlu0 %10176, %v3377_v63   ;;  %v18899_v58 = vld [vmem:[#allocation137_spill] sm:$0xff] }
 0x3ed   :  { %v15349_v8 = vmul.f32 %v6163_v41, %v18895_v0  ;;  %v15352_v4 = vmul.f32 %v6165_v44, %v18896_v24  ;;  %v5585_v42 = vsub.f32 1.0, %v5009_v61  ;;  %v18898_v21 = vsub.f32 %v10446_v16, %v18897_v5  ;;  %8192 = vmatprep.mubr.f32.mxu1 %v7090_v50  ;;  %v18901_v41 = vld [vmem:[#allocation190_spill] sm:$0xff] }
 0x3ee   :  { %v5586_v48 = vsub.f32 1.0, %v5010_v35  ;;  %v6159_v31 = vmax.f32 %v5583_v29, 0.0  ;;  %v15360_v12 = vmax.f32 %v5584_v23, 0.0  ;;  %v18900_v34 = vsub.f32 %v10446_v16, %v18899_v58  ;;  %7418 = vmatmul.mubr.f32.gmra.mrb[16].mxu0 %v7089_v14  ;;  %v18903_v35 = vld [vmem:[#allocation192_spill] sm:$0xff] }
 0x3ef   :  { %v1780_v33 = vand.u32 2147483647, %v18898_v21  ;;  %v6161_v11 = vmax.f32 %v5585_v42, 0.0  ;;  %v4984_v59 = vand.u32 2147483647, %v4408_v36  ;;  %v18902_v50 = vsub.f32 %v18563_v37, %v18897_v5  ;;  %7423 = vmatprep.mubr.f32.mxu0 %v7099_v56 }
 0x3f0   :  { %v1784_v17 = vand.u32 2147483647, %v18900_v34  ;;  %v4988_v15 = vand.u32 2147483647, %v4412_v52  ;;  %v15371_v57 = vmax.f32 %v5586_v48, 0.0  ;;  %v15374_v44 = vmul.f32 %v6159_v31, %v18901_v41  ;;  %8193 = vmatmul.mubr.f32.gmra.mrb[16].mxu1 %v7089_v14  ;;  %v18905_v31 = vld [vmem:[#allocation167_spill] sm:$0xff]  ;;  %v3803_v34 = vpop.permute.xlu1 %3802 }
 0x3f1   :  { %v2356_v45 = vsub.f32 1.0, %v1780_v33  ;;  %v1782_v55 = vand.u32 2147483647, %v18902_v50  ;;  %v15380_v29 = vmul.f32 %v6161_v11, %v18903_v35  ;;  %v5560_v23 = vsub.f32 1.0, %v4984_v59  ;;  %8198 = vmatprep.mubr.f32.mxu1 %v7099_v56  ;;  %v18907_v41 = vld [vmem:[#allocation169_spill] sm:$0xff] }
 0x3f2   :  { %v2360_v61 = vsub.f32 1.0, %v1784_v17  ;;  %v5564_v63 = vsub.f32 1.0, %v4988_v15  ;;  %v18904_v0 = vsub.f32 %v18563_v37, %v18899_v58  ;;  %v4986_v21 = vand.u32 2147483647, %v4410_v1  ;;  %v7098_v58 = vld [vmem:[%s17899_s1 + $0x298] sm:$0xff] }
 0x3f3   :  { %v2932_v36 = vmax.f32 %v2356_v45, 0.0  ;;  %v2358_v42 = vsub.f32 1.0, %v1782_v55  ;;  %v6136_v5 = vmax.f32 %v5560_v23, 0.0  ;;  %v4990_v48 = vand.u32 2147483647, %v4414_v54  ;;  %7424 = vmatmul.mubr.f32.gmra.mrb[18].mxu0 %v7098_v58  ;;  %v3798_v55 = vpop.permute.xlu0 %3797 }
 0x3f4   :  { %v2936_v52 = vmax.f32 %v2360_v61, 0.0  ;;  %v1786_v24 = vand.u32 2147483647, %v18904_v0  ;;  %v6140_v33 = vmax.f32 %v5564_v63, 0.0  ;;  %v6715_v14 = vmul.f32 %v15103_v25, %v18905_v31  ;;  %8199 = vmatmul.mubr.f32.gmra.mrb[18].mxu1 %v7098_v58  ;;  %v7108_v58 = vld [vmem:[%s17899_s1 + $0x2e8] sm:$0xff] }
 0x3f5   :  { %v2934_v11 = vmax.f32 %v2358_v42, 0.0  ;;  %v5562_v45 = vsub.f32 1.0, %v4986_v21  ;;  %v6713_v1 = vmul.f32 %v15124_v30, %v18906_v47  ;;  %v6712_v56 = vmul.f32 %v6136_v5, %v2932_v36  ;;  %v8701_v5 = vld [vmem:[%s17902_s4 + $0x8] sm:$0xff]  ;;  %7429 = vmatprep.mubr.f32.mxu0 %v7108_v58  ;;  %8204 = vmatprep.mubr.f32.mxu1 %v7108_v58 }
 0x3f6   :  { %v2362_v17 = vsub.f32 1.0, %v1786_v24  ;;  %v6716_v59 = vmul.f32 %v6140_v33, %v2936_v52  ;;  %v5566_v15 = vsub.f32 1.0, %v4990_v48  ;;  %v9494_v18 = vpack.c.bf16 %v6715_v14, %v15333_v43  ;;  %v8700_v33 = vld [vmem:[%s17902_s4] sm:$0xff]  ;;  %8758 = vperm.xlu1 %10177, %v8701_v5  }
 0x3f7   :  { %v6138_v25 = vmax.f32 %v5562_v45, 0.0  ;;  %v6717_v61 = vmul.f32 %v15108_v13, %v18907_v41  ;;  %v4443_v50 = vsub.f32 %v12827_v19, %v3803_v34  ;;  %v4444_v63 = vsub.f32 %v12829_v10, %v3803_v34  ;;  %8753 = vperm.xlu0 %10176, %v8700_v33  }
 0x3f8   :  { %v2938_v54 = vmax.f32 %v2362_v17, 0.0  ;;  %v9492_v35 = vpack.c.bf16 %v6716_v59, %v6712_v56  ;;  %v6142_v23 = vmax.f32 %v5566_v15, 0.0  ;;  %v4445_v30 = vsub.f32 %v12832_v38, %v3803_v34 }
 0x3f9   :  { %v6714_v36 = vmul.f32 %v6138_v25, %v2934_v11  ;;  %v9782_v52 = vpack.c.bf16 %v6717_v61, %v6713_v1  ;;  %v4446_v0 = vsub.f32 %v12834_v62, %v3803_v34  ;;  %v5019_v43 = vand.u32 2147483647, %v4443_v50  ;;  %v18908_v50 = vld [vmem:[#allocation193_spill] sm:$0xff] }
 0x3fa   :  { %9493 = vmatprep.subr.bf16.mxu0 %v9492_v35  ;;  %v6718_v24 = vmul.f32 %v6142_v23, %v2938_v54  ;;  %v5020_v42 = vand.u32 2147483647, %v4444_v63  ;;  %v5021_v21 = vand.u32 2147483647, %v4445_v30  ;;  %v4439_v13 = vsub.f32 %v12827_v19, %v3798_v55  ;;  %v18909_v63 = vld [vmem:[#allocation195_spill] sm:$0xff] }
 0x3fb   :  { %9495 = vmatpush1.bf16.msra.mxu0 %v9494_v18  ;;  %v5022_v48 = vand.u32 2147483647, %v4446_v0  ;;  %v5595_v31 = vsub.f32 1.0, %v5019_v43  ;;  %v4440_v14 = vsub.f32 %v12829_v10, %v3798_v55  ;;  %v4441_v34 = vsub.f32 %v12832_v38, %v3798_v55  ;;  %v18910_v43 = vld [vmem:[#allocation144_spill] sm:$0xff] }
 0x3fc   :  { %v9780_v17 = vpack.c.bf16 %v6718_v24, %v6714_v36  ;;  %v5596_v11 = vsub.f32 1.0, %v5020_v42  ;;  %v5597_v45 = vsub.f32 1.0, %v5021_v21  ;;  %v4442_v47 = vsub.f32 %v12834_v62, %v3798_v55 }
 0x3fd   :  { %v5598_v1 = vsub.f32 1.0, %v5022_v48  ;;  %v6171_v56 = vmax.f32 %v5595_v31, 0.0  ;;  %v5015_v59 = vand.u32 2147483647, %v4439_v13  ;;  %v5016_v15 = vand.u32 2147483647, %v4440_v14 }
 0x3fe   :  { %9781 = vmatprep.subr.bf16.mxu1 %v9780_v17  ;;  %v15418_v18 = vmax.f32 %v5596_v11, 0.0  ;;  %v6173_v54 = vmax.f32 %v5597_v45, 0.0  ;;  %v5017_v25 = vand.u32 2147483647, %v4441_v34  ;;  %v5018_v41 = vand.u32 2147483647, %v4442_v47 }
 0x3ff   :  { %9783 = vmatpush1.bf16.msra.mxu1 %v9782_v52  ;;  %v15420_v61 = vmax.f32 %v5598_v1, 0.0  ;;  %v15423_v35 = vmul.f32 %v6171_v56, %v18908_v50  ;;  %v5591_v55 = vsub.f32 1.0, %v5015_v59  ;;  %v5592_v23 = vsub.f32 1.0, %v5016_v15  ;;  %v18912_v52 = vld [vmem:[#allocation142_spill] sm:$0xff]  ;;  %v7107_v45 = vld [vmem:[%s17899_s1 + $0x2e0] sm:$0xff]  ;;  %v18916_v47 = vld [vmem:[#allocation197_spill] sm:$0xff] }
 0x400   :  { %v15426_v30 = vmul.f32 %v6173_v54, %v18909_v63  ;;  %v5593_v36 = vsub.f32 1.0, %v5017_v25  ;;  %v5594_v0 = vsub.f32 1.0, %v5018_v41  ;;  %v18911_v24 = vsub.f32 %v10446_v16, %v18910_v43  ;;  %7430 = vmatmul.mubr.f32.gmra.mrb[20].mxu0 %v7107_v45  ;;  %8205 = vmatmul.mubr.f32.gmra.mrb[20].mxu1 %v7107_v45  ;;  %v18918_v25 = vld [vmem:[#allocation198_spill] sm:$0xff] }
 0x401   :  { %v6167_v21 = vmax.f32 %v5591_v55, 0.0  ;;  %v15431_v13 = vmax.f32 %v5592_v23, 0.0  ;;  %v18913_v5 = vsub.f32 %v10446_v16, %v18912_v52  ;;  %v18914_v48 = vsub.f32 %v12829_v10, %v15147_v27  ;;  %v18923_v45 = vld [vmem:[#allocation174_spill] sm:$0xff] }
 0x402   :  { %v1788_v42 = vand.u32 2147483647, %v18911_v24  ;;  %v6169_v14 = vmax.f32 %v5593_v36, 0.0  ;;  %v15439_v34 = vmax.f32 %v5594_v0, 0.0  ;;  %v18915_v17 = vsub.f32 %v12829_v10, %v15137_v51 }
 0x403   :  { %v1792_v33 = vand.u32 2147483647, %v18913_v5  ;;  %v4992_v31 = vand.u32 2147483647, %v18914_v48  ;;  %v15448_v1 = vmul.f32 %v6167_v21, %v18916_v47  ;;  %v18917_v15 = vsub.f32 %v18563_v37, %v18910_v43 }
 0x404   :  { %v2364_v58 = vsub.f32 1.0, %v1788_v42  ;;  %v4996_v11 = vand.u32 2147483647, %v18915_v17  ;;  %v15454_v41 = vmul.f32 %v6169_v14, %v18918_v25  ;;  %v18919_v23 = vsub.f32 %v18563_v37, %v18912_v52  ;;  %v7117_v25 = vld [vmem:[%s17899_s1 + $0x330] sm:$0xff] }
 0x405   :  { %v2368_v56 = vsub.f32 1.0, %v1792_v33  ;;  %v5568_v59 = vsub.f32 1.0, %v4992_v31  ;;  %v1790_v54 = vand.u32 2147483647, %v18917_v15  ;;  %v18920_v42 = vsub.f32 %v12834_v62, %v15147_v27  ;;  %v18922_v31 = vld [vmem:[#allocation177_spill] sm:$0xff]  ;;  %v18924_v15 = vld [vmem:[#allocation178_spill] sm:$0xff]  ;;  %7435 = vmatprep.mubr.f32.mxu0 %v7117_v25  ;;  %8210 = vmatprep.mubr.f32.mxu1 %v7117_v25 }
 0x406   :  { %v2940_v50 = vmax.f32 %v2364_v58, 0.0  ;;  %v5572_v55 = vsub.f32 1.0, %v4996_v11  ;;  %v1794_v63 = vand.u32 2147483647, %v18919_v23  ;;  %v18921_v33 = vsub.f32 %v12834_v62, %v15137_v51  ;;  %v3813_v58 = vpop.permute.xlu1 %3812  ;;  %v8706_v51 = vld [vmem:[%s17902_s4 + $0x30] sm:$0xff] }
 0x407   :  { %v2944_v36 = vmax.f32 %v2368_v56, 0.0  ;;  %v6144_v0 = vmax.f32 %v5568_v59, 0.0  ;;  %v2366_v24 = vsub.f32 1.0, %v1790_v54  ;;  %v4994_v21 = vand.u32 2147483647, %v18920_v42  ;;  %8783 = vperm.xlu1 %10177, %v8706_v51  }
 0x408   :  { %v6148_v43 = vmax.f32 %v5572_v55, 0.0  ;;  %v2370_v5 = vsub.f32 1.0, %v1794_v63  ;;  %v4998_v48 = vand.u32 2147483647, %v18921_v33  ;;  %v6719_v14 = vmul.f32 %v15194_v3, %v18922_v31  ;;  %v8705_v3 = vld [vmem:[%s17902_s4 + $0x28] sm:$0xff] }
 0x409   :  { %v6720_v17 = vmul.f32 %v6144_v0, %v2940_v50  ;;  %v2942_v52 = vmax.f32 %v2366_v24, 0.0  ;;  %v5570_v11 = vsub.f32 1.0, %v4994_v21  ;;  %v6723_v47 = vmul.f32 %v15175_v7, %v18923_v45  ;;  %v18925_v55 = vld [vmem:[#allocation176_spill] sm:$0xff]  ;;  %8778 = vperm.xlu0 %10176, %v8705_v3  }
 0x40a   :  { %v6724_v56 = vmul.f32 %v6148_v43, %v2944_v36  ;;  %v2946_v59 = vmax.f32 %v2370_v5, 0.0  ;;  %v5574_v27 = vsub.f32 1.0, %v4998_v48  ;;  %v6721_v54 = vmul.f32 %v15202_v60, %v18924_v15  ;;  %v3808_v60 = vpop.permute.xlu0 %3807 }
 0x40b   :  { %v6146_v50 = vmax.f32 %v5570_v11, 0.0  ;;  %v9498_v7 = vpack.c.bf16 %v6723_v47, %v6719_v14  ;;  %v6725_v23 = vmul.f32 %v15180_v28, %v18925_v55  ;;  %v4451_v63 = vsub.f32 %v12827_v19, %v3813_v58 }
 0x40c   :  { %v9496_v36 = vpack.c.bf16 %v6724_v56, %v6720_v17  ;;  %v6150_v0 = vmax.f32 %v5574_v27, 0.0  ;;  %v4452_v24 = vsub.f32 %v12829_v10, %v3813_v58  ;;  %v4453_v42 = vsub.f32 %v12832_v38, %v3813_v58 }
 0x40d   :  { %v6722_v21 = vmul.f32 %v6146_v50, %v2942_v52  ;;  %v9786_v43 = vpack.c.bf16 %v6725_v23, %v6721_v54  ;;  %v4454_v5 = vsub.f32 %v12834_v62, %v3813_v58  ;;  %v5027_v33 = vand.u32 2147483647, %v4451_v63  ;;  %v18926_v23 = vld [vmem:[#allocation200_spill] sm:$0xff] }
 0x40e   :  { %9497 = vmatprep.subr.bf16.mxu0 %v9496_v36  ;;  %v6726_v28 = vmul.f32 %v6150_v0, %v2946_v59  ;;  %v5028_v48 = vand.u32 2147483647, %v4452_v24  ;;  %v5029_v31 = vand.u32 2147483647, %v4453_v42  ;;  %v4447_v14 = vsub.f32 %v12827_v19, %v3808_v60  ;;  %v18927_v24 = vld [vmem:[#allocation202_spill] sm:$0xff] }
 0x40f   :  { %9499 = vmatpush1.bf16.msra.mxu0 %v9498_v7  ;;  %v5030_v17 = vand.u32 2147483647, %v4454_v5  ;;  %v5603_v11 = vsub.f32 1.0, %v5027_v33  ;;  %v4448_v45 = vsub.f32 %v12829_v10, %v3808_v60  ;;  %v4449_v47 = vsub.f32 %v12832_v38, %v3808_v60  ;;  %v18928_v33 = vld [vmem:[#allocation149_spill] sm:$0xff] }
 0x410   :  { %v9784_v56 = vpack.c.bf16 %v6726_v28, %v6722_v21  ;;  %v5604_v27 = vsub.f32 1.0, %v5028_v48  ;;  %v5605_v52 = vsub.f32 1.0, %v5029_v31  ;;  %v4450_v15 = vsub.f32 %v12834_v62, %v3808_v60  ;;  %v7116_v60 = vld [vmem:[%s17899_s1 + $0x328] sm:$0xff] }
 0x411   :  { %v5606_v58 = vsub.f32 1.0, %v5030_v17  ;;  %v6179_v54 = vmax.f32 %v5603_v11, 0.0  ;;  %v5023_v51 = vand.u32 2147483647, %v4447_v14  ;;  %v5024_v59 = vand.u32 2147483647, %v4448_v45  ;;  %7436 = vmatmul.mubr.f32.gmra.mrb[22].mxu0 %v7116_v60  ;;  %8211 = vmatmul.mubr.f32.gmra.mrb[22].mxu1 %v7116_v60 }
 0x412   :  { %9785 = vmatprep.subr.bf16.mxu1 %v9784_v56  ;;  %v15490_v3 = vmax.f32 %v5604_v27, 0.0  ;;  %v6181_v25 = vmax.f32 %v5605_v52, 0.0  ;;  %v5025_v50 = vand.u32 2147483647, %v4449_v47  ;;  %v5026_v7 = vand.u32 2147483647, %v4450_v15 }
 0x413   :  { %9787 = vmatpush1.bf16.msra.mxu1 %v9786_v43  ;;  %v15492_v55 = vmax.f32 %v5606_v58, 0.0  ;;  %v15495_v63 = vmul.f32 %v6179_v54, %v18926_v23  ;;  %v5599_v36 = vsub.f32 1.0, %v5023_v51  ;;  %v5600_v0 = vsub.f32 1.0, %v5024_v59  ;;  %v18930_v14 = vld [vmem:[#allocation147_spill] sm:$0xff]  ;;  %v18935_v23 = vld [vmem:[#allocation204_spill] sm:$0xff] }
 0x414   :  { %v15501_v42 = vmul.f32 %v6181_v25, %v18927_v24  ;;  %v5601_v21 = vsub.f32 1.0, %v5025_v50  ;;  %v5602_v5 = vsub.f32 1.0, %v5026_v7  ;;  %v18929_v28 = vsub.f32 %v10446_v16, %v18928_v33  ;;  %v18933_v58 = vld [vmem:[#allocation203_spill] sm:$0xff]  ;;  %v3823_v7 = vpop.permute.xlu1 %3822 }
 0x415   :  { %v6175_v48 = vmax.f32 %v5599_v36, 0.0  ;;  %v15506_v31 = vmax.f32 %v5600_v0, 0.0  ;;  %v18931_v17 = vsub.f32 %v10446_v16, %v18930_v14  ;;  %v5000_v45 = vand.u32 2147483647, %v4424_v22 }
 0x416   :  { %v1796_v43 = vand.u32 2147483647, %v18929_v28  ;;  %v6177_v47 = vmax.f32 %v5601_v21, 0.0  ;;  %v15514_v56 = vmax.f32 %v5602_v5, 0.0  ;;  %v18932_v52 = vsub.f32 %v18563_v37, %v18928_v33  ;;  %v8711_v21 = vld [vmem:[%s17902_s4 + $0x58] sm:$0xff]  ;;  %v8710_v5 = vld [vmem:[%s17902_s4 + $0x50] sm:$0xff] }
 0x417   :  { %v1800_v11 = vand.u32 2147483647, %v18931_v17  ;;  %v15520_v54 = vmul.f32 %v6175_v48, %v18933_v58  ;;  %v5576_v59 = vsub.f32 1.0, %v5000_v45  ;;  %v18934_v25 = vsub.f32 %v18563_v37, %v18930_v14  ;;  %v18937_v48 = vld [vmem:[#allocation183_spill] sm:$0xff]  ;;  %8808 = vperm.xlu1 %10177, %v8711_v21   ;;  %8803 = vperm.xlu0 %10176, %v8710_v5   ;;  %v18938_v45 = vld [vmem:[#allocation185_spill] sm:$0xff] }
 0x418   :  { %v2372_v27 = vsub.f32 1.0, %v1796_v43  ;;  %v1798_v15 = vand.u32 2147483647, %v18932_v52  ;;  %v15526_v22 = vmul.f32 %v6177_v47, %v18935_v23  ;;  %v18936_v60 = vsub.f32 %v12834_v62, %v15228_v26  ;;  %v7126_v26 = vld [vmem:[%s17899_s1 + $0x378] sm:$0xff] }
 0x419   :  { %v2376_v51 = vsub.f32 1.0, %v1800_v11  ;;  %v1802_v50 = vand.u32 2147483647, %v18934_v25  ;;  %v6152_v28 = vmax.f32 %v5576_v59, 0.0  ;;  %v6727_v14 = vmul.f32 %v15281_v6, %v18937_v48  ;;  %7441 = vmatprep.mubr.f32.mxu0 %v7126_v26  ;;  %8216 = vmatprep.mubr.f32.mxu1 %v7126_v26 }
 0x41a   :  { %v2948_v36 = vmax.f32 %v2372_v27, 0.0  ;;  %v2374_v0 = vsub.f32 1.0, %v1798_v15  ;;  %v5002_v24 = vand.u32 2147483647, %v18936_v60  ;;  %v6729_v47 = vmul.f32 %v15283_v49, %v18938_v45 }
 0x41b   :  { %v2952_v33 = vmax.f32 %v2376_v51, 0.0  ;;  %v2378_v43 = vsub.f32 1.0, %v1802_v50  ;;  %v4459_v27 = vsub.f32 %v12827_v19, %v3823_v7  ;;  %v9502_v6 = vpack.c.bf16 %v15264_v20, %v6727_v14  ;;  %v3818_v51 = vpop.permute.xlu0 %3817 }
 0x41c   :  { %v2950_v17 = vmax.f32 %v2374_v0, 0.0  ;;  %v5578_v11 = vsub.f32 1.0, %v5002_v24  ;;  %v6728_v52 = vmul.f32 %v6152_v28, %v2948_v36  ;;  %v9790_v25 = vpack.c.bf16 %v15270_v53, %v6729_v47 }
 0x41d   :  { %v6732_v15 = vmul.f32 %v15253_v46, %v2952_v33  ;;  %v2954_v58 = vmax.f32 %v2378_v43, 0.0  ;;  %v4460_v50 = vsub.f32 %v12829_v10, %v3823_v7  ;;  %v4461_v23 = vsub.f32 %v12832_v38, %v3823_v7 }
 0x41e   :  { %v6154_v59 = vmax.f32 %v5578_v11, 0.0  ;;  %v4462_v60 = vsub.f32 %v12834_v62, %v3823_v7  ;;  %v5035_v24 = vand.u32 2147483647, %v4459_v27  ;;  %v4455_v5 = vsub.f32 %v12827_v19, %v3818_v51  ;;  %v7125_v7 = vld [vmem:[%s17899_s1 + $0x370] sm:$0xff] }
 0x41f   :  { %v9500_v0 = vpack.c.bf16 %v6732_v15, %v6728_v52  ;;  %v6734_v49 = vmul.f32 %v15261_v39, %v2954_v58  ;;  %v5036_v21 = vand.u32 2147483647, %v4460_v50  ;;  %v5037_v46 = vand.u32 2147483647, %v4461_v23  ;;  %7442 = vmatmul.mubr.f32.gmra.mrb[24].mxu0 %v7125_v7  ;;  %8217 = vmatmul.mubr.f32.gmra.mrb[24].mxu1 %v7125_v7  ;;  %v18940_v23 = vld [vmem:[#allocation208_spill] sm:$0xff] }
 0x420   :  { %v6730_v36 = vmul.f32 %v6154_v59, %v2950_v17  ;;  %v5038_v20 = vand.u32 2147483647, %v4462_v60  ;;  %v5611_v33 = vsub.f32 1.0, %v5035_v24  ;;  %v4456_v53 = vsub.f32 %v12829_v10, %v3818_v51  ;;  %v18941_v24 = vld [vmem:[#allocation154_spill] sm:$0xff] }
 0x421   :  { %9501 = vmatprep.subr.bf16.mxu0 %v9500_v0  ;;  %v4457_v28 = vsub.f32 %v12832_v38, %v3818_v51  ;;  %v5612_v48 = vsub.f32 1.0, %v5036_v21  ;;  %v5613_v14 = vsub.f32 1.0, %v5037_v46  ;;  %v4458_v39 = vsub.f32 %v12834_v62, %v3818_v51 }
 0x422   :  { %v9788_v43 = vpack.c.bf16 %v6734_v49, %v6730_v36  ;;  %9503 = vmatpush1.bf16.msra.mxu0 %v9502_v6  ;;  %v5614_v26 = vsub.f32 1.0, %v5038_v20  ;;  %v6187_v17 = vmax.f32 %v5611_v33, 0.0  ;;  %v5031_v11 = vand.u32 2147483647, %v4455_v5  ;;  %v18939_v6 = vld [vmem:[#allocation206_spill] sm:$0xff] }
 0x423   :  { %v5032_v45 = vand.u32 2147483647, %v4456_v53  ;;  %v15559_v47 = vmax.f32 %v5612_v48, 0.0  ;;  %v6189_v27 = vmax.f32 %v5613_v14, 0.0  ;;  %v5033_v52 = vand.u32 2147483647, %v4457_v28 }
 0x424   :  { %9789 = vmatprep.subr.bf16.mxu1 %v9788_v43  ;;  %v5034_v15 = vand.u32 2147483647, %v4458_v39  ;;  %v15561_v58 = vmax.f32 %v5614_v26, 0.0  ;;  %v15564_v51 = vmul.f32 %v6187_v17, %v18939_v6  ;;  %v5607_v59 = vsub.f32 1.0, %v5031_v11  ;;  %v3833_v26 = vpop.permute.xlu1 %3832  ;;  %v8707_v17 = vld [vmem:[%s17902_s4 + $0x38] sm:$0xff]  ;;  %v18947_v11 = vld [vmem:[#allocation209_spill] sm:$0xff] }
 0x425   :  { %9791 = vmatpush1.bf16.msra.mxu1 %v9790_v25  ;;  %v5608_v50 = vsub.f32 1.0, %v5032_v45  ;;  %v15567_v0 = vmul.f32 %v6189_v27, %v18940_v23  ;;  %v5609_v49 = vsub.f32 1.0, %v5033_v52  ;;  %v18942_v36 = vsub.f32 %v10446_v16, %v18941_v24  ;;  %v18943_v25 = vld [vmem:[#allocation153_spill] sm:$0xff]  ;;  %8788 = vperm.xlu1 %10177, %v8707_v17  }
 0x426   :  { %v5610_v60 = vsub.f32 1.0, %v5034_v15  ;;  %v6183_v46 = vmax.f32 %v5607_v59, 0.0  ;;  %v18944_v20 = vsub.f32 %v10446_v16, %v18943_v25  ;;  %v18945_v53 = vsub.f32 %v18563_v37, %v18941_v24  ;;  %v8702_v6 = vld [vmem:[%s17902_s4 + $0x10] sm:$0xff]  ;;  %v7135_v59 = vld [vmem:[%s17899_s1 + $0x3c0] sm:$0xff] }
 0x427   :  { %v1804_v21 = vand.u32 2147483647, %v18942_v36  ;;  %v15572_v5 = vmax.f32 %v5608_v50, 0.0  ;;  %v6185_v43 = vmax.f32 %v5609_v49, 0.0  ;;  %v18946_v39 = vsub.f32 %v18563_v37, %v18943_v25  ;;  %v18948_v50 = vld [vmem:[#allocation210_spill] sm:$0xff]  ;;  %8763 = vperm.xlu0 %10176, %v8702_v6   ;;  %7447 = vmatprep.mubr.f32.mxu0 %v7135_v59 }
 0x428   :  { %v1808_v33 = vand.u32 2147483647, %v18944_v20  ;;  %v1806_v28 = vand.u32 2147483647, %v18945_v53  ;;  %v15580_v48 = vmax.f32 %v5610_v60, 0.0  ;;  %v15589_v45 = vmul.f32 %v6183_v46, %v18947_v11  ;;  %v3828_v46 = vpop.permute.xlu0 %3827  ;;  %8222 = vmatprep.mubr.f32.mxu1 %v7135_v59 }
 0x429   :  { %v2380_v14 = vsub.f32 1.0, %v1804_v21  ;;  %v1810_v7 = vand.u32 2147483647, %v18946_v39  ;;  %v9506_v15 = vpack.c.bf16 %v15349_v8, %v15374_v44  ;;  %v15600_v23 = vmul.f32 %v6185_v43, %v18948_v50 }
 0x42a   :  { %v2384_v27 = vsub.f32 1.0, %v1808_v33  ;;  %v2382_v52 = vsub.f32 1.0, %v1806_v28  ;;  %v9794_v24 = vpack.c.bf16 %v15352_v4, %v15380_v29  ;;  %v4467_v36 = vsub.f32 %v12827_v19, %v3833_v26 }
 0x42b   :  { %v2956_v49 = vmax.f32 %v2380_v14, 0.0  ;;  %v2386_v60 = vsub.f32 1.0, %v1810_v7  ;;  %v4468_v21 = vsub.f32 %v12829_v10, %v3833_v26  ;;  %v4469_v33 = vsub.f32 %v12832_v38, %v3833_v26 }
 0x42c   :  { %v2960_v8 = vmax.f32 %v2384_v27, 0.0  ;;  %v2958_v44 = vmax.f32 %v2382_v52, 0.0  ;;  %v4470_v53 = vsub.f32 %v12834_v62, %v3833_v26  ;;  %v5043_v29 = vand.u32 2147483647, %v4467_v36 }
 0x42d   :  { %v6736_v25 = vmul.f32 %v15360_v12, %v2956_v49  ;;  %v2962_v20 = vmax.f32 %v2386_v60, 0.0  ;;  %v5044_v43 = vand.u32 2147483647, %v4468_v21  ;;  %v5045_v39 = vand.u32 2147483647, %v4469_v33 }
 0x42e   :  { %v6740_v28 = vmul.f32 %v15338_v32, %v2960_v8  ;;  %v6738_v4 = vmul.f32 %v15371_v57, %v2958_v44  ;;  %v5046_v7 = vand.u32 2147483647, %v4470_v53  ;;  %v4463_v17 = vsub.f32 %v12827_v19, %v3828_v46  ;;  %v7134_v57 = vld [vmem:[%s17899_s1 + $0x3b8] sm:$0xff] }
 0x42f   :  { %v6742_v14 = vmul.f32 %v15343_v40, %v2962_v20  ;;  %v5619_v27 = vsub.f32 1.0, %v5043_v29  ;;  %v5620_v12 = vsub.f32 1.0, %v5044_v43  ;;  %v4464_v52 = vsub.f32 %v12829_v10, %v3828_v46  ;;  %7448 = vmatmul.mubr.f32.gmra.mrb[26].mxu0 %v7134_v57  ;;  %8223 = vmatmul.mubr.f32.gmra.mrb[26].mxu1 %v7134_v57  ;;  %v8703_v57 = vld [vmem:[%s17902_s4 + $0x18] sm:$0xff] }
 0x430   :  { %v9504_v11 = vpack.c.bf16 %v6740_v28, %v6736_v25  ;;  %v5621_v59 = vsub.f32 1.0, %v5045_v39  ;;  %v5622_v26 = vsub.f32 1.0, %v5046_v7  ;;  %v4465_v32 = vsub.f32 %v12832_v38, %v3828_v46  ;;  %v18949_v25 = vld [vmem:[#allocation212_spill] sm:$0xff]  ;;  %v18953_v39 = vld [vmem:[#allocation158_spill] sm:$0xff]  ;;  %8768 = vperm.xlu1 %10177, %v8703_v57  }
 0x431   :  { %v9792_v6 = vpack.c.bf16 %v6742_v14, %v6738_v4  ;;  %v6195_v40 = vmax.f32 %v5619_v27, 0.0  ;;  %v15618_v50 = vmax.f32 %v5620_v12, 0.0  ;;  %v4466_v49 = vsub.f32 %v12834_v62, %v3828_v46  ;;  %v18950_v28 = vld [vmem:[#allocation160_spill] sm:$0xff]  ;;  %v18952_v46 = vld [vmem:[#allocation213_spill] sm:$0xff] }
 0x432   :  { %9505 = vmatprep.subr.bf16.mxu0 %v9504_v11  ;;  %v5039_v60 = vand.u32 2147483647, %v4463_v17  ;;  %v6197_v8 = vmax.f32 %v5621_v59, 0.0  ;;  %v15621_v44 = vmax.f32 %v5622_v26, 0.0  ;;  %v5040_v36 = vand.u32 2147483647, %v4464_v52 }
 0x433   :  { %9793 = vmatprep.subr.bf16.mxu1 %v9792_v6  ;;  %9507 = vmatpush1.bf16.msra.mxu0 %v9506_v15  ;;  %v5041_v21 = vand.u32 2147483647, %v4465_v32  ;;  %v15624_v20 = vmul.f32 %v6195_v40, %v18949_v25  ;;  %v5042_v33 = vand.u32 2147483647, %v4466_v49  ;;  %v18951_v4 = vsub.f32 %v10446_v16, %v18950_v28  ;;  %v3843_v49 = vpop.permute.xlu1 %3842 }
 0x434   :  { %9795 = vmatpush1.bf16.msra.mxu1 %v9794_v24  ;;  %v5615_v53 = vsub.f32 1.0, %v5039_v60  ;;  %v15630_v43 = vmul.f32 %v6197_v8, %v18952_v46  ;;  %v5616_v14 = vsub.f32 1.0, %v5040_v36  ;;  %v18954_v7 = vsub.f32 %v10446_v16, %v18953_v39  ;;  %v18957_v8 = vld [vmem:[#allocation215_spill] sm:$0xff] }
 0x435   :  { %v1812_v29 = vand.u32 2147483647, %v18951_v4  ;;  %v5617_v15 = vsub.f32 1.0, %v5041_v21  ;;  %v5618_v24 = vsub.f32 1.0, %v5042_v33  ;;  %v18955_v12 = vsub.f32 %v18563_v37, %v18950_v28  ;;  %v8712_v33 = vld [vmem:[%s17902_s4 + $0x60] sm:$0xff]  ;;  %v18958_v28 = vld [vmem:[#allocation216_spill] sm:$0xff] }
 0x436   :  { %v1816_v17 = vand.u32 2147483647, %v18954_v7  ;;  %v6191_v11 = vmax.f32 %v5615_v53, 0.0  ;;  %v15638_v6 = vmax.f32 %v5616_v14, 0.0  ;;  %v18956_v32 = vsub.f32 %v18563_v37, %v18953_v39  ;;  %v7144_v53 = vld [vmem:[%s17899_s1 + $0x408] sm:$0xff]  ;;  %8813 = vperm.xlu0 %10176, %v8712_v33   ;;  %v7143_v33 = vld [vmem:[%s17899_s1 + $0x400] sm:$0xff] }
 0x437   :  { %v2388_v27 = vsub.f32 1.0, %v1812_v29  ;;  %v1814_v52 = vand.u32 2147483647, %v18955_v12  ;;  %v6193_v59 = vmax.f32 %v5617_v15, 0.0  ;;  %v15646_v60 = vmax.f32 %v5618_v24, 0.0  ;;  %v3838_v15 = vpop.permute.xlu0 %3837  ;;  %7453 = vmatprep.mubr.f32.mxu0 %v7144_v53  ;;  %8228 = vmatprep.mubr.f32.mxu1 %v7144_v53 }
 0x438   :  { %v2392_v26 = vsub.f32 1.0, %v1816_v17  ;;  %v1818_v40 = vand.u32 2147483647, %v18956_v32  ;;  %v15649_v36 = vmul.f32 %v6191_v11, %v18957_v8  ;;  %v9510_v14 = vpack.c.bf16 %v15423_v35, %v15448_v1  ;;  %8229 = vmatmul.mubr.f32.gmra.mrb[28].mxu1 %v7143_v33  ;;  %7454 = vmatmul.mubr.f32.gmra.mrb[28].mxu0 %v7143_v33 }
 0x439   :  { %v2964_v21 = vmax.f32 %v2388_v27, 0.0  ;;  %v2390_v25 = vsub.f32 1.0, %v1814_v52  ;;  %v15658_v4 = vmul.f32 %v6193_v59, %v18958_v28  ;;  %v9798_v17 = vpack.c.bf16 %v15426_v30, %v15454_v41 }
 0x43a   :  { %v2968_v29 = vmax.f32 %v2392_v26, 0.0  ;;  %v2394_v46 = vsub.f32 1.0, %v1818_v40  ;;  %v4475_v24 = vsub.f32 %v12827_v19, %v3843_v49  ;;  %v4476_v12 = vsub.f32 %v12829_v10, %v3843_v49 }
 0x43b   :  { %v6744_v39 = vmul.f32 %v15431_v13, %v2964_v21  ;;  %v2966_v7 = vmax.f32 %v2390_v25, 0.0  ;;  %v4477_v52 = vsub.f32 %v12832_v38, %v3843_v49  ;;  %v4478_v1 = vsub.f32 %v12834_v62, %v3843_v49 }
 0x43c   :  { %v6748_v11 = vmul.f32 %v15418_v18, %v2968_v29  ;;  %v2970_v27 = vmax.f32 %v2394_v46, 0.0  ;;  %v5051_v59 = vand.u32 2147483647, %v4475_v24  ;;  %v4471_v13 = vsub.f32 %v12827_v19, %v3838_v15 }
 0x43d   :  { %v6746_v35 = vmul.f32 %v15439_v34, %v2966_v7  ;;  %v5052_v41 = vand.u32 2147483647, %v4476_v12  ;;  %v5053_v32 = vand.u32 2147483647, %v4477_v52  ;;  %v5054_v40 = vand.u32 2147483647, %v4478_v1 }
 0x43e   :  { %v9508_v26 = vpack.c.bf16 %v6748_v11, %v6744_v39  ;;  %v6750_v30 = vmul.f32 %v15420_v61, %v2970_v27  ;;  %v5627_v57 = vsub.f32 1.0, %v5051_v59  ;;  %v4472_v18 = vsub.f32 %v12829_v10, %v3838_v15  ;;  %v18960_v52 = vld [vmem:[#allocation219_spill] sm:$0xff] }
 0x43f   :  { %v4473_v8 = vsub.f32 %v12832_v38, %v3838_v15  ;;  %v5628_v25 = vsub.f32 1.0, %v5052_v41  ;;  %v5629_v34 = vsub.f32 1.0, %v5053_v32  ;;  %v4474_v49 = vsub.f32 %v12834_v62, %v3838_v15  ;;  %v18959_v15 = vld [vmem:[#allocation218_spill] sm:$0xff] }
 0x440   :  { %9509 = vmatprep.subr.bf16.mxu0 %v9508_v26  ;;  %v9796_v21 = vpack.c.bf16 %v6750_v30, %v6746_v35  ;;  %v5630_v61 = vsub.f32 1.0, %v5054_v40  ;;  %v6203_v53 = vmax.f32 %v5627_v57, 0.0  ;;  %v5047_v28 = vand.u32 2147483647, %v4471_v13  ;;  %v18961_v13 = vld [vmem:[#allocation165_spill] sm:$0xff] }
 0x441   :  { %9511 = vmatpush1.bf16.msra.mxu0 %v9510_v14  ;;  %v5048_v29 = vand.u32 2147483647, %v4472_v18  ;;  %v15679_v46 = vmax.f32 %v5628_v25, 0.0  ;;  %v6205_v39 = vmax.f32 %v5629_v34, 0.0  ;;  %v5049_v7 = vand.u32 2147483647, %v4473_v8 }
 0x442   :  { %9797 = vmatprep.subr.bf16.mxu1 %v9796_v21  ;;  %v5050_v24 = vand.u32 2147483647, %v4474_v49  ;;  %v15681_v11 = vmax.f32 %v5630_v61, 0.0  ;;  %v15684_v27 = vmul.f32 %v6203_v53, %v18959_v15  ;;  %v5623_v12 = vsub.f32 1.0, %v5047_v28  ;;  %v3853_v61 = vpop.permute.xlu1 %3852  ;;  %v8713_v53 = vld [vmem:[%s17902_s4 + $0x68] sm:$0xff]  ;;  %v8708_v15 = vld [vmem:[%s17902_s4 + $0x40] sm:$0xff] }
 0x443   :  { %9799 = vmatpush1.bf16.msra.mxu1 %v9798_v17  ;;  %v5624_v14 = vsub.f32 1.0, %v5048_v29  ;;  %v15687_v35 = vmul.f32 %v6205_v39, %v18960_v52  ;;  %v5625_v1 = vsub.f32 1.0, %v5049_v7  ;;  %v18962_v26 = vsub.f32 %v10446_v16, %v18961_v13  ;;  %v18963_v17 = vld [vmem:[#allocation163_spill] sm:$0xff]  ;;  %v18967_v28 = vld [vmem:[#allocation220_spill] sm:$0xff]  ;;  %8818 = vperm.xlu1 %10177, %v8713_v53  }
 0x444   :  { %v5626_v59 = vsub.f32 1.0, %v5050_v24  ;;  %v6199_v41 = vmax.f32 %v5623_v12, 0.0  ;;  %v18964_v40 = vsub.f32 %v10446_v16, %v18963_v17  ;;  %v18965_v18 = vsub.f32 %v18563_v37, %v18961_v13  ;;  %v7020_v12 = vld [vmem:[%s17899_s1 + $0x28] sm:$0xff]  ;;  %8793 = vperm.xlu0 %10176, %v8708_v15  }
 0x445   :  { %v1820_v30 = vand.u32 2147483647, %v18962_v26  ;;  %v15692_v32 = vmax.f32 %v5624_v14, 0.0  ;;  %v6201_v21 = vmax.f32 %v5625_v1, 0.0  ;;  %v18966_v49 = vsub.f32 %v18563_v37, %v18963_v17  ;;  %v18968_v14 = vld [vmem:[#allocation222_spill] sm:$0xff]  ;;  %7524 = vmatprep.mubr.f32.mxu0 %v7020_v12  ;;  %8299 = vmatprep.mubr.f32.mxu1 %v7020_v12 }
 0x446   :  { %v1824_v57 = vand.u32 2147483647, %v18964_v40  ;;  %v1822_v8 = vand.u32 2147483647, %v18965_v18  ;;  %v15700_v25 = vmax.f32 %v5626_v59, 0.0  ;;  %v15709_v29 = vmul.f32 %v6199_v41, %v18967_v28  ;;  %v3848_v41 = vpop.permute.xlu0 %3847 }
 0x447   :  { %v2396_v34 = vsub.f32 1.0, %v1820_v30  ;;  %v1826_v33 = vand.u32 2147483647, %v18966_v49  ;;  %v9514_v24 = vpack.c.bf16 %v15495_v63, %v15520_v54  ;;  %v15720_v52 = vmul.f32 %v6201_v21, %v18968_v14 }
 0x448   :  { %v2400_v39 = vsub.f32 1.0, %v1824_v57  ;;  %v2398_v7 = vsub.f32 1.0, %v1822_v8  ;;  %v9802_v13 = vpack.c.bf16 %v15501_v42, %v15526_v22  ;;  %v4483_v26 = vsub.f32 %v12827_v19, %v3853_v61 }
 0x449   :  { %v2972_v1 = vmax.f32 %v2396_v34, 0.0  ;;  %v2402_v59 = vsub.f32 1.0, %v1826_v33  ;;  %v4484_v30 = vsub.f32 %v12829_v10, %v3853_v61  ;;  %v4485_v57 = vsub.f32 %v12832_v38, %v3853_v61 }
 0x44a   :  { %v2976_v63 = vmax.f32 %v2400_v39, 0.0  ;;  %v2974_v54 = vmax.f32 %v2398_v7, 0.0  ;;  %v4486_v18 = vsub.f32 %v12834_v62, %v3853_v61  ;;  %v5059_v22 = vand.u32 2147483647, %v4483_v26 }
 0x44b   :  { %v6752_v17 = vmul.f32 %v15506_v31, %v2972_v1  ;;  %v2978_v40 = vmax.f32 %v2402_v59, 0.0  ;;  %v5060_v21 = vand.u32 2147483647, %v4484_v30  ;;  %v5061_v49 = vand.u32 2147483647, %v4485_v57  ;;  %v18969_v30 = vld [vmem:[#allocation223_spill] sm:$0xff] }
 0x44c   :  { %v6756_v8 = vmul.f32 %v15490_v3, %v2976_v63  ;;  %v6754_v42 = vmul.f32 %v15514_v56, %v2974_v54  ;;  %v5062_v33 = vand.u32 2147483647, %v4486_v18  ;;  %v4479_v53 = vsub.f32 %v12827_v19, %v3848_v41  ;;  %v18970_v18 = vld [vmem:[#allocation170_spill] sm:$0xff] }
 0x44d   :  { %v6758_v34 = vmul.f32 %v15492_v55, %v2978_v40  ;;  %v5635_v39 = vsub.f32 1.0, %v5059_v22  ;;  %v5636_v31 = vsub.f32 1.0, %v5060_v21  ;;  %v4480_v7 = vsub.f32 %v12829_v10, %v3848_v41  ;;  %v18972_v22 = vld [vmem:[#allocation225_spill] sm:$0xff] }
 0x44e   :  { %v9512_v28 = vpack.c.bf16 %v6756_v8, %v6752_v17  ;;  %v5637_v12 = vsub.f32 1.0, %v5061_v49  ;;  %v5638_v61 = vsub.f32 1.0, %v5062_v33  ;;  %v4481_v3 = vsub.f32 %v12832_v38, %v3848_v41 }
 0x44f   :  { %v9800_v15 = vpack.c.bf16 %v6758_v34, %v6754_v42  ;;  %v6211_v56 = vmax.f32 %v5635_v39, 0.0  ;;  %v15735_v14 = vmax.f32 %v5636_v31, 0.0  ;;  %v4482_v55 = vsub.f32 %v12834_v62, %v3848_v41  ;;  %v18973_v34 = vld [vmem:[#allocation168_spill] sm:$0xff] }
 0x450   :  { %9513 = vmatprep.subr.bf16.mxu0 %v9512_v28  ;;  %v5055_v1 = vand.u32 2147483647, %v4479_v53  ;;  %v6213_v59 = vmax.f32 %v5637_v12, 0.0  ;;  %v15738_v63 = vmax.f32 %v5638_v61, 0.0  ;;  %v5056_v54 = vand.u32 2147483647, %v4480_v7 }
 0x451   :  { %9801 = vmatprep.subr.bf16.mxu1 %v9800_v15  ;;  %9515 = vmatpush1.bf16.msra.mxu0 %v9514_v24  ;;  %v5057_v26 = vand.u32 2147483647, %v4481_v3  ;;  %v15741_v17 = vmul.f32 %v6211_v56, %v18969_v30  ;;  %v5058_v40 = vand.u32 2147483647, %v4482_v55  ;;  %v18971_v8 = vsub.f32 %v10446_v16, %v18970_v18  ;;  %v3863_v56 = vpop.permute.xlu1 %3862  ;;  %v8709_v55 = vld [vmem:[%s17902_s4 + $0x48] sm:$0xff] }
 0x452   :  { %9803 = vmatpush1.bf16.msra.mxu1 %v9802_v13  ;;  %v5631_v57 = vsub.f32 1.0, %v5055_v1  ;;  %v15747_v41 = vmul.f32 %v6213_v59, %v18972_v22  ;;  %v5632_v21 = vsub.f32 1.0, %v5056_v54  ;;  %v18974_v49 = vsub.f32 %v10446_v16, %v18973_v34  ;;  %v18977_v59 = vld [vmem:[#allocation226_spill] sm:$0xff]  ;;  %8798 = vperm.xlu1 %10177, %v8709_v55  }
 0x453   :  { %v1828_v42 = vand.u32 2147483647, %v18971_v8  ;;  %v5633_v24 = vsub.f32 1.0, %v5057_v26  ;;  %v5634_v53 = vsub.f32 1.0, %v5058_v40  ;;  %v18975_v39 = vsub.f32 %v18563_v37, %v18970_v18  ;;  %v8704_v40 = vld [vmem:[%s17902_s4 + $0x20] sm:$0xff] }
 0x454   :  { %v1832_v33 = vand.u32 2147483647, %v18974_v49  ;;  %v6207_v13 = vmax.f32 %v5631_v57, 0.0  ;;  %v15755_v7 = vmax.f32 %v5632_v21, 0.0  ;;  %v18976_v61 = vsub.f32 %v18563_v37, %v18973_v34  ;;  %v18978_v57 = vld [vmem:[#allocation227_spill] sm:$0xff]  ;;  %v3858_v21 = vpop.permute.xlu0 %3857  ;;  %8773 = vperm.xlu0 %10176, %v8704_v40  }
 0x455   :  { %v2404_v28 = vsub.f32 1.0, %v1828_v42  ;;  %v1830_v31 = vand.u32 2147483647, %v18975_v39  ;;  %v6209_v15 = vmax.f32 %v5633_v24, 0.0  ;;  %v15763_v1 = vmax.f32 %v5634_v53, 0.0 }
 0x456   :  { %v2408_v12 = vsub.f32 1.0, %v1832_v33  ;;  %v1834_v3 = vand.u32 2147483647, %v18976_v61  ;;  %v15766_v54 = vmul.f32 %v6207_v13, %v18977_v59  ;;  %v9518_v22 = vpack.c.bf16 %v15564_v51, %v15589_v45 }
 0x457   :  { %v2980_v26 = vmax.f32 %v2404_v28, 0.0  ;;  %v2406_v30 = vsub.f32 1.0, %v1830_v31  ;;  %v15772_v18 = vmul.f32 %v6209_v15, %v18978_v57  ;;  %v9806_v49 = vpack.c.bf16 %v15567_v0, %v15600_v23 }
 0x458   :  { %v2984_v8 = vmax.f32 %v2408_v12, 0.0  ;;  %v2410_v42 = vsub.f32 1.0, %v1834_v3  ;;  %v4491_v33 = vsub.f32 %v12827_v19, %v3863_v56  ;;  %v4492_v28 = vsub.f32 %v12829_v10, %v3863_v56 }
 0x459   :  { %v6760_v24 = vmul.f32 %v15572_v5, %v2980_v26  ;;  %v2982_v34 = vmax.f32 %v2406_v30, 0.0  ;;  %v4493_v39 = vsub.f32 %v12832_v38, %v3863_v56  ;;  %v4494_v51 = vsub.f32 %v12834_v62, %v3863_v56 }
 0x45a   :  { %v6764_v53 = vmul.f32 %v15559_v47, %v2984_v8  ;;  %v2986_v13 = vmax.f32 %v2410_v42, 0.0  ;;  %v5067_v45 = vand.u32 2147483647, %v4491_v33  ;;  %v4487_v5 = vsub.f32 %v12827_v19, %v3858_v21 }
 0x45b   :  { %v6762_v31 = vmul.f32 %v15580_v48, %v2982_v34  ;;  %v5068_v0 = vand.u32 2147483647, %v4492_v28  ;;  %v5069_v23 = vand.u32 2147483647, %v4493_v39  ;;  %v5070_v61 = vand.u32 2147483647, %v4494_v51 }
 0x45c   :  { %v9516_v15 = vpack.c.bf16 %v6764_v53, %v6760_v24  ;;  %v6766_v12 = vmul.f32 %v15561_v58, %v2986_v13  ;;  %v5643_v3 = vsub.f32 1.0, %v5067_v45  ;;  %v4488_v47 = vsub.f32 %v12829_v10, %v3858_v21  ;;  %v18979_v53 = vld [vmem:[#allocation229_spill] sm:$0xff]  ;;  %v18981_v45 = vld [vmem:[#allocation175_spill] sm:$0xff] }
 0x45d   :  { %v4489_v55 = vsub.f32 %v12832_v38, %v3858_v21  ;;  %v5644_v26 = vsub.f32 1.0, %v5068_v0  ;;  %v5645_v48 = vsub.f32 1.0, %v5069_v23  ;;  %v4490_v56 = vsub.f32 %v12834_v62, %v3858_v21  ;;  %v18980_v21 = vld [vmem:[#allocation230_spill] sm:$0xff] }
 0x45e   :  { %9517 = vmatprep.subr.bf16.mxu0 %v9516_v15  ;;  %v9804_v59 = vpack.c.bf16 %v6766_v12, %v6762_v31  ;;  %v5646_v30 = vsub.f32 1.0, %v5070_v61  ;;  %v6219_v40 = vmax.f32 %v5643_v3, 0.0  ;;  %v5063_v57 = vand.u32 2147483647, %v4487_v5 }
 0x45f   :  { %9519 = vmatpush1.bf16.msra.mxu0 %v9518_v22  ;;  %v5064_v8 = vand.u32 2147483647, %v4488_v47  ;;  %v15790_v58 = vmax.f32 %v5644_v26, 0.0  ;;  %v6221_v42 = vmax.f32 %v5645_v48, 0.0  ;;  %v5065_v24 = vand.u32 2147483647, %v4489_v55 }
 0x460   :  { %9805 = vmatprep.subr.bf16.mxu1 %v9804_v59  ;;  %v5066_v34 = vand.u32 2147483647, %v4490_v56  ;;  %v15792_v33 = vmax.f32 %v5646_v30, 0.0  ;;  %v15795_v13 = vmul.f32 %v6219_v40, %v18979_v53  ;;  %v5639_v28 = vsub.f32 1.0, %v5063_v57  ;;  %v3873_v30 = vpop.permute.xlu1 %3872  ;;  %v18987_v40 = vld [vmem:[#allocation232_spill] sm:$0xff]  ;;  %v18988_v53 = vld [vmem:[#allocation233_spill] sm:$0xff] }
 0x461   :  { %9807 = vmatpush1.bf16.msra.mxu1 %v9806_v49  ;;  %v5640_v39 = vsub.f32 1.0, %v5064_v8  ;;  %v15798_v22 = vmul.f32 %v6221_v42, %v18980_v21  ;;  %v5641_v31 = vsub.f32 1.0, %v5065_v24  ;;  %v18982_v5 = vsub.f32 %v10446_v16, %v18981_v45  ;;  %v18983_v49 = vld [vmem:[#allocation173_spill] sm:$0xff] }
 0x462   :  { %v5642_v51 = vsub.f32 1.0, %v5066_v34  ;;  %v6215_v12 = vmax.f32 %v5639_v28, 0.0  ;;  %v18984_v23 = vsub.f32 %v10446_v16, %v18983_v49  ;;  %v18985_v3 = vsub.f32 %v18563_v37, %v18981_v45  ;;  %v8714_v34 = vld [vmem:[%s17902_s4 + $0x70] sm:$0xff] }
 0x463   :  { %v1836_v15 = vand.u32 2147483647, %v18982_v5  ;;  %v15803_v0 = vmax.f32 %v5640_v39, 0.0  ;;  %v6217_v55 = vmax.f32 %v5641_v31, 0.0  ;;  %v18986_v48 = vsub.f32 %v18563_v37, %v18983_v49  ;;  %8823 = vperm.xlu0 %10176, %v8714_v34  }
 0x464   :  { %v1840_v61 = vand.u32 2147483647, %v18984_v23  ;;  %v1838_v47 = vand.u32 2147483647, %v18985_v3  ;;  %v15811_v59 = vmax.f32 %v5642_v51, 0.0  ;;  %v15817_v57 = vmul.f32 %v6215_v12, %v18987_v40 }
 0x465   :  { %v2412_v26 = vsub.f32 1.0, %v1836_v15  ;;  %v1842_v56 = vand.u32 2147483647, %v18986_v48  ;;  %v9522_v24 = vpack.c.bf16 %v15624_v20, %v15649_v36  ;;  %v15825_v28 = vmul.f32 %v6217_v55, %v18988_v53  ;;  %v3868_v20 = vpop.permute.xlu0 %3867 }
 0x466   :  { %v2416_v8 = vsub.f32 1.0, %v1840_v61  ;;  %v2414_v42 = vsub.f32 1.0, %v1838_v47  ;;  %v9810_v31 = vpack.c.bf16 %v15630_v43, %v15658_v4  ;;  %v4499_v5 = vsub.f32 %v12827_v19, %v3873_v30 }
 0x467   :  { %v2988_v39 = vmax.f32 %v2412_v26, 0.0  ;;  %v2418_v21 = vsub.f32 1.0, %v1842_v56  ;;  %v4500_v15 = vsub.f32 %v12829_v10, %v3873_v30  ;;  %v4501_v49 = vsub.f32 %v12832_v38, %v3873_v30 }
 0x468   :  { %v2992_v51 = vmax.f32 %v2416_v8, 0.0  ;;  %v2990_v45 = vmax.f32 %v2414_v42, 0.0  ;;  %v4502_v23 = vsub.f32 %v12834_v62, %v3873_v30  ;;  %v5075_v43 = vand.u32 2147483647, %v4499_v5 }
 0x469   :  { %v6768_v36 = vmul.f32 %v15638_v6, %v2988_v39  ;;  %v2994_v12 = vmax.f32 %v2418_v21, 0.0  ;;  %v5076_v4 = vand.u32 2147483647, %v4500_v15  ;;  %v5077_v55 = vand.u32 2147483647, %v4501_v49  ;;  %v18989_v15 = vld [vmem:[#allocation235_spill] sm:$0xff] }
 0x46a   :  { %v6772_v61 = vmul.f32 %v15618_v50, %v2992_v51  ;;  %v6770_v3 = vmul.f32 %v15646_v60, %v2990_v45  ;;  %v5078_v26 = vand.u32 2147483647, %v4502_v23  ;;  %v4495_v48 = vsub.f32 %v12827_v19, %v3868_v20  ;;  %v18990_v23 = vld [vmem:[#allocation180_spill] sm:$0xff] }
 0x46b   :  { %v6774_v47 = vmul.f32 %v15621_v44, %v2994_v12  ;;  %v5651_v40 = vsub.f32 1.0, %v5075_v43  ;;  %v5652_v6 = vsub.f32 1.0, %v5076_v4  ;;  %v4496_v8 = vsub.f32 %v12829_v10, %v3868_v20  ;;  %v18992_v43 = vld [vmem:[#allocation236_spill] sm:$0xff] }
 0x46c   :  { %v9520_v56 = vpack.c.bf16 %v6772_v61, %v6768_v36  ;;  %v5653_v34 = vsub.f32 1.0, %v5077_v55  ;;  %v5654_v30 = vsub.f32 1.0, %v5078_v26  ;;  %v4497_v50 = vsub.f32 %v12832_v38, %v3868_v20 }
 0x46d   :  { %v9808_v42 = vpack.c.bf16 %v6774_v47, %v6770_v3  ;;  %v6227_v60 = vmax.f32 %v5651_v40, 0.0  ;;  %v15840_v53 = vmax.f32 %v5652_v6, 0.0  ;;  %v4498_v44 = vsub.f32 %v12834_v62, %v3868_v20  ;;  %v18993_v47 = vld [vmem:[#allocation179_spill] sm:$0xff] }
 0x46e   :  { %9521 = vmatprep.subr.bf16.mxu0 %v9520_v56  ;;  %v5071_v39 = vand.u32 2147483647, %v4495_v48  ;;  %v6229_v21 = vmax.f32 %v5653_v34, 0.0  ;;  %v15843_v51 = vmax.f32 %v5654_v30, 0.0  ;;  %v5072_v45 = vand.u32 2147483647, %v4496_v8 }
 0x46f   :  { %9809 = vmatprep.subr.bf16.mxu1 %v9808_v42  ;;  %9523 = vmatpush1.bf16.msra.mxu0 %v9522_v24  ;;  %v5073_v5 = vand.u32 2147483647, %v4497_v50  ;;  %v15846_v36 = vmul.f32 %v6227_v60, %v18989_v15  ;;  %v5074_v12 = vand.u32 2147483647, %v4498_v44  ;;  %v18991_v61 = vsub.f32 %v10446_v16, %v18990_v23  ;;  %v3883_v60 = vpop.permute.xlu1 %3882  ;;  %v18998_v15 = vld [vmem:[#allocation239_spill] sm:$0xff] }
 0x470   :  { %9811 = vmatpush1.bf16.msra.mxu1 %v9810_v31  ;;  %v5647_v49 = vsub.f32 1.0, %v5071_v39  ;;  %v15852_v20 = vmul.f32 %v6229_v21, %v18992_v43  ;;  %v5648_v4 = vsub.f32 1.0, %v5072_v45  ;;  %v18994_v55 = vsub.f32 %v10446_v16, %v18993_v47  ;;  %v18997_v39 = vld [vmem:[#allocation237_spill] sm:$0xff] }
 0x471   :  { %v1844_v3 = vand.u32 2147483647, %v18991_v61  ;;  %v5649_v24 = vsub.f32 1.0, %v5073_v5  ;;  %v5650_v48 = vsub.f32 1.0, %v5074_v12  ;;  %v18995_v40 = vsub.f32 %v18563_v37, %v18990_v23 }
 0x472   :  { %v1848_v26 = vand.u32 2147483647, %v18994_v55  ;;  %v6223_v31 = vmax.f32 %v5647_v49, 0.0  ;;  %v15860_v8 = vmax.f32 %v5648_v4, 0.0  ;;  %v18996_v30 = vsub.f32 %v18563_v37, %v18993_v47 }
 0x473   :  { %v2420_v56 = vsub.f32 1.0, %v1844_v3  ;;  %v1846_v6 = vand.u32 2147483647, %v18995_v40  ;;  %v6225_v42 = vmax.f32 %v5649_v24, 0.0  ;;  %v15865_v44 = vmax.f32 %v5650_v48, 0.0  ;;  %v3878_v3 = vpop.permute.xlu0 %3877 }
 0x474   :  { %v2424_v34 = vsub.f32 1.0, %v1848_v26  ;;  %v1850_v50 = vand.u32 2147483647, %v18996_v30  ;;  %v15868_v21 = vmul.f32 %v6223_v31, %v18997_v39  ;;  %v9526_v61 = vpack.c.bf16 %v15684_v27, %v15709_v29 }
 0x475   :  { %v2996_v45 = vmax.f32 %v2420_v56, 0.0  ;;  %v2422_v5 = vsub.f32 1.0, %v1846_v6  ;;  %v15871_v12 = vmul.f32 %v6225_v42, %v18998_v15  ;;  %v9814_v24 = vpack.c.bf16 %v15687_v35, %v15720_v52 }
 0x476   :  { %v3000_v49 = vmax.f32 %v2424_v34, 0.0  ;;  %v2426_v23 = vsub.f32 1.0, %v1850_v50  ;;  %v4507_v47 = vsub.f32 %v12827_v19, %v3883_v60  ;;  %v4508_v48 = vsub.f32 %v12829_v10, %v3883_v60 }
 0x477   :  { %v6776_v43 = vmul.f32 %v15692_v32, %v2996_v45  ;;  %v2998_v4 = vmax.f32 %v2422_v5, 0.0  ;;  %v4509_v31 = vsub.f32 %v12832_v38, %v3883_v60  ;;  %v4510_v27 = vsub.f32 %v12834_v62, %v3883_v60 }
 0x478   :  { %v6780_v55 = vmul.f32 %v15679_v46, %v3000_v49  ;;  %v3002_v26 = vmax.f32 %v2426_v23, 0.0  ;;  %v5083_v29 = vand.u32 2147483647, %v4507_v47  ;;  %v4503_v32 = vsub.f32 %v12827_v19, %v3878_v3 }
 0x479   :  { %v6778_v56 = vmul.f32 %v15700_v25, %v2998_v4  ;;  %v5084_v35 = vand.u32 2147483647, %v4508_v48  ;;  %v5085_v52 = vand.u32 2147483647, %v4509_v31  ;;  %v5086_v42 = vand.u32 2147483647, %v4510_v27 }
 0x47a   :  { %v9524_v40 = vpack.c.bf16 %v6780_v55, %v6776_v43  ;;  %v6782_v6 = vmul.f32 %v15681_v11, %v3002_v26  ;;  %v5659_v34 = vsub.f32 1.0, %v5083_v29  ;;  %v4504_v46 = vsub.f32 %v12829_v10, %v3878_v3  ;;  %v18999_v55 = vld [vmem:[#allocation240_spill] sm:$0xff]  ;;  %v19001_v29 = vld [vmem:[#allocation186_spill] sm:$0xff] }
 0x47b   :  { %v4505_v30 = vsub.f32 %v12832_v38, %v3878_v3  ;;  %v5660_v39 = vsub.f32 1.0, %v5084_v35  ;;  %v5661_v25 = vsub.f32 1.0, %v5085_v52  ;;  %v4506_v60 = vsub.f32 %v12834_v62, %v3878_v3  ;;  %v19000_v3 = vld [vmem:[#allocation242_spill] sm:$0xff] }
 0x47c   :  { %9525 = vmatprep.subr.bf16.mxu0 %v9524_v40  ;;  %v9812_v50 = vpack.c.bf16 %v6782_v6, %v6778_v56  ;;  %v5662_v45 = vsub.f32 1.0, %v5086_v42  ;;  %v6235_v5 = vmax.f32 %v5659_v34, 0.0  ;;  %v5079_v15 = vand.u32 2147483647, %v4503_v32 }
 0x47d   :  { %9527 = vmatpush1.bf16.msra.mxu0 %v9526_v61  ;;  %v5080_v49 = vand.u32 2147483647, %v4504_v46  ;;  %v15889_v11 = vmax.f32 %v5660_v39, 0.0  ;;  %v6237_v23 = vmax.f32 %v5661_v25, 0.0  ;;  %v5081_v43 = vand.u32 2147483647, %v4505_v30 }
 0x47e   :  { %9813 = vmatprep.subr.bf16.mxu1 %v9812_v50  ;;  %v5082_v4 = vand.u32 2147483647, %v4506_v60  ;;  %v15891_v47 = vmax.f32 %v5662_v45, 0.0  ;;  %v15894_v26 = vmul.f32 %v6235_v5, %v18999_v55  ;;  %v5655_v48 = vsub.f32 1.0, %v5079_v15  ;;  %v3893_v45 = vpop.permute.xlu1 %3892  ;;  %v19007_v5 = vld [vmem:[#allocation243_spill] sm:$0xff] }
 0x47f   :  { %9815 = vmatpush1.bf16.msra.mxu1 %v9814_v24  ;;  %v5656_v31 = vsub.f32 1.0, %v5080_v49  ;;  %v15897_v61 = vmul.f32 %v6237_v23, %v19000_v3  ;;  %v5657_v56 = vsub.f32 1.0, %v5081_v43  ;;  %v19002_v32 = vsub.f32 %v10446_v16, %v19001_v29  ;;  %v19003_v24 = vld [vmem:[#allocation184_spill] sm:$0xff] }
 0x480   :  { %v5658_v27 = vsub.f32 1.0, %v5082_v4  ;;  %v6231_v6 = vmax.f32 %v5655_v48, 0.0  ;;  %v19004_v52 = vsub.f32 %v10446_v16, %v19003_v24  ;;  %v19005_v34 = vsub.f32 %v18563_v37, %v19001_v29  ;;  %v19008_v4 = vld [vmem:[#allocation244_spill] sm:$0xff] }
 0x481   :  { %v1852_v40 = vand.u32 2147483647, %v19002_v32  ;;  %v15902_v35 = vmax.f32 %v5656_v31, 0.0  ;;  %v6233_v30 = vmax.f32 %v5657_v56, 0.0  ;;  %v19006_v25 = vsub.f32 %v18563_v37, %v19003_v24 }
 0x482   :  { %v1856_v42 = vand.u32 2147483647, %v19004_v52  ;;  %v1854_v46 = vand.u32 2147483647, %v19005_v34  ;;  %v15910_v50 = vmax.f32 %v5658_v27, 0.0  ;;  %v15916_v15 = vmul.f32 %v6231_v6, %v19007_v5 }
 0x483   :  { %v2428_v39 = vsub.f32 1.0, %v1852_v40  ;;  %v1858_v60 = vand.u32 2147483647, %v19006_v25  ;;  %v9530_v43 = vpack.c.bf16 %v15741_v17, %v15766_v54  ;;  %v15921_v55 = vmul.f32 %v6233_v30, %v19008_v4  ;;  %v3888_v40 = vpop.permute.xlu0 %3887 }
 0x484   :  { %v2432_v49 = vsub.f32 1.0, %v1856_v42  ;;  %v2430_v23 = vsub.f32 1.0, %v1854_v46  ;;  %v9818_v3 = vpack.c.bf16 %v15747_v41, %v15772_v18  ;;  %v4515_v29 = vsub.f32 %v12827_v19, %v3893_v45 }
 0x485   :  { %v3004_v48 = vmax.f32 %v2428_v39, 0.0  ;;  %v2434_v31 = vsub.f32 1.0, %v1858_v60  ;;  %v4516_v32 = vsub.f32 %v12829_v10, %v3893_v45  ;;  %v4517_v17 = vsub.f32 %v12832_v38, %v3893_v45 }
 0x486   :  { %v3008_v56 = vmax.f32 %v2432_v49, 0.0  ;;  %v3006_v27 = vmax.f32 %v2430_v23, 0.0  ;;  %v4518_v54 = vsub.f32 %v12834_v62, %v3893_v45  ;;  %v5091_v34 = vand.u32 2147483647, %v4515_v29 }
 0x487   :  { %v6784_v6 = vmul.f32 %v15755_v7, %v3004_v48  ;;  %v3010_v24 = vmax.f32 %v2434_v31, 0.0  ;;  %v5092_v41 = vand.u32 2147483647, %v4516_v32  ;;  %v5093_v46 = vand.u32 2147483647, %v4517_v17  ;;  %v19009_v32 = vld [vmem:[#allocation246_spill] sm:$0xff] }
 0x488   :  { %v6788_v52 = vmul.f32 %v15735_v14, %v3008_v56  ;;  %v6786_v42 = vmul.f32 %v15763_v1, %v3006_v27  ;;  %v5094_v30 = vand.u32 2147483647, %v4518_v54  ;;  %v4511_v39 = vsub.f32 %v12827_v19, %v3888_v40  ;;  %v19010_v54 = vld [vmem:[#allocation191_spill] sm:$0xff] }
 0x489   :  { %v6790_v18 = vmul.f32 %v15738_v63, %v3010_v24  ;;  %v5667_v60 = vsub.f32 1.0, %v5091_v34  ;;  %v5668_v7 = vsub.f32 1.0, %v5092_v41  ;;  %v4512_v5 = vsub.f32 %v12829_v10, %v3888_v40  ;;  %v19012_v34 = vld [vmem:[#allocation247_spill] sm:$0xff] }
 0x48a   :  { %v9528_v25 = vpack.c.bf16 %v6788_v52, %v6784_v6  ;;  %v5669_v23 = vsub.f32 1.0, %v5093_v46  ;;  %v5670_v45 = vsub.f32 1.0, %v5094_v30  ;;  %v4513_v14 = vsub.f32 %v12832_v38, %v3888_v40 }
 0x48b   :  { %v9816_v49 = vpack.c.bf16 %v6790_v18, %v6786_v42  ;;  %v6243_v1 = vmax.f32 %v5667_v60, 0.0  ;;  %v15936_v4 = vmax.f32 %v5668_v7, 0.0  ;;  %v4514_v63 = vsub.f32 %v12834_v62, %v3888_v40  ;;  %v19013_v18 = vld [vmem:[#allocation189_spill] sm:$0xff] }
 0x48c   :  { %9529 = vmatprep.subr.bf16.mxu0 %v9528_v25  ;;  %v5087_v48 = vand.u32 2147483647, %v4511_v39  ;;  %v6245_v31 = vmax.f32 %v5669_v23, 0.0  ;;  %v15939_v56 = vmax.f32 %v5670_v45, 0.0  ;;  %v5088_v27 = vand.u32 2147483647, %v4512_v5 }
 0x48d   :  { %9817 = vmatprep.subr.bf16.mxu1 %v9816_v49  ;;  %9531 = vmatpush1.bf16.msra.mxu0 %v9530_v43  ;;  %v5089_v29 = vand.u32 2147483647, %v4513_v14  ;;  %v15942_v6 = vmul.f32 %v6243_v1, %v19009_v32  ;;  %v5090_v24 = vand.u32 2147483647, %v4514_v63  ;;  %v19011_v52 = vsub.f32 %v10446_v16, %v19010_v54  ;;  %v3903_v1 = vpop.permute.xlu1 %3902  ;;  %v19018_v32 = vld [vmem:[#allocation250_spill] sm:$0xff] }
 0x48e   :  { %9819 = vmatpush1.bf16.msra.mxu1 %v9818_v3  ;;  %v5663_v17 = vsub.f32 1.0, %v5087_v48  ;;  %v15948_v40 = vmul.f32 %v6245_v31, %v19012_v34  ;;  %v5664_v41 = vsub.f32 1.0, %v5088_v27  ;;  %v19014_v46 = vsub.f32 %v10446_v16, %v19013_v18  ;;  %v19017_v48 = vld [vmem:[#allocation249_spill] sm:$0xff] }
 0x48f   :  { %v1860_v42 = vand.u32 2147483647, %v19011_v52  ;;  %v5665_v43 = vsub.f32 1.0, %v5089_v29  ;;  %v5666_v39 = vsub.f32 1.0, %v5090_v24  ;;  %v19015_v60 = vsub.f32 %v18563_v37, %v19010_v54 }
 0x490   :  { %v1864_v30 = vand.u32 2147483647, %v19014_v46  ;;  %v6239_v3 = vmax.f32 %v5663_v17, 0.0  ;;  %v15956_v5 = vmax.f32 %v5664_v41, 0.0  ;;  %v19016_v45 = vsub.f32 %v18563_v37, %v19013_v18 }
 0x491   :  { %v2436_v25 = vsub.f32 1.0, %v1860_v42  ;;  %v1862_v7 = vand.u32 2147483647, %v19015_v60  ;;  %v6241_v49 = vmax.f32 %v5665_v43, 0.0  ;;  %v15961_v63 = vmax.f32 %v5666_v39, 0.0  ;;  %v3898_v42 = vpop.permute.xlu0 %3897 }
 0x492   :  { %v2440_v23 = vsub.f32 1.0, %v1864_v30  ;;  %v1866_v14 = vand.u32 2147483647, %v19016_v45  ;;  %v15964_v31 = vmul.f32 %v6239_v3, %v19017_v48  ;;  %v9534_v52 = vpack.c.bf16 %v15795_v13, %v15817_v57 }
 0x493   :  { %v3012_v27 = vmax.f32 %v2436_v25, 0.0  ;;  %v2438_v29 = vsub.f32 1.0, %v1862_v7  ;;  %v15967_v24 = vmul.f32 %v6241_v49, %v19018_v32  ;;  %v9822_v43 = vpack.c.bf16 %v15798_v22, %v15825_v28 }
 0x494   :  { %v3016_v17 = vmax.f32 %v2440_v23, 0.0  ;;  %v2442_v54 = vsub.f32 1.0, %v1866_v14  ;;  %v4523_v18 = vsub.f32 %v12827_v19, %v3903_v1  ;;  %v4524_v39 = vsub.f32 %v12829_v10, %v3903_v1 }
 0x495   :  { %v6792_v34 = vmul.f32 %v15803_v0, %v3012_v27  ;;  %v3014_v41 = vmax.f32 %v2438_v29, 0.0  ;;  %v4525_v3 = vsub.f32 %v12832_v38, %v3903_v1  ;;  %v4526_v13 = vsub.f32 %v12834_v62, %v3903_v1 }
 0x496   :  { %v6796_v46 = vmul.f32 %v15790_v58, %v3016_v17  ;;  %v3018_v30 = vmax.f32 %v2442_v54, 0.0  ;;  %v5099_v57 = vand.u32 2147483647, %v4523_v18  ;;  %v4519_v0 = vsub.f32 %v12827_v19, %v3898_v42 }
 0x497   :  { %v6794_v25 = vmul.f32 %v15811_v59, %v3014_v41  ;;  %v5100_v22 = vand.u32 2147483647, %v4524_v39  ;;  %v5101_v28 = vand.u32 2147483647, %v4525_v3  ;;  %v5102_v49 = vand.u32 2147483647, %v4526_v13 }
 0x498   :  { %v9532_v60 = vpack.c.bf16 %v6796_v46, %v6792_v34  ;;  %v6798_v7 = vmul.f32 %v15792_v33, %v3018_v30  ;;  %v5675_v23 = vsub.f32 1.0, %v5099_v57  ;;  %v4520_v58 = vsub.f32 %v12829_v10, %v3898_v42  ;;  %v19019_v46 = vld [vmem:[#allocation252_spill] sm:$0xff] }
 0x499   :  { %v4521_v45 = vsub.f32 %v12832_v38, %v3898_v42  ;;  %v5676_v48 = vsub.f32 1.0, %v5100_v22  ;;  %v5677_v59 = vsub.f32 1.0, %v5101_v28  ;;  %v4522_v1 = vsub.f32 %v12834_v62, %v3898_v42  ;;  %v19020_v42 = vld [vmem:[#allocation253_spill] sm:$0xff]  ;;  %v19021_v57 = vld [vmem:[#allocation196_spill] sm:$0xff] }
 0x49a   :  { %9533 = vmatprep.subr.bf16.mxu0 %v9532_v60  ;;  %v9820_v14 = vpack.c.bf16 %v6798_v7, %v6794_v25  ;;  %v5678_v27 = vsub.f32 1.0, %v5102_v49  ;;  %v6251_v29 = vmax.f32 %v5675_v23, 0.0  ;;  %v5095_v32 = vand.u32 2147483647, %v4519_v0 }
 0x49b   :  { %9535 = vmatpush1.bf16.msra.mxu0 %v9534_v52  ;;  %v5096_v17 = vand.u32 2147483647, %v4520_v58  ;;  %v15985_v33 = vmax.f32 %v5676_v48, 0.0  ;;  %v6253_v54 = vmax.f32 %v5677_v59, 0.0  ;;  %v5097_v34 = vand.u32 2147483647, %v4521_v45 }
 0x49c   :  { %9821 = vmatprep.subr.bf16.mxu1 %v9820_v14  ;;  %v5098_v41 = vand.u32 2147483647, %v4522_v1  ;;  %v15987_v18 = vmax.f32 %v5678_v27, 0.0  ;;  %v15990_v30 = vmul.f32 %v6251_v29, %v19019_v46  ;;  %v5671_v39 = vsub.f32 1.0, %v5095_v32  ;;  %v3913_v27 = vpop.permute.xlu1 %3912  ;;  %v19027_v29 = vld [vmem:[#allocation254_spill] sm:$0xff] }
 0x49d   :  { %9823 = vmatpush1.bf16.msra.mxu1 %v9822_v43  ;;  %v5672_v3 = vsub.f32 1.0, %v5096_v17  ;;  %v15993_v52 = vmul.f32 %v6253_v54, %v19020_v42  ;;  %v5673_v25 = vsub.f32 1.0, %v5097_v34  ;;  %v19022_v0 = vsub.f32 %v10446_v16, %v19021_v57  ;;  %v19023_v43 = vld [vmem:[#allocation194_spill] sm:$0xff] }
 0x49e   :  { %v5674_v13 = vsub.f32 1.0, %v5098_v41  ;;  %v6247_v7 = vmax.f32 %v5671_v39, 0.0  ;;  %v19024_v28 = vsub.f32 %v10446_v16, %v19023_v43  ;;  %v19025_v23 = vsub.f32 %v18563_v37, %v19021_v57  ;;  %v19028_v41 = vld [vmem:[#allocation256_spill] sm:$0xff] }
 0x49f   :  { %v1868_v60 = vand.u32 2147483647, %v19022_v0  ;;  %v15998_v22 = vmax.f32 %v5672_v3, 0.0  ;;  %v6249_v45 = vmax.f32 %v5673_v25, 0.0  ;;  %v19026_v59 = vsub.f32 %v18563_v37, %v19023_v43 }
 0x4a0   :  { %v1872_v49 = vand.u32 2147483647, %v19024_v28  ;;  %v1870_v58 = vand.u32 2147483647, %v19025_v23  ;;  %v16006_v14 = vmax.f32 %v5674_v13, 0.0  ;;  %v16012_v32 = vmul.f32 %v6247_v7, %v19027_v29 }
 0x4a1   :  { %v2444_v48 = vsub.f32 1.0, %v1868_v60  ;;  %v1874_v1 = vand.u32 2147483647, %v19026_v59  ;;  %v9538_v34 = vpack.c.bf16 %v15846_v36, %v15868_v21  ;;  %v16017_v46 = vmul.f32 %v6249_v45, %v19028_v41  ;;  %v3908_v60 = vpop.permute.xlu0 %3907 }
 0x4a2   :  { %v2448_v17 = vsub.f32 1.0, %v1872_v49  ;;  %v2446_v54 = vsub.f32 1.0, %v1870_v58  ;;  %v9826_v42 = vpack.c.bf16 %v15852_v20, %v15871_v12  ;;  %v4531_v57 = vsub.f32 %v12827_v19, %v3913_v27 }
 0x4a3   :  { %v3020_v39 = vmax.f32 %v2444_v48, 0.0  ;;  %v2450_v3 = vsub.f32 1.0, %v1874_v1  ;;  %v4532_v0 = vsub.f32 %v12829_v10, %v3913_v27  ;;  %v4533_v36 = vsub.f32 %v12832_v38, %v3913_v27 }
 0x4a4   :  { %v3024_v25 = vmax.f32 %v2448_v17, 0.0  ;;  %v3022_v13 = vmax.f32 %v2446_v54, 0.0  ;;  %v4534_v21 = vsub.f32 %v12834_v62, %v3913_v27  ;;  %v5107_v23 = vand.u32 2147483647, %v4531_v57 }
 0x4a5   :  { %v6800_v7 = vmul.f32 %v15860_v8, %v3020_v39  ;;  %v3026_v43 = vmax.f32 %v2450_v3, 0.0  ;;  %v5108_v20 = vand.u32 2147483647, %v4532_v0  ;;  %v5109_v58 = vand.u32 2147483647, %v4533_v36  ;;  %v19029_v0 = vld [vmem:[#allocation257_spill] sm:$0xff] }
 0x4a6   :  { %v6804_v28 = vmul.f32 %v15840_v53, %v3024_v25  ;;  %v6802_v49 = vmul.f32 %v15865_v44, %v3022_v13  ;;  %v5110_v45 = vand.u32 2147483647, %v4534_v21  ;;  %v4527_v48 = vsub.f32 %v12827_v19, %v3908_v60  ;;  %v19030_v21 = vld [vmem:[#allocation201_spill] sm:$0xff] }
 0x4a7   :  { %v6806_v12 = vmul.f32 %v15843_v51, %v3026_v43  ;;  %v5683_v1 = vsub.f32 1.0, %v5107_v23  ;;  %v5684_v8 = vsub.f32 1.0, %v5108_v20  ;;  %v4528_v29 = vsub.f32 %v12829_v10, %v3908_v60  ;;  %v19032_v23 = vld [vmem:[#allocation259_spill] sm:$0xff] }
 0x4a8   :  { %v9536_v59 = vpack.c.bf16 %v6804_v28, %v6800_v7  ;;  %v5685_v54 = vsub.f32 1.0, %v5109_v58  ;;  %v5686_v27 = vsub.f32 1.0, %v5110_v45  ;;  %v4529_v53 = vsub.f32 %v12832_v38, %v3908_v60 }
 0x4a9   :  { %v9824_v17 = vpack.c.bf16 %v6806_v12, %v6802_v49  ;;  %v6259_v44 = vmax.f32 %v5683_v1, 0.0  ;;  %v16032_v41 = vmax.f32 %v5684_v8, 0.0  ;;  %v4530_v51 = vsub.f32 %v12834_v62, %v3908_v60  ;;  %v19033_v12 = vld [vmem:[#allocation199_spill] sm:$0xff] }
 0x4aa   :  { %9537 = vmatprep.subr.bf16.mxu0 %v9536_v59  ;;  %v5103_v39 = vand.u32 2147483647, %v4527_v48  ;;  %v6261_v3 = vmax.f32 %v5685_v54, 0.0  ;;  %v16035_v25 = vmax.f32 %v5686_v27, 0.0  ;;  %v5104_v13 = vand.u32 2147483647, %v4528_v29 }
 0x4ab   :  { %9825 = vmatprep.subr.bf16.mxu1 %v9824_v17  ;;  %9539 = vmatpush1.bf16.msra.mxu0 %v9538_v34  ;;  %v5105_v57 = vand.u32 2147483647, %v4529_v53  ;;  %v16038_v7 = vmul.f32 %v6259_v44, %v19029_v0  ;;  %v5106_v43 = vand.u32 2147483647, %v4530_v51  ;;  %v19031_v28 = vsub.f32 %v10446_v16, %v19030_v21  ;;  %v3923_v44 = vpop.permute.xlu1 %3922  ;;  %v19038_v0 = vld [vmem:[#allocation261_spill] sm:$0xff] }
 0x4ac   :  { %9827 = vmatpush1.bf16.msra.mxu1 %v9826_v42  ;;  %v5679_v36 = vsub.f32 1.0, %v5103_v39  ;;  %v16044_v60 = vmul.f32 %v6261_v3, %v19032_v23  ;;  %v5680_v20 = vsub.f32 1.0, %v5104_v13  ;;  %v19034_v58 = vsub.f32 %v10446_v16, %v19033_v12  ;;  %v19037_v39 = vld [vmem:[#allocation260_spill] sm:$0xff] }
 0x4ad   :  { %v1876_v49 = vand.u32 2147483647, %v19031_v28  ;;  %v5681_v34 = vsub.f32 1.0, %v5105_v57  ;;  %v5682_v48 = vsub.f32 1.0, %v5106_v43  ;;  %v19035_v1 = vsub.f32 %v18563_v37, %v19030_v21 }
 0x4ae   :  { %v1880_v45 = vand.u32 2147483647, %v19034_v58  ;;  %v6255_v42 = vmax.f32 %v5679_v36, 0.0  ;;  %v16052_v29 = vmax.f32 %v5680_v20, 0.0  ;;  %v19036_v27 = vsub.f32 %v18563_v37, %v19033_v12 }
 0x4af   :  { %v2452_v59 = vsub.f32 1.0, %v1876_v49  ;;  %v1878_v8 = vand.u32 2147483647, %v19035_v1  ;;  %v6257_v17 = vmax.f32 %v5681_v34, 0.0  ;;  %v16057_v51 = vmax.f32 %v5682_v48, 0.0  ;;  %v3918_v49 = vpop.permute.xlu0 %3917 }
 0x4b0   :  { %v2456_v54 = vsub.f32 1.0, %v1880_v45  ;;  %v1882_v53 = vand.u32 2147483647, %v19036_v27  ;;  %v16060_v3 = vmul.f32 %v6255_v42, %v19037_v39  ;;  %v9542_v28 = vpack.c.bf16 %v15894_v26, %v15916_v15 }
 0x4b1   :  { %v3028_v13 = vmax.f32 %v2452_v59, 0.0  ;;  %v2454_v57 = vsub.f32 1.0, %v1878_v8  ;;  %v16063_v43 = vmul.f32 %v6257_v17, %v19038_v0  ;;  %v9830_v34 = vpack.c.bf16 %v15897_v61, %v15921_v55 }
 0x4b2   :  { %v3032_v36 = vmax.f32 %v2456_v54, 0.0  ;;  %v2458_v21 = vsub.f32 1.0, %v1882_v53  ;;  %v4539_v12 = vsub.f32 %v12827_v19, %v3923_v44  ;;  %v4540_v48 = vsub.f32 %v12829_v10, %v3923_v44 }
 0x4b3   :  { %v6808_v23 = vmul.f32 %v15902_v35, %v3028_v13  ;;  %v3030_v20 = vmax.f32 %v2454_v57, 0.0  ;;  %v4541_v42 = vsub.f32 %v12832_v38, %v3923_v44  ;;  %v4542_v26 = vsub.f32 %v12834_v62, %v3923_v44 }
 0x4b4   :  { %v6812_v58 = vmul.f32 %v15889_v11, %v3032_v36  ;;  %v3034_v45 = vmax.f32 %v2458_v21, 0.0  ;;  %v5115_v15 = vand.u32 2147483647, %v4539_v12  ;;  %v4535_v35 = vsub.f32 %v12827_v19, %v3918_v49 }
 0x4b5   :  { %v6810_v59 = vmul.f32 %v15910_v50, %v3030_v20  ;;  %v5116_v61 = vand.u32 2147483647, %v4540_v48  ;;  %v5117_v55 = vand.u32 2147483647, %v4541_v42  ;;  %v5118_v17 = vand.u32 2147483647, %v4542_v26 }
 0x4b6   :  { %v9540_v1 = vpack.c.bf16 %v6812_v58, %v6808_v23  ;;  %v6814_v8 = vmul.f32 %v15891_v47, %v3034_v45  ;;  %v5691_v54 = vsub.f32 1.0, %v5115_v15  ;;  %v4536_v11 = vsub.f32 %v12829_v10, %v3918_v49  ;;  %v19039_v58 = vld [vmem:[#allocation263_spill] sm:$0xff] }
 0x4b7   :  { %v4537_v27 = vsub.f32 %v12832_v38, %v3918_v49  ;;  %v5692_v39 = vsub.f32 1.0, %v5116_v61  ;;  %v5693_v50 = vsub.f32 1.0, %v5117_v55  ;;  %v4538_v44 = vsub.f32 %v12834_v62, %v3918_v49  ;;  %v19040_v49 = vld [vmem:[#allocation264_spill] sm:$0xff]  ;;  %v19041_v15 = vld [vmem:[#allocation207_spill] sm:$0xff] }
 0x4b8   :  { %9541 = vmatprep.subr.bf16.mxu0 %v9540_v1  ;;  %v9828_v53 = vpack.c.bf16 %v6814_v8, %v6810_v59  ;;  %v5694_v13 = vsub.f32 1.0, %v5118_v17  ;;  %v6267_v57 = vmax.f32 %v5691_v54, 0.0  ;;  %v5111_v0 = vand.u32 2147483647, %v4535_v35 }
 0x4b9   :  { %9543 = vmatpush1.bf16.msra.mxu0 %v9542_v28  ;;  %v5112_v36 = vand.u32 2147483647, %v4536_v11  ;;  %v16081_v47 = vmax.f32 %v5692_v39, 0.0  ;;  %v6269_v21 = vmax.f32 %v5693_v50, 0.0  ;;  %v5113_v23 = vand.u32 2147483647, %v4537_v27 }
 0x4ba   :  { %9829 = vmatprep.subr.bf16.mxu1 %v9828_v53  ;;  %v5114_v20 = vand.u32 2147483647, %v4538_v44  ;;  %v16083_v12 = vmax.f32 %v5694_v13, 0.0  ;;  %v16086_v45 = vmul.f32 %v6267_v57, %v19039_v58  ;;  %v5687_v48 = vsub.f32 1.0, %v5111_v0  ;;  %v3933_v13 = vpop.permute.xlu1 %3932  ;;  %v19047_v57 = vld [vmem:[#allocation266_spill] sm:$0xff] }
 0x4bb   :  { %9831 = vmatpush1.bf16.msra.mxu1 %v9830_v34  ;;  %v5688_v42 = vsub.f32 1.0, %v5112_v36  ;;  %v16089_v28 = vmul.f32 %v6269_v21, %v19040_v49  ;;  %v5689_v59 = vsub.f32 1.0, %v5113_v23  ;;  %v19042_v35 = vsub.f32 %v10446_v16, %v19041_v15  ;;  %v19043_v34 = vld [vmem:[#allocation205_spill] sm:$0xff] }
 0x4bc   :  { %v5690_v26 = vsub.f32 1.0, %v5114_v20  ;;  %v6263_v8 = vmax.f32 %v5687_v48, 0.0  ;;  %v19044_v55 = vsub.f32 %v10446_v16, %v19043_v34  ;;  %v19045_v54 = vsub.f32 %v18563_v37, %v19041_v15  ;;  %v19048_v20 = vld [vmem:[#allocation267_spill] sm:$0xff] }
 0x4bd   :  { %v1884_v1 = vand.u32 2147483647, %v19042_v35  ;;  %v16094_v61 = vmax.f32 %v5688_v42, 0.0  ;;  %v6265_v27 = vmax.f32 %v5689_v59, 0.0  ;;  %v19046_v50 = vsub.f32 %v18563_v37, %v19043_v34 }
 0x4be   :  { %v1888_v17 = vand.u32 2147483647, %v19044_v55  ;;  %v1886_v11 = vand.u32 2147483647, %v19045_v54  ;;  %v16102_v53 = vmax.f32 %v5690_v26, 0.0  ;;  %v16108_v0 = vmul.f32 %v6263_v8, %v19047_v57 }
 0x4bf   :  { %v2460_v39 = vsub.f32 1.0, %v1884_v1  ;;  %v1890_v44 = vand.u32 2147483647, %v19046_v50  ;;  %v9546_v23 = vpack.c.bf16 %v15942_v6, %v15964_v31  ;;  %v16113_v58 = vmul.f32 %v6265_v27, %v19048_v20  ;;  %v3928_v1 = vpop.permute.xlu0 %3927 }
 0x4c0   :  { %v2464_v36 = vsub.f32 1.0, %v1888_v17  ;;  %v2462_v21 = vsub.f32 1.0, %v1886_v11  ;;  %v9834_v49 = vpack.c.bf16 %v15948_v40, %v15967_v24  ;;  %v4547_v15 = vsub.f32 %v12827_v19, %v3933_v13 }
 0x4c1   :  { %v3036_v48 = vmax.f32 %v2460_v39, 0.0  ;;  %v2466_v42 = vsub.f32 1.0, %v1890_v44  ;;  %v4548_v35 = vsub.f32 %v12829_v10, %v3933_v13  ;;  %v4549_v6 = vsub.f32 %v12832_v38, %v3933_v13 }
 0x4c2   :  { %v3040_v59 = vmax.f32 %v2464_v36, 0.0  ;;  %v3038_v26 = vmax.f32 %v2462_v21, 0.0  ;;  %v4550_v31 = vsub.f32 %v12834_v62, %v3933_v13  ;;  %v5123_v54 = vand.u32 2147483647, %v4547_v15 }
 0x4c3   :  { %v6816_v8 = vmul.f32 %v15956_v5, %v3036_v48  ;;  %v3042_v34 = vmax.f32 %v2466_v42, 0.0  ;;  %v5124_v40 = vand.u32 2147483647, %v4548_v35  ;;  %v5125_v11 = vand.u32 2147483647, %v4549_v6  ;;  %v7019_v42 = vld [vmem:[%s17899_s1 + $0x20] sm:$0xff] }
 0x4c4   :  { %v6820_v55 = vmul.f32 %v15936_v4, %v3040_v59  ;;  %v6818_v17 = vmul.f32 %v15961_v63, %v3038_v26  ;;  %v5126_v27 = vand.u32 2147483647, %v4550_v31  ;;  %v4543_v39 = vsub.f32 %v12827_v19, %v3928_v1 }
 0x4c5   :  { %v6822_v24 = vmul.f32 %v15939_v56, %v3042_v34  ;;  %v5699_v44 = vsub.f32 1.0, %v5123_v54  ;;  %v5700_v5 = vsub.f32 1.0, %v5124_v40  ;;  %v4544_v57 = vsub.f32 %v12829_v10, %v3928_v1  ;;  %v7029_v54 = vld [vmem:[%s17899_s1 + $0x70] sm:$0xff] }
 0x4c6   :  { %v9544_v50 = vpack.c.bf16 %v6820_v55, %v6816_v8  ;;  %v5701_v21 = vsub.f32 1.0, %v5125_v11  ;;  %v5702_v13 = vsub.f32 1.0, %v5126_v27  ;;  %v4545_v4 = vsub.f32 %v12832_v38, %v3928_v1  ;;  %v19049_v8 = vld [vmem:[#allocation269_spill] sm:$0xff] }
 0x4c7   :  { %v9832_v36 = vpack.c.bf16 %v6822_v24, %v6818_v17  ;;  %v6275_v63 = vmax.f32 %v5699_v44, 0.0  ;;  %v16128_v20 = vmax.f32 %v5700_v5, 0.0  ;;  %v4546_v56 = vsub.f32 %v12834_v62, %v3928_v1  ;;  %v19050_v1 = vld [vmem:[#allocation214_spill] sm:$0xff] }
 0x4c8   :  { %9545 = vmatprep.subr.bf16.mxu0 %v9544_v50  ;;  %v5119_v48 = vand.u32 2147483647, %v4543_v39  ;;  %v6277_v59 = vmax.f32 %v5701_v21, 0.0  ;;  %v16134_v26 = vmax.f32 %v5702_v13, 0.0  ;;  %v5120_v15 = vand.u32 2147483647, %v4544_v57 }
 0x4c9   :  { %9833 = vmatprep.subr.bf16.mxu1 %v9832_v36  ;;  %9547 = vmatpush1.bf16.msra.mxu0 %v9546_v23  ;;  %v5121_v35 = vand.u32 2147483647, %v4545_v4  ;;  %v16137_v34 = vmul.f32 %v6275_v63, %v19049_v8  ;;  %v5122_v6 = vand.u32 2147483647, %v4546_v56  ;;  %v19051_v55 = vsub.f32 %v10446_v16, %v19050_v1  ;;  %v19052_v23 = vld [vmem:[#allocation270_spill] sm:$0xff] }
 0x4ca   :  { %9835 = vmatpush1.bf16.msra.mxu1 %v9834_v49  ;;  %v5695_v31 = vsub.f32 1.0, %v5119_v48  ;;  %v16146_v40 = vmul.f32 %v6277_v59, %v19052_v23  ;;  %v5696_v24 = vsub.f32 1.0, %v5120_v15  ;;  %v19053_v49 = vld [vmem:[#allocation211_spill] sm:$0xff]  ;;  %v19055_v57 = vsub.f32 %v18563_v37, %v19050_v1  ;;  %v3943_v48 = vpop.permute.xlu1 %3942  ;;  %v7028_v59 = vld [vmem:[%s17899_s1 + $0x68] sm:$0xff]  ;;  %v7038_v1 = vld [vmem:[%s17899_s1 + $0xb8] sm:$0xff] }
 0x4cb   :  { %v1892_v17 = vand.u32 2147483647, %v19051_v55  ;;  %v5697_v11 = vsub.f32 1.0, %v5121_v35  ;;  %v19054_v27 = vsub.f32 %v10446_v16, %v19053_v49  ;;  %v5698_v50 = vsub.f32 1.0, %v5122_v6  ;;  %v19057_v35 = vld [vmem:[#allocation271_spill] sm:$0xff]  ;;  %v19058_v55 = vld [vmem:[#allocation273_spill] sm:$0xff] }
 0x4cc   :  { %v6271_v44 = vmax.f32 %v5695_v31, 0.0  ;;  %v1894_v36 = vand.u32 2147483647, %v19055_v57  ;;  %7525 = vmatmul.mubr.f32.vlgmr.msra.gmra.mrb[0].mxu0 %v7019_v42  ;;  %v16154_v21 = vmax.f32 %v5696_v24, 0.0  ;;  %v19056_v63 = vsub.f32 %v18563_v37, %v19053_v49 }
 0x4cd   :  { %v1896_v39 = vand.u32 2147483647, %v19054_v27  ;;  %v2468_v5 = vsub.f32 1.0, %v1892_v17  ;;  %v6273_v13 = vmax.f32 %v5697_v11, 0.0  ;;  %8300 = vmatmul.mubr.f32.vlgmr.msra.gmra.mrb[0].mxu1 %v7019_v42  ;;  %7530 = vmatprep.mubr.f32.mxu0 %v7029_v54  ;;  %v16162_v15 = vmax.f32 %v5698_v50, 0.0  ;;  %v3938_v11 = vpop.permute.xlu0 %3937 }
 0x4ce   :  { %v1898_v56 = vand.u32 2147483647, %v19056_v63  ;;  %v16165_v8 = vmul.f32 %v6271_v44, %v19057_v35  ;;  %v2470_v31 = vsub.f32 1.0, %v1894_v36  ;;  %8305 = vmatprep.mubr.f32.mxu1 %v7029_v54  ;;  %v9550_v24 = vpack.c.bf16 %v15990_v30, %v16012_v32  ;;  %v7037_v30 = vld [vmem:[%s17899_s1 + $0xb0] sm:$0xff]  ;;  %v7047_v63 = vld [vmem:[%s17899_s1 + $0x100] sm:$0xff] }
 0x4cf   :  { %v2472_v4 = vsub.f32 1.0, %v1896_v39  ;;  %v3044_v6 = vmax.f32 %v2468_v5, 0.0  ;;  %v16171_v42 = vmul.f32 %v6273_v13, %v19058_v55  ;;  %v9838_v39 = vpack.c.bf16 %v15993_v52, %v16017_v46  ;;  %v7056_v55 = vld [vmem:[%s17899_s1 + $0x148] sm:$0xff] }
 0x4d0   :  { %v2474_v23 = vsub.f32 1.0, %v1898_v56  ;;  %v3046_v27 = vmax.f32 %v2470_v31, 0.0  ;;  %v4555_v54 = vsub.f32 %v12827_v19, %v3943_v48  ;;  %7531 = vmatmul.mubr.f32.gmra.mrb[2].mxu0 %v7028_v59  ;;  %v4556_v5 = vsub.f32 %v12829_v10, %v3943_v48 }
 0x4d1   :  { %v3048_v17 = vmax.f32 %v2472_v4, 0.0  ;;  %v6824_v49 = vmul.f32 %v15998_v22, %v3044_v6  ;;  %v4557_v57 = vsub.f32 %v12832_v38, %v3943_v48  ;;  %8306 = vmatmul.mubr.f32.gmra.mrb[2].mxu1 %v7028_v59  ;;  %7536 = vmatprep.mubr.f32.mxu0 %v7038_v1  ;;  %v4558_v52 = vsub.f32 %v12834_v62, %v3943_v48 }
 0x4d2   :  { %v3050_v44 = vmax.f32 %v2474_v23, 0.0  ;;  %v6826_v22 = vmul.f32 %v16006_v14, %v3046_v27  ;;  %v5131_v32 = vand.u32 2147483647, %v4555_v54  ;;  %v4551_v46 = vsub.f32 %v12827_v19, %v3938_v11  ;;  %8311 = vmatprep.mubr.f32.mxu1 %v7038_v1 }
 0x4d3   :  { %v6828_v50 = vmul.f32 %v15985_v33, %v3048_v17  ;;  %v5132_v13 = vand.u32 2147483647, %v4556_v5  ;;  %v5133_v4 = vand.u32 2147483647, %v4557_v57  ;;  %v5134_v56 = vand.u32 2147483647, %v4558_v52 }
 0x4d4   :  { %v6830_v36 = vmul.f32 %v15987_v18, %v3050_v44  ;;  %v5707_v59 = vsub.f32 1.0, %v5131_v32  ;;  %v4552_v35 = vsub.f32 %v12829_v10, %v3938_v11  ;;  %v4553_v14 = vsub.f32 %v12832_v38, %v3938_v11  ;;  %7537 = vmatmul.mubr.f32.gmra.mrb[4].mxu0 %v7037_v30  ;;  %v7046_v18 = vld [vmem:[%s17899_s1 + $0xf8] sm:$0xff]  ;;  %v19060_v52 = vld [vmem:[#allocation276_spill] sm:$0xff] }
 0x4d5   :  { %v9548_v33 = vpack.c.bf16 %v6828_v50, %v6824_v49  ;;  %v5708_v6 = vsub.f32 1.0, %v5132_v13  ;;  %v5709_v31 = vsub.f32 1.0, %v5133_v4  ;;  %v4554_v1 = vsub.f32 %v12834_v62, %v3938_v11  ;;  %8312 = vmatmul.mubr.f32.gmra.mrb[4].mxu1 %v7037_v30  ;;  %7542 = vmatprep.mubr.f32.mxu0 %v7047_v63  ;;  %v19059_v57 = vld [vmem:[#allocation274_spill] sm:$0xff] }
 0x4d6   :  { %v9836_v48 = vpack.c.bf16 %v6830_v36, %v6826_v22  ;;  %v5710_v17 = vsub.f32 1.0, %v5134_v56  ;;  %v6283_v23 = vmax.f32 %v5707_v59, 0.0  ;;  %v5127_v49 = vand.u32 2147483647, %v4551_v46  ;;  %8317 = vmatprep.mubr.f32.mxu1 %v7047_v63  ;;  %v19061_v36 = vld [vmem:[#allocation221_spill] sm:$0xff] }
 0x4d7   :  { %9549 = vmatprep.subr.bf16.mxu0 %v9548_v33  ;;  %v5128_v27 = vand.u32 2147483647, %v4552_v35  ;;  %v16201_v54 = vmax.f32 %v5708_v6, 0.0  ;;  %v6285_v50 = vmax.f32 %v5709_v31, 0.0  ;;  %v5129_v11 = vand.u32 2147483647, %v4553_v14 }
 0x4d8   :  { %9551 = vmatpush1.bf16.msra.mxu0 %v9550_v24  ;;  %9837 = vmatprep.subr.bf16.mxu1 %v9836_v48  ;;  %v5130_v44 = vand.u32 2147483647, %v4554_v1  ;;  %v16203_v5 = vmax.f32 %v5710_v17, 0.0  ;;  %v16206_v30 = vmul.f32 %v6283_v23, %v19059_v57  ;;  %v5703_v22 = vsub.f32 1.0, %v5127_v49  ;;  %v7065_v63 = vld [vmem:[%s17899_s1 + $0x190] sm:$0xff] }
 0x4d9   :  { %9839 = vmatpush1.bf16.msra.mxu1 %v9838_v39  ;;  %v5704_v24 = vsub.f32 1.0, %v5128_v27  ;;  %7543 = vmatmul.mubr.f32.gmra.mrb[6].mxu0 %v7046_v18  ;;  %v16209_v32 = vmul.f32 %v6285_v50, %v19060_v52  ;;  %v5705_v46 = vsub.f32 1.0, %v5129_v11  ;;  %v19062_v13 = vsub.f32 %v10446_v16, %v19061_v36  ;;  %v7055_v39 = vld [vmem:[%s17899_s1 + $0x140] sm:$0xff]  ;;  %v19063_v35 = vld [vmem:[#allocation217_spill] sm:$0xff]  ;;  %v3953_v27 = vpop.permute.xlu1 %3952 }
 0x4da   :  { %v5706_v33 = vsub.f32 1.0, %v5130_v44  ;;  %8318 = vmatmul.mubr.f32.gmra.mrb[6].mxu1 %v7046_v18  ;;  %7548 = vmatprep.mubr.f32.mxu0 %v7056_v55  ;;  %v6279_v56 = vmax.f32 %v5703_v22, 0.0  ;;  %v19064_v14 = vsub.f32 %v10446_v16, %v19063_v35  ;;  %v19065_v6 = vsub.f32 %v18563_v37, %v19061_v36  ;;  %v19067_v50 = vld [vmem:[#allocation277_spill] sm:$0xff]  ;;  %v7064_v36 = vld [vmem:[%s17899_s1 + $0x188] sm:$0xff] }
 0x4db   :  { %v1900_v4 = vand.u32 2147483647, %v19062_v13  ;;  %v16220_v59 = vmax.f32 %v5704_v24, 0.0  ;;  %8323 = vmatprep.mubr.f32.mxu1 %v7056_v55  ;;  %v6281_v1 = vmax.f32 %v5705_v46, 0.0  ;;  %v19066_v23 = vsub.f32 %v18563_v37, %v19063_v35  ;;  %v19068_v24 = vld [vmem:[#allocation278_spill] sm:$0xff] }
 0x4dc   :  { %v1904_v48 = vand.u32 2147483647, %v19064_v14  ;;  %v1902_v31 = vand.u32 2147483647, %v19065_v6  ;;  %v16228_v18 = vmax.f32 %v5706_v33, 0.0  ;;  %v16234_v11 = vmul.f32 %v6279_v56, %v19067_v50  ;;  %v7074_v35 = vld [vmem:[%s17899_s1 + $0x1d8] sm:$0xff] }
 0x4dd   :  { %v2476_v17 = vsub.f32 1.0, %v1900_v4  ;;  %v1906_v49 = vand.u32 2147483647, %v19066_v23  ;;  %v9554_v22 = vpack.c.bf16 %v16038_v7, %v16060_v3  ;;  %7549 = vmatmul.mubr.f32.gmra.mrb[8].mxu0 %v7055_v39  ;;  %v16239_v55 = vmul.f32 %v6281_v1, %v19068_v24  ;;  %v3948_v3 = vpop.permute.xlu0 %3947 }
 0x4de   :  { %v2480_v44 = vsub.f32 1.0, %v1904_v48  ;;  %v2478_v57 = vsub.f32 1.0, %v1902_v31  ;;  %v9842_v33 = vpack.c.bf16 %v16044_v60, %v16063_v43  ;;  %8324 = vmatmul.mubr.f32.gmra.mrb[8].mxu1 %v7055_v39  ;;  %7554 = vmatprep.mubr.f32.mxu0 %v7065_v63  ;;  %v4563_v56 = vsub.f32 %v12827_v19, %v3953_v27 }
 0x4df   :  { %v3052_v52 = vmax.f32 %v2476_v17, 0.0  ;;  %v2482_v46 = vsub.f32 1.0, %v1906_v49  ;;  %v4564_v7 = vsub.f32 %v12829_v10, %v3953_v27  ;;  %8329 = vmatprep.mubr.f32.mxu1 %v7065_v63  ;;  %v4565_v39 = vsub.f32 %v12832_v38, %v3953_v27 }
 0x4e0   :  { %v3056_v13 = vmax.f32 %v2480_v44, 0.0  ;;  %v3054_v4 = vmax.f32 %v2478_v57, 0.0  ;;  %v4566_v14 = vsub.f32 %v12834_v62, %v3953_v27  ;;  %v5139_v31 = vand.u32 2147483647, %v4563_v56  ;;  %v7082_v56 = vld [vmem:[%s17899_s1 + $0x218] sm:$0xff] }
 0x4e1   :  { %v6832_v60 = vmul.f32 %v16052_v29, %v3052_v52  ;;  %v3058_v43 = vmax.f32 %v2482_v46, 0.0  ;;  %v5140_v1 = vand.u32 2147483647, %v4564_v7  ;;  %7555 = vmatmul.mubr.f32.gmra.mrb[10].mxu0 %v7064_v36  ;;  %v5141_v17 = vand.u32 2147483647, %v4565_v39  ;;  %v7073_v29 = vld [vmem:[%s17899_s1 + $0x1d0] sm:$0xff] }
 0x4e2   :  { %v6836_v48 = vmul.f32 %v16032_v41, %v3056_v13  ;;  %v6834_v6 = vmul.f32 %v16057_v51, %v3054_v4  ;;  %v5142_v23 = vand.u32 2147483647, %v4566_v14  ;;  %v4559_v49 = vsub.f32 %v12827_v19, %v3948_v3  ;;  %8330 = vmatmul.mubr.f32.gmra.mrb[10].mxu1 %v7064_v36  ;;  %7560 = vmatprep.mubr.f32.mxu0 %v7074_v35  ;;  %v7083_v52 = vld [vmem:[%s17899_s1 + $0x220] sm:$0xff]  ;;  %v19069_v39 = vld [vmem:[#allocation280_spill] sm:$0xff] }
 0x4e3   :  { %v6838_v63 = vmul.f32 %v16035_v25, %v3058_v43  ;;  %v5715_v50 = vsub.f32 1.0, %v5139_v31  ;;  %v5716_v41 = vsub.f32 1.0, %v5140_v1  ;;  %v4560_v51 = vsub.f32 %v12829_v10, %v3948_v3  ;;  %8335 = vmatprep.mubr.f32.mxu1 %v7074_v35 }
 0x4e4   :  { %v9552_v27 = vpack.c.bf16 %v6836_v48, %v6832_v60  ;;  %v5717_v57 = vsub.f32 1.0, %v5141_v17  ;;  %v5718_v24 = vsub.f32 1.0, %v5142_v23  ;;  %v4561_v25 = vsub.f32 %v12832_v38, %v3948_v3 }
 0x4e5   :  { %v9840_v44 = vpack.c.bf16 %v6838_v63, %v6834_v6  ;;  %v6291_v46 = vmax.f32 %v5715_v50, 0.0  ;;  %v16266_v36 = vmax.f32 %v5716_v41, 0.0  ;;  %v4562_v13 = vsub.f32 %v12834_v62, %v3948_v3  ;;  %7561 = vmatmul.mubr.f32.gmra.mrb[12].mxu0 %v7073_v29  ;;  %v19070_v3 = vld [vmem:[#allocation228_spill] sm:$0xff]  ;;  %v19072_v63 = vld [vmem:[#allocation281_spill] sm:$0xff] }
 0x4e6   :  { %9553 = vmatprep.subr.bf16.mxu0 %v9552_v27  ;;  %v5135_v4 = vand.u32 2147483647, %v4559_v49  ;;  %v6293_v7 = vmax.f32 %v5717_v57, 0.0  ;;  %v16272_v35 = vmax.f32 %v5718_v24, 0.0  ;;  %v5136_v60 = vand.u32 2147483647, %v4560_v51  ;;  %7566 = vmatprep.mubr.f32.mxu0 %v7083_v52 }
 0x4e7   :  { %9841 = vmatprep.subr.bf16.mxu1 %v9840_v44  ;;  %9555 = vmatpush1.bf16.msra.mxu0 %v9554_v22  ;;  %v5137_v43 = vand.u32 2147483647, %v4561_v25  ;;  %v16275_v14 = vmul.f32 %v6291_v46, %v19069_v39  ;;  %v5138_v48 = vand.u32 2147483647, %v4562_v13  ;;  %v19071_v31 = vsub.f32 %v10446_v16, %v19070_v3  ;;  %v7092_v22 = vld [vmem:[%s17899_s1 + $0x268] sm:$0xff]  ;;  %v19077_v39 = vld [vmem:[#allocation283_spill] sm:$0xff] }
 0x4e8   :  { %9843 = vmatpush1.bf16.msra.mxu1 %v9842_v33  ;;  %v5711_v6 = vsub.f32 1.0, %v5135_v4  ;;  %v16284_v17 = vmul.f32 %v6293_v7, %v19072_v63  ;;  %v5712_v23 = vsub.f32 1.0, %v5136_v60  ;;  %v19073_v33 = vld [vmem:[#allocation224_spill] sm:$0xff]  ;;  %v19075_v57 = vsub.f32 %v18563_v37, %v19070_v3  ;;  %v3963_v60 = vpop.permute.xlu1 %3962  ;;  %v7101_v3 = vld [vmem:[%s17899_s1 + $0x2b0] sm:$0xff] }
 0x4e9   :  { %v1908_v1 = vand.u32 2147483647, %v19071_v31  ;;  %v5713_v49 = vsub.f32 1.0, %v5137_v43  ;;  %v19074_v27 = vsub.f32 %v10446_v16, %v19073_v33  ;;  %8336 = vmatmul.mubr.f32.gmra.mrb[12].mxu1 %v7073_v29  ;;  %v5714_v41 = vsub.f32 1.0, %v5138_v48  ;;  %7567 = vmatmul.mubr.f32.gmra.mrb[14].mxu0 %v7082_v56  ;;  %v7091_v29 = vld [vmem:[%s17899_s1 + $0x260] sm:$0xff]  ;;  %v19078_v31 = vld [vmem:[#allocation284_spill] sm:$0xff] }
 0x4ea   :  { %v6287_v51 = vmax.f32 %v5711_v6, 0.0  ;;  %v1910_v24 = vand.u32 2147483647, %v19075_v57  ;;  %8341 = vmatprep.mubr.f32.mxu1 %v7083_v52  ;;  %v16292_v25 = vmax.f32 %v5712_v23, 0.0  ;;  %v19076_v4 = vsub.f32 %v18563_v37, %v19073_v33  ;;  %7572 = vmatprep.mubr.f32.mxu0 %v7092_v22  ;;  %v3958_v33 = vpop.permute.xlu0 %3957 }
 0x4eb   :  { %v1912_v50 = vand.u32 2147483647, %v19074_v27  ;;  %v2484_v44 = vsub.f32 1.0, %v1908_v1  ;;  %v6289_v46 = vmax.f32 %v5713_v49, 0.0  ;;  %v16300_v43 = vmax.f32 %v5714_v41, 0.0 }
 0x4ec   :  { %v1914_v7 = vand.u32 2147483647, %v19076_v4  ;;  %v16303_v48 = vmul.f32 %v6287_v51, %v19077_v39  ;;  %v2486_v6 = vsub.f32 1.0, %v1910_v24  ;;  %v9558_v49 = vpack.c.bf16 %v16086_v45, %v16108_v0  ;;  %v7100_v45 = vld [vmem:[%s17899_s1 + $0x2a8] sm:$0xff] }
 0x4ed   :  { %v2488_v13 = vsub.f32 1.0, %v1912_v50  ;;  %v3060_v52 = vmax.f32 %v2484_v44, 0.0  ;;  %v16309_v1 = vmul.f32 %v6289_v46, %v19078_v31  ;;  %8342 = vmatmul.mubr.f32.gmra.mrb[14].mxu1 %v7082_v56  ;;  %v9846_v41 = vpack.c.bf16 %v16089_v28, %v16113_v58  ;;  %7573 = vmatmul.mubr.f32.gmra.mrb[16].mxu0 %v7091_v29 }
 0x4ee   :  { %v2490_v23 = vsub.f32 1.0, %v1914_v7  ;;  %v3062_v50 = vmax.f32 %v2486_v6, 0.0  ;;  %v4571_v51 = vsub.f32 %v12827_v19, %v3963_v60  ;;  %8347 = vmatprep.mubr.f32.mxu1 %v7092_v22  ;;  %v4572_v24 = vsub.f32 %v12829_v10, %v3963_v60  ;;  %7578 = vmatprep.mubr.f32.mxu0 %v7101_v3 }
 0x4ef   :  { %v3064_v63 = vmax.f32 %v2488_v13, 0.0  ;;  %v6840_v27 = vmul.f32 %v16094_v61, %v3060_v52  ;;  %v4573_v46 = vsub.f32 %v12832_v38, %v3963_v60  ;;  %v4574_v28 = vsub.f32 %v12834_v62, %v3963_v60 }
 0x4f0   :  { %v3066_v57 = vmax.f32 %v2490_v23, 0.0  ;;  %v6842_v61 = vmul.f32 %v16102_v53, %v3062_v50  ;;  %v5147_v0 = vand.u32 2147483647, %v4571_v51  ;;  %v4567_v58 = vsub.f32 %v12827_v19, %v3958_v33 }
 0x4f1   :  { %v6844_v44 = vmul.f32 %v16081_v47, %v3064_v63  ;;  %v7110_v47 = vld [vmem:[%s17899_s1 + $0x2f8] sm:$0xff]  ;;  %v5148_v13 = vand.u32 2147483647, %v4572_v24  ;;  %v5149_v4 = vand.u32 2147483647, %v4573_v46  ;;  %8348 = vmatmul.mubr.f32.gmra.mrb[16].mxu1 %v7091_v29  ;;  %v4568_v52 = vsub.f32 %v12829_v10, %v3958_v33  ;;  %7579 = vmatmul.mubr.f32.gmra.mrb[18].mxu0 %v7100_v45 }
 0x4f2   :  { %v6846_v22 = vmul.f32 %v16083_v12, %v3066_v57  ;;  %v5150_v7 = vand.u32 2147483647, %v4574_v28  ;;  %v5723_v39 = vsub.f32 1.0, %v5147_v0  ;;  %v4569_v53 = vsub.f32 %v12832_v38, %v3958_v33  ;;  %8353 = vmatprep.mubr.f32.mxu1 %v7101_v3  ;;  %7584 = vmatprep.mubr.f32.mxu0 %v7110_v47  ;;  %v7109_v12 = vld [vmem:[%s17899_s1 + $0x2f0] sm:$0xff] }
 0x4f3   :  { %v9556_v56 = vpack.c.bf16 %v6844_v44, %v6840_v27  ;;  %v5724_v6 = vsub.f32 1.0, %v5148_v13  ;;  %v5725_v31 = vsub.f32 1.0, %v5149_v4  ;;  %v4570_v63 = vsub.f32 %v12834_v62, %v3958_v33  ;;  %v19079_v33 = vld [vmem:[#allocation286_spill] sm:$0xff] }
 0x4f4   :  { %v9844_v60 = vpack.c.bf16 %v6846_v22, %v6842_v61  ;;  %v5726_v29 = vsub.f32 1.0, %v5150_v7  ;;  %v6299_v23 = vmax.f32 %v5723_v39, 0.0  ;;  %v5143_v27 = vand.u32 2147483647, %v4567_v58  ;;  %v19081_v22 = vld [vmem:[#allocation234_spill] sm:$0xff]  ;;  %v19083_v7 = vld [vmem:[#allocation231_spill] sm:$0xff] }
 0x4f5   :  { %9557 = vmatprep.subr.bf16.mxu0 %v9556_v56  ;;  %v5144_v50 = vand.u32 2147483647, %v4568_v52  ;;  %v16336_v51 = vmax.f32 %v5724_v6, 0.0  ;;  %v6301_v3 = vmax.f32 %v5725_v31, 0.0  ;;  %v5145_v44 = vand.u32 2147483647, %v4569_v53  ;;  %8354 = vmatmul.mubr.f32.gmra.mrb[18].mxu1 %v7100_v45 }
 0x4f6   :  { %9559 = vmatpush1.bf16.msra.mxu0 %v9558_v49  ;;  %9845 = vmatprep.subr.bf16.mxu1 %v9844_v60  ;;  %v5146_v57 = vand.u32 2147483647, %v4570_v63  ;;  %v16338_v24 = vmax.f32 %v5726_v29, 0.0  ;;  %v16341_v46 = vmul.f32 %v6299_v23, %v19079_v33  ;;  %v5719_v61 = vsub.f32 1.0, %v5143_v27  ;;  %v19080_v49 = vld [vmem:[#allocation287_spill] sm:$0xff]  ;;  %v3973_v23 = vpop.permute.xlu1 %3972 }
 0x4f7   :  { %9847 = vmatpush1.bf16.msra.mxu1 %v9846_v41  ;;  %v5720_v28 = vsub.f32 1.0, %v5144_v50  ;;  %8359 = vmatprep.mubr.f32.mxu1 %v7110_v47  ;;  %v16344_v0 = vmul.f32 %v6301_v3, %v19080_v49  ;;  %v5721_v58 = vsub.f32 1.0, %v5145_v44  ;;  %v19082_v13 = vsub.f32 %v10446_v16, %v19081_v22  ;;  %v7119_v27 = vld [vmem:[%s17899_s1 + $0x340] sm:$0xff]  ;;  %v19087_v50 = vld [vmem:[#allocation288_spill] sm:$0xff] }
 0x4f8   :  { %v5722_v56 = vsub.f32 1.0, %v5146_v57  ;;  %7585 = vmatmul.mubr.f32.gmra.mrb[20].mxu0 %v7109_v12  ;;  %v6295_v45 = vmax.f32 %v5719_v61, 0.0  ;;  %v19084_v39 = vsub.f32 %v10446_v16, %v19083_v7  ;;  %v19085_v47 = vsub.f32 %v18563_v37, %v19081_v22  ;;  %v7118_v61 = vld [vmem:[%s17899_s1 + $0x338] sm:$0xff] }
 0x4f9   :  { %v1916_v4 = vand.u32 2147483647, %v19082_v13  ;;  %v16349_v41 = vmax.f32 %v5720_v28, 0.0  ;;  %v6297_v60 = vmax.f32 %v5721_v58, 0.0  ;;  %v19086_v63 = vsub.f32 %v18563_v37, %v19083_v7  ;;  %8360 = vmatmul.mubr.f32.gmra.mrb[20].mxu1 %v7109_v12  ;;  %7590 = vmatprep.mubr.f32.mxu0 %v7119_v27  ;;  %v19088_v28 = vld [vmem:[#allocation290_spill] sm:$0xff] }
 0x4fa   :  { %v1920_v52 = vand.u32 2147483647, %v19084_v39  ;;  %v1918_v53 = vand.u32 2147483647, %v19085_v47  ;;  %v16357_v6 = vmax.f32 %v5722_v56, 0.0  ;;  %v16366_v3 = vmul.f32 %v6295_v45, %v19087_v50  ;;  %8365 = vmatprep.mubr.f32.mxu1 %v7119_v27 }
 0x4fb   :  { %v2492_v31 = vsub.f32 1.0, %v1916_v4  ;;  %v1922_v29 = vand.u32 2147483647, %v19086_v63  ;;  %v9562_v33 = vpack.c.bf16 %v16137_v34, %v16165_v8  ;;  %v16374_v12 = vmul.f32 %v6297_v60, %v19088_v28  ;;  %v3968_v8 = vpop.permute.xlu0 %3967 }
 0x4fc   :  { %v2496_v44 = vsub.f32 1.0, %v1920_v52  ;;  %v2494_v57 = vsub.f32 1.0, %v1918_v53  ;;  %v9850_v56 = vpack.c.bf16 %v16146_v40, %v16171_v42  ;;  %7591 = vmatmul.mubr.f32.gmra.mrb[22].mxu0 %v7118_v61  ;;  %v4579_v4 = vsub.f32 %v12827_v19, %v3973_v23 }
 0x4fd   :  { %v3068_v49 = vmax.f32 %v2492_v31, 0.0  ;;  %v2498_v58 = vsub.f32 1.0, %v1922_v29  ;;  %v4580_v34 = vsub.f32 %v12829_v10, %v3973_v23  ;;  %v4581_v39 = vsub.f32 %v12832_v38, %v3973_v23  ;;  %8366 = vmatmul.mubr.f32.gmra.mrb[22].mxu1 %v7118_v61 }
 0x4fe   :  { %v3072_v22 = vmax.f32 %v2496_v44, 0.0  ;;  %v3070_v13 = vmax.f32 %v2494_v57, 0.0  ;;  %v4582_v52 = vsub.f32 %v12834_v62, %v3973_v23  ;;  %v5155_v42 = vand.u32 2147483647, %v4579_v4 }
 0x4ff   :  { %v6848_v45 = vmul.f32 %v16154_v21, %v3068_v49  ;;  %v3074_v7 = vmax.f32 %v2498_v58, 0.0  ;;  %v5156_v53 = vand.u32 2147483647, %v4580_v34  ;;  %v5157_v31 = vand.u32 2147483647, %v4581_v39  ;;  %v19089_v34 = vld [vmem:[#allocation291_spill] sm:$0xff] }
 0x500   :  { %v6852_v47 = vmul.f32 %v16128_v20, %v3072_v22  ;;  %v6850_v40 = vmul.f32 %v16162_v15, %v3070_v13  ;;  %v5158_v63 = vand.u32 2147483647, %v4582_v52  ;;  %v4575_v29 = vsub.f32 %v12827_v19, %v3968_v8  ;;  %v19090_v52 = vld [vmem:[#allocation241_spill] sm:$0xff] }
 0x501   :  { %v6854_v60 = vmul.f32 %v16134_v26, %v3074_v7  ;;  %v5731_v21 = vsub.f32 1.0, %v5155_v42  ;;  %v5732_v50 = vsub.f32 1.0, %v5156_v53  ;;  %v4576_v44 = vsub.f32 %v12829_v10, %v3968_v8  ;;  %v19092_v42 = vld [vmem:[#allocation293_spill] sm:$0xff] }
 0x502   :  { %v9560_v27 = vpack.c.bf16 %v6852_v47, %v6848_v45  ;;  %v5733_v23 = vsub.f32 1.0, %v5157_v31  ;;  %v5734_v61 = vsub.f32 1.0, %v5158_v63  ;;  %v4577_v20 = vsub.f32 %v12832_v38, %v3968_v8 }
 0x503   :  { %v9848_v57 = vpack.c.bf16 %v6854_v60, %v6850_v40  ;;  %v6307_v15 = vmax.f32 %v5731_v21, 0.0  ;;  %v16389_v28 = vmax.f32 %v5732_v50, 0.0  ;;  %v4578_v26 = vsub.f32 %v12834_v62, %v3968_v8  ;;  %v19093_v60 = vld [vmem:[#allocation238_spill] sm:$0xff] }
 0x504   :  { %9561 = vmatprep.subr.bf16.mxu0 %v9560_v27  ;;  %v5151_v49 = vand.u32 2147483647, %v4575_v29  ;;  %v6309_v58 = vmax.f32 %v5733_v23, 0.0  ;;  %v16392_v22 = vmax.f32 %v5734_v61, 0.0  ;;  %v5152_v13 = vand.u32 2147483647, %v4576_v44 }
 0x505   :  { %9849 = vmatprep.subr.bf16.mxu1 %v9848_v57  ;;  %9563 = vmatpush1.bf16.msra.mxu0 %v9562_v33  ;;  %v5153_v4 = vand.u32 2147483647, %v4577_v20  ;;  %v16395_v45 = vmul.f32 %v6307_v15, %v19089_v34  ;;  %v5154_v7 = vand.u32 2147483647, %v4578_v26  ;;  %v19091_v47 = vsub.f32 %v10446_v16, %v19090_v52  ;;  %v3983_v15 = vpop.permute.xlu1 %3982  ;;  %v7128_v26 = vld [vmem:[%s17899_s1 + $0x388] sm:$0xff] }
 0x506   :  { %9851 = vmatpush1.bf16.msra.mxu1 %v9850_v56  ;;  %v5727_v39 = vsub.f32 1.0, %v5151_v49  ;;  %v16401_v8 = vmul.f32 %v6309_v58, %v19092_v42  ;;  %v5728_v53 = vsub.f32 1.0, %v5152_v13  ;;  %v19094_v31 = vsub.f32 %v10446_v16, %v19093_v60  ;;  %v19097_v58 = vld [vmem:[#allocation294_spill] sm:$0xff]  ;;  %7596 = vmatprep.mubr.f32.mxu0 %v7128_v26 }
 0x507   :  { %v1924_v40 = vand.u32 2147483647, %v19091_v47  ;;  %v5729_v33 = vsub.f32 1.0, %v5153_v4  ;;  %v5730_v29 = vsub.f32 1.0, %v5154_v7  ;;  %v19095_v21 = vsub.f32 %v18563_v37, %v19090_v52  ;;  %8371 = vmatprep.mubr.f32.mxu1 %v7128_v26  ;;  %v7127_v7 = vld [vmem:[%s17899_s1 + $0x380] sm:$0xff] }
 0x508   :  { %v1928_v63 = vand.u32 2147483647, %v19094_v31  ;;  %v6303_v56 = vmax.f32 %v5727_v39, 0.0  ;;  %v16409_v44 = vmax.f32 %v5728_v53, 0.0  ;;  %v19096_v61 = vsub.f32 %v18563_v37, %v19093_v60  ;;  %v19098_v39 = vld [vmem:[#allocation295_spill] sm:$0xff]  ;;  %v3978_v53 = vpop.permute.xlu0 %3977  ;;  %7597 = vmatmul.mubr.f32.gmra.mrb[24].mxu0 %v7127_v7  ;;  %8372 = vmatmul.mubr.f32.gmra.mrb[24].mxu1 %v7127_v7 }
 0x509   :  { %v2500_v27 = vsub.f32 1.0, %v1924_v40  ;;  %v1926_v50 = vand.u32 2147483647, %v19095_v21  ;;  %v6305_v57 = vmax.f32 %v5729_v33, 0.0  ;;  %v16417_v49 = vmax.f32 %v5730_v29, 0.0 }
 0x50a   :  { %v2504_v23 = vsub.f32 1.0, %v1928_v63  ;;  %v1930_v20 = vand.u32 2147483647, %v19096_v61  ;;  %v16420_v13 = vmul.f32 %v6303_v56, %v19097_v58  ;;  %v9566_v42 = vpack.c.bf16 %v16206_v30, %v16234_v11 }
 0x50b   :  { %v3076_v4 = vmax.f32 %v2500_v27, 0.0  ;;  %v2502_v34 = vsub.f32 1.0, %v1926_v50  ;;  %v16426_v52 = vmul.f32 %v6305_v57, %v19098_v39  ;;  %v9854_v31 = vpack.c.bf16 %v16209_v32, %v16239_v55 }
 0x50c   :  { %v3080_v47 = vmax.f32 %v2504_v23, 0.0  ;;  %v2506_v40 = vsub.f32 1.0, %v1930_v20  ;;  %v4587_v63 = vsub.f32 %v12827_v19, %v3983_v15  ;;  %v4588_v27 = vsub.f32 %v12829_v10, %v3983_v15 }
 0x50d   :  { %v6856_v33 = vmul.f32 %v16220_v59, %v3076_v4  ;;  %v3078_v60 = vmax.f32 %v2502_v34, 0.0  ;;  %v4589_v21 = vsub.f32 %v12832_v38, %v3983_v15  ;;  %v4590_v11 = vsub.f32 %v12834_v62, %v3983_v15 }
 0x50e   :  { %v6860_v29 = vmul.f32 %v16201_v54, %v3080_v47  ;;  %v3082_v56 = vmax.f32 %v2506_v40, 0.0  ;;  %v5163_v50 = vand.u32 2147483647, %v4587_v63  ;;  %v4583_v59 = vsub.f32 %v12827_v19, %v3978_v53 }
 0x50f   :  { %v6858_v30 = vmul.f32 %v16228_v18, %v3078_v60  ;;  %v5164_v32 = vand.u32 2147483647, %v4588_v27  ;;  %v5165_v55 = vand.u32 2147483647, %v4589_v21  ;;  %v5166_v61 = vand.u32 2147483647, %v4590_v11 }
 0x510   :  { %v9564_v57 = vpack.c.bf16 %v6860_v29, %v6856_v33  ;;  %v6862_v23 = vmul.f32 %v16203_v5, %v3082_v56  ;;  %v5739_v20 = vsub.f32 1.0, %v5163_v50  ;;  %v4584_v54 = vsub.f32 %v12829_v10, %v3978_v53  ;;  %v19099_v29 = vld [vmem:[#allocation297_spill] sm:$0xff]  ;;  %v19101_v50 = vld [vmem:[#allocation248_spill] sm:$0xff] }
 0x511   :  { %v4585_v26 = vsub.f32 %v12832_v38, %v3978_v53  ;;  %v5740_v4 = vsub.f32 1.0, %v5164_v32  ;;  %v5741_v18 = vsub.f32 1.0, %v5165_v55  ;;  %v4586_v15 = vsub.f32 %v12834_v62, %v3978_v53  ;;  %v19100_v53 = vld [vmem:[#allocation298_spill] sm:$0xff] }
 0x512   :  { %9565 = vmatprep.subr.bf16.mxu0 %v9564_v57  ;;  %v9852_v58 = vpack.c.bf16 %v6862_v23, %v6858_v30  ;;  %v5742_v34 = vsub.f32 1.0, %v5166_v61  ;;  %v6315_v7 = vmax.f32 %v5739_v20, 0.0  ;;  %v5159_v39 = vand.u32 2147483647, %v4583_v59 }
 0x513   :  { %9567 = vmatpush1.bf16.msra.mxu0 %v9566_v42  ;;  %v5160_v47 = vand.u32 2147483647, %v4584_v54  ;;  %v16444_v5 = vmax.f32 %v5740_v4, 0.0  ;;  %v6317_v40 = vmax.f32 %v5741_v18, 0.0  ;;  %v5161_v33 = vand.u32 2147483647, %v4585_v26 }
 0x514   :  { %9853 = vmatprep.subr.bf16.mxu1 %v9852_v58  ;;  %v5162_v60 = vand.u32 2147483647, %v4586_v15  ;;  %v16446_v63 = vmax.f32 %v5742_v34, 0.0  ;;  %v16449_v56 = vmul.f32 %v6315_v7, %v19099_v29  ;;  %v5735_v27 = vsub.f32 1.0, %v5159_v39  ;;  %v3993_v34 = vpop.permute.xlu1 %3992  ;;  %v7137_v7 = vld [vmem:[%s17899_s1 + $0x3d0] sm:$0xff]  ;;  %v19107_v39 = vld [vmem:[#allocation300_spill] sm:$0xff] }
 0x515   :  { %9855 = vmatpush1.bf16.msra.mxu1 %v9854_v31  ;;  %v5736_v21 = vsub.f32 1.0, %v5160_v47  ;;  %v16452_v42 = vmul.f32 %v6317_v40, %v19100_v53  ;;  %v5737_v30 = vsub.f32 1.0, %v5161_v33  ;;  %v19102_v59 = vsub.f32 %v10446_v16, %v19101_v50  ;;  %v19103_v31 = vld [vmem:[#allocation245_spill] sm:$0xff]  ;;  %7602 = vmatprep.mubr.f32.mxu0 %v7137_v7  ;;  %v7136_v29 = vld [vmem:[%s17899_s1 + $0x3c8] sm:$0xff] }
 0x516   :  { %v5738_v11 = vsub.f32 1.0, %v5162_v60  ;;  %v6311_v23 = vmax.f32 %v5735_v27, 0.0  ;;  %v19104_v55 = vsub.f32 %v10446_v16, %v19103_v31  ;;  %v19105_v20 = vsub.f32 %v18563_v37, %v19101_v50  ;;  %8377 = vmatprep.mubr.f32.mxu1 %v7137_v7  ;;  %v19108_v27 = vld [vmem:[#allocation301_spill] sm:$0xff]  ;;  %7603 = vmatmul.mubr.f32.gmra.mrb[26].mxu0 %v7136_v29 }
 0x517   :  { %v1932_v57 = vand.u32 2147483647, %v19102_v59  ;;  %v16457_v32 = vmax.f32 %v5736_v21, 0.0  ;;  %v6313_v26 = vmax.f32 %v5737_v30, 0.0  ;;  %v19106_v18 = vsub.f32 %v18563_v37, %v19103_v31  ;;  %8378 = vmatmul.mubr.f32.gmra.mrb[26].mxu1 %v7136_v29 }
 0x518   :  { %v1936_v61 = vand.u32 2147483647, %v19104_v55  ;;  %v1934_v54 = vand.u32 2147483647, %v19105_v20  ;;  %v16465_v58 = vmax.f32 %v5738_v11, 0.0  ;;  %v16474_v47 = vmul.f32 %v6311_v23, %v19107_v39 }
 0x519   :  { %v2508_v4 = vsub.f32 1.0, %v1932_v57  ;;  %v1938_v15 = vand.u32 2147483647, %v19106_v18  ;;  %v9570_v60 = vpack.c.bf16 %v16275_v14, %v16303_v48  ;;  %v16482_v21 = vmul.f32 %v6313_v26, %v19108_v27  ;;  %v3988_v57 = vpop.permute.xlu0 %3987 }
 0x51a   :  { %v2512_v40 = vsub.f32 1.0, %v1936_v61  ;;  %v2510_v33 = vsub.f32 1.0, %v1934_v54  ;;  %v9858_v11 = vpack.c.bf16 %v16284_v17, %v16309_v1  ;;  %v4595_v14 = vsub.f32 %v12827_v19, %v3993_v34 }
 0x51b   :  { %v3084_v53 = vmax.f32 %v2508_v4, 0.0  ;;  %v2514_v30 = vsub.f32 1.0, %v1938_v15  ;;  %v4596_v48 = vsub.f32 %v12829_v10, %v3993_v34  ;;  %v4597_v55 = vsub.f32 %v12832_v38, %v3993_v34 }
 0x51c   :  { %v3088_v50 = vmax.f32 %v2512_v40, 0.0  ;;  %v3086_v59 = vmax.f32 %v2510_v33, 0.0  ;;  %v4598_v61 = vsub.f32 %v12834_v62, %v3993_v34  ;;  %v5171_v1 = vand.u32 2147483647, %v4595_v14 }
 0x51d   :  { %v6864_v23 = vmul.f32 %v16292_v25, %v3084_v53  ;;  %v3090_v31 = vmax.f32 %v2514_v30, 0.0  ;;  %v5172_v54 = vand.u32 2147483647, %v4596_v48  ;;  %v5173_v4 = vand.u32 2147483647, %v4597_v55  ;;  %v19109_v48 = vld [vmem:[#allocation303_spill] sm:$0xff] }
 0x51e   :  { %v6868_v20 = vmul.f32 %v16266_v36, %v3088_v50  ;;  %v6866_v17 = vmul.f32 %v16300_v43, %v3086_v59  ;;  %v5174_v18 = vand.u32 2147483647, %v4598_v61  ;;  %v4591_v15 = vsub.f32 %v12827_v19, %v3988_v57  ;;  %v19110_v61 = vld [vmem:[#allocation255_spill] sm:$0xff] }
 0x51f   :  { %v6870_v26 = vmul.f32 %v16272_v35, %v3090_v31  ;;  %v5747_v39 = vsub.f32 1.0, %v5171_v1  ;;  %v5748_v25 = vsub.f32 1.0, %v5172_v54  ;;  %v4592_v40 = vsub.f32 %v12829_v10, %v3988_v57  ;;  %v19112_v1 = vld [vmem:[#allocation304_spill] sm:$0xff] }
 0x520   :  { %v9568_v7 = vpack.c.bf16 %v6868_v20, %v6864_v23  ;;  %v5749_v29 = vsub.f32 1.0, %v5173_v4  ;;  %v5750_v34 = vsub.f32 1.0, %v5174_v18  ;;  %v4593_v36 = vsub.f32 %v12832_v38, %v3988_v57 }
 0x521   :  { %v9856_v33 = vpack.c.bf16 %v6870_v26, %v6866_v17  ;;  %v6323_v43 = vmax.f32 %v5747_v39, 0.0  ;;  %v16497_v27 = vmax.f32 %v5748_v25, 0.0  ;;  %v4594_v35 = vsub.f32 %v12834_v62, %v3988_v57  ;;  %v19113_v26 = vld [vmem:[#allocation251_spill] sm:$0xff] }
 0x522   :  { %9569 = vmatprep.subr.bf16.mxu0 %v9568_v7  ;;  %v5167_v53 = vand.u32 2147483647, %v4591_v15  ;;  %v6325_v30 = vmax.f32 %v5749_v29, 0.0  ;;  %v16500_v50 = vmax.f32 %v5750_v34, 0.0  ;;  %v5168_v59 = vand.u32 2147483647, %v4592_v40 }
 0x523   :  { %9857 = vmatprep.subr.bf16.mxu1 %v9856_v33  ;;  %9571 = vmatpush1.bf16.msra.mxu0 %v9570_v60  ;;  %v5169_v14 = vand.u32 2147483647, %v4593_v36  ;;  %v16503_v23 = vmul.f32 %v6323_v43, %v19109_v48  ;;  %v5170_v31 = vand.u32 2147483647, %v4594_v35  ;;  %v19111_v20 = vsub.f32 %v10446_v16, %v19110_v61  ;;  %v7145_v15 = vld [vmem:[%s17899_s1 + $0x410] sm:$0xff] }
 0x524   :  { %9859 = vmatpush1.bf16.msra.mxu1 %v9858_v11  ;;  %v5743_v55 = vsub.f32 1.0, %v5167_v53  ;;  %v16509_v57 = vmul.f32 %v6325_v30, %v19112_v1  ;;  %v5744_v54 = vsub.f32 1.0, %v5168_v59  ;;  %v19114_v4 = vsub.f32 %v10446_v16, %v19113_v26  ;;  %v7146_v11 = vld [vmem:[%s17899_s1 + $0x418] sm:$0xff]  ;;  %v4003_v53 = vpop.permute.xlu1 %4002  ;;  %v19117_v59 = vld [vmem:[#allocation305_spill] sm:$0xff] }
 0x525   :  { %v1940_v17 = vand.u32 2147483647, %v19111_v20  ;;  %v5745_v60 = vsub.f32 1.0, %v5169_v14  ;;  %v5746_v7 = vsub.f32 1.0, %v5170_v31  ;;  %v19115_v40 = vsub.f32 %v18563_v37, %v19110_v61  ;;  %7608 = vmatprep.mubr.f32.mxu0 %v7146_v11  ;;  %8383 = vmatprep.mubr.f32.mxu1 %v7146_v11 }
 0x526   :  { %v1944_v18 = vand.u32 2147483647, %v19114_v4  ;;  %v6319_v39 = vmax.f32 %v5743_v55, 0.0  ;;  %v16523_v29 = vmax.f32 %v5744_v54, 0.0  ;;  %v19116_v43 = vsub.f32 %v18563_v37, %v19113_v26  ;;  %7609 = vmatmul.mubr.f32.gmra.mrb[28].mxu0 %v7145_v15  ;;  %8384 = vmatmul.mubr.f32.gmra.mrb[28].mxu1 %v7145_v15  ;;  %v19118_v55 = vld [vmem:[#allocation307_spill] sm:$0xff]  ;;  %v3998_v54 = vpop.permute.xlu0 %3997 }
 0x527   :  { %v2516_v25 = vsub.f32 1.0, %v1940_v17  ;;  %v1942_v33 = vand.u32 2147483647, %v19115_v40  ;;  %v6321_v34 = vmax.f32 %v5745_v60, 0.0  ;;  %v16528_v30 = vmax.f32 %v5746_v7, 0.0 }
 0x528   :  { %v2520_v36 = vsub.f32 1.0, %v1944_v18  ;;  %v1946_v35 = vand.u32 2147483647, %v19116_v43  ;;  %v16531_v14 = vmul.f32 %v6319_v39, %v19117_v59  ;;  %v9574_v1 = vpack.c.bf16 %v16341_v46, %v16366_v3 }
 0x529   :  { %v3092_v48 = vmax.f32 %v2516_v25, 0.0  ;;  %v2518_v31 = vsub.f32 1.0, %v1942_v33  ;;  %v16534_v61 = vmul.f32 %v6321_v34, %v19118_v55  ;;  %v9862_v4 = vpack.c.bf16 %v16344_v0, %v16374_v12 }
 0x52a   :  { %v3096_v20 = vmax.f32 %v2520_v36, 0.0  ;;  %v2522_v17 = vsub.f32 1.0, %v1946_v35  ;;  %v4603_v18 = vsub.f32 %v12827_v19, %v4003_v53  ;;  %v4604_v7 = vsub.f32 %v12829_v10, %v4003_v53 }
 0x52b   :  { %v6872_v60 = vmul.f32 %v16349_v41, %v3092_v48  ;;  %v3094_v26 = vmax.f32 %v2518_v31, 0.0  ;;  %v4605_v39 = vsub.f32 %v12832_v38, %v4003_v53  ;;  %v4606_v46 = vsub.f32 %v12834_v62, %v4003_v53 }
 0x52c   :  { %v6876_v11 = vmul.f32 %v16336_v51, %v3096_v20  ;;  %v3098_v15 = vmax.f32 %v2522_v17, 0.0  ;;  %v5179_v3 = vand.u32 2147483647, %v4603_v18  ;;  %v4599_v41 = vsub.f32 %v12827_v19, %v3998_v54 }
 0x52d   :  { %v6874_v25 = vmul.f32 %v16357_v6, %v3094_v26  ;;  %v5180_v0 = vand.u32 2147483647, %v4604_v7  ;;  %v5181_v12 = vand.u32 2147483647, %v4605_v39  ;;  %v5182_v34 = vand.u32 2147483647, %v4606_v46 }
 0x52e   :  { %v9572_v40 = vpack.c.bf16 %v6876_v11, %v6872_v60  ;;  %v6878_v33 = vmul.f32 %v16338_v24, %v3098_v15  ;;  %v5755_v36 = vsub.f32 1.0, %v5179_v3  ;;  %v4600_v51 = vsub.f32 %v12829_v10, %v3998_v54  ;;  %v19119_v11 = vld [vmem:[#allocation308_spill] sm:$0xff]  ;;  %v19121_v3 = vld [vmem:[#allocation262_spill] sm:$0xff] }
 0x52f   :  { %v4601_v43 = vsub.f32 %v12832_v38, %v3998_v54  ;;  %v5756_v59 = vsub.f32 1.0, %v5180_v0  ;;  %v5757_v6 = vsub.f32 1.0, %v5181_v12  ;;  %v4602_v53 = vsub.f32 %v12834_v62, %v3998_v54  ;;  %v19120_v54 = vld [vmem:[#allocation310_spill] sm:$0xff] }
 0x530   :  { %9573 = vmatprep.subr.bf16.mxu0 %v9572_v40  ;;  %v9860_v35 = vpack.c.bf16 %v6878_v33, %v6874_v25  ;;  %v5758_v48 = vsub.f32 1.0, %v5182_v34  ;;  %v6331_v31 = vmax.f32 %v5755_v36, 0.0  ;;  %v5175_v55 = vand.u32 2147483647, %v4599_v41 }
 0x531   :  { %9575 = vmatpush1.bf16.msra.mxu0 %v9574_v1  ;;  %v5176_v20 = vand.u32 2147483647, %v4600_v51  ;;  %v16552_v24 = vmax.f32 %v5756_v59, 0.0  ;;  %v6333_v17 = vmax.f32 %v5757_v6, 0.0  ;;  %v5177_v60 = vand.u32 2147483647, %v4601_v43 }
 0x532   :  { %9861 = vmatprep.subr.bf16.mxu1 %v9860_v35  ;;  %v5178_v26 = vand.u32 2147483647, %v4602_v53  ;;  %v16554_v18 = vmax.f32 %v5758_v48, 0.0  ;;  %v16557_v15 = vmul.f32 %v6331_v31, %v19119_v11  ;;  %v5751_v7 = vsub.f32 1.0, %v5175_v55  ;;  %v4013_v48 = vpop.permute.xlu1 %4012  ;;  %v7022_v31 = vld [vmem:[%s17899_s1 + $0x38] sm:$0xff]  ;;  %v19127_v55 = vld [vmem:[#allocation311_spill] sm:$0xff] }
 0x533   :  { %9863 = vmatpush1.bf16.msra.mxu1 %v9862_v4  ;;  %v5752_v39 = vsub.f32 1.0, %v5176_v20  ;;  %v16560_v1 = vmul.f32 %v6333_v17, %v19120_v54  ;;  %v5753_v25 = vsub.f32 1.0, %v5177_v60  ;;  %v19122_v41 = vsub.f32 %v10446_v16, %v19121_v3  ;;  %v19123_v4 = vld [vmem:[#allocation258_spill] sm:$0xff]  ;;  %7679 = vmatprep.mubr.f32.mxu0 %v7022_v31  ;;  %v19128_v11 = vld [vmem:[#allocation312_spill] sm:$0xff] }
 0x534   :  { %v5754_v46 = vsub.f32 1.0, %v5178_v26  ;;  %v6327_v33 = vmax.f32 %v5751_v7, 0.0  ;;  %v19124_v12 = vsub.f32 %v10446_v16, %v19123_v4  ;;  %v19125_v36 = vsub.f32 %v18563_v37, %v19121_v3  ;;  %8454 = vmatprep.mubr.f32.mxu1 %v7022_v31 }
 0x535   :  { %v1948_v40 = vand.u32 2147483647, %v19122_v41  ;;  %v16565_v0 = vmax.f32 %v5752_v39, 0.0  ;;  %v6329_v43 = vmax.f32 %v5753_v25, 0.0  ;;  %v19126_v6 = vsub.f32 %v18563_v37, %v19123_v4 }
 0x536   :  { %v1952_v34 = vand.u32 2147483647, %v19124_v12  ;;  %v1950_v51 = vand.u32 2147483647, %v19125_v36  ;;  %v16573_v35 = vmax.f32 %v5754_v46, 0.0  ;;  %v16582_v20 = vmul.f32 %v6327_v33, %v19127_v55  ;;  %v4008_v33 = vpop.permute.xlu0 %4007 }
 0x537   :  { %v2524_v59 = vsub.f32 1.0, %v1948_v40  ;;  %v1954_v53 = vand.u32 2147483647, %v19126_v6  ;;  %v9578_v26 = vpack.c.bf16 %v16395_v45, %v16420_v13  ;;  %v16587_v7 = vmul.f32 %v6329_v43, %v19128_v11 }
 0x538   :  { %v2528_v17 = vsub.f32 1.0, %v1952_v34  ;;  %v2526_v60 = vsub.f32 1.0, %v1950_v51  ;;  %v9866_v25 = vpack.c.bf16 %v16401_v8, %v16426_v52  ;;  %v4611_v41 = vsub.f32 %v12827_v19, %v4013_v48 }
 0x539   :  { %v3100_v39 = vmax.f32 %v2524_v59, 0.0  ;;  %v2530_v54 = vsub.f32 1.0, %v1954_v53  ;;  %v4612_v40 = vsub.f32 %v12829_v10, %v4013_v48  ;;  %v4613_v13 = vsub.f32 %v12832_v38, %v4013_v48 }
 0x53a   :  { %v3104_v46 = vmax.f32 %v2528_v17, 0.0  ;;  %v3102_v3 = vmax.f32 %v2526_v60, 0.0  ;;  %v4614_v12 = vsub.f32 %v12834_v62, %v4013_v48  ;;  %v5187_v51 = vand.u32 2147483647, %v4611_v41 }
 0x53b   :  { %v6880_v4 = vmul.f32 %v16409_v44, %v3100_v39  ;;  %v3106_v45 = vmax.f32 %v2530_v54, 0.0  ;;  %v5188_v8 = vand.u32 2147483647, %v4612_v40  ;;  %v5189_v43 = vand.u32 2147483647, %v4613_v13  ;;  %v19129_v40 = vld [vmem:[#allocation314_spill] sm:$0xff] }
 0x53c   :  { %v6884_v34 = vmul.f32 %v16389_v28, %v3104_v46  ;;  %v6882_v36 = vmul.f32 %v16417_v49, %v3102_v3  ;;  %v5190_v59 = vand.u32 2147483647, %v4614_v12  ;;  %v4607_v6 = vsub.f32 %v12827_v19, %v4008_v33  ;;  %v19130_v12 = vld [vmem:[#allocation268_spill] sm:$0xff] }
 0x53d   :  { %v6886_v52 = vmul.f32 %v16392_v22, %v3106_v45  ;;  %v5763_v31 = vsub.f32 1.0, %v5187_v51  ;;  %v5764_v44 = vsub.f32 1.0, %v5188_v8  ;;  %v4608_v55 = vsub.f32 %v12829_v10, %v4008_v33  ;;  %v19132_v51 = vld [vmem:[#allocation315_spill] sm:$0xff] }
 0x53e   :  { %v9576_v53 = vpack.c.bf16 %v6884_v34, %v6880_v4  ;;  %v5765_v60 = vsub.f32 1.0, %v5189_v43  ;;  %v5766_v48 = vsub.f32 1.0, %v5190_v59  ;;  %v4609_v28 = vsub.f32 %v12832_v38, %v4008_v33 }
 0x53f   :  { %v9864_v17 = vpack.c.bf16 %v6886_v52, %v6882_v36  ;;  %v6339_v49 = vmax.f32 %v5763_v31, 0.0  ;;  %v16602_v11 = vmax.f32 %v5764_v44, 0.0  ;;  %v4610_v22 = vsub.f32 %v12834_v62, %v4008_v33  ;;  %v19133_v52 = vld [vmem:[#allocation265_spill] sm:$0xff] }
 0x540   :  { %9577 = vmatprep.subr.bf16.mxu0 %v9576_v53  ;;  %v5183_v39 = vand.u32 2147483647, %v4607_v6  ;;  %v6341_v54 = vmax.f32 %v5765_v60, 0.0  ;;  %v16605_v46 = vmax.f32 %v5766_v48, 0.0  ;;  %v5184_v3 = vand.u32 2147483647, %v4608_v55 }
 0x541   :  { %9865 = vmatprep.subr.bf16.mxu1 %v9864_v17  ;;  %9579 = vmatpush1.bf16.msra.mxu0 %v9578_v26  ;;  %v5185_v41 = vand.u32 2147483647, %v4609_v28  ;;  %v16608_v4 = vmul.f32 %v6339_v49, %v19129_v40  ;;  %v5186_v45 = vand.u32 2147483647, %v4610_v22  ;;  %v19131_v34 = vsub.f32 %v10446_v16, %v19130_v12  ;;  %v4023_v49 = vpop.permute.xlu1 %4022  ;;  %v19138_v40 = vld [vmem:[#allocation318_spill] sm:$0xff] }
 0x542   :  { %9867 = vmatpush1.bf16.msra.mxu1 %v9866_v25  ;;  %v5759_v13 = vsub.f32 1.0, %v5183_v39  ;;  %v16614_v33 = vmul.f32 %v6341_v54, %v19132_v51  ;;  %v5760_v8 = vsub.f32 1.0, %v5184_v3  ;;  %v19134_v43 = vsub.f32 %v10446_v16, %v19133_v52  ;;  %v19137_v39 = vld [vmem:[#allocation317_spill] sm:$0xff] }
 0x543   :  { %v1956_v36 = vand.u32 2147483647, %v19131_v34  ;;  %v5761_v26 = vsub.f32 1.0, %v5185_v41  ;;  %v5762_v6 = vsub.f32 1.0, %v5186_v45  ;;  %v19135_v31 = vsub.f32 %v18563_v37, %v19130_v12 }
 0x544   :  { %v1960_v59 = vand.u32 2147483647, %v19134_v43  ;;  %v6335_v25 = vmax.f32 %v5759_v13, 0.0  ;;  %v16622_v55 = vmax.f32 %v5760_v8, 0.0  ;;  %v19136_v48 = vsub.f32 %v18563_v37, %v19133_v52 }
 0x545   :  { %v2532_v53 = vsub.f32 1.0, %v1956_v36  ;;  %v1958_v44 = vand.u32 2147483647, %v19135_v31  ;;  %v6337_v17 = vmax.f32 %v5761_v26, 0.0  ;;  %v16627_v22 = vmax.f32 %v5762_v6, 0.0  ;;  %v4018_v36 = vpop.permute.xlu0 %4017 }
 0x546   :  { %v2536_v60 = vsub.f32 1.0, %v1960_v59  ;;  %v1962_v28 = vand.u32 2147483647, %v19136_v48  ;;  %v16630_v54 = vmul.f32 %v6335_v25, %v19137_v39  ;;  %v9582_v34 = vpack.c.bf16 %v16449_v56, %v16474_v47 }
 0x547   :  { %v3108_v3 = vmax.f32 %v2532_v53, 0.0  ;;  %v2534_v41 = vsub.f32 1.0, %v1958_v44  ;;  %v16633_v45 = vmul.f32 %v6337_v17, %v19138_v40  ;;  %v9870_v26 = vpack.c.bf16 %v16452_v42, %v16482_v21 }
 0x548   :  { %v3112_v13 = vmax.f32 %v2536_v60, 0.0  ;;  %v2538_v12 = vsub.f32 1.0, %v1962_v28  ;;  %v4619_v52 = vsub.f32 %v12827_v19, %v4023_v49  ;;  %v4620_v6 = vsub.f32 %v12829_v10, %v4023_v49 }
 0x549   :  { %v6888_v51 = vmul.f32 %v16457_v32, %v3108_v3  ;;  %v3110_v8 = vmax.f32 %v2534_v41, 0.0  ;;  %v4621_v25 = vsub.f32 %v12832_v38, %v4023_v49  ;;  %v4622_v56 = vsub.f32 %v12834_v62, %v4023_v49 }
 0x54a   :  { %v6892_v43 = vmul.f32 %v16444_v5, %v3112_v13  ;;  %v3114_v59 = vmax.f32 %v2538_v12, 0.0  ;;  %v5195_v47 = vand.u32 2147483647, %v4619_v52  ;;  %v4615_v32 = vsub.f32 %v12827_v19, %v4018_v36 }
 0x54b   :  { %v6890_v53 = vmul.f32 %v16465_v58, %v3110_v8  ;;  %v5196_v42 = vand.u32 2147483647, %v4620_v6  ;;  %v5197_v21 = vand.u32 2147483647, %v4621_v25  ;;  %v5198_v17 = vand.u32 2147483647, %v4622_v56 }
 0x54c   :  { %v9580_v31 = vpack.c.bf16 %v6892_v43, %v6888_v51  ;;  %v6894_v44 = vmul.f32 %v16446_v63, %v3114_v59  ;;  %v5771_v60 = vsub.f32 1.0, %v5195_v47  ;;  %v4616_v5 = vsub.f32 %v12829_v10, %v4018_v36  ;;  %v19139_v43 = vld [vmem:[#allocation320_spill] sm:$0xff]  ;;  %v19141_v47 = vld [vmem:[#allocation275_spill] sm:$0xff] }
 0x54d   :  { %v4617_v48 = vsub.f32 %v12832_v38, %v4018_v36  ;;  %v5772_v39 = vsub.f32 1.0, %v5196_v42  ;;  %v5773_v58 = vsub.f32 1.0, %v5197_v21  ;;  %v4618_v49 = vsub.f32 %v12834_v62, %v4018_v36  ;;  %v19140_v36 = vld [vmem:[#allocation321_spill] sm:$0xff] }
 0x54e   :  { %9581 = vmatprep.subr.bf16.mxu0 %v9580_v31  ;;  %v9868_v28 = vpack.c.bf16 %v6894_v44, %v6890_v53  ;;  %v5774_v3 = vsub.f32 1.0, %v5198_v17  ;;  %v6347_v41 = vmax.f32 %v5771_v60, 0.0  ;;  %v5191_v40 = vand.u32 2147483647, %v4615_v32 }
 0x54f   :  { %9583 = vmatpush1.bf16.msra.mxu0 %v9582_v34  ;;  %v5192_v13 = vand.u32 2147483647, %v4616_v5  ;;  %v16651_v63 = vmax.f32 %v5772_v39, 0.0  ;;  %v6349_v12 = vmax.f32 %v5773_v58, 0.0  ;;  %v5193_v51 = vand.u32 2147483647, %v4617_v48 }
 0x550   :  { %9869 = vmatprep.subr.bf16.mxu1 %v9868_v28  ;;  %v5194_v8 = vand.u32 2147483647, %v4618_v49  ;;  %v16653_v52 = vmax.f32 %v5774_v3, 0.0  ;;  %v16656_v59 = vmul.f32 %v6347_v41, %v19139_v43  ;;  %v5767_v6 = vsub.f32 1.0, %v5191_v40  ;;  %v4033_v3 = vpop.permute.xlu1 %4032  ;;  %v19147_v41 = vld [vmem:[#allocation322_spill] sm:$0xff] }
 0x551   :  { %9871 = vmatpush1.bf16.msra.mxu1 %v9870_v26  ;;  %v5768_v25 = vsub.f32 1.0, %v5192_v13  ;;  %v16659_v34 = vmul.f32 %v6349_v12, %v19140_v36  ;;  %v5769_v53 = vsub.f32 1.0, %v5193_v51  ;;  %v19142_v32 = vsub.f32 %v10446_v16, %v19141_v47  ;;  %v19143_v26 = vld [vmem:[#allocation272_spill] sm:$0xff] }
 0x552   :  { %v5770_v56 = vsub.f32 1.0, %v5194_v8  ;;  %v6343_v44 = vmax.f32 %v5767_v6, 0.0  ;;  %v19144_v21 = vsub.f32 %v10446_v16, %v19143_v26  ;;  %v19145_v60 = vsub.f32 %v18563_v37, %v19141_v47  ;;  %v19148_v8 = vld [vmem:[#allocation324_spill] sm:$0xff] }
 0x553   :  { %v1964_v31 = vand.u32 2147483647, %v19142_v32  ;;  %v16664_v42 = vmax.f32 %v5768_v25, 0.0  ;;  %v6345_v48 = vmax.f32 %v5769_v53, 0.0  ;;  %v19146_v58 = vsub.f32 %v18563_v37, %v19143_v26 }
 0x554   :  { %v1968_v17 = vand.u32 2147483647, %v19144_v21  ;;  %v1966_v5 = vand.u32 2147483647, %v19145_v60  ;;  %v16672_v28 = vmax.f32 %v5770_v56, 0.0  ;;  %v16678_v40 = vmul.f32 %v6343_v44, %v19147_v41 }
 0x555   :  { %v2540_v39 = vsub.f32 1.0, %v1964_v31  ;;  %v1970_v49 = vand.u32 2147483647, %v19146_v58  ;;  %v9586_v51 = vpack.c.bf16 %v16503_v23, %v16531_v14  ;;  %v16683_v43 = vmul.f32 %v6345_v48, %v19148_v8  ;;  %v4028_v31 = vpop.permute.xlu0 %4027 }
 0x556   :  { %v2544_v13 = vsub.f32 1.0, %v1968_v17  ;;  %v2542_v12 = vsub.f32 1.0, %v1966_v5  ;;  %v9874_v36 = vpack.c.bf16 %v16509_v57, %v16534_v61  ;;  %v4627_v47 = vsub.f32 %v12827_v19, %v4033_v3 }
 0x557   :  { %v3116_v6 = vmax.f32 %v2540_v39, 0.0  ;;  %v2546_v25 = vsub.f32 1.0, %v1970_v49  ;;  %v4628_v32 = vsub.f32 %v12829_v10, %v4033_v3  ;;  %v4629_v23 = vsub.f32 %v12832_v38, %v4033_v3 }
 0x558   :  { %v3120_v53 = vmax.f32 %v2544_v13, 0.0  ;;  %v3118_v56 = vmax.f32 %v2542_v12, 0.0  ;;  %v4630_v14 = vsub.f32 %v12834_v62, %v4033_v3  ;;  %v5203_v60 = vand.u32 2147483647, %v4627_v47 }
 0x559   :  { %v6896_v44 = vmul.f32 %v16523_v29, %v3116_v6  ;;  %v3122_v26 = vmax.f32 %v2546_v25, 0.0  ;;  %v5204_v57 = vand.u32 2147483647, %v4628_v32  ;;  %v5205_v5 = vand.u32 2147483647, %v4629_v23  ;;  %v19149_v32 = vld [vmem:[#allocation325_spill] sm:$0xff] }
 0x55a   :  { %v6900_v21 = vmul.f32 %v16497_v27, %v3120_v53  ;;  %v6898_v17 = vmul.f32 %v16528_v30, %v3118_v56  ;;  %v5206_v48 = vand.u32 2147483647, %v4630_v14  ;;  %v4623_v39 = vsub.f32 %v12827_v19, %v4028_v31  ;;  %v19150_v14 = vld [vmem:[#allocation282_spill] sm:$0xff] }
 0x55b   :  { %v6902_v61 = vmul.f32 %v16500_v50, %v3122_v26  ;;  %v5779_v49 = vsub.f32 1.0, %v5203_v60  ;;  %v5780_v29 = vsub.f32 1.0, %v5204_v57  ;;  %v4624_v41 = vsub.f32 %v12829_v10, %v4028_v31  ;;  %v19152_v60 = vld [vmem:[#allocation327_spill] sm:$0xff] }
 0x55c   :  { %v9584_v58 = vpack.c.bf16 %v6900_v21, %v6896_v44  ;;  %v5781_v12 = vsub.f32 1.0, %v5205_v5  ;;  %v5782_v3 = vsub.f32 1.0, %v5206_v48  ;;  %v4625_v27 = vsub.f32 %v12832_v38, %v4028_v31 }
 0x55d   :  { %v9872_v13 = vpack.c.bf16 %v6902_v61, %v6898_v17  ;;  %v6355_v30 = vmax.f32 %v5779_v49, 0.0  ;;  %v16698_v8 = vmax.f32 %v5780_v29, 0.0  ;;  %v4626_v50 = vsub.f32 %v12834_v62, %v4028_v31  ;;  %v19153_v61 = vld [vmem:[#allocation279_spill] sm:$0xff] }
 0x55e   :  { %9585 = vmatprep.subr.bf16.mxu0 %v9584_v58  ;;  %v5199_v6 = vand.u32 2147483647, %v4623_v39  ;;  %v6357_v25 = vmax.f32 %v5781_v12, 0.0  ;;  %v16701_v53 = vmax.f32 %v5782_v3, 0.0  ;;  %v5200_v56 = vand.u32 2147483647, %v4624_v41 }
 0x55f   :  { %9873 = vmatprep.subr.bf16.mxu1 %v9872_v13  ;;  %9587 = vmatpush1.bf16.msra.mxu0 %v9586_v51  ;;  %v5201_v47 = vand.u32 2147483647, %v4625_v27  ;;  %v16704_v44 = vmul.f32 %v6355_v30, %v19149_v32  ;;  %v5202_v26 = vand.u32 2147483647, %v4626_v50  ;;  %v19151_v21 = vsub.f32 %v10446_v16, %v19150_v14  ;;  %v4043_v30 = vpop.permute.xlu1 %4042  ;;  %v19158_v32 = vld [vmem:[#allocation329_spill] sm:$0xff] }
 0x560   :  { %9875 = vmatpush1.bf16.msra.mxu1 %v9874_v36  ;;  %v5775_v23 = vsub.f32 1.0, %v5199_v6  ;;  %v16710_v31 = vmul.f32 %v6357_v25, %v19152_v60  ;;  %v5776_v57 = vsub.f32 1.0, %v5200_v56  ;;  %v19154_v5 = vsub.f32 %v10446_v16, %v19153_v61  ;;  %v19157_v6 = vld [vmem:[#allocation328_spill] sm:$0xff] }
 0x561   :  { %v1972_v17 = vand.u32 2147483647, %v19151_v21  ;;  %v5777_v51 = vsub.f32 1.0, %v5201_v47  ;;  %v5778_v39 = vsub.f32 1.0, %v5202_v26  ;;  %v19155_v49 = vsub.f32 %v18563_v37, %v19150_v14 }
 0x562   :  { %v1976_v48 = vand.u32 2147483647, %v19154_v5  ;;  %v6351_v36 = vmax.f32 %v5775_v23, 0.0  ;;  %v16718_v41 = vmax.f32 %v5776_v57, 0.0  ;;  %v19156_v3 = vsub.f32 %v18563_v37, %v19153_v61 }
 0x563   :  { %v2548_v58 = vsub.f32 1.0, %v1972_v17  ;;  %v1974_v29 = vand.u32 2147483647, %v19155_v49  ;;  %v6353_v13 = vmax.f32 %v5777_v51, 0.0  ;;  %v16723_v50 = vmax.f32 %v5778_v39, 0.0  ;;  %v4038_v17 = vpop.permute.xlu0 %4037 }
 0x564   :  { %v2552_v12 = vsub.f32 1.0, %v1976_v48  ;;  %v1978_v27 = vand.u32 2147483647, %v19156_v3  ;;  %v16726_v25 = vmul.f32 %v6351_v36, %v19157_v6  ;;  %v9590_v21 = vpack.c.bf16 %v16557_v15, %v16582_v20 }
 0x565   :  { %v3124_v56 = vmax.f32 %v2548_v58, 0.0  ;;  %v2550_v47 = vsub.f32 1.0, %v1974_v29  ;;  %v16729_v26 = vmul.f32 %v6353_v13, %v19158_v32  ;;  %v9878_v51 = vpack.c.bf16 %v16560_v1, %v16587_v7 }
 0x566   :  { %v3128_v23 = vmax.f32 %v2552_v12, 0.0  ;;  %v2554_v14 = vsub.f32 1.0, %v1978_v27  ;;  %v4635_v61 = vsub.f32 %v12827_v19, %v4043_v30  ;;  %v4636_v39 = vsub.f32 %v12829_v10, %v4043_v30 }
 0x567   :  { %v6904_v60 = vmul.f32 %v16565_v0, %v3124_v56  ;;  %v3126_v57 = vmax.f32 %v2550_v47, 0.0  ;;  %v4637_v36 = vsub.f32 %v12832_v38, %v4043_v30  ;;  %v4638_v15 = vsub.f32 %v12834_v62, %v4043_v30 }
 0x568   :  { %v6908_v5 = vmul.f32 %v16552_v24, %v3128_v23  ;;  %v3130_v48 = vmax.f32 %v2554_v14, 0.0  ;;  %v5211_v20 = vand.u32 2147483647, %v4635_v61  ;;  %v4631_v0 = vsub.f32 %v12827_v19, %v4038_v17 }
 0x569   :  { %v6906_v58 = vmul.f32 %v16573_v35, %v3126_v57  ;;  %v5212_v1 = vand.u32 2147483647, %v4636_v39  ;;  %v5213_v7 = vand.u32 2147483647, %v4637_v36  ;;  %v5214_v13 = vand.u32 2147483647, %v4638_v15 }
 0x56a   :  { %v9588_v49 = vpack.c.bf16 %v6908_v5, %v6904_v60  ;;  %v6910_v29 = vmul.f32 %v16554_v18, %v3130_v48  ;;  %v5787_v12 = vsub.f32 1.0, %v5211_v20  ;;  %v4632_v24 = vsub.f32 %v12829_v10, %v4038_v17  ;;  %v19159_v5 = vld [vmem:[#allocation331_spill] sm:$0xff]  ;;  %v19161_v20 = vld [vmem:[#allocation289_spill] sm:$0xff] }
 0x56b   :  { %v4633_v3 = vsub.f32 %v12832_v38, %v4038_v17  ;;  %v5788_v6 = vsub.f32 1.0, %v5212_v1  ;;  %v5789_v35 = vsub.f32 1.0, %v5213_v7  ;;  %v4634_v30 = vsub.f32 %v12834_v62, %v4038_v17  ;;  %v19160_v17 = vld [vmem:[#allocation332_spill] sm:$0xff] }
 0x56c   :  { %9589 = vmatprep.subr.bf16.mxu0 %v9588_v49  ;;  %v9876_v27 = vpack.c.bf16 %v6910_v29, %v6906_v58  ;;  %v5790_v56 = vsub.f32 1.0, %v5214_v13  ;;  %v6363_v47 = vmax.f32 %v5787_v12, 0.0  ;;  %v5207_v32 = vand.u32 2147483647, %v4631_v0 }
 0x56d   :  { %9591 = vmatpush1.bf16.msra.mxu0 %v9590_v21  ;;  %v5208_v23 = vand.u32 2147483647, %v4632_v24  ;;  %v16747_v18 = vmax.f32 %v5788_v6, 0.0  ;;  %v6365_v14 = vmax.f32 %v5789_v35, 0.0  ;;  %v5209_v60 = vand.u32 2147483647, %v4633_v3 }
 0x56e   :  { %9877 = vmatprep.subr.bf16.mxu1 %v9876_v27  ;;  %v5210_v57 = vand.u32 2147483647, %v4634_v30  ;;  %v16749_v61 = vmax.f32 %v5790_v56, 0.0  ;;  %v16752_v48 = vmul.f32 %v6363_v47, %v19159_v5  ;;  %v5783_v39 = vsub.f32 1.0, %v5207_v32  ;;  %v4053_v56 = vpop.permute.xlu1 %4052  ;;  %v19167_v47 = vld [vmem:[#allocation333_spill] sm:$0xff] }
 0x56f   :  { %9879 = vmatpush1.bf16.msra.mxu1 %v9878_v51  ;;  %v5784_v36 = vsub.f32 1.0, %v5208_v23  ;;  %v16755_v21 = vmul.f32 %v6365_v14, %v19160_v17  ;;  %v5785_v58 = vsub.f32 1.0, %v5209_v60  ;;  %v19162_v0 = vsub.f32 %v10446_v16, %v19161_v20  ;;  %v19163_v51 = vld [vmem:[#allocation285_spill] sm:$0xff] }
 0x570   :  { %v5786_v15 = vsub.f32 1.0, %v5210_v57  ;;  %v6359_v29 = vmax.f32 %v5783_v39, 0.0  ;;  %v19164_v7 = vsub.f32 %v10446_v16, %v19163_v51  ;;  %v19165_v12 = vsub.f32 %v18563_v37, %v19161_v20  ;;  %v19168_v57 = vld [vmem:[#allocation334_spill] sm:$0xff] }
 0x571   :  { %v1980_v49 = vand.u32 2147483647, %v19162_v0  ;;  %v16760_v1 = vmax.f32 %v5784_v36, 0.0  ;;  %v6361_v3 = vmax.f32 %v5785_v58, 0.0  ;;  %v19166_v35 = vsub.f32 %v18563_v37, %v19163_v51 }
 0x572   :  { %v1984_v13 = vand.u32 2147483647, %v19164_v7  ;;  %v1982_v24 = vand.u32 2147483647, %v19165_v12  ;;  %v16768_v27 = vmax.f32 %v5786_v15, 0.0  ;;  %v16774_v32 = vmul.f32 %v6359_v29, %v19167_v47 }
 0x573   :  { %v2556_v6 = vsub.f32 1.0, %v1980_v49  ;;  %v1986_v30 = vand.u32 2147483647, %v19166_v35  ;;  %v9594_v60 = vpack.c.bf16 %v16608_v4, %v16630_v54  ;;  %v16779_v5 = vmul.f32 %v6361_v3, %v19168_v57  ;;  %v4048_v49 = vpop.permute.xlu0 %4047 }
 0x574   :  { %v2560_v23 = vsub.f32 1.0, %v1984_v13  ;;  %v2558_v14 = vsub.f32 1.0, %v1982_v24  ;;  %v9882_v17 = vpack.c.bf16 %v16614_v33, %v16633_v45  ;;  %v4643_v20 = vsub.f32 %v12827_v19, %v4053_v56 }
 0x575   :  { %v3132_v39 = vmax.f32 %v2556_v6, 0.0  ;;  %v2562_v36 = vsub.f32 1.0, %v1986_v30  ;;  %v4644_v0 = vsub.f32 %v12829_v10, %v4053_v56  ;;  %v4645_v4 = vsub.f32 %v12832_v38, %v4053_v56 }
 0x576   :  { %v3136_v58 = vmax.f32 %v2560_v23, 0.0  ;;  %v3134_v15 = vmax.f32 %v2558_v14, 0.0  ;;  %v4646_v54 = vsub.f32 %v12834_v62, %v4053_v56  ;;  %v5219_v12 = vand.u32 2147483647, %v4643_v20 }
 0x577   :  { %v6912_v29 = vmul.f32 %v16622_v55, %v3132_v39  ;;  %v3138_v51 = vmax.f32 %v2562_v36, 0.0  ;;  %v5220_v33 = vand.u32 2147483647, %v4644_v0  ;;  %v5221_v24 = vand.u32 2147483647, %v4645_v4  ;;  %v19169_v0 = vld [vmem:[#allocation335_spill] sm:$0xff] }
 0x578   :  { %v6916_v7 = vmul.f32 %v16602_v11, %v3136_v58  ;;  %v6914_v13 = vmul.f32 %v16627_v22, %v3134_v15  ;;  %v5222_v3 = vand.u32 2147483647, %v4646_v54  ;;  %v4639_v6 = vsub.f32 %v12827_v19, %v4048_v49  ;;  %v19170_v54 = vld [vmem:[#allocation296_spill] sm:$0xff] }
 0x579   :  { %v6918_v45 = vmul.f32 %v16605_v46, %v3138_v51  ;;  %v5795_v30 = vsub.f32 1.0, %v5219_v12  ;;  %v5796_v55 = vsub.f32 1.0, %v5220_v33  ;;  %v4640_v47 = vsub.f32 %v12829_v10, %v4048_v49  ;;  %v19172_v12 = vld [vmem:[#allocation336_spill] sm:$0xff] }
 0x57a   :  { %v9592_v35 = vpack.c.bf16 %v6916_v7, %v6912_v29  ;;  %v5797_v14 = vsub.f32 1.0, %v5221_v24  ;;  %v5798_v56 = vsub.f32 1.0, %v5222_v3  ;;  %v4641_v11 = vsub.f32 %v12832_v38, %v4048_v49 }
 0x57b   :  { %v9880_v23 = vpack.c.bf16 %v6918_v45, %v6914_v13  ;;  %v6371_v22 = vmax.f32 %v5795_v30, 0.0  ;;  %v16794_v57 = vmax.f32 %v5796_v55, 0.0  ;;  %v4642_v46 = vsub.f32 %v12834_v62, %v4048_v49  ;;  %v19173_v45 = vld [vmem:[#allocation292_spill] sm:$0xff] }
 0x57c   :  { %9593 = vmatprep.subr.bf16.mxu0 %v9592_v35  ;;  %v5215_v39 = vand.u32 2147483647, %v4639_v6  ;;  %v6373_v36 = vmax.f32 %v5797_v14, 0.0  ;;  %v16797_v58 = vmax.f32 %v5798_v56, 0.0  ;;  %v5216_v15 = vand.u32 2147483647, %v4640_v47 }
 0x57d   :  { %9881 = vmatprep.subr.bf16.mxu1 %v9880_v23  ;;  %9595 = vmatpush1.bf16.msra.mxu0 %v9594_v60  ;;  %v5217_v20 = vand.u32 2147483647, %v4641_v11  ;;  %v16800_v29 = vmul.f32 %v6371_v22, %v19169_v0  ;;  %v5218_v51 = vand.u32 2147483647, %v4642_v46  ;;  %v19171_v7 = vsub.f32 %v10446_v16, %v19170_v54  ;;  %v4063_v22 = vpop.permute.xlu1 %4062  ;;  %v19178_v0 = vld [vmem:[#allocation338_spill] sm:$0xff] }
 0x57e   :  { %9883 = vmatpush1.bf16.msra.mxu1 %v9882_v17  ;;  %v5791_v4 = vsub.f32 1.0, %v5215_v39  ;;  %v16806_v49 = vmul.f32 %v6373_v36, %v19172_v12  ;;  %v5792_v33 = vsub.f32 1.0, %v5216_v15  ;;  %v19174_v24 = vsub.f32 %v10446_v16, %v19173_v45  ;;  %v19177_v39 = vld [vmem:[#allocation337_spill] sm:$0xff] }
 0x57f   :  { %v1988_v13 = vand.u32 2147483647, %v19171_v7  ;;  %v5793_v60 = vsub.f32 1.0, %v5217_v20  ;;  %v5794_v6 = vsub.f32 1.0, %v5218_v51  ;;  %v19175_v30 = vsub.f32 %v18563_v37, %v19170_v54 }
 0x580   :  { %v1992_v3 = vand.u32 2147483647, %v19174_v24  ;;  %v6367_v17 = vmax.f32 %v5791_v4, 0.0  ;;  %v16814_v47 = vmax.f32 %v5792_v33, 0.0  ;;  %v19176_v56 = vsub.f32 %v18563_v37, %v19173_v45 }
 0x581   :  { %v2564_v35 = vsub.f32 1.0, %v1988_v13  ;;  %v1990_v55 = vand.u32 2147483647, %v19175_v30  ;;  %v6369_v23 = vmax.f32 %v5793_v60, 0.0  ;;  %v16819_v46 = vmax.f32 %v5794_v6, 0.0  ;;  %v4058_v13 = vpop.permute.xlu0 %4057 }
 0x582   :  { %v2568_v14 = vsub.f32 1.0, %v1992_v3  ;;  %v1994_v11 = vand.u32 2147483647, %v19176_v56  ;;  %v16822_v36 = vmul.f32 %v6367_v17, %v19177_v39  ;;  %v9598_v7 = vpack.c.bf16 %v16656_v59, %v16678_v40 }
 0x583   :  { %v3140_v15 = vmax.f32 %v2564_v35, 0.0  ;;  %v2566_v20 = vsub.f32 1.0, %v1990_v55  ;;  %v16825_v51 = vmul.f32 %v6369_v23, %v19178_v0  ;;  %v9886_v60 = vpack.c.bf16 %v16659_v34, %v16683_v43 }
 0x584   :  { %v3144_v4 = vmax.f32 %v2568_v14, 0.0  ;;  %v2570_v54 = vsub.f32 1.0, %v1994_v11  ;;  %v4651_v45 = vsub.f32 %v12827_v19, %v4063_v22  ;;  %v4652_v6 = vsub.f32 %v12829_v10, %v4063_v22 }
 0x585   :  { %v6920_v12 = vmul.f32 %v16664_v42, %v3140_v15  ;;  %v3142_v33 = vmax.f32 %v2566_v20, 0.0  ;;  %v4653_v17 = vsub.f32 %v12832_v38, %v4063_v22  ;;  %v4654_v59 = vsub.f32 %v12834_v62, %v4063_v22 }
 0x586   :  { %v6924_v24 = vmul.f32 %v16651_v63, %v3144_v4  ;;  %v3146_v3 = vmax.f32 %v2570_v54, 0.0  ;;  %v5227_v40 = vand.u32 2147483647, %v4651_v45  ;;  %v4647_v42 = vsub.f32 %v12827_v19, %v4058_v13 }
 0x587   :  { %v6922_v35 = vmul.f32 %v16672_v28, %v3142_v33  ;;  %v5228_v34 = vand.u32 2147483647, %v4652_v6  ;;  %v5229_v43 = vand.u32 2147483647, %v4653_v17  ;;  %v5230_v23 = vand.u32 2147483647, %v4654_v59 }
 0x588   :  { %v9596_v30 = vpack.c.bf16 %v6924_v24, %v6920_v12  ;;  %v6926_v55 = vmul.f32 %v16653_v52, %v3146_v3  ;;  %v5803_v14 = vsub.f32 1.0, %v5227_v40  ;;  %v4648_v63 = vsub.f32 %v12829_v10, %v4058_v13  ;;  %v19179_v24 = vld [vmem:[#allocation339_spill] sm:$0xff]  ;;  %v19181_v40 = vld [vmem:[#allocation302_spill] sm:$0xff] }
 0x589   :  { %v4649_v56 = vsub.f32 %v12832_v38, %v4058_v13  ;;  %v5804_v39 = vsub.f32 1.0, %v5228_v34  ;;  %v5805_v28 = vsub.f32 1.0, %v5229_v43  ;;  %v4650_v22 = vsub.f32 %v12834_v62, %v4058_v13  ;;  %v19180_v13 = vld [vmem:[#allocation340_spill] sm:$0xff] }
 0x58a   :  { %9597 = vmatprep.subr.bf16.mxu0 %v9596_v30  ;;  %v9884_v11 = vpack.c.bf16 %v6926_v55, %v6922_v35  ;;  %v5806_v15 = vsub.f32 1.0, %v5230_v23  ;;  %v6379_v20 = vmax.f32 %v5803_v14, 0.0  ;;  %v5223_v0 = vand.u32 2147483647, %v4647_v42 }
 0x58b   :  { %9599 = vmatpush1.bf16.msra.mxu0 %v9598_v7  ;;  %v5224_v4 = vand.u32 2147483647, %v4648_v63  ;;  %v16843_v52 = vmax.f32 %v5804_v39, 0.0  ;;  %v6381_v54 = vmax.f32 %v5805_v28, 0.0  ;;  %v5225_v12 = vand.u32 2147483647, %v4649_v56 }
 0x58c   :  { %9885 = vmatprep.subr.bf16.mxu1 %v9884_v11  ;;  %v5226_v33 = vand.u32 2147483647, %v4650_v22  ;;  %v16845_v45 = vmax.f32 %v5806_v15, 0.0  ;;  %v16848_v3 = vmul.f32 %v6379_v20, %v19179_v24  ;;  %v5799_v6 = vsub.f32 1.0, %v5223_v0  ;;  %v4073_v15 = vpop.permute.xlu1 %4072  ;;  %v19187_v20 = vld [vmem:[#allocation341_spill] sm:$0xff] }
 0x58d   :  { %9887 = vmatpush1.bf16.msra.mxu1 %v9886_v60  ;;  %v5800_v17 = vsub.f32 1.0, %v5224_v4  ;;  %v16851_v7 = vmul.f32 %v6381_v54, %v19180_v13  ;;  %v5801_v35 = vsub.f32 1.0, %v5225_v12  ;;  %v19182_v42 = vsub.f32 %v10446_v16, %v19181_v40  ;;  %v19183_v60 = vld [vmem:[#allocation299_spill] sm:$0xff] }
 0x58e   :  { %v5802_v59 = vsub.f32 1.0, %v5226_v33  ;;  %v6375_v55 = vmax.f32 %v5799_v6, 0.0  ;;  %v19184_v43 = vsub.f32 %v10446_v16, %v19183_v60  ;;  %v19185_v14 = vsub.f32 %v18563_v37, %v19181_v40  ;;  %v19188_v33 = vld [vmem:[#allocation342_spill] sm:$0xff] }
 0x58f   :  { %v1996_v30 = vand.u32 2147483647, %v19182_v42  ;;  %v16856_v34 = vmax.f32 %v5800_v17, 0.0  ;;  %v6377_v56 = vmax.f32 %v5801_v35, 0.0  ;;  %v19186_v28 = vsub.f32 %v18563_v37, %v19183_v60 }
 0x590   :  { %v2000_v23 = vand.u32 2147483647, %v19184_v43  ;;  %v1998_v63 = vand.u32 2147483647, %v19185_v14  ;;  %v16864_v11 = vmax.f32 %v5802_v59, 0.0  ;;  %v16870_v0 = vmul.f32 %v6375_v55, %v19187_v20 }
 0x591   :  { %v2572_v39 = vsub.f32 1.0, %v1996_v30  ;;  %v2002_v22 = vand.u32 2147483647, %v19186_v28  ;;  %v9602_v12 = vpack.c.bf16 %v16704_v44, %v16726_v25  ;;  %v16875_v24 = vmul.f32 %v6377_v56, %v19188_v33  ;;  %v4068_v30 = vpop.permute.xlu0 %4067 }
 0x592   :  { %v2576_v4 = vsub.f32 1.0, %v2000_v23  ;;  %v2574_v54 = vsub.f32 1.0, %v1998_v63  ;;  %v9890_v13 = vpack.c.bf16 %v16710_v31, %v16729_v26  ;;  %v4659_v40 = vsub.f32 %v12827_v19, %v4073_v15 }
 0x593   :  { %v3148_v6 = vmax.f32 %v2572_v39, 0.0  ;;  %v2578_v17 = vsub.f32 1.0, %v2002_v22  ;;  %v4660_v42 = vsub.f32 %v12829_v10, %v4073_v15  ;;  %v4661_v44 = vsub.f32 %v12832_v38, %v4073_v15 }
 0x594   :  { %v3152_v35 = vmax.f32 %v2576_v4, 0.0  ;;  %v3150_v59 = vmax.f32 %v2574_v54, 0.0  ;;  %v4662_v25 = vsub.f32 %v12834_v62, %v4073_v15  ;;  %v5235_v14 = vand.u32 2147483647, %v4659_v40 }
 0x595   :  { %v6928_v55 = vmul.f32 %v16718_v41, %v3148_v6  ;;  %v3154_v60 = vmax.f32 %v2578_v17, 0.0  ;;  %v5236_v31 = vand.u32 2147483647, %v4660_v42  ;;  %v5237_v63 = vand.u32 2147483647, %v4661_v44  ;;  %v19189_v42 = vld [vmem:[#allocation343_spill] sm:$0xff] }
 0x596   :  { %v6932_v43 = vmul.f32 %v16698_v8, %v3152_v35  ;;  %v6930_v23 = vmul.f32 %v16723_v50, %v3150_v59  ;;  %v5238_v56 = vand.u32 2147483647, %v4662_v25  ;;  %v4655_v39 = vsub.f32 %v12827_v19, %v4068_v30  ;;  %v19190_v25 = vld [vmem:[#allocation309_spill] sm:$0xff] }
 0x597   :  { %v6934_v26 = vmul.f32 %v16701_v53, %v3154_v60  ;;  %v5811_v22 = vsub.f32 1.0, %v5235_v14  ;;  %v5812_v41 = vsub.f32 1.0, %v5236_v31  ;;  %v4656_v20 = vsub.f32 %v12829_v10, %v4068_v30  ;;  %v19192_v14 = vld [vmem:[#allocation344_spill] sm:$0xff] }
 0x598   :  { %v9600_v28 = vpack.c.bf16 %v6932_v43, %v6928_v55  ;;  %v5813_v54 = vsub.f32 1.0, %v5237_v63  ;;  %v5814_v15 = vsub.f32 1.0, %v5238_v56  ;;  %v4657_v8 = vsub.f32 %v12832_v38, %v4068_v30 }
 0x599   :  { %v9888_v4 = vpack.c.bf16 %v6934_v26, %v6930_v23  ;;  %v6387_v50 = vmax.f32 %v5811_v22, 0.0  ;;  %v16890_v33 = vmax.f32 %v5812_v41, 0.0  ;;  %v4658_v53 = vsub.f32 %v12834_v62, %v4068_v30  ;;  %v19193_v26 = vld [vmem:[#allocation306_spill] sm:$0xff] }
 0x59a   :  { %9601 = vmatprep.subr.bf16.mxu0 %v9600_v28  ;;  %v5231_v6 = vand.u32 2147483647, %v4655_v39  ;;  %v6389_v17 = vmax.f32 %v5813_v54, 0.0  ;;  %v16893_v35 = vmax.f32 %v5814_v15, 0.0  ;;  %v5232_v59 = vand.u32 2147483647, %v4656_v20 }
 0x59b   :  { %9889 = vmatprep.subr.bf16.mxu1 %v9888_v4  ;;  %9603 = vmatpush1.bf16.msra.mxu0 %v9602_v12  ;;  %v5233_v40 = vand.u32 2147483647, %v4657_v8  ;;  %v16896_v55 = vmul.f32 %v6387_v50, %v19189_v42  ;;  %v5234_v60 = vand.u32 2147483647, %v4658_v53  ;;  %v19191_v43 = vsub.f32 %v10446_v16, %v19190_v25  ;;  %v879_v50 = vpop.permute.xlu1 %878  ;;  %v19198_v42 = vld [vmem:[#allocation346_spill] sm:$0xff] }
 0x59c   :  { %9891 = vmatpush1.bf16.msra.mxu1 %v9890_v13  ;;  %v5807_v44 = vsub.f32 1.0, %v5231_v6  ;;  %v16902_v30 = vmul.f32 %v6389_v17, %v19192_v14  ;;  %v5808_v31 = vsub.f32 1.0, %v5232_v59  ;;  %v19194_v63 = vsub.f32 %v10446_v16, %v19193_v26  ;;  %v19197_v6 = vld [vmem:[#allocation345_spill] sm:$0xff] }
 0x59d   :  { %v2004_v23 = vand.u32 2147483647, %v19191_v43  ;;  %v5809_v12 = vsub.f32 1.0, %v5233_v40  ;;  %v5810_v39 = vsub.f32 1.0, %v5234_v60  ;;  %v19195_v22 = vsub.f32 %v18563_v37, %v19190_v25 }
 0x59e   :  { %v2008_v56 = vand.u32 2147483647, %v19194_v63  ;;  %v6383_v13 = vmax.f32 %v5807_v44, 0.0  ;;  %v16910_v20 = vmax.f32 %v5808_v31, 0.0  ;;  %v19196_v15 = vsub.f32 %v18563_v37, %v19193_v26 }
 0x59f   :  { %v2580_v28 = vsub.f32 1.0, %v2004_v23  ;;  %v2006_v41 = vand.u32 2147483647, %v19195_v22  ;;  %v6385_v4 = vmax.f32 %v5809_v12, 0.0  ;;  %v16915_v53 = vmax.f32 %v5810_v39, 0.0  ;;  %v874_v23 = vpop.permute.xlu0 %873 }
 0x5a0   :  { %v2584_v54 = vsub.f32 1.0, %v2008_v56  ;;  %v2010_v8 = vand.u32 2147483647, %v19196_v15  ;;  %v16918_v17 = vmul.f32 %v6383_v13, %v19197_v6  ;;  %v9606_v43 = vpack.c.bf16 %v16752_v48, %v16774_v32 }
 0x5a1   :  { %v3156_v59 = vmax.f32 %v2580_v28, 0.0  ;;  %v2582_v40 = vsub.f32 1.0, %v2006_v41  ;;  %v16921_v60 = vmul.f32 %v6385_v4, %v19198_v42  ;;  %v9894_v12 = vpack.c.bf16 %v16755_v21, %v16779_v5 }
 0x5a2   :  { %v3160_v44 = vmax.f32 %v2584_v54, 0.0  ;;  %v2586_v25 = vsub.f32 1.0, %v2010_v8  ;;  %v1463_v26 = vsub.f32 %v18567_v2, %v879_v50  ;;  %v1464_v39 = vsub.f32 %v10446_v16, %v879_v50 }
 0x5a3   :  { %v6936_v14 = vmul.f32 %v16760_v1, %v3156_v59  ;;  %v3158_v31 = vmax.f32 %v2582_v40, 0.0  ;;  %v1465_v13 = vsub.f32 %v18570_v9, %v879_v50  ;;  %v1466_v48 = vsub.f32 %v18563_v37, %v879_v50 }
 0x5a4   :  { %v6940_v63 = vmul.f32 %v16747_v18, %v3160_v44  ;;  %v3162_v56 = vmax.f32 %v2586_v25, 0.0  ;;  %v2039_v32 = vand.u32 2147483647, %v1463_v26  ;;  %v1459_v1 = vsub.f32 %v18567_v2, %v874_v23 }
 0x5a5   :  { %v6938_v28 = vmul.f32 %v16768_v27, %v3158_v31  ;;  %v2040_v21 = vand.u32 2147483647, %v1464_v39  ;;  %v2041_v5 = vand.u32 2147483647, %v1465_v13  ;;  %v2042_v4 = vand.u32 2147483647, %v1466_v48 }
 0x5a6   :  { %v9604_v22 = vpack.c.bf16 %v6940_v63, %v6936_v14  ;;  %v6942_v41 = vmul.f32 %v16749_v61, %v3162_v56  ;;  %v2615_v54 = vsub.f32 1.0, %v2039_v32  ;;  %v1460_v18 = vsub.f32 %v10446_v16, %v874_v23  ;;  %v19201_v48 = vld [vmem:[#allocation313_spill] sm:$0xff] }
 0x5a7   :  { %v1461_v15 = vsub.f32 %v18570_v9, %v874_v23  ;;  %v2616_v6 = vsub.f32 1.0, %v2040_v21  ;;  %v2617_v27 = vsub.f32 1.0, %v2041_v5  ;;  %v1462_v50 = vsub.f32 %v18563_v37, %v874_v23  ;;  %v19199_v23 = vld [vmem:[#allocation316_spill] sm:$0xff] }
 0x5a8   :  { %9605 = vmatprep.subr.bf16.mxu0 %v9604_v22  ;;  %v9892_v8 = vpack.c.bf16 %v6942_v41, %v6938_v28  ;;  %v2618_v59 = vsub.f32 1.0, %v2042_v4  ;;  %v16939_v40 = vmax.f32 %v2615_v54, 0.0  ;;  %v2035_v42 = vand.u32 2147483647, %v1459_v1 }
 0x5a9   :  { %9607 = vmatpush1.bf16.msra.mxu0 %v9606_v43  ;;  %v2036_v61 = vand.u32 2147483647, %v1460_v18  ;;  %v16941_v44 = vmax.f32 %v2616_v6, 0.0  ;;  %v16943_v25 = vmax.f32 %v2617_v27, 0.0  ;;  %v2037_v14 = vand.u32 2147483647, %v1461_v15  ;;  %v4083_v18 = vpop.permute.xlu1 %4082 }
 0x5aa   :  { %9893 = vmatprep.subr.bf16.mxu1 %v9892_v8  ;;  %v2038_v31 = vand.u32 2147483647, %v1462_v50  ;;  %v16945_v26 = vmax.f32 %v2618_v59, 0.0  ;;  %v2611_v63 = vsub.f32 1.0, %v2035_v42  ;;  %v19200_v43 = vsub.f32 %v10446_v16, %v19199_v23 }
 0x5ab   :  { %9895 = vmatpush1.bf16.msra.mxu1 %v9894_v12  ;;  %v2612_v56 = vsub.f32 1.0, %v2036_v61  ;;  %v2613_v13 = vsub.f32 1.0, %v2037_v14  ;;  %v19202_v32 = vsub.f32 %v10446_v16, %v19201_v48  ;;  %v19203_v22 = vsub.f32 %v18563_v37, %v19199_v23  ;;  %v4078_v23 = vpop.permute.xlu0 %4077 }
 0x5ac   :  { %v2012_v39 = vand.u32 2147483647, %v19200_v43  ;;  %v2614_v28 = vsub.f32 1.0, %v2038_v31  ;;  %v16956_v21 = vmax.f32 %v2611_v63, 0.0  ;;  %v19204_v4 = vsub.f32 %v18563_v37, %v19201_v48 }
 0x5ad   :  { %v2016_v1 = vand.u32 2147483647, %v19202_v32  ;;  %v2014_v41 = vand.u32 2147483647, %v19203_v22  ;;  %v16958_v12 = vmax.f32 %v2612_v56, 0.0  ;;  %v16963_v15 = vmax.f32 %v2613_v13, 0.0 }
 0x5ae   :  { %v2588_v5 = vsub.f32 1.0, %v2012_v39  ;;  %v2018_v54 = vand.u32 2147483647, %v19204_v4  ;;  %v16965_v8 = vmax.f32 %v2614_v28, 0.0  ;;  %v9610_v42 = vpack.c.bf16 %v16800_v29, %v16822_v36 }
 0x5af   :  { %v2592_v6 = vsub.f32 1.0, %v2016_v1  ;;  %v2590_v27 = vsub.f32 1.0, %v2014_v41  ;;  %v9898_v61 = vpack.c.bf16 %v16806_v49, %v16825_v51  ;;  %v4667_v63 = vsub.f32 %v12827_v19, %v4083_v18 }
 0x5b0   :  { %v3164_v50 = vmax.f32 %v2588_v5, 0.0  ;;  %v2594_v59 = vsub.f32 1.0, %v2018_v54  ;;  %v4668_v56 = vsub.f32 %v12829_v10, %v4083_v18  ;;  %v4669_v13 = vsub.f32 %v12832_v38, %v4083_v18 }
 0x5b1   :  { %v3168_v14 = vmax.f32 %v2592_v6, 0.0  ;;  %v3166_v31 = vmax.f32 %v2590_v27, 0.0  ;;  %v4670_v28 = vsub.f32 %v12834_v62, %v4083_v18  ;;  %v5243_v36 = vand.u32 2147483647, %v4667_v63 }
 0x5b2   :  { %v6944_v43 = vmul.f32 %v16814_v47, %v3164_v50  ;;  %v3170_v39 = vmax.f32 %v2594_v59, 0.0  ;;  %v5244_v49 = vand.u32 2147483647, %v4668_v56  ;;  %v5245_v32 = vand.u32 2147483647, %v4669_v13  ;;  %v7021_v59 = vld [vmem:[%s17899_s1 + $0x30] sm:$0xff] }
 0x5b3   :  { %v6948_v48 = vmul.f32 %v16794_v57, %v3168_v14  ;;  %v6946_v29 = vmul.f32 %v16819_v46, %v3166_v31  ;;  %v5246_v1 = vand.u32 2147483647, %v4670_v28  ;;  %v4663_v22 = vsub.f32 %v12827_v19, %v4078_v23 }
 0x5b4   :  { %v6950_v51 = vmul.f32 %v16797_v58, %v3170_v39  ;;  %v5819_v5 = vsub.f32 1.0, %v5243_v36  ;;  %v5820_v47 = vsub.f32 1.0, %v5244_v49  ;;  %v4664_v4 = vsub.f32 %v12829_v10, %v4078_v23 }
 0x5b5   :  { %v9608_v41 = vpack.c.bf16 %v6948_v48, %v6944_v43  ;;  %v5821_v6 = vsub.f32 1.0, %v5245_v32  ;;  %v5822_v18 = vsub.f32 1.0, %v5246_v1  ;;  %v4665_v57 = vsub.f32 %v12832_v38, %v4078_v23 }
 0x5b6   :  { %v9896_v54 = vpack.c.bf16 %v6950_v51, %v6946_v29  ;;  %v6395_v46 = vmax.f32 %v5819_v5, 0.0  ;;  %v16982_v27 = vmax.f32 %v5820_v47, 0.0  ;;  %v4666_v58 = vsub.f32 %v12834_v62, %v4078_v23  ;;  %v19205_v23 = vld [vmem:[#allocation323_spill] sm:$0xff] }
 0x5b7   :  { %9609 = vmatprep.subr.bf16.mxu0 %v9608_v41  ;;  %v5239_v50 = vand.u32 2147483647, %v4663_v22  ;;  %v6397_v14 = vmax.f32 %v5821_v6, 0.0  ;;  %v16988_v31 = vmax.f32 %v5822_v18, 0.0  ;;  %v5240_v63 = vand.u32 2147483647, %v4664_v4  ;;  %v889_v18 = vpop.permute.xlu1 %888 }
 0x5b8   :  { %9897 = vmatprep.subr.bf16.mxu1 %v9896_v54  ;;  %9611 = vmatpush1.bf16.msra.mxu0 %v9610_v42  ;;  %v5241_v56 = vand.u32 2147483647, %v4665_v57  ;;  %v16991_v43 = vmul.f32 %v6395_v46, %v16939_v40  ;;  %v5242_v39 = vand.u32 2147483647, %v4666_v58  ;;  %v19206_v28 = vsub.f32 %v10446_v16, %v19205_v23  ;;  %v7031_v29 = vld [vmem:[%s17899_s1 + $0x80] sm:$0xff]  ;;  %v7030_v57 = vld [vmem:[%s17899_s1 + $0x78] sm:$0xff] }
 0x5b9   :  { %9899 = vmatpush1.bf16.msra.mxu1 %v9898_v61  ;;  %v5815_v13 = vsub.f32 1.0, %v5239_v50  ;;  %v17000_v42 = vmul.f32 %v6397_v14, %v16943_v25  ;;  %v5816_v36 = vsub.f32 1.0, %v5240_v63  ;;  %v19207_v61 = vld [vmem:[#allocation319_spill] sm:$0xff]  ;;  %v19209_v41 = vsub.f32 %v18563_v37, %v19205_v23  ;;  %v884_v23 = vpop.permute.xlu0 %883 }
 0x5ba   :  { %v2020_v48 = vand.u32 2147483647, %v19206_v28  ;;  %v5817_v49 = vsub.f32 1.0, %v5241_v56  ;;  %v19208_v51 = vsub.f32 %v10446_v16, %v19207_v61  ;;  %v5818_v32 = vsub.f32 1.0, %v5242_v39 }
 0x5bb   :  { %v6391_v1 = vmax.f32 %v5815_v13, 0.0  ;;  %7680 = vmatmul.mubr.f32.vlgmr.msra.gmra.mrb[0].mxu0 %v7021_v59  ;;  %v2022_v5 = vand.u32 2147483647, %v19209_v41  ;;  %v17008_v47 = vmax.f32 %v5816_v36, 0.0  ;;  %v19210_v25 = vsub.f32 %v18563_v37, %v19207_v61 }
 0x5bc   :  { %v2024_v40 = vand.u32 2147483647, %v19208_v51  ;;  %v2596_v22 = vsub.f32 1.0, %v2020_v48  ;;  %v6393_v4 = vmax.f32 %v5817_v49, 0.0  ;;  %8455 = vmatmul.mubr.f32.vlgmr.msra.gmra.mrb[0].mxu1 %v7021_v59  ;;  %7685 = vmatprep.mubr.f32.mxu0 %v7031_v29  ;;  %v17016_v46 = vmax.f32 %v5818_v32, 0.0  ;;  %v7040_v59 = vld [vmem:[%s17899_s1 + $0xc8] sm:$0xff] }
 0x5bd   :  { %v2026_v6 = vand.u32 2147483647, %v19210_v25  ;;  %v17019_v58 = vmul.f32 %v6391_v1, %v16956_v21  ;;  %v2598_v14 = vsub.f32 1.0, %v2022_v5  ;;  %8460 = vmatprep.mubr.f32.mxu1 %v7031_v29  ;;  %v9614_v13 = vpack.c.bf16 %v16848_v3, %v16870_v0  ;;  %v7039_v3 = vld [vmem:[%s17899_s1 + $0xc0] sm:$0xff]  ;;  %v7049_v1 = vld [vmem:[%s17899_s1 + $0x110] sm:$0xff] }
 0x5be   :  { %v2600_v54 = vsub.f32 1.0, %v2024_v40  ;;  %v3172_v50 = vmax.f32 %v2596_v22, 0.0  ;;  %v17025_v63 = vmul.f32 %v6393_v4, %v16963_v15  ;;  %v9902_v48 = vpack.c.bf16 %v16851_v7, %v16875_v24 }
 0x5bf   :  { %v2602_v39 = vsub.f32 1.0, %v2026_v6  ;;  %v3174_v21 = vmax.f32 %v2598_v14, 0.0  ;;  %v1471_v29 = vsub.f32 %v18567_v2, %v889_v18  ;;  %7686 = vmatmul.mubr.f32.gmra.mrb[2].mxu0 %v7030_v57  ;;  %v1472_v15 = vsub.f32 %v10446_v16, %v889_v18 }
 0x5c0   :  { %v3176_v56 = vmax.f32 %v2600_v54, 0.0  ;;  %v6952_v28 = vmul.f32 %v16856_v34, %v3172_v50  ;;  %v1473_v61 = vsub.f32 %v18570_v9, %v889_v18  ;;  %8461 = vmatmul.mubr.f32.gmra.mrb[2].mxu1 %v7030_v57  ;;  %7691 = vmatprep.mubr.f32.mxu0 %v7040_v59  ;;  %v1474_v7 = vsub.f32 %v18563_v37, %v889_v18  ;;  %v7058_v18 = vld [vmem:[%s17899_s1 + $0x158] sm:$0xff] }
 0x5c1   :  { %v3178_v49 = vmax.f32 %v2602_v39, 0.0  ;;  %v6954_v34 = vmul.f32 %v16864_v11, %v3174_v21  ;;  %v2047_v0 = vand.u32 2147483647, %v1471_v29  ;;  %v1467_v24 = vsub.f32 %v18567_v2, %v884_v23  ;;  %8466 = vmatprep.mubr.f32.mxu1 %v7040_v59 }
 0x5c2   :  { %v6956_v36 = vmul.f32 %v16843_v52, %v3176_v56  ;;  %v2048_v40 = vand.u32 2147483647, %v1472_v15  ;;  %v2049_v32 = vand.u32 2147483647, %v1473_v61  ;;  %v2050_v22 = vand.u32 2147483647, %v1474_v7 }
 0x5c3   :  { %v6958_v51 = vmul.f32 %v16845_v45, %v3178_v49  ;;  %v2623_v41 = vsub.f32 1.0, %v2047_v0  ;;  %v1468_v5 = vsub.f32 %v10446_v16, %v884_v23  ;;  %v1469_v11 = vsub.f32 %v18570_v9, %v884_v23  ;;  %7692 = vmatmul.mubr.f32.gmra.mrb[4].mxu0 %v7039_v3  ;;  %v7048_v45 = vld [vmem:[%s17899_s1 + $0x108] sm:$0xff]  ;;  %v7057_v61 = vld [vmem:[%s17899_s1 + $0x150] sm:$0xff]  ;;  %v19213_v7 = vld [vmem:[#allocation326_spill] sm:$0xff] }
 0x5c4   :  { %v9612_v52 = vpack.c.bf16 %v6956_v36, %v6952_v28  ;;  %v2624_v54 = vsub.f32 1.0, %v2048_v40  ;;  %v2625_v25 = vsub.f32 1.0, %v2049_v32  ;;  %v1470_v6 = vsub.f32 %v18563_v37, %v884_v23  ;;  %8467 = vmatmul.mubr.f32.gmra.mrb[4].mxu1 %v7039_v3  ;;  %7697 = vmatprep.mubr.f32.mxu0 %v7049_v1 }
 0x5c5   :  { %v9900_v4 = vpack.c.bf16 %v6958_v51, %v6954_v34  ;;  %v2626_v57 = vsub.f32 1.0, %v2050_v22  ;;  %v17055_v50 = vmax.f32 %v2623_v41, 0.0  ;;  %v2043_v14 = vand.u32 2147483647, %v1467_v24  ;;  %8472 = vmatprep.mubr.f32.mxu1 %v7049_v1  ;;  %v4093_v41 = vpop.permute.xlu1 %4092 }
 0x5c6   :  { %9613 = vmatprep.subr.bf16.mxu0 %v9612_v52  ;;  %v2044_v59 = vand.u32 2147483647, %v1468_v5  ;;  %v17057_v56 = vmax.f32 %v2624_v54, 0.0  ;;  %v17059_v39 = vmax.f32 %v2625_v25, 0.0  ;;  %v2045_v23 = vand.u32 2147483647, %v1469_v11 }
 0x5c7   :  { %9615 = vmatpush1.bf16.msra.mxu0 %v9614_v13  ;;  %9901 = vmatprep.subr.bf16.mxu1 %v9900_v4  ;;  %v2046_v28 = vand.u32 2147483647, %v1470_v6  ;;  %v17061_v21 = vmax.f32 %v2626_v57, 0.0  ;;  %v2619_v29 = vsub.f32 1.0, %v2043_v14  ;;  %v19211_v13 = vld [vmem:[#allocation330_spill] sm:$0xff]  ;;  %v19214_v0 = vsub.f32 %v10446_v16, %v19213_v7  ;;  %v7067_v5 = vld [vmem:[%s17899_s1 + $0x1a0] sm:$0xff] }
 0x5c8   :  { %9903 = vmatpush1.bf16.msra.mxu1 %v9902_v48  ;;  %v2620_v36 = vsub.f32 1.0, %v2044_v59  ;;  %v19212_v49 = vsub.f32 %v10446_v16, %v19211_v13  ;;  %7698 = vmatmul.mubr.f32.gmra.mrb[6].mxu0 %v7048_v45  ;;  %v2621_v3 = vsub.f32 1.0, %v2045_v23  ;;  %v19215_v48 = vsub.f32 %v18563_v37, %v19211_v13 }
 0x5c9   :  { %v2622_v34 = vsub.f32 1.0, %v2046_v28  ;;  %v2032_v24 = vand.u32 2147483647, %v19214_v0  ;;  %8473 = vmatmul.mubr.f32.gmra.mrb[6].mxu1 %v7048_v45  ;;  %7703 = vmatprep.mubr.f32.mxu0 %v7058_v18  ;;  %v17075_v51 = vmax.f32 %v2619_v29, 0.0  ;;  %v19216_v1 = vsub.f32 %v18563_v37, %v19213_v7  ;;  %v4088_v29 = vpop.permute.xlu0 %4087 }
 0x5ca   :  { %v2028_v15 = vand.u32 2147483647, %v19212_v49  ;;  %v2030_v52 = vand.u32 2147483647, %v19215_v48  ;;  %v17077_v40 = vmax.f32 %v2620_v36, 0.0  ;;  %8478 = vmatprep.mubr.f32.mxu1 %v7058_v18  ;;  %v17085_v11 = vmax.f32 %v2621_v3, 0.0 }
 0x5cb   :  { %v2034_v22 = vand.u32 2147483647, %v19216_v1  ;;  %v17087_v4 = vmax.f32 %v2622_v34, 0.0  ;;  %v2608_v54 = vsub.f32 1.0, %v2032_v24  ;;  %v9618_v57 = vpack.c.bf16 %v16896_v55, %v16918_v17  ;;  %v7066_v36 = vld [vmem:[%s17899_s1 + $0x198] sm:$0xff] }
 0x5cc   :  { %v2604_v32 = vsub.f32 1.0, %v2028_v15  ;;  %v2606_v25 = vsub.f32 1.0, %v2030_v52  ;;  %v9906_v14 = vpack.c.bf16 %v16902_v30, %v16921_v60  ;;  %7704 = vmatmul.mubr.f32.gmra.mrb[8].mxu0 %v7057_v61  ;;  %v4675_v23 = vsub.f32 %v12827_v19, %v4093_v41  ;;  %v7076_v60 = vld [vmem:[%s17899_s1 + $0x1e8] sm:$0xff] }
 0x5cd   :  { %v2610_v45 = vsub.f32 1.0, %v2034_v22  ;;  %v3184_v18 = vmax.f32 %v2608_v54, 0.0  ;;  %v4676_v28 = vsub.f32 %v12829_v10, %v4093_v41  ;;  %8479 = vmatmul.mubr.f32.gmra.mrb[8].mxu1 %v7057_v61  ;;  %7709 = vmatprep.mubr.f32.mxu0 %v7067_v5  ;;  %v4677_v17 = vsub.f32 %v12832_v38, %v4093_v41 }
 0x5ce   :  { %v3180_v6 = vmax.f32 %v2604_v32, 0.0  ;;  %v3182_v59 = vmax.f32 %v2606_v25, 0.0  ;;  %v4678_v30 = vsub.f32 %v12834_v62, %v4093_v41  ;;  %8484 = vmatprep.mubr.f32.mxu1 %v7067_v5  ;;  %v5251_v61 = vand.u32 2147483647, %v4675_v23  ;;  %v899_v41 = vpop.permute.xlu1 %898 }
 0x5cf   :  { %v3186_v55 = vmax.f32 %v2610_v45, 0.0  ;;  %v6964_v49 = vmul.f32 %v16890_v33, %v3184_v18  ;;  %v5252_v3 = vand.u32 2147483647, %v4676_v28  ;;  %v5253_v7 = vand.u32 2147483647, %v4677_v17  ;;  %v7085_v45 = vld [vmem:[%s17899_s1 + $0x230] sm:$0xff] }
 0x5d0   :  { %v6960_v13 = vmul.f32 %v16910_v20, %v3180_v6  ;;  %v6962_v15 = vmul.f32 %v16915_v53, %v3182_v59  ;;  %v5254_v20 = vand.u32 2147483647, %v4678_v30  ;;  %v4671_v0 = vsub.f32 %v12827_v19, %v4088_v29  ;;  %7710 = vmatmul.mubr.f32.gmra.mrb[10].mxu0 %v7066_v36 }
 0x5d1   :  { %v6966_v34 = vmul.f32 %v16893_v35, %v3186_v55  ;;  %v5827_v48 = vsub.f32 1.0, %v5251_v61  ;;  %v5828_v52 = vsub.f32 1.0, %v5252_v3  ;;  %v4672_v32 = vsub.f32 %v12829_v10, %v4088_v29  ;;  %8485 = vmatmul.mubr.f32.gmra.mrb[10].mxu1 %v7066_v36  ;;  %7715 = vmatprep.mubr.f32.mxu0 %v7076_v60  ;;  %v7075_v35 = vld [vmem:[%s17899_s1 + $0x1e0] sm:$0xff]  ;;  %v894_v3 = vpop.permute.xlu0 %893 }
 0x5d2   :  { %v9616_v24 = vpack.c.bf16 %v6964_v49, %v6960_v13  ;;  %v5829_v33 = vsub.f32 1.0, %v5253_v7  ;;  %v5830_v22 = vsub.f32 1.0, %v5254_v20  ;;  %v4673_v53 = vsub.f32 %v12832_v38, %v4088_v29  ;;  %8490 = vmatprep.mubr.f32.mxu1 %v7076_v60 }
 0x5d3   :  { %v9904_v1 = vpack.c.bf16 %v6966_v34, %v6962_v15  ;;  %v6403_v5 = vmax.f32 %v5827_v48, 0.0  ;;  %v17113_v54 = vmax.f32 %v5828_v52, 0.0  ;;  %v4674_v25 = vsub.f32 %v12834_v62, %v4088_v29 }
 0x5d4   :  { %9617 = vmatprep.subr.bf16.mxu0 %v9616_v24  ;;  %v5247_v6 = vand.u32 2147483647, %v4671_v0  ;;  %v6405_v18 = vmax.f32 %v5829_v33, 0.0  ;;  %v17119_v59 = vmax.f32 %v5830_v22, 0.0  ;;  %v5248_v23 = vand.u32 2147483647, %v4672_v32  ;;  %7716 = vmatmul.mubr.f32.gmra.mrb[12].mxu0 %v7075_v35 }
 0x5d5   :  { %9905 = vmatprep.subr.bf16.mxu1 %v9904_v1  ;;  %9619 = vmatpush1.bf16.msra.mxu0 %v9618_v57  ;;  %v5249_v28 = vand.u32 2147483647, %v4673_v53  ;;  %v17122_v36 = vmul.f32 %v6403_v5, %v17055_v50  ;;  %v5250_v13 = vand.u32 2147483647, %v4674_v25  ;;  %v1479_v29 = vsub.f32 %v18567_v2, %v899_v41 }
 0x5d6   :  { %9907 = vmatpush1.bf16.msra.mxu1 %v9906_v14  ;;  %v5823_v55 = vsub.f32 1.0, %v5247_v6  ;;  %v17126_v17 = vmul.f32 %v6405_v18, %v17059_v39  ;;  %v5824_v30 = vsub.f32 1.0, %v5248_v23  ;;  %v1480_v57 = vsub.f32 %v10446_v16, %v899_v41  ;;  %7721 = vmatprep.mubr.f32.mxu0 %v7085_v45  ;;  %v7084_v14 = vld [vmem:[%s17899_s1 + $0x228] sm:$0xff]  ;;  %v7094_v39 = vld [vmem:[%s17899_s1 + $0x278] sm:$0xff] }
 0x5d7   :  { %v5825_v60 = vsub.f32 1.0, %v5249_v28  ;;  %8491 = vmatmul.mubr.f32.gmra.mrb[12].mxu1 %v7075_v35  ;;  %v5826_v50 = vsub.f32 1.0, %v5250_v13  ;;  %v1481_v15 = vsub.f32 %v18570_v9, %v899_v41  ;;  %v1482_v61 = vsub.f32 %v18563_v37, %v899_v41  ;;  %v7093_v41 = vld [vmem:[%s17899_s1 + $0x270] sm:$0xff] }
 0x5d8   :  { %v6399_v49 = vmax.f32 %v5823_v55, 0.0  ;;  %8496 = vmatprep.mubr.f32.mxu1 %v7085_v45  ;;  %v17137_v34 = vmax.f32 %v5824_v30, 0.0  ;;  %v2055_v20 = vand.u32 2147483647, %v1479_v29  ;;  %v2056_v0 = vand.u32 2147483647, %v1480_v57  ;;  %7722 = vmatmul.mubr.f32.gmra.mrb[14].mxu0 %v7084_v14 }
 0x5d9   :  { %v6401_v7 = vmax.f32 %v5825_v60, 0.0  ;;  %v17139_v24 = vmax.f32 %v5826_v50, 0.0  ;;  %v2057_v52 = vand.u32 2147483647, %v1481_v15  ;;  %v2058_v32 = vand.u32 2147483647, %v1482_v61  ;;  %7727 = vmatprep.mubr.f32.mxu0 %v7094_v39 }
 0x5da   :  { %v17142_v48 = vmul.f32 %v6399_v49, %v17075_v51  ;;  %v2631_v33 = vsub.f32 1.0, %v2055_v20  ;;  %v2632_v22 = vsub.f32 1.0, %v2056_v0  ;;  %v1475_v53 = vsub.f32 %v18567_v2, %v894_v3  ;;  %v7102_v50 = vld [vmem:[%s17899_s1 + $0x2b8] sm:$0xff] }
 0x5db   :  { %v17145_v1 = vmul.f32 %v6401_v7, %v17085_v11  ;;  %8497 = vmatmul.mubr.f32.gmra.mrb[14].mxu1 %v7084_v14  ;;  %v2633_v35 = vsub.f32 1.0, %v2057_v52  ;;  %v2634_v5 = vsub.f32 1.0, %v2058_v32  ;;  %v1476_v51 = vsub.f32 %v10446_v16, %v894_v3  ;;  %v7103_v11 = vld [vmem:[%s17899_s1 + $0x2c0] sm:$0xff]  ;;  %v4098_v7 = vpop.permute.xlu0 %4097 }
 0x5dc   :  { %v1477_v25 = vsub.f32 %v18570_v9, %v894_v3  ;;  %8502 = vmatprep.mubr.f32.mxu1 %v7094_v39  ;;  %v17156_v6 = vmax.f32 %v2631_v33, 0.0  ;;  %v17158_v45 = vmax.f32 %v2632_v22, 0.0  ;;  %v1478_v18 = vsub.f32 %v18563_v37, %v894_v3  ;;  %7728 = vmatmul.mubr.f32.gmra.mrb[16].mxu0 %v7093_v41  ;;  %v4103_v39 = vpop.permute.xlu1 %4102  ;;  %v7111_v32 = vld [vmem:[%s17899_s1 + $0x300] sm:$0xff]  ;;  %v7121_v22 = vld [vmem:[%s17899_s1 + $0x350] sm:$0xff] }
 0x5dd   :  { %v2051_v23 = vand.u32 2147483647, %v1475_v53  ;;  %v17161_v28 = vmax.f32 %v2633_v35, 0.0  ;;  %v17163_v13 = vmax.f32 %v2634_v5, 0.0  ;;  %v2052_v55 = vand.u32 2147483647, %v1476_v51  ;;  %7733 = vmatprep.mubr.f32.mxu0 %v7103_v11 }
 0x5de   :  { %v2053_v29 = vand.u32 2147483647, %v1477_v25  ;;  %v2054_v30 = vand.u32 2147483647, %v1478_v18  ;;  %v6968_v57 = vmul.f32 %v17008_v47, %v16958_v12  ;;  %v6972_v14 = vmul.f32 %v16982_v27, %v16941_v44 }
 0x5df   :  { %v2627_v60 = vsub.f32 1.0, %v2051_v23  ;;  %8503 = vmatmul.mubr.f32.gmra.mrb[16].mxu1 %v7093_v41  ;;  %v2628_v49 = vsub.f32 1.0, %v2052_v55  ;;  %v6970_v61 = vmul.f32 %v17016_v46, %v16965_v8  ;;  %v6974_v3 = vmul.f32 %v16988_v31, %v16945_v26  ;;  %v7112_v26 = vld [vmem:[%s17899_s1 + $0x308] sm:$0xff] }
 0x5e0   :  { %v2629_v15 = vsub.f32 1.0, %v2053_v29  ;;  %8508 = vmatprep.mubr.f32.mxu1 %v7103_v11  ;;  %v2630_v12 = vsub.f32 1.0, %v2054_v30  ;;  %v9620_v44 = vpack.c.bf16 %v6972_v14, %v6968_v57  ;;  %v9622_v27 = vpack.c.bf16 %v16991_v43, %v17019_v58  ;;  %7734 = vmatmul.mubr.f32.gmra.mrb[18].mxu0 %v7102_v50 }
 0x5e1   :  { %v17176_v47 = vmax.f32 %v2627_v60, 0.0  ;;  %v17180_v20 = vmax.f32 %v2628_v49, 0.0  ;;  %v9908_v52 = vpack.c.bf16 %v6974_v3, %v6970_v61  ;;  %v9910_v8 = vpack.c.bf16 %v17000_v42, %v17025_v63  ;;  %7739 = vmatprep.mubr.f32.mxu0 %v7112_v26  ;;  %v7120_v60 = vld [vmem:[%s17899_s1 + $0x348] sm:$0xff]  ;;  %v7130_v61 = vld [vmem:[%s17899_s1 + $0x398] sm:$0xff] }
 0x5e2   :  { %v17182_v0 = vmax.f32 %v2629_v15, 0.0  ;;  %v17189_v31 = vmax.f32 %v2630_v12, 0.0  ;;  %9621 = vmatprep.subr.bf16.mxu0 %v9620_v44  ;;  %v4683_v46 = vsub.f32 %v12827_v19, %v4103_v39  ;;  %v4684_v43 = vsub.f32 %v12829_v10, %v4103_v39  ;;  %v909_v15 = vpop.permute.xlu1 %908 }
 0x5e3   :  { %v4685_v58 = vsub.f32 %v12832_v38, %v4103_v39  ;;  %8509 = vmatmul.mubr.f32.gmra.mrb[18].mxu1 %v7102_v50  ;;  %9909 = vmatprep.subr.bf16.mxu1 %v9908_v52  ;;  %v4686_v42 = vsub.f32 %v12834_v62, %v4103_v39  ;;  %v4679_v63 = vsub.f32 %v12827_v19, %v4098_v7 }
 0x5e4   :  { %9623 = vmatpush1.bf16.msra.mxu0 %v9622_v27  ;;  %v4680_v33 = vsub.f32 %v12829_v10, %v4098_v7  ;;  %9911 = vmatpush1.bf16.msra.mxu1 %v9910_v8  ;;  %v5259_v53 = vand.u32 2147483647, %v4683_v46  ;;  %v5260_v41 = vand.u32 2147483647, %v4684_v43  ;;  %v4681_v5 = vsub.f32 %v12832_v38, %v4098_v7 }
 0x5e5   :  { %v5261_v35 = vand.u32 2147483647, %v4685_v58  ;;  %v5262_v51 = vand.u32 2147483647, %v4686_v42  ;;  %v4682_v25 = vsub.f32 %v12834_v62, %v4098_v7  ;;  %v5255_v11 = vand.u32 2147483647, %v4679_v63  ;;  %8514 = vmatprep.mubr.f32.mxu1 %v7112_v26  ;;  %7740 = vmatmul.mubr.f32.gmra.mrb[20].mxu0 %v7111_v32  ;;  %v904_v26 = vpop.permute.xlu0 %903 }
 0x5e6   :  { %v5256_v18 = vand.u32 2147483647, %v4680_v33  ;;  %v5835_v23 = vsub.f32 1.0, %v5259_v53  ;;  %v5836_v55 = vsub.f32 1.0, %v5260_v41  ;;  %v5257_v30 = vand.u32 2147483647, %v4681_v5  ;;  %7745 = vmatprep.mubr.f32.mxu0 %v7121_v22 }
 0x5e7   :  { %v5837_v29 = vsub.f32 1.0, %v5261_v35  ;;  %8515 = vmatmul.mubr.f32.gmra.mrb[20].mxu1 %v7111_v32  ;;  %v5838_v57 = vsub.f32 1.0, %v5262_v51  ;;  %v5258_v14 = vand.u32 2147483647, %v4682_v25  ;;  %v5831_v50 = vsub.f32 1.0, %v5255_v11  ;;  %v7129_v42 = vld [vmem:[%s17899_s1 + $0x390] sm:$0xff] }
 0x5e8   :  { %v5832_v49 = vsub.f32 1.0, %v5256_v18  ;;  %8520 = vmatprep.mubr.f32.mxu1 %v7121_v22  ;;  %v6411_v3 = vmax.f32 %v5835_v23, 0.0  ;;  %v17211_v39 = vmax.f32 %v5836_v55, 0.0  ;;  %v5833_v44 = vsub.f32 1.0, %v5257_v30  ;;  %v7138_v18 = vld [vmem:[%s17899_s1 + $0x3d8] sm:$0xff]  ;;  %v7148_v30 = vld [vmem:[%s17899_s1 + $0x428] sm:$0xff] }
 0x5e9   :  { %v6413_v12 = vmax.f32 %v5837_v29, 0.0  ;;  %v17213_v27 = vmax.f32 %v5838_v57, 0.0  ;;  %v5834_v7 = vsub.f32 1.0, %v5258_v14  ;;  %v6407_v52 = vmax.f32 %v5831_v50, 0.0  ;;  %7746 = vmatmul.mubr.f32.gmra.mrb[22].mxu0 %v7120_v60 }
 0x5ea   :  { %v17215_v8 = vmax.f32 %v5832_v49, 0.0  ;;  %v17218_v46 = vmul.f32 %v6411_v3, %v17156_v6  ;;  %v6409_v58 = vmax.f32 %v5833_v44, 0.0  ;;  %v1487_v32 = vsub.f32 %v18567_v2, %v909_v15  ;;  %7751 = vmatprep.mubr.f32.mxu0 %v7130_v61 }
 0x5eb   :  { %v17221_v43 = vmul.f32 %v6413_v12, %v17161_v28  ;;  %8521 = vmatmul.mubr.f32.gmra.mrb[22].mxu1 %v7120_v60  ;;  %v17227_v63 = vmax.f32 %v5834_v7, 0.0  ;;  %v17230_v33 = vmul.f32 %v6407_v52, %v17176_v47  ;;  %v1488_v6 = vsub.f32 %v10446_v16, %v909_v15  ;;  %v7139_v28 = vld [vmem:[%s17899_s1 + $0x3e0] sm:$0xff] }
 0x5ec   :  { %v1489_v22 = vsub.f32 %v18570_v9, %v909_v15  ;;  %8526 = vmatprep.mubr.f32.mxu1 %v7130_v61  ;;  %v17238_v53 = vmul.f32 %v6409_v58, %v17182_v0  ;;  %v1490_v41 = vsub.f32 %v18563_v37, %v909_v15  ;;  %v2063_v35 = vand.u32 2147483647, %v1487_v32 }
 0x5ed   :  { %v1483_v5 = vsub.f32 %v18567_v2, %v904_v26  ;;  %v2064_v51 = vand.u32 2147483647, %v1488_v6  ;;  %v1484_v25 = vsub.f32 %v10446_v16, %v904_v26  ;;  %v1485_v11 = vsub.f32 %v18570_v9, %v904_v26  ;;  %7752 = vmatmul.mubr.f32.gmra.mrb[24].mxu0 %v7129_v42  ;;  %v4113_v6 = vpop.permute.xlu1 %4112 }
 0x5ee   :  { %v2065_v47 = vand.u32 2147483647, %v1489_v22  ;;  %v2066_v23 = vand.u32 2147483647, %v1490_v41  ;;  %v2639_v55 = vsub.f32 1.0, %v2063_v35  ;;  %v1486_v0 = vsub.f32 %v18563_v37, %v904_v26  ;;  %7757 = vmatprep.mubr.f32.mxu0 %v7139_v28  ;;  %v7147_v22 = vld [vmem:[%s17899_s1 + $0x420] sm:$0xff] }
 0x5ef   :  { %v2059_v29 = vand.u32 2147483647, %v1483_v5  ;;  %8527 = vmatmul.mubr.f32.gmra.mrb[24].mxu1 %v7129_v42  ;;  %v2640_v60 = vsub.f32 1.0, %v2064_v51  ;;  %v2060_v14 = vand.u32 2147483647, %v1484_v25  ;;  %v6976_v42 = vmul.f32 %v17137_v34, %v17077_v40  ;;  %v4108_v51 = vpop.permute.xlu0 %4107 }
 0x5f0   :  { %v2641_v57 = vsub.f32 1.0, %v2065_v47  ;;  %v2061_v50 = vand.u32 2147483647, %v1485_v11  ;;  %8532 = vmatprep.mubr.f32.mxu1 %v7139_v28  ;;  %v2642_v49 = vsub.f32 1.0, %v2066_v23  ;;  %v17251_v15 = vmax.f32 %v2639_v55, 0.0 }
 0x5f1   :  { %v2062_v61 = vand.u32 2147483647, %v1486_v0  ;;  %v2635_v3 = vsub.f32 1.0, %v2059_v29  ;;  %v17253_v12 = vmax.f32 %v2640_v60, 0.0  ;;  %v2636_v7 = vsub.f32 1.0, %v2060_v14  ;;  %7758 = vmatmul.mubr.f32.gmra.mrb[26].mxu0 %v7138_v18 }
 0x5f2   :  { %v17255_v44 = vmax.f32 %v2641_v57, 0.0  ;;  %v2637_v52 = vsub.f32 1.0, %v2061_v50  ;;  %v17257_v26 = vmax.f32 %v2642_v49, 0.0  ;;  %7763 = vmatprep.mubr.f32.mxu0 %v7148_v30  ;;  %v6980_v35 = vmul.f32 %v17113_v54, %v17057_v56 }
 0x5f3   :  { %v2638_v58 = vsub.f32 1.0, %v2062_v61  ;;  %v17259_v32 = vmax.f32 %v2635_v3, 0.0  ;;  %8533 = vmatmul.mubr.f32.gmra.mrb[26].mxu1 %v7138_v18  ;;  %v17266_v28 = vmax.f32 %v2636_v7, 0.0  ;;  %v6978_v5 = vmul.f32 %v17139_v24, %v17087_v4 }
 0x5f4   :  { %v3213_v41 = vmax.f32 %v2637_v52, 0.0  ;;  %8538 = vmatprep.mubr.f32.mxu1 %v7148_v30  ;;  %v6982_v40 = vmul.f32 %v17119_v59, %v17061_v21  ;;  %v9626_v34 = vpack.c.bf16 %v17122_v36, %v17142_v48  ;;  %v9914_v25 = vpack.c.bf16 %v17126_v17, %v17145_v1  ;;  %v919_v52 = vpop.permute.xlu1 %918 }
 0x5f5   :  { %v17272_v47 = vmax.f32 %v2638_v58, 0.0  ;;  %v9624_v11 = vpack.c.bf16 %v6980_v35, %v6976_v42  ;;  %v4691_v18 = vsub.f32 %v12827_v19, %v4113_v6  ;;  %v4692_v56 = vsub.f32 %v12829_v10, %v4113_v6  ;;  %7764 = vmatmul.mubr.f32.gmra.mrb[28].mxu0 %v7147_v22 }
 0x5f6   :  { %v4693_v4 = vsub.f32 %v12832_v38, %v4113_v6  ;;  %v9912_v54 = vpack.c.bf16 %v6982_v40, %v6978_v5  ;;  %v4694_v24 = vsub.f32 %v12834_v62, %v4113_v6  ;;  %v4687_v23 = vsub.f32 %v12827_v19, %v4108_v51 }
 0x5f7   :  { %v4688_v21 = vsub.f32 %v12829_v10, %v4108_v51  ;;  %8539 = vmatmul.mubr.f32.gmra.mrb[28].mxu1 %v7147_v22  ;;  %9625 = vmatprep.subr.bf16.mxu0 %v9624_v11  ;;  %v5267_v59 = vand.u32 2147483647, %v4691_v18  ;;  %v5268_v36 = vand.u32 2147483647, %v4692_v56  ;;  %v4689_v48 = vsub.f32 %v12832_v38, %v4108_v51 }
 0x5f8   :  { %v5269_v17 = vand.u32 2147483647, %v4693_v4  ;;  %v10203_v1 = vmov 0.0   ;;  %9913 = vmatprep.subr.bf16.mxu1 %v9912_v54  ;;  %9627 = vmatpush1.bf16.msra.mxu0 %v9626_v34  ;;  %v5270_v55 = vand.u32 2147483647, %v4694_v24  ;;  %v4690_v0 = vsub.f32 %v12834_v62, %v4108_v51  ;;  %v914_v34 = vpop.permute.xlu0 %913 }
 0x5f9   :  { %7834 = vmatprep.mubr.f32.mxu0 %v10203_v1  ;;  %v5263_v29 = vand.u32 2147483647, %v4687_v23  ;;  %v5264_v30 = vand.u32 2147483647, %v4688_v21  ;;  %9915 = vmatpush1.bf16.msra.mxu1 %v9914_v25  ;;  %v5843_v60 = vsub.f32 1.0, %v5267_v59  ;;  %v5844_v57 = vsub.f32 1.0, %v5268_v36 }
 0x5fa   :  { %v5845_v14 = vsub.f32 1.0, %v5269_v17  ;;  %v5265_v50 = vand.u32 2147483647, %v4689_v48  ;;  %8609 = vmatprep.mubr.f32.mxu1 %v10203_v1  ;;  %v5846_v49 = vsub.f32 1.0, %v5270_v55  ;;  %v5266_v61 = vand.u32 2147483647, %v4690_v0 }
 0x5fb   :  { %v5839_v3 = vsub.f32 1.0, %v5263_v29  ;;  %v5840_v7 = vsub.f32 1.0, %v5264_v30  ;;  %v6419_v58 = vmax.f32 %v5843_v60, 0.0  ;;  %v17290_v42 = vmax.f32 %v5844_v57, 0.0 }
 0x5fc   :  { %v6421_v6 = vmax.f32 %v5845_v14, 0.0  ;;  %v5841_v22 = vsub.f32 1.0, %v5265_v50  ;;  %v17292_v35 = vmax.f32 %v5846_v49, 0.0  ;;  %v5842_v5 = vsub.f32 1.0, %v5266_v61 }
 0x5fd   :  { %v6415_v51 = vmax.f32 %v5839_v3, 0.0  ;;  %v17294_v40 = vmax.f32 %v5840_v7, 0.0  ;;  %v17297_v25 = vmul.f32 %v6419_v58, %v17251_v15  ;;  %v1495_v56 = vsub.f32 %v18567_v2, %v919_v52 }
 0x5fe   :  { %v17300_v11 = vmul.f32 %v6421_v6, %v17255_v44  ;;  %v6417_v18 = vmax.f32 %v5841_v22, 0.0  ;;  %v17303_v4 = vmax.f32 %v5842_v5, 0.0  ;;  %v1496_v24 = vsub.f32 %v10446_v16, %v919_v52 }
 0x5ff   :  { %v17306_v54 = vmul.f32 %v6415_v51, %v17259_v32  ;;  %v1497_v23 = vsub.f32 %v18570_v9, %v919_v52  ;;  %v1498_v15 = vsub.f32 %v18563_v37, %v919_v52  ;;  %v2071_v59 = vand.u32 2147483647, %v1495_v56 }
 0x600   :  { %v17310_v21 = vmul.f32 %v6417_v18, %v3213_v41  ;;  %v1491_v44 = vsub.f32 %v18567_v2, %v914_v34  ;;  %v2072_v36 = vand.u32 2147483647, %v1496_v24  ;;  %v1492_v48 = vsub.f32 %v10446_v16, %v914_v34  ;;  %v4123_v18 = vpop.permute.xlu1 %4122 }
 0x601   :  { %v2073_v17 = vand.u32 2147483647, %v1497_v23  ;;  %v1493_v55 = vsub.f32 %v18570_v9, %v914_v34  ;;  %v2074_v0 = vand.u32 2147483647, %v1498_v15  ;;  %v2647_v32 = vsub.f32 1.0, %v2071_v59  ;;  %v4118_v59 = vpop.permute.xlu0 %4117 }
 0x602   :  { %v1494_v29 = vsub.f32 %v18563_v37, %v914_v34  ;;  %v2067_v30 = vand.u32 2147483647, %v1491_v44  ;;  %v2648_v60 = vsub.f32 1.0, %v2072_v36  ;;  %v2068_v41 = vand.u32 2147483647, %v1492_v48 }
 0x603   :  { %v2649_v57 = vsub.f32 1.0, %v2073_v17  ;;  %v2069_v14 = vand.u32 2147483647, %v1493_v55  ;;  %v2650_v50 = vsub.f32 1.0, %v2074_v0  ;;  %v3223_v49 = vmax.f32 %v2647_v32, 0.0 }
 0x604   :  { %v2070_v61 = vand.u32 2147483647, %v1494_v29  ;;  %v2643_v3 = vsub.f32 1.0, %v2067_v30  ;;  %v17317_v7 = vmax.f32 %v2648_v60, 0.0  ;;  %v2644_v58 = vsub.f32 1.0, %v2068_v41 }
 0x605   :  { %v3225_v52 = vmax.f32 %v2649_v57, 0.0  ;;  %v2645_v6 = vsub.f32 1.0, %v2069_v14  ;;  %v17319_v22 = vmax.f32 %v2650_v50, 0.0  ;;  %v6984_v34 = vmul.f32 %v17215_v8, %v17180_v20 }
 0x606   :  { %v2646_v5 = vsub.f32 1.0, %v2070_v61  ;;  %v3219_v51 = vmax.f32 %v2643_v3, 0.0  ;;  %v17323_v56 = vmax.f32 %v2644_v58, 0.0  ;;  %v6988_v23 = vmul.f32 %v17211_v39, %v17158_v45  ;;  %v929_v58 = vpop.permute.xlu1 %928 }
 0x607   :  { %v3221_v24 = vmax.f32 %v2645_v6, 0.0  ;;  %v6986_v15 = vmul.f32 %v17227_v63, %v17189_v31  ;;  %v6990_v36 = vmul.f32 %v17213_v27, %v17163_v13  ;;  %v9630_v17 = vpack.c.bf16 %v17218_v46, %v17230_v33 }
 0x608   :  { %v17329_v44 = vmax.f32 %v2646_v5, 0.0  ;;  %v9918_v20 = vpack.c.bf16 %v17221_v43, %v17238_v53  ;;  %v9628_v8 = vpack.c.bf16 %v6988_v23, %v6984_v34  ;;  %v4699_v48 = vsub.f32 %v12827_v19, %v4123_v18 }
 0x609   :  { %v4700_v45 = vsub.f32 %v12829_v10, %v4123_v18  ;;  %v4701_v39 = vsub.f32 %v12832_v38, %v4123_v18  ;;  %v9916_v31 = vpack.c.bf16 %v6990_v36, %v6986_v15  ;;  %v4702_v63 = vsub.f32 %v12834_v62, %v4123_v18 }
 0x60a   :  { %v4695_v55 = vsub.f32 %v12827_v19, %v4118_v59  ;;  %v4696_v13 = vsub.f32 %v12829_v10, %v4118_v59  ;;  %9629 = vmatprep.subr.bf16.mxu0 %v9628_v8  ;;  %v5275_v27 = vand.u32 2147483647, %v4699_v48  ;;  %v4697_v43 = vsub.f32 %v12832_v38, %v4118_v59 }
 0x60b   :  { %v5276_v46 = vand.u32 2147483647, %v4700_v45  ;;  %v5277_v33 = vand.u32 2147483647, %v4701_v39  ;;  %9917 = vmatprep.subr.bf16.mxu1 %v9916_v31  ;;  %9631 = vmatpush1.bf16.msra.mxu0 %v9630_v17  ;;  %v5278_v53 = vand.u32 2147483647, %v4702_v63  ;;  %v4698_v0 = vsub.f32 %v12834_v62, %v4118_v59  ;;  %v924_v17 = vpop.permute.xlu0 %923 }
 0x60c   :  { %v5271_v32 = vand.u32 2147483647, %v4695_v55  ;;  %v5272_v29 = vand.u32 2147483647, %v4696_v13  ;;  %9919 = vmatpush1.bf16.msra.mxu1 %v9918_v20  ;;  %v5851_v30 = vsub.f32 1.0, %v5275_v27  ;;  %v1503_v45 = vsub.f32 %v18567_v2, %v929_v58 }
 0x60d   :  { %v5852_v60 = vsub.f32 1.0, %v5276_v46  ;;  %v5853_v57 = vsub.f32 1.0, %v5277_v33  ;;  %v5273_v41 = vand.u32 2147483647, %v4697_v43  ;;  %v5854_v14 = vsub.f32 1.0, %v5278_v53 }
 0x60e   :  { %v5274_v50 = vand.u32 2147483647, %v4698_v0  ;;  %v5847_v61 = vsub.f32 1.0, %v5271_v32  ;;  %v5848_v3 = vsub.f32 1.0, %v5272_v29  ;;  %v6427_v6 = vmax.f32 %v5851_v30, 0.0 }
 0x60f   :  { %v17345_v5 = vmax.f32 %v5852_v60, 0.0  ;;  %v6429_v34 = vmax.f32 %v5853_v57, 0.0  ;;  %v5849_v18 = vsub.f32 1.0, %v5273_v41  ;;  %v17347_v23 = vmax.f32 %v5854_v14, 0.0 }
 0x610   :  { %v5850_v15 = vsub.f32 1.0, %v5274_v50  ;;  %v6423_v59 = vmax.f32 %v5847_v61, 0.0  ;;  %v17349_v36 = vmax.f32 %v5848_v3, 0.0  ;;  %v17351_v20 = vmul.f32 %v6427_v6, %v3223_v49 }
 0x611   :  { %v17353_v8 = vmul.f32 %v6429_v34, %v3225_v52  ;;  %v6425_v48 = vmax.f32 %v5849_v18, 0.0  ;;  %v1504_v63 = vsub.f32 %v10446_v16, %v929_v58  ;;  %v1505_v55 = vsub.f32 %v18570_v9, %v929_v58  ;;  %v4133_v18 = vpop.permute.xlu1 %4132 }
 0x612   :  { %v17356_v39 = vmax.f32 %v5850_v15, 0.0  ;;  %v17358_v31 = vmul.f32 %v6423_v59, %v3219_v51  ;;  %v1506_v27 = vsub.f32 %v18563_v37, %v929_v58  ;;  %v2079_v46 = vand.u32 2147483647, %v1503_v45  ;;  %v4128_v45 = vpop.permute.xlu0 %4127 }
 0x613   :  { %v17362_v13 = vmul.f32 %v6425_v48, %v3221_v24  ;;  %v1499_v49 = vsub.f32 %v18567_v2, %v924_v17  ;;  %v2080_v52 = vand.u32 2147483647, %v1504_v63  ;;  %v2081_v33 = vand.u32 2147483647, %v1505_v55 }
 0x614   :  { %v1500_v43 = vsub.f32 %v10446_v16, %v924_v17  ;;  %v1501_v53 = vsub.f32 %v18570_v9, %v924_v17  ;;  %v2082_v0 = vand.u32 2147483647, %v1506_v27  ;;  %v2655_v51 = vsub.f32 1.0, %v2079_v46 }
 0x615   :  { %v1502_v32 = vsub.f32 %v18563_v37, %v924_v17  ;;  %v2075_v29 = vand.u32 2147483647, %v1499_v49  ;;  %v2656_v30 = vsub.f32 1.0, %v2080_v52  ;;  %v2657_v60 = vsub.f32 1.0, %v2081_v33 }
 0x616   :  { %v2076_v24 = vand.u32 2147483647, %v1500_v43  ;;  %v2077_v57 = vand.u32 2147483647, %v1501_v53  ;;  %v2658_v41 = vsub.f32 1.0, %v2082_v0  ;;  %v3231_v14 = vmax.f32 %v2655_v51, 0.0 }
 0x617   :  { %v2078_v50 = vand.u32 2147483647, %v1502_v32  ;;  %v2651_v61 = vsub.f32 1.0, %v2075_v29  ;;  %v17369_v2 = vmax.f32 %v2656_v30, 0.0  ;;  %v3233_v3 = vmax.f32 %v2657_v60, 0.0 }
 0x618   :  { %v2652_v58 = vsub.f32 1.0, %v2076_v24  ;;  %v2653_v16 = vsub.f32 1.0, %v2077_v57  ;;  %v17371_v6 = vmax.f32 %v2658_v41, 0.0  ;;  %v6992_v37 = vmul.f32 %v17294_v40, %v17266_v28 }
 0x619   :  { %v2654_v9 = vsub.f32 1.0, %v2078_v50  ;;  %v3227_v34 = vmax.f32 %v2651_v61, 0.0  ;;  %v6996_v17 = vmul.f32 %v17290_v42, %v17253_v12  ;;  %v6994_v48 = vmul.f32 %v17303_v4, %v17272_v47 }
 0x61a   :  { %v3228_v15 = vmax.f32 %v2652_v58, 0.0  ;;  %v3229_v59 = vmax.f32 %v2653_v16, 0.0  ;;  %v6998_v55 = vmul.f32 %v17292_v35, %v17257_v26  ;;  %v9634_v27 = vpack.c.bf16 %v17297_v25, %v17306_v54 }
 0x61b   :  { %v3230_v63 = vmax.f32 %v2654_v9, 0.0  ;;  %v9922_v28 = vpack.c.bf16 %v17300_v11, %v17310_v21  ;;  %v9632_v40 = vpack.c.bf16 %v6996_v17, %v6992_v37  ;;  %v4707_v46 = vsub.f32 %v12827_v19, %v4133_v18 }
 0x61c   :  { %v4708_v49 = vsub.f32 %v12829_v10, %v4133_v18  ;;  %v4709_v12 = vsub.f32 %v12832_v38, %v4133_v18  ;;  %v9920_v42 = vpack.c.bf16 %v6998_v55, %v6994_v48  ;;  %v4710_v47 = vsub.f32 %v12834_v62, %v4133_v18 }
 0x61d   :  { %v4703_v4 = vsub.f32 %v12827_v19, %v4128_v45  ;;  %v4704_v26 = vsub.f32 %v12829_v10, %v4128_v45  ;;  %9633 = vmatprep.subr.bf16.mxu0 %v9632_v40  ;;  %v5283_v35 = vand.u32 2147483647, %v4707_v46  ;;  %v4705_v11 = vsub.f32 %v12832_v38, %v4128_v45  ;;  %v7113_v46 = vld [vmem:[%s17899_s1 + $0x310] sm:$0xff] }
 0x61e   :  { %v5284_v25 = vand.u32 2147483647, %v4708_v49  ;;  %v5285_v54 = vand.u32 2147483647, %v4709_v12  ;;  %9921 = vmatprep.subr.bf16.mxu1 %v9920_v42  ;;  %9635 = vmatpush1.bf16.msra.mxu0 %v9634_v27  ;;  %v5286_v21 = vand.u32 2147483647, %v4710_v47  ;;  %v4706_v52 = vsub.f32 %v12834_v62, %v4128_v45 }
 0x61f   :  { %v5279_v33 = vand.u32 2147483647, %v4703_v4  ;;  %v5280_v43 = vand.u32 2147483647, %v4704_v26  ;;  %9923 = vmatpush1.bf16.msra.mxu1 %v9922_v28  ;;  %v5859_v53 = vsub.f32 1.0, %v5283_v35  ;;  %v7000_v37 = vmul.f32 %v17349_v36, %v17323_v56  ;;  %v7122_v49 = vld [vmem:[%s17899_s1 + $0x358] sm:$0xff]  ;;  %v8754_v4 = vpop.permute.xlu0 %8753  ;;  %v8759_v26 = vpop.permute.xlu1 %8758 }
 0x620   :  { %v5860_v0 = vsub.f32 1.0, %v5284_v25  ;;  %v5861_v51 = vsub.f32 1.0, %v5285_v54  ;;  %v5281_v19 = vand.u32 2147483647, %v4705_v11  ;;  %v5862_v32 = vsub.f32 1.0, %v5286_v21  ;;  %v7131_v12 = vld [vmem:[%s17899_s1 + $0x3a0] sm:$0xff] }
 0x621   :  { %v5282_v10 = vand.u32 2147483647, %v4706_v52  ;;  %v5855_v29 = vsub.f32 1.0, %v5279_v33  ;;  %v5856_v30 = vsub.f32 1.0, %v5280_v43  ;;  %v6435_v60 = vmax.f32 %v5859_v53, 0.0  ;;  %v7140_v42 = vld [vmem:[%s17899_s1 + $0x3e8] sm:$0xff] }
 0x622   :  { %v6436_v24 = vmax.f32 %v5860_v0, 0.0  ;;  %v6437_v57 = vmax.f32 %v5861_v51, 0.0  ;;  %v5857_v38 = vsub.f32 1.0, %v5281_v19  ;;  %v6438_v41 = vmax.f32 %v5862_v32, 0.0  ;;  %v7149_v47 = vld [vmem:[%s17899_s1 + $0x430] sm:$0xff]  ;;  %v19218_v51 = vld [vmem:[#allocation6_spill] sm:$0xff] }
 0x623   :  { %v5858_v50 = vsub.f32 1.0, %v5282_v10  ;;  %v6431_v61 = vmax.f32 %v5855_v29, 0.0  ;;  %v6432_v58 = vmax.f32 %v5856_v30, 0.0  ;;  %v7011_v62 = vmul.f32 %v6435_v60, %v3231_v14  ;;  %v17480_v35 = vpop.permute.xlu0 %8778  ;;  %v17482_v25 = vpop.permute.xlu1 %8783  ;;  %v19217_v43 = vld [vmem:[#allocation5_spill] sm:$0xff]  ;;  %v19219_v32 = vld [vmem:[#allocation7_spill] sm:$0xff] }
 0x624   :  { %v7013_v16 = vmul.f32 %v6437_v57, %v3233_v3  ;;  %v6433_v9 = vmax.f32 %v5857_v38, 0.0  ;;  %v7004_v48 = vmul.f32 %v17345_v5, %v17317_v7  ;;  %v7002_v45 = vmul.f32 %v17356_v39, %v17329_v44  ;;  %v7041_v39 = vld [vmem:[%s17899_s1 + $0xd0] sm:$0xff] }
 0x625   :  { %v6434_v18 = vmax.f32 %v5858_v50, 0.0  ;;  %v7007_v17 = vmul.f32 %v6431_v61, %v3227_v34  ;;  %v7006_v27 = vmul.f32 %v17347_v23, %v17319_v22  ;;  %v9638_v14 = vpack.c.bf16 %v17351_v20, %v17358_v31  ;;  %v7023_v20 = vld [vmem:[%s17899_s1 + $0x40] sm:$0xff]  ;;  %v7050_v31 = vld [vmem:[%s17899_s1 + $0x118] sm:$0xff] }
 0x626   :  { %v7009_v55 = vmul.f32 %v6433_v9, %v3229_v59  ;;  %v9926_v3 = vpack.c.bf16 %v17353_v8, %v17362_v13  ;;  %v9636_v28 = vpack.c.bf16 %v7004_v48, %v7000_v37  ;;  %v7008_v56 = vmul.f32 %v6432_v58, %v3228_v15  ;;  %v7032_v8 = vld [vmem:[%s17899_s1 + $0x88] sm:$0xff]  ;;  %v7059_v13 = vld [vmem:[%s17899_s1 + $0x160] sm:$0xff]  ;;  %v7086_v15 = vld [vmem:[%s17899_s1 + $0x238] sm:$0xff] }
 0x627   :  { %v7012_v36 = vmul.f32 %v6436_v24, %v17369_v2  ;;  %v7010_v34 = vmul.f32 %v6434_v18, %v3230_v63  ;;  %v9924_v40 = vpack.c.bf16 %v7006_v27, %v7002_v45  ;;  %v7014_v7 = vmul.f32 %v6438_v41, %v17371_v6  ;;  %v7068_v2 = vld [vmem:[%s17899_s1 + $0x1a8] sm:$0xff]  ;;  %v7077_v6 = vld [vmem:[%s17899_s1 + $0x1f0] sm:$0xff]  ;;  %v7095_v59 = vld [vmem:[%s17899_s1 + $0x280] sm:$0xff]  ;;  %v17484_v54 = vpop.permute.xlu0 %8803  ;;  %v17486_v11 = vpop.permute.xlu1 %8808 }
 0x628   :  { %9637 = vmatprep.subr.bf16.mxu0 %v9636_v28  ;;  %v9642_v22 = vpack.c.bf16 %v7011_v62, %v7007_v17  ;;  %v9930_v23 = vpack.c.bf16 %v7013_v16, %v7009_v55  ;;  %v7104_v63 = vld [vmem:[%s17899_s1 + $0x2c8] sm:$0xff]  ;;  %v8721_v53 = vsub.s32 6, %v19217_v43  ;;  %s10205_s1 = smov [#allocation2]  }
 0x629   :  { %v9640_v44 = vpack.c.bf16 %v7012_v36, %v7008_v56  ;;  %9925 = vmatprep.subr.bf16.mxu1 %v9924_v40  ;;  %9639 = vmatpush1.bf16.msra.mxu0 %v9638_v14  ;;  %v9928_v5 = vpack.c.bf16 %v7014_v7, %v7010_v34  ;;  %s9348_s3 = sshll.u32 %s10205_s1, 4  ;;  %s9349_s3 = int_to_ptr.vmem [resolvable:$true] %s9348_s3 }
 0x62a   :  { %9927 = vmatpush1.bf16.msra.mxu1 %v9926_v3  ;;  %v8722_v30 = vrot.slane %v19218_v51, %v8721_v53  ;;  %v8730_v60 = vrot.slane %v19219_v32, %v8721_v53  ;;  %s10178_s23 = scalar_lea.vmem %s9349_s3, 256  ;;  %p10183_p1 = scmp.lt.s32.totalorder %s9349_s3, %s9349_s3 }
 0x62b   :  { %9641 = vmatprep.subr.bf16.mxu0 %v9640_v44  ;;  %9929 = vmatprep.subr.bf16.mxu1 %v9928_v5  ;;  %v17488_v21 = vpop.permute.xlu0 %8763  ;;  %v17490_v52 = vpop.permute.xlu1 %8788  ;;  %p10179_p0 = scmp.ne.s32.totalorder %s9349_s3, %s10178_s23  ;;  %p10184_p2 = scmp.lt.s32.totalorder %s10178_s23, %s10178_s23 }
 0x62d   :  { %9643 = vmatpush1.bf16.msra.mxu0 %v9642_v22  ;;  %p10185_p3 = por %p10184_p2, %p10183_p1 }
 0x62e   :  { %9931 = vmatpush1.bf16.msra.mxu1 %v9930_v23 }
 0x62f   :  { %v17492_v33 = vpop.permute.xlu0 %8813  ;;  %v17496_v0 = vpop.permute.xlu1 %8768  ;;  %p10186_p4 = pnand %p10185_p3, %p10179_p0 }
 0x630   :  { %7835 = vmatmul.mubr.f32.vlgmr.msra.gmra.mrb[0].mxu0 %v7023_v20 }
 0x631   :  { %8610 = vmatmul.mubr.f32.vlgmr.msra.gmra.mrb[0].mxu1 %v7023_v20  ;;  %7840 = vmatprep.mubr.f32.mxu0 %v10203_v1 }
 0x632   :  { %8615 = vmatprep.mubr.f32.mxu1 %v10203_v1 }
 0x633   :  { %v17500_v29 = vpop.permute.xlu0 %8793  ;;  %v17508_v38 = vpop.permute.xlu1 %8818 }
 0x634   :  { %7841 = vmatmul.mubr.f32.gmra.mrb[2].mxu0 %v7032_v8 }
 0x635   :  { %8616 = vmatmul.mubr.f32.gmra.mrb[2].mxu1 %v7032_v8  ;;  %7846 = vmatprep.mubr.f32.mxu0 %v10203_v1 }
 0x636   :  { %8621 = vmatprep.mubr.f32.mxu1 %v10203_v1 }
 0x637   :  { %v17514_v61 = vpop.permute.xlu0 %8773  ;;  %v17519_v9 = vpop.permute.xlu1 %8798 }
 0x638   :  { %7847 = vmatmul.mubr.f32.gmra.mrb[4].mxu0 %v7041_v39 }
 0x639   :  { %8622 = vmatmul.mubr.f32.gmra.mrb[4].mxu1 %v7041_v39  ;;  %7852 = vmatprep.mubr.f32.mxu0 %v10203_v1 }
 0x63a   :  { %8627 = vmatprep.mubr.f32.mxu1 %v10203_v1 }
 0x63b   :  { %v17524_v55 = vpop.permute.xlu0 %8823 }
 0x63c   :  { %7853 = vmatmul.mubr.f32.gmra.mrb[6].mxu0 %v7050_v31 }
 0x63d   :  { %8628 = vmatmul.mubr.f32.gmra.mrb[6].mxu1 %v7050_v31  ;;  %7858 = vmatprep.mubr.f32.mxu0 %v10203_v1 }
 0x63e   :  { %8633 = vmatprep.mubr.f32.mxu1 %v10203_v1 }
 0x640   :  { %7859 = vmatmul.mubr.f32.gmra.mrb[8].mxu0 %v7059_v13 }
 0x641   :  { %8634 = vmatmul.mubr.f32.gmra.mrb[8].mxu1 %v7059_v13  ;;  %7864 = vmatprep.mubr.f32.mxu0 %v10203_v1 }
 0x642   :  { %8639 = vmatprep.mubr.f32.mxu1 %v10203_v1 }
 0x644   :  { %7865 = vmatmul.mubr.f32.gmra.mrb[10].mxu0 %v7068_v2 }
 0x645   :  { %8640 = vmatmul.mubr.f32.gmra.mrb[10].mxu1 %v7068_v2  ;;  %7870 = vmatprep.mubr.f32.mxu0 %v10203_v1 }
 0x646   :  { %8645 = vmatprep.mubr.f32.mxu1 %v10203_v1 }
 0x648   :  { %7871 = vmatmul.mubr.f32.gmra.mrb[12].mxu0 %v7077_v6 }
 0x649   :  { %8646 = vmatmul.mubr.f32.gmra.mrb[12].mxu1 %v7077_v6  ;;  %7876 = vmatprep.mubr.f32.mxu0 %v10203_v1 }
 0x64a   :  { %8651 = vmatprep.mubr.f32.mxu1 %v10203_v1 }
 0x64c   :  { %7877 = vmatmul.mubr.f32.gmra.mrb[14].mxu0 %v7086_v15 }
 0x64d   :  { %8652 = vmatmul.mubr.f32.gmra.mrb[14].mxu1 %v7086_v15  ;;  %7882 = vmatprep.mubr.f32.mxu0 %v10203_v1 }
 0x64e   :  { %8657 = vmatprep.mubr.f32.mxu1 %v10203_v1 }
 0x650   :  { %7883 = vmatmul.mubr.f32.gmra.mrb[16].mxu0 %v7095_v59 }
 0x651   :  { %8658 = vmatmul.mubr.f32.gmra.mrb[16].mxu1 %v7095_v59  ;;  %7888 = vmatprep.mubr.f32.mxu0 %v10203_v1 }
 0x652   :  { %8663 = vmatprep.mubr.f32.mxu1 %v10203_v1 }
 0x654   :  { %7889 = vmatmul.mubr.f32.gmra.mrb[18].mxu0 %v7104_v63 }
 0x655   :  { %8664 = vmatmul.mubr.f32.gmra.mrb[18].mxu1 %v7104_v63  ;;  %7894 = vmatprep.mubr.f32.mxu0 %v10203_v1 }
 0x656   :  { %8669 = vmatprep.mubr.f32.mxu1 %v10203_v1 }
 0x658   :  { %7895 = vmatmul.mubr.f32.gmra.mrb[20].mxu0 %v7113_v46 }
 0x659   :  { %8670 = vmatmul.mubr.f32.gmra.mrb[20].mxu1 %v7113_v46  ;;  %7900 = vmatprep.mubr.f32.mxu0 %v10203_v1 }
 0x65a   :  { %8675 = vmatprep.mubr.f32.mxu1 %v10203_v1 }
 0x65c   :  { %7901 = vmatmul.mubr.f32.gmra.mrb[22].mxu0 %v7122_v49 }
 0x65d   :  { %8676 = vmatmul.mubr.f32.gmra.mrb[22].mxu1 %v7122_v49  ;;  %7906 = vmatprep.mubr.f32.mxu0 %v10203_v1 }
 0x65e   :  { %8681 = vmatprep.mubr.f32.mxu1 %v10203_v1 }
 0x660   :  { %7907 = vmatmul.mubr.f32.gmra.mrb[24].mxu0 %v7131_v12 }
 0x661   :  { %8682 = vmatmul.mubr.f32.gmra.mrb[24].mxu1 %v7131_v12  ;;  %7912 = vmatprep.mubr.f32.mxu0 %v10203_v1 }
 0x662   :  { %8687 = vmatprep.mubr.f32.mxu1 %v10203_v1 }
 0x664   :  { %7913 = vmatmul.mubr.f32.gmra.mrb[26].mxu0 %v7140_v42 }
 0x665   :  { %8688 = vmatmul.mubr.f32.gmra.mrb[26].mxu1 %v7140_v42  ;;  %7918 = vmatprep.mubr.f32.mxu0 %v10203_v1 }
 0x666   :  { %8693 = vmatprep.mubr.f32.mxu1 %v10203_v1  ;;  %v8717_v1 = vsub.s32 2, %v19217_v43 }
 0x668   :  { %7919 = vmatmul.mubr.f32.gmra.mrb[28].mxu0 %v7149_v47  ;;  %v8718_v19 = vrot.slane %v19218_v51, %v8717_v1  ;;  %v8726_v10 = vrot.slane %v19219_v32, %v8717_v1  ;;  %v17510_v41 = vrot.slane %v8722_v30, %v8717_v1  ;;  %v17512_v50 = vrot.slane %v8730_v60, %v8717_v1 }
 0x669   :  { %8694 = vmatmul.mubr.f32.gmra.mrb[28].mxu1 %v7149_v47 }
 0x66a   :  { %v17504_v24 = vrot.slane %v8718_v19, %v8717_v1  ;;  %v17506_v57 = vrot.slane %v8726_v10, %v8717_v1  ;;  %v8827_v16 = vsub.f32 %v17510_v41, %v8754_v4  ;;  %v8829_v37 = vsub.f32 %v17512_v50, %v8754_v4 }
 0x66b   :  { %v8831_v3 = vsub.f32 %v17510_v41, %v8759_v26  ;;  %v8833_v28 = vsub.f32 %v17512_v50, %v8759_v26  ;;  %v8863_v56 = vsub.f32 %v17510_v41, %v17519_v9  ;;  %v8865_v23 = vsub.f32 %v17512_v50, %v17519_v9 }
 0x66c   :  { %v8826_v58 = vsub.f32 %v17504_v24, %v8754_v4  ;;  %v8828_v62 = vsub.f32 %v17506_v57, %v8754_v4  ;;  %v8830_v18 = vsub.f32 %v17504_v24, %v8759_v26  ;;  %v8832_v45 = vsub.f32 %v17506_v57, %v8759_v26 }
 0x66d   :  { %v8887_v27 = vand.u32 2147483647, %v8827_v16  ;;  %v8862_v14 = vsub.f32 %v17504_v24, %v17519_v9  ;;  %v8864_v36 = vsub.f32 %v17506_v57, %v17519_v9  ;;  %v8889_v34 = vand.u32 2147483647, %v8829_v37 }
 0x66e   :  { %v8886_v17 = vand.u32 2147483647, %v8826_v58  ;;  %v8888_v48 = vand.u32 2147483647, %v8828_v62  ;;  %v8890_v40 = vand.u32 2147483647, %v8830_v18  ;;  %v8834_v8 = vsub.f32 %v17504_v24, %v17488_v21 }
 0x66f   :  { %v8892_v22 = vand.u32 2147483647, %v8832_v45  ;;  %v8947_v20 = vsub.f32 1.0, %v8887_v27  ;;  %v8846_v39 = vsub.f32 %v17504_v24, %v17480_v35  ;;  %v8891_v31 = vand.u32 2147483647, %v8831_v3 }
 0x670   :  { %v8946_v44 = vsub.f32 1.0, %v8886_v17  ;;  %v8948_v5 = vsub.f32 1.0, %v8888_v48  ;;  %v8893_v13 = vand.u32 2147483647, %v8833_v28  ;;  %v8836_v2 = vsub.f32 %v17506_v57, %v17488_v21 }
 0x671   :  { %v8835_v6 = vsub.f32 %v17510_v41, %v17488_v21  ;;  %v8949_v15 = vsub.f32 1.0, %v8889_v34  ;;  %v8950_v59 = vsub.f32 1.0, %v8890_v40  ;;  %v8837_v63 = vsub.f32 %v17512_v50, %v17488_v21 }
 0x672   :  { %v8838_v46 = vsub.f32 %v17504_v24, %v17496_v0  ;;  %v17550_v49 = vmax.f32 %v8946_v44, 0.0  ;;  %v17552_v12 = vmax.f32 %v8948_v5, 0.0  ;;  %v8952_v42 = vsub.f32 1.0, %v8892_v22 }
 0x673   :  { %v8848_v47 = vsub.f32 %v17506_v57, %v17480_v35  ;;  %v17556_v4 = vmax.f32 %v8947_v20, 0.0  ;;  %v8894_v26 = vand.u32 2147483647, %v8834_v8  ;;  %v8906_v1 = vand.u32 2147483647, %v8846_v39 }
 0x674   :  { %v8847_v53 = vsub.f32 %v17510_v41, %v17480_v35  ;;  %v8951_v51 = vsub.f32 1.0, %v8891_v31  ;;  %v8953_v21 = vsub.f32 1.0, %v8893_v13  ;;  %v8896_v19 = vand.u32 2147483647, %v8836_v2 }
 0x675   :  { %v8895_v32 = vand.u32 2147483647, %v8835_v6  ;;  %v17560_v10 = vmax.f32 %v8949_v15, 0.0  ;;  %v17562_v30 = vmax.f32 %v8950_v59, 0.0  ;;  %v8897_v60 = vand.u32 2147483647, %v8837_v63 }
 0x676   :  { %v8898_v58 = vand.u32 2147483647, %v8838_v46  ;;  %v17564_v62 = vmax.f32 %v8952_v42, 0.0  ;;  %v8840_v16 = vsub.f32 %v17506_v57, %v17496_v0  ;;  %v8908_v37 = vand.u32 2147483647, %v8848_v47 }
 0x677   :  { %v8849_v18 = vsub.f32 %v17512_v50, %v17480_v35  ;;  %v8954_v17 = vsub.f32 1.0, %v8894_v26  ;;  %v8839_v48 = vsub.f32 %v17510_v41, %v17496_v0  ;;  %v8966_v45 = vsub.f32 1.0, %v8906_v1 }
 0x678   :  { %v8907_v27 = vand.u32 2147483647, %v8847_v53  ;;  %v17572_v3 = vmax.f32 %v8951_v51, 0.0  ;;  %v17574_v28 = vmax.f32 %v8953_v21, 0.0  ;;  %v8956_v34 = vsub.f32 1.0, %v8896_v19 }
 0x679   :  { %v8955_v40 = vsub.f32 1.0, %v8895_v32  ;;  %v8957_v44 = vsub.f32 1.0, %v8897_v60  ;;  %v8958_v5 = vsub.f32 1.0, %v8898_v58  ;;  %v8841_v22 = vsub.f32 %v17512_v50, %v17496_v0 }
 0x67a   :  { %v8850_v35 = vsub.f32 %v17504_v24, %v17482_v25  ;;  %v8900_v20 = vand.u32 2147483647, %v8840_v16  ;;  %v8842_v8 = vsub.f32 %v17504_v24, %v17514_v61  ;;  %v8968_v39 = vsub.f32 1.0, %v8908_v37 }
 0x67b   :  { %v8909_v31 = vand.u32 2147483647, %v8849_v18  ;;  %v17582_v13 = vmax.f32 %v8954_v17, 0.0  ;;  %v8899_v2 = vand.u32 2147483647, %v8839_v48  ;;  %v17584_v6 = vmax.f32 %v8966_v45, 0.0 }
 0x67c   :  { %v8967_v15 = vsub.f32 1.0, %v8907_v27  ;;  %v17586_v59 = vmax.f32 %v8956_v34, 0.0  ;;  %v17588_v63 = vmax.f32 %v8955_v40, 0.0  ;;  %v8852_v0 = vsub.f32 %v17506_v57, %v17482_v25 }
 0x67d   :  { %v8851_v46 = vsub.f32 %v17510_v41, %v17482_v25  ;;  %v17594_v42 = vmax.f32 %v8957_v44, 0.0  ;;  %v17596_v47 = vmax.f32 %v8958_v5, 0.0  ;;  %v8901_v26 = vand.u32 2147483647, %v8841_v22 }
 0x67e   :  { %v8853_v1 = vsub.f32 %v17512_v50, %v17482_v25  ;;  %v8960_v53 = vsub.f32 1.0, %v8900_v20  ;;  %v8902_v51 = vand.u32 2147483647, %v8842_v8  ;;  %v17600_v21 = vmax.f32 %v8968_v39, 0.0 }
 0x67f   :  { %v8854_v19 = vsub.f32 %v17504_v24, %v17490_v52  ;;  %v8959_v32 = vsub.f32 1.0, %v8899_v2  ;;  %v8844_v60 = vsub.f32 %v17506_v57, %v17514_v61  ;;  %v8843_v58 = vsub.f32 %v17510_v41, %v17514_v61 }
 0x680   :  { %v8845_v16 = vsub.f32 %v17512_v50, %v17514_v61  ;;  %v8910_v37 = vand.u32 2147483647, %v8850_v35  ;;  %v8912_v18 = vand.u32 2147483647, %v8852_v0  ;;  %v8911_v25 = vand.u32 2147483647, %v8851_v46 }
 0x681   :  { %v8856_v17 = vsub.f32 %v17506_v57, %v17490_v52  ;;  %v8961_v48 = vsub.f32 1.0, %v8901_v26  ;;  %v17612_v45 = vmax.f32 %v8967_v15, 0.0  ;;  %v8913_v27 = vand.u32 2147483647, %v8853_v1 }
 0x682   :  { %v8855_v34 = vsub.f32 %v17510_v41, %v17490_v52  ;;  %v8962_v40 = vsub.f32 1.0, %v8902_v51  ;;  %v8969_v44 = vsub.f32 1.0, %v8909_v31  ;;  %v8914_v5 = vand.u32 2147483647, %v8854_v19 }
 0x683   :  { %v8857_v22 = vsub.f32 %v17512_v50, %v17490_v52  ;;  %v8904_v35 = vand.u32 2147483647, %v8844_v60  ;;  %v8903_v20 = vand.u32 2147483647, %v8843_v58  ;;  %v8905_v8 = vand.u32 2147483647, %v8845_v16 }
 0x684   :  { %v8970_v39 = vsub.f32 1.0, %v8910_v37  ;;  %v8972_v2 = vsub.f32 1.0, %v8912_v18  ;;  %v8971_v15 = vsub.f32 1.0, %v8911_v25  ;;  %v8916_v0 = vand.u32 2147483647, %v8856_v17 }
 0x685   :  { %v17620_v46 = vmax.f32 %v8960_v53, 0.0  ;;  %v17622_v26 = vmax.f32 %v8959_v32, 0.0  ;;  %v8973_v1 = vsub.f32 1.0, %v8913_v27  ;;  %v8915_v31 = vand.u32 2147483647, %v8855_v34 }
 0x686   :  { %v17624_v51 = vmax.f32 %v8961_v48, 0.0  ;;  %v17626_v19 = vmax.f32 %v8962_v40, 0.0  ;;  %v17628_v52 = vmax.f32 %v8969_v44, 0.0  ;;  %v8917_v61 = vand.u32 2147483647, %v8857_v22 }
 0x687   :  { %v8964_v60 = vsub.f32 1.0, %v8904_v35  ;;  %v8963_v58 = vsub.f32 1.0, %v8903_v20  ;;  %v8965_v16 = vsub.f32 1.0, %v8905_v8  ;;  %v8974_v37 = vsub.f32 1.0, %v8914_v5 }
 0x688   :  { %19220 = vst [vmem:[#allocation27_spill] sm:$0xff] %v17628_v52  ;;  %v17630_v18 = vmax.f32 %v8970_v39, 0.0  ;;  %v17632_v25 = vmax.f32 %v8972_v2, 0.0  ;;  %v17634_v53 = vmax.f32 %v8971_v15, 0.0  ;;  %v8976_v32 = vsub.f32 1.0, %v8916_v0 }
 0x689   :  { %v17636_v17 = vmax.f32 %v8973_v1, 0.0  ;;  %v8975_v48 = vsub.f32 1.0, %v8915_v31  ;;  %v8858_v27 = vsub.f32 %v17504_v24, %v17500_v29  ;;  %v8860_v34 = vsub.f32 %v17506_v57, %v17500_v29 }
 0x68a   :  { %19221 = vst [vmem:[#allocation28_spill] sm:$0xff] %v17630_v18  ;;  %19222 = vst [vmem:[#allocation29_spill] sm:$0xff] %v17632_v25  ;;  %v8977_v40 = vsub.f32 1.0, %v8917_v61  ;;  %v8859_v44 = vsub.f32 %v17510_v41, %v17500_v29  ;;  %v8861_v5 = vsub.f32 %v17512_v50, %v17500_v29  ;;  %v8922_v22 = vand.u32 2147483647, %v8862_v14 }
 0x68b   :  { %19223 = vst [vmem:[#allocation32_spill] sm:$0xff] %v17634_v53  ;;  %19224 = vst [vmem:[#allocation35_spill] sm:$0xff] %v17636_v17  ;;  %v17649_v35 = vmax.f32 %v8964_v60, 0.0  ;;  %v17651_v20 = vmax.f32 %v8963_v58, 0.0  ;;  %v17653_v8 = vmax.f32 %v8965_v16, 0.0  ;;  %v17655_v39 = vmax.f32 %v8974_v37, 0.0 }
 0x68c   :  { %v17657_v2 = vmax.f32 %v8976_v32, 0.0  ;;  %v8866_v61 = vsub.f32 %v17504_v24, %v17484_v54  ;;  %v8868_v29 = vsub.f32 %v17506_v57, %v17484_v54  ;;  %v8867_v15 = vsub.f32 %v17510_v41, %v17484_v54 }
 0x68d   :  { %19225 = vst [vmem:[#allocation36_spill] sm:$0xff] %v17655_v39  ;;  %v17665_v14 = vmax.f32 %v8975_v48, 0.0  ;;  %v8918_v0 = vand.u32 2147483647, %v8858_v27  ;;  %v8920_v1 = vand.u32 2147483647, %v8860_v34  ;;  %v8869_v31 = vsub.f32 %v17512_v50, %v17484_v54 }
 0x68e   :  { %19226 = vst [vmem:[#allocation37_spill] sm:$0xff] %v17657_v2  ;;  %v17669_v60 = vmax.f32 %v8977_v40, 0.0  ;;  %v8919_v58 = vand.u32 2147483647, %v8859_v44  ;;  %v8921_v16 = vand.u32 2147483647, %v8861_v5  ;;  %v8870_v44 = vsub.f32 %v17504_v24, %v17486_v11 }
 0x68f   :  { %19227 = vst [vmem:[#allocation40_spill] sm:$0xff] %v17665_v14  ;;  %v8982_v37 = vsub.f32 1.0, %v8922_v22  ;;  %v8924_v7 = vand.u32 2147483647, %v8864_v36  ;;  %v8923_v48 = vand.u32 2147483647, %v8863_v56  ;;  %v8872_v32 = vsub.f32 %v17506_v57, %v17486_v11 }
 0x690   :  { %19228 = vst [vmem:[#allocation41_spill] sm:$0xff] %v17669_v60  ;;  %v8925_v54 = vand.u32 2147483647, %v8865_v23  ;;  %v8926_v27 = vand.u32 2147483647, %v8866_v61  ;;  %v8978_v5 = vsub.f32 1.0, %v8918_v0  ;;  %v8871_v36 = vsub.f32 %v17510_v41, %v17486_v11 }
 0x691   :  { %v8928_v34 = vand.u32 2147483647, %v8868_v29  ;;  %v8927_v40 = vand.u32 2147483647, %v8867_v15  ;;  %v8929_v22 = vand.u32 2147483647, %v8869_v31  ;;  %v8873_v9 = vsub.f32 %v17512_v50, %v17486_v11 }
 0x692   :  { %v8980_v60 = vsub.f32 1.0, %v8920_v1  ;;  %v8979_v56 = vsub.f32 1.0, %v8919_v58  ;;  %v8981_v14 = vsub.f32 1.0, %v8921_v16  ;;  %v17690_v23 = vmax.f32 %v8982_v37, 0.0 }
 0x693   :  { %v8984_v61 = vsub.f32 1.0, %v8924_v7  ;;  %v8983_v29 = vsub.f32 1.0, %v8923_v48  ;;  %v8985_v15 = vsub.f32 1.0, %v8925_v54  ;;  %v8986_v2 = vsub.f32 1.0, %v8926_v27 }
 0x694   :  { %v8988_v0 = vsub.f32 1.0, %v8928_v34  ;;  %v8987_v31 = vsub.f32 1.0, %v8927_v40  ;;  %v8930_v39 = vand.u32 2147483647, %v8870_v44  ;;  %v8989_v25 = vsub.f32 1.0, %v8929_v22 }
 0x695   :  { %v8932_v1 = vand.u32 2147483647, %v8872_v32  ;;  %v8931_v58 = vand.u32 2147483647, %v8871_v36  ;;  %v17694_v52 = vmax.f32 %v8978_v5, 0.0  ;;  %v17696_v11 = vmax.f32 %v8980_v60, 0.0 }
 0x696   :  { %v8933_v7 = vand.u32 2147483647, %v8873_v9  ;;  %v8874_v37 = vsub.f32 %v17504_v24, %v17492_v33  ;;  %v17700_v54 = vmax.f32 %v8979_v56, 0.0  ;;  %v17702_v27 = vmax.f32 %v8981_v14, 0.0 }
 0x697   :  { %v17704_v34 = vmax.f32 %v8984_v61, 0.0  ;;  %v17706_v40 = vmax.f32 %v8983_v29, 0.0  ;;  %v17708_v32 = vmax.f32 %v8985_v15, 0.0  ;;  %v17710_v44 = vmax.f32 %v8986_v2, 0.0 }
 0x698   :  { %v17712_v5 = vmax.f32 %v8988_v0, 0.0  ;;  %v8990_v60 = vsub.f32 1.0, %v8930_v39  ;;  %v17714_v36 = vmax.f32 %v8987_v31, 0.0  ;;  %v17716_v9 = vmax.f32 %v8989_v25, 0.0 }
 0x699   :  { %19229 = vst [vmem:[#allocation42_spill] sm:$0xff] %v17706_v40  ;;  %19230 = vst [vmem:[#allocation45_spill] sm:$0xff] %v17708_v32  ;;  %v8992_v56 = vsub.f32 1.0, %v8932_v1  ;;  %v8991_v17 = vsub.f32 1.0, %v8931_v58  ;;  %v8993_v15 = vsub.f32 1.0, %v8933_v7 }
 0x69a   :  { %v8934_v32 = vand.u32 2147483647, %v8874_v37 }
 0x69b   :  { %v17728_v37 = vmax.f32 %v8992_v56, 0.0 }
 0x69c   :  { %v8994_v56 = vsub.f32 1.0, %v8934_v32  ;;  %v8880_v32 = vsub.f32 %v17506_v57, %v17508_v38 }
 0x703   :  { %v7836_v53 = vpop.f32.mrb[0].mxu0 }
 0x704   :  { %v8611_v16 = vpop.f32.mrb[0].mxu1  ;;  %v7838_v18 = vpop.f32.mrb[1].mxu0  ;;  %v9066_v14 = vmul.f32 %v17550_v49, %v7836_v53  ;;  %v17726_v53 = vmax.f32 %v8990_v60, 0.0  ;;  %v17739_v60 = vmax.f32 %v8993_v15, 0.0 }
 0x705   :  { %v8613_v48 = vpop.f32.mrb[1].mxu1  ;;  %v9068_v2 = vmul.f32 %v17552_v12, %v8611_v16  ;;  %v9067_v0 = vmul.f32 %v17556_v4, %v7838_v18  ;;  %v8876_v12 = vsub.f32 %v17506_v57, %v17492_v33  ;;  %v17733_v16 = vmax.f32 %v8991_v17, 0.0 }
 0x706   :  { %v9069_v1 = vmul.f32 %v17560_v10, %v8613_v48  ;;  %v8875_v10 = vsub.f32 %v17510_v41, %v17492_v33  ;;  %v8878_v17 = vsub.f32 %v17504_v24, %v17508_v38 }
 0x707   :  { %v7842_v22 = vpop.f32.mrb[2].mxu0 }
 0x708   :  { %v9070_v61 = vmul.f32 %v17562_v30, %v7842_v22  ;;  %v8617_v29 = vpop.f32.mrb[2].mxu1  ;;  %v7844_v40 = vpop.f32.mrb[3].mxu0 }
 0x709   :  { %v9072_v39 = vmul.f32 %v17564_v62, %v8617_v29  ;;  %v9071_v31 = vmul.f32 %v17572_v3, %v7844_v40  ;;  %v8619_v25 = vpop.f32.mrb[3].mxu1 }
 0x70a   :  { %v9126_v58 = vadd.f32 %v9070_v61, %v9066_v14  ;;  %v9073_v49 = vmul.f32 %v17574_v28, %v8619_v25  ;;  %v8935_v25 = vand.u32 2147483647, %v8875_v10 }
 0x70b   :  { %v9146_v30 = vadd.f32 %v9072_v39, %v9068_v2  ;;  %v9136_v22 = vadd.f32 %v9071_v31, %v9067_v0  ;;  %v7848_v7 = vpop.f32.mrb[4].mxu0  ;;  %v8936_v39 = vand.u32 2147483647, %v8876_v12 }
 0x70c   :  { %v9156_v4 = vadd.f32 %v9073_v49, %v9069_v1  ;;  %v9074_v62 = vmul.f32 %v17582_v13, %v7848_v7  ;;  %v8623_v3 = vpop.f32.mrb[4].mxu1  ;;  %v7850_v18 = vpop.f32.mrb[5].mxu0  ;;  %v8877_v13 = vsub.f32 %v17512_v50, %v17492_v33  ;;  %v8879_v49 = vsub.f32 %v17510_v41, %v17508_v38 }
 0x70d   :  { %v9076_v28 = vmul.f32 %v17586_v59, %v8623_v3  ;;  %v9075_v48 = vmul.f32 %v17588_v63, %v7850_v18  ;;  %v8625_v40 = vpop.f32.mrb[5].mxu1  ;;  %v10204_v7 = vmov 1966171168   ;;  %v17758_v18 = vand.u32 2147483647, %v8878_v17 }
 0x70e   :  { %v9127_v14 = vadd.f32 %v9126_v58, %v9074_v62  ;;  %v9077_v61 = vmul.f32 %v17594_v42, %v8625_v40  ;;  %v17751_v58 = vmax.f32 %v8994_v56, 0.0  ;;  %v9253_v12 = vunpack.c.l.s4 %v10204_v7 }
 0x70f   :  { %v9147_v29 = vadd.f32 %v9146_v30, %v9076_v28  ;;  %v9137_v2 = vadd.f32 %v9136_v22, %v9075_v48  ;;  %v7854_v0 = vpop.f32.mrb[6].mxu0  ;;  %v8996_v40 = vsub.f32 1.0, %v8936_v39  ;;  %v8995_v56 = vsub.f32 1.0, %v8935_v25 }
 0x710   :  { %v9157_v59 = vadd.f32 %v9156_v4, %v9077_v61  ;;  %v9078_v63 = vmul.f32 %v17596_v47, %v7854_v0  ;;  %v8629_v31 = vpop.f32.mrb[6].mxu1  ;;  %v7856_v15 = vpop.f32.mrb[7].mxu0  ;;  %v17756_v47 = vand.u32 2147483647, %v8877_v13  ;;  %v17765_v13 = vand.u32 2147483647, %v8880_v32 }
 0x711   :  { %v9080_v42 = vmul.f32 %v17620_v46, %v8629_v31  ;;  %v9079_v33 = vmul.f32 %v17622_v26, %v7856_v15  ;;  %v8631_v1 = vpop.f32.mrb[7].mxu1  ;;  %v8881_v46 = vsub.f32 %v17512_v50, %v17508_v38  ;;  %v9254_v0 = vunpack.c.0.s8 %v9253_v12 }
 0x712   :  { %v9128_v30 = vadd.f32 %v9127_v14, %v9078_v63  ;;  %v9081_v22 = vmul.f32 %v17624_v51, %v8631_v1  ;;  %v8997_v38 = vsub.f32 1.0, %v17756_v47  ;;  %v17774_v32 = vmax.f32 %v8996_v40, 0.0  ;;  %v19232_v40 = vld [vmem:[#allocation27_spill] sm:$0xff] }
 0x713   :  { %v9148_v4 = vadd.f32 %v9147_v29, %v9080_v42  ;;  %v9138_v62 = vadd.f32 %v9137_v2, %v9079_v33  ;;  %v7860_v3 = vpop.f32.mrb[8].mxu0  ;;  %v17767_v29 = vand.u32 2147483647, %v8879_v49  ;;  %v17772_v31 = vand.u32 2147483647, %v8881_v46 }
 0x714   :  { %v9158_v26 = vadd.f32 %v9157_v59, %v9081_v22  ;;  %v9082_v10 = vmul.f32 %v17626_v19, %v7860_v3  ;;  %v8635_v28 = vpop.f32.mrb[8].mxu1  ;;  %v7862_v48 = vpop.f32.mrb[9].mxu0  ;;  %v19231_v42 = vsub.f32 %v17504_v24, %v17524_v55 }
 0x715   :  { %v9084_v51 = vmul.f32 %v17649_v35, %v8635_v28  ;;  %v9083_v14 = vmul.f32 %v17651_v20, %v7862_v48  ;;  %v8637_v61 = vpop.f32.mrb[9].mxu1 }
 0x716   :  { %v9129_v17 = vadd.f32 %v9128_v30, %v9082_v10  ;;  %v9085_v2 = vmul.f32 %v17653_v8, %v8637_v61  ;;  %v17779_v8 = vand.u32 2147483647, %v19231_v42  ;;  %v17781_v30 = vmax.f32 %v8995_v56, 0.0 }
 0x717   :  { %v9149_v19 = vadd.f32 %v9148_v4, %v9084_v51  ;;  %v9139_v59 = vadd.f32 %v9138_v62, %v9083_v14  ;;  %v7866_v63 = vpop.f32.mrb[10].mxu0  ;;  %v17786_v62 = vsub.s32 %v9254_v0, %v19217_v43  ;;  %v19233_v51 = vld [vmem:[#allocation28_spill] sm:$0xff] }
 0x718   :  { %v9130_v35 = vrot.slane %v9129_v17, 4  ;;  %v9159_v20 = vadd.f32 %v9158_v26, %v9085_v2  ;;  %v8641_v15 = vpop.f32.mrb[10].mxu1  ;;  %v7868_v25 = vpop.f32.mrb[11].mxu0  ;;  %v9086_v4 = vmul.f32 %v17584_v6, %v7866_v63  ;;  %v19234_v63 = vld [vmem:[#allocation29_spill] sm:$0xff]  ;;  %v19235_v0 = vld [vmem:[#allocation32_spill] sm:$0xff] }
 0x719   :  { %v9150_v33 = vrot.slane %v9149_v19, 4  ;;  %v9140_v1 = vrot.slane %v9139_v59, 4  ;;  %v8643_v49 = vpop.f32.mrb[11].mxu1  ;;  %v9088_v24 = vmul.f32 %v17600_v21, %v8641_v15  ;;  %v9087_v26 = vmul.f32 %v17612_v45, %v7868_v25  ;;  %v19236_v45 = vld [vmem:[#allocation35_spill] sm:$0xff] }
 0x71a   :  { %v9131_v7 = vadd.f32 %v9130_v35, %v9129_v17  ;;  %v9160_v12 = vrot.slane %v9159_v20, 4  ;;  %v9089_v56 = vmul.f32 %v19232_v40, %v8643_v49 }
 0x71b   :  { %v9151_v3 = vadd.f32 %v9150_v33, %v9149_v19  ;;  %v9141_v46 = vadd.f32 %v9140_v1, %v9139_v59  ;;  %v7872_v10 = vpop.f32.mrb[12].mxu0 }
 0x71c   :  { %v9132_v28 = vrot.slane %v9131_v7, 2  ;;  %v9161_v48 = vadd.f32 %v9160_v12, %v9159_v20  ;;  %v9090_v14 = vmul.f32 %v19233_v51, %v7872_v10  ;;  %v8647_v61 = vpop.f32.mrb[12].mxu1  ;;  %v7874_v17 = vpop.f32.mrb[13].mxu0  ;;  %v19237_v51 = vld [vmem:[#allocation36_spill] sm:$0xff] }
 0x71d   :  { %v9152_v2 = vrot.slane %v9151_v3, 2  ;;  %v9142_v6 = vrot.slane %v9141_v46, 2  ;;  %v9092_v43 = vmul.f32 %v19234_v63, %v8647_v61  ;;  %v9091_v19 = vmul.f32 %v19235_v0, %v7874_v17  ;;  %v8649_v59 = vpop.f32.mrb[13].mxu1  ;;  %v19238_v0 = vld [vmem:[#allocation37_spill] sm:$0xff] }
 0x71e   :  { %v9133_v35 = vadd.f32 %v9132_v28, %v9131_v7  ;;  %v9162_v21 = vrot.slane %v9161_v48, 2  ;;  %v9166_v15 = vadd.f32 %v9090_v14, %v9086_v4  ;;  %v9093_v25 = vmul.f32 %v19236_v45, %v8649_v59  ;;  %v19239_v28 = vld [vmem:[#allocation40_spill] sm:$0xff] }
 0x71f   :  { %v9153_v42 = vadd.f32 %v9152_v2, %v9151_v3  ;;  %v9143_v20 = vadd.f32 %v9142_v6, %v9141_v46  ;;  %v9186_v33 = vadd.f32 %v9092_v43, %v9088_v24  ;;  %v9176_v1 = vadd.f32 %v9091_v19, %v9087_v26  ;;  %v7878_v49 = vpop.f32.mrb[14].mxu0  ;;  %v19240_v24 = vld [vmem:[#allocation41_spill] sm:$0xff] }
 0x720   :  { %v9134_v12 = vrot.slane %v9133_v35, 1  ;;  %v9163_v10 = vadd.f32 %v9162_v21, %v9161_v48  ;;  %v9196_v40 = vadd.f32 %v9093_v25, %v9089_v56  ;;  %v9094_v22 = vmul.f32 %v19237_v51, %v7878_v49  ;;  %v8653_v39 = vpop.f32.mrb[14].mxu1  ;;  %v7880_v61 = vpop.f32.mrb[15].mxu0 }
 0x721   :  { %v9154_v63 = vrot.slane %v9153_v42, 1  ;;  %v9144_v17 = vrot.slane %v9143_v20, 1  ;;  %v9096_v7 = vmul.f32 %v19238_v0, %v8653_v39  ;;  %v9095_v4 = vmul.f32 %v19239_v28, %v7880_v61  ;;  %v8655_v14 = vpop.f32.mrb[15].mxu1  ;;  %v19242_v0 = vld [vmem:[#allocation42_spill] sm:$0xff] }
 0x722   :  { %v9135_v59 = vadd.f32 %v9134_v12, %v9133_v35  ;;  %v9164_v3 = vrot.slane %v9163_v10, 1  ;;  %v9167_v46 = vadd.f32 %v9166_v15, %v9094_v22  ;;  %v9097_v26 = vmul.f32 %v19240_v24, %v8655_v14 }
 0x723   :  { %v9155_v2 = vadd.f32 %v9154_v63, %v9153_v42  ;;  %v9145_v6 = vadd.f32 %v9144_v17, %v9143_v20  ;;  %v9187_v48 = vadd.f32 %v9186_v33, %v9096_v7  ;;  %v9177_v56 = vadd.f32 %v9176_v1, %v9095_v4  ;;  %v7884_v43 = vpop.f32.mrb[16].mxu0 }
 0x724   :  { %v9165_v19 = vadd.f32 %v9164_v3, %v9163_v10  ;;  %v9197_v21 = vadd.f32 %v9196_v40, %v9097_v26  ;;  %v9098_v45 = vmul.f32 %v17694_v52, %v7884_v43  ;;  %v8659_v25 = vpop.f32.mrb[16].mxu1  ;;  %v7886_v49 = vpop.f32.mrb[17].mxu0  ;;  %v8999_v39 = vsub.f32 1.0, %v17767_v29  ;;  %v19245_v3 = vld [vmem:[#allocation45_spill] sm:$0xff] }
 0x725   :  { %v9250_v51 = vcombine.low %v9135_v59, %v9145_v6  ;;  %v9100_v35 = vmul.f32 %v17696_v11, %v8659_v25  ;;  %v9099_v22 = vmul.f32 %v17700_v54, %v7886_v49  ;;  %v8661_v15 = vpop.f32.mrb[17].mxu1  ;;  %v17805_v42 = vmax.f32 %v8997_v38, 0.0 }
 0x726   :  { %v9251_v20 = vcombine.low %v9155_v2, %v9165_v19  ;;  %v9168_v33 = vadd.f32 %v9167_v46, %v9098_v45  ;;  %v9101_v1 = vmul.f32 %v17702_v27, %v8661_v15  ;;  %v19241_v52 = vsub.f32 1.0, %v17758_v18 }
 0x727   :  { %v9188_v10 = vadd.f32 %v9187_v48, %v9100_v35  ;;  %v9178_v29 = vadd.f32 %v9177_v56, %v9099_v22  ;;  %v7890_v40 = vpop.f32.mrb[18].mxu0  ;;  %v9001_v11 = vsub.f32 1.0, %v17772_v31  ;;  %v9258_v54 = vrot.slane %v9250_v51, %v17786_v62 }
 0x728   :  { %v17810_v12 = vmax.f32 %v19241_v52, 0.0  ;;  %v9198_v61 = vadd.f32 %v9197_v21, %v9101_v1  ;;  %v9102_v47 = vmul.f32 %v17690_v23, %v7890_v40  ;;  %v8665_v38 = vpop.f32.mrb[18].mxu1  ;;  %v7892_v63 = vpop.f32.mrb[19].mxu0  ;;  %v9002_v17 = vsub.f32 1.0, %v17779_v8 }
 0x729   :  { %v9265_v27 = vrot.slane %v9251_v20, %v17786_v62  ;;  %v9104_v18 = vmul.f32 %v17704_v34, %v8665_v38  ;;  %v9103_v7 = vmul.f32 %v19242_v0, %v7892_v63  ;;  %v8667_v28 = vpop.f32.mrb[19].mxu1  ;;  %v19243_v4 = vsub.f32 1.0, %v17765_v13 }
 0x72a   :  { %v19244_v31 = vsub.f32 %v17506_v57, %v17524_v55  ;;  %v9169_v23 = vadd.f32 %v9168_v33, %v9102_v47  ;;  %v9105_v46 = vmul.f32 %v19245_v3, %v8667_v28  ;;  %v19246_v24 = vsub.f32 %v17510_v41, %v17524_v55 }
 0x72b   :  { %v17821_v14 = vmax.f32 %v19243_v4, 0.0  ;;  %v9266_v34 = vcombine.low %v9258_v54, %v9265_v27  ;;  %v9189_v2 = vadd.f32 %v9188_v10, %v9104_v18  ;;  %v9179_v6 = vadd.f32 %v9178_v29, %v9103_v7  ;;  %v7896_v48 = vpop.f32.mrb[20].mxu0 }
 0x72c   :  { %v17826_v59 = vand.u32 2147483647, %v19244_v31  ;;  %v17832_v26 = vand.u32 2147483647, %v19246_v24  ;;  %v17834_v13 = vmax.f32 %v8999_v39, 0.0  ;;  %v19247_v56 = vlaneseq  ;;  %v8671_v21 = vpop.f32.mrb[20].mxu1 }
 0x72d   :  { %v9170_v57 = vrot.slane %v9169_v23, 4  ;;  %v9199_v19 = vadd.f32 %v9198_v61, %v9105_v46  ;;  %v7898_v45 = vpop.f32.mrb[21].mxu0  ;;  %v17841_v25 = vmax.f32 %v9001_v11, 0.0  ;;  %v9273_v41 = vrot.slane %v9266_v34, %v17786_v62  ;;  %v8673_v35 = vpop.f32.mrb[21].mxu1 }
 0x72e   :  { %vm17837_vm0 = vcmp.lt.s32.totalorder %v19247_v56, 512  ;;  %v9190_v49 = vrot.slane %v9189_v2, 4  ;;  %v9180_v51 = vrot.slane %v9179_v6, 4  ;;  %v9004_v22 = vsub.f32 1.0, %v17826_v59 }
 0x72f   :  { %v19250_v39 = vsub.f32 %v17512_v50, %v17524_v55  ;;  %v9171_v20 = vadd.f32 %v9170_v57, %v9169_v23  ;;  %v9200_v33 = vrot.slane %v9199_v19, 4  ;;  %v9106_v1 = vmul.f32 %v17710_v44, %v7896_v48  ;;  %9279 = vst.msk [vmem:[#allocation2] ss:$4 sm:$0xf] %vm17837_vm0, %v9273_v41  ;;  %v7902_v54 = vpop.f32.mrb[22].mxu0 }
 0x730   :  { %v9003_v52 = vsub.f32 1.0, %v17832_v26  ;;  %v9191_v10 = vadd.f32 %v9190_v49, %v9189_v2  ;;  %v9181_v29 = vadd.f32 %v9180_v51, %v9179_v6  ;;  %v9108_v40 = vmul.f32 %v17712_v5, %v8671_v21  ;;  %v8677_v38 = vpop.f32.mrb[22].mxu1  ;;  %v7904_v44 = vpop.f32.mrb[23].mxu0 }
 0x731   :  { %v17848_v15 = vand.u32 2147483647, %v19250_v39  ;;  %v9107_v11 = vmul.f32 %v17714_v36, %v7898_v45  ;;  %v9172_v61 = vrot.slane %v9171_v20, 2  ;;  %v9201_v50 = vadd.f32 %v9200_v33, %v9199_v19  ;;  %v8679_v7 = vpop.f32.mrb[23].mxu1 }
 0x732   :  { %v9109_v55 = vmul.f32 %v17716_v9, %v8673_v35  ;;  %v9110_v47 = vmul.f32 %v17726_v53, %v7902_v54  ;;  %v9192_v63 = vrot.slane %v9191_v10, 2  ;;  %v9182_v27 = vrot.slane %v9181_v29, 2 }
 0x733   :  { %v9112_v18 = vmul.f32 %v17728_v37, %v8677_v38  ;;  %v9111_v0 = vmul.f32 %v17733_v16, %v7904_v44  ;;  %v9173_v28 = vadd.f32 %v9172_v61, %v9171_v20  ;;  %v9202_v5 = vrot.slane %v9201_v50, 2  ;;  %v7908_v46 = vpop.f32.mrb[24].mxu0 }
 0x734   :  { %v9206_v4 = vadd.f32 %v9110_v47, %v9106_v1  ;;  %v9113_v36 = vmul.f32 %v17739_v60, %v8679_v7  ;;  %v9193_v31 = vadd.f32 %v9192_v63, %v9191_v10  ;;  %v9183_v23 = vadd.f32 %v9182_v27, %v9181_v29  ;;  %v8683_v6 = vpop.f32.mrb[24].mxu1  ;;  %v7910_v37 = vpop.f32.mrb[25].mxu0 }
 0x735   :  { %v9226_v3 = vadd.f32 %v9112_v18, %v9108_v40  ;;  %v9216_v9 = vadd.f32 %v9111_v0, %v9107_v11  ;;  %v9174_v53 = vrot.slane %v9173_v28, 1  ;;  %v9203_v24 = vadd.f32 %v9202_v5, %v9201_v50  ;;  %v8685_v19 = vpop.f32.mrb[25].mxu1 }
 0x736   :  { %v9236_v34 = vadd.f32 %v9113_v36, %v9109_v55  ;;  %v9114_v2 = vmul.f32 %v17751_v58, %v7908_v46  ;;  %v9194_v48 = vrot.slane %v9193_v31, 1  ;;  %v9184_v16 = vrot.slane %v9183_v23, 1 }
 0x737   :  { %v9116_v56 = vmul.f32 %v17774_v32, %v8683_v6  ;;  %v9115_v57 = vmul.f32 %v17781_v30, %v7910_v37  ;;  %v9175_v60 = vadd.f32 %v9174_v53, %v9173_v28  ;;  %v9204_v21 = vrot.slane %v9203_v24, 1  ;;  %v7914_v20 = vpop.f32.mrb[26].mxu0 }
 0x738   :  { %v9207_v45 = vadd.f32 %v9206_v4, %v9114_v2  ;;  %v9117_v41 = vmul.f32 %v17805_v42, %v8685_v19  ;;  %v9195_v49 = vadd.f32 %v9194_v48, %v9193_v31  ;;  %v9185_v51 = vadd.f32 %v9184_v16, %v9183_v23  ;;  %v8689_v10 = vpop.f32.mrb[26].mxu1  ;;  %v7916_v29 = vpop.f32.mrb[27].mxu0 }
 0x739   :  { %v9227_v35 = vadd.f32 %v9226_v3, %v9116_v56  ;;  %v9217_v39 = vadd.f32 %v9216_v9, %v9115_v57  ;;  %v9205_v58 = vadd.f32 %v9204_v21, %v9203_v24  ;;  %v9118_v1 = vmul.f32 %v17810_v12, %v7914_v20  ;;  %v8691_v54 = vpop.f32.mrb[27].mxu1 }
 0x73a   :  { %v9237_v33 = vadd.f32 %v9236_v34, %v9117_v41  ;;  %v9005_v32 = vsub.f32 1.0, %v17848_v15  ;;  %v9284_v30 = vcombine.low %v9175_v60, %v9185_v51  ;;  %v9120_v40 = vmul.f32 %v17821_v14, %v8689_v10 }
 0x73b   :  { %v9119_v11 = vmul.f32 %v17834_v13, %v7916_v29  ;;  %v9062_v42 = vmax.f32 %v9002_v17, 0.0  ;;  %v9285_v61 = vcombine.low %v9195_v49, %v9205_v58  ;;  %v9208_v50 = vadd.f32 %v9207_v45, %v9118_v1  ;;  %v7920_v44 = vpop.f32.mrb[28].mxu0 }
 0x73c   :  { %v9121_v55 = vmul.f32 %v17841_v25, %v8691_v54  ;;  %v9064_v12 = vmax.f32 %v9004_v22, 0.0  ;;  %v9228_v47 = vadd.f32 %v9227_v35, %v9120_v40  ;;  %v9063_v15 = vmax.f32 %v9003_v52, 0.0  ;;  %v8695_v27 = vpop.f32.mrb[28].mxu1  ;;  %v7922_v8 = vpop.f32.mrb[29].mxu0 }
 0x73d   :  { %v9218_v38 = vadd.f32 %v9217_v39, %v9119_v11  ;;  %v9292_v14 = vrot.slane %v9284_v30, %v17786_v62  ;;  %v9122_v63 = vmul.f32 %v9062_v42, %v7920_v44  ;;  %v9065_v17 = vmax.f32 %v9005_v32, 0.0  ;;  %v8697_v7 = vpop.f32.mrb[29].mxu1 }
 0x73e   :  { %v9238_v13 = vadd.f32 %v9237_v33, %v9121_v55  ;;  %v9299_v18 = vrot.slane %v9285_v61, %v17786_v62  ;;  %v9124_v0 = vmul.f32 %v9064_v12, %v8695_v27  ;;  %v9123_v25 = vmul.f32 %v9063_v15, %v7922_v8 }
 0x73f   :  { %v9209_v59 = vadd.f32 %v9208_v50, %v9122_v63  ;;  %v9125_v22 = vmul.f32 %v9065_v17, %v8697_v7 }
 0x740   :  { %v9300_v28 = vcombine.low %v9292_v14, %v9299_v18  ;;  %v9229_v5 = vadd.f32 %v9228_v47, %v9124_v0  ;;  %v9219_v4 = vadd.f32 %v9218_v38, %v9123_v25 }
 0x741   :  { %v9210_v36 = vrot.slane %v9209_v59, 4  ;;  %v9239_v26 = vadd.f32 %v9238_v13, %v9125_v22 }
 0x742   :  { %v9307_v52 = vrot.slane %v9300_v28, %v17786_v62  ;;  %v9230_v31 = vrot.slane %v9229_v5, 4  ;;  %v9220_v23 = vrot.slane %v9219_v4, 4 }
 0x743   :  { %v9211_v3 = vadd.f32 %v9210_v36, %v9209_v59  ;;  %v9240_v9 = vrot.slane %v9239_v26, 4 }
 0x744   :  { %9310 = vst.msk [vmem:[#allocation2 + $0x1] ss:$4 sm:$0xf] %vm17837_vm0, %v9307_v52  ;;  %v9231_v46 = vadd.f32 %v9230_v31, %v9229_v5  ;;  %v9221_v53 = vadd.f32 %v9220_v23, %v9219_v4 }
 0x745   :  { %v9212_v24 = vrot.slane %v9211_v3, 2  ;;  %v9241_v34 = vadd.f32 %v9240_v9, %v9239_v26 }
 0x746   :  { %v9232_v2 = vrot.slane %v9231_v46, 2  ;;  %v9222_v6 = vrot.slane %v9221_v53, 2 }
 0x747   :  { %v9213_v37 = vadd.f32 %v9212_v24, %v9211_v3  ;;  %v9242_v48 = vrot.slane %v9241_v34, 2 }
 0x748   :  { %v9233_v16 = vadd.f32 %v9232_v2, %v9231_v46  ;;  %v9223_v56 = vadd.f32 %v9222_v6, %v9221_v53 }
 0x749   :  { %v9214_v57 = vrot.slane %v9213_v37, 1  ;;  %v9243_v19 = vadd.f32 %v9242_v48, %v9241_v34 }
 0x74a   :  { %v9234_v60 = vrot.slane %v9233_v16, 1  ;;  %v9224_v21 = vrot.slane %v9223_v56, 1 }
 0x74b   :  { %v9215_v45 = vadd.f32 %v9214_v57, %v9213_v37  ;;  %v9244_v41 = vrot.slane %v9243_v19, 1 }
 0x74c   :  { %v9235_v49 = vadd.f32 %v9234_v60, %v9233_v16  ;;  %v9225_v51 = vadd.f32 %v9224_v21, %v9223_v56 }
 0x74d   :  { %v9245_v35 = vadd.f32 %v9244_v41, %v9243_v19 }
 0x74e   :  { %v9315_v39 = vcombine.low %v9215_v45, %v9225_v51 }
 0x74f   :  { %v9316_v20 = vcombine.low %v9235_v49, %v9245_v35 }
 0x750   :  { %v9323_v58 = vrot.slane %v9315_v39, %v17786_v62 }
 0x751   :  { %v9330_v33 = vrot.slane %v9316_v20, %v17786_v62 }
 0x753   :  { %v9331_v1 = vcombine.low %v9323_v58, %v9330_v33 }
 0x755   :  { %v9338_v10 = vrot.slane %v9331_v1, %v17786_v62 }
 0x757   :  { %9341 = vst.msk [vmem:[#allocation2 + $0x2] ss:$4 sm:$0xf] %vm17837_vm0, %v9338_v10 }
 0x758   :  { %10189 = shalt.err (!%p10186_p4)
}
 0x759   :  { %s10190_s26 = scalar_lea.hbm %s17903_s5, 256 }
 0x75a   :  { %p10191_p5 = scmp.ne.s32.totalorder %s17903_s5, %s10190_s26  ;;  %p10194_p6 = scmp.lt.u32.totalorder %s10190_s26, %s17903_s5 }
 0x75c   :  { %p10196_p7 = pnand %p10194_p6, %p10191_p5 }
 0x75e   :  { %10199 = shalt.err (!%p10196_p7)
}
 0x75f   :  { %9351 = dma.vmem_to_hbm [thread:$0]  %s9349_s3, 256, %s17903_s5, [#allocation3]  }
 0x760   :  { %10200 = dma.done.wait [#allocation3], 256  }
 0x761   :  { %10201 = vsyncadd [#allocation3], 4294967040 }
 0x762   :  { %9355 = vsyncpa [#allocation3], 1 }

</bundles_post_ra>
